<compile_context>
chip_gen: v6e
topology: v6e:2x2x1
jax: 0.10.0
libtpu: 0.0.40
codegen_flags: <defaults>
</compile_context>

<pallas_src>
import functools
import numpy as np
import jax
import jax.numpy as jnp
from jax import lax
from jax.experimental import pallas as pl
from jax.experimental.pallas import tpu as pltpu


# ----------------------------- math helpers -------------------------------
def _layernorm(x, w, b, eps=1e-5):
    # Single-pass statistics (var = E[x^2] - mu^2) and folded scale/shift:
    # saves two full (rows, D) VALU passes per LayerNorm and one XLU
    # cross-lane reduction dependency.
    mu = jnp.mean(x, axis=-1, keepdims=True)
    var = jnp.maximum(jnp.mean(x * x, axis=-1, keepdims=True) - mu * mu, 0.0)
    a = jax.lax.rsqrt(var + eps) * w
    return x * a + (b - mu * a)


def _erf_f32(x, use_approx_recip=False):
    # f32 rational-polynomial erf (same approximation XLA/Eigen use), built
    # from mul/add (and one divide / EUP reciprocal) so it lowers cleanly.
    x = jnp.clip(x, -4.0, 4.0)
    x2 = x * x
    p = jnp.float32(-2.72614225801306e-10)
    p = p * x2 + jnp.float32(2.77068142495902e-08)
    p = p * x2 + jnp.float32(-2.10102402082508e-06)
    p = p * x2 + jnp.float32(-5.69250639462346e-05)
    p = p * x2 + jnp.float32(-7.34990630326855e-04)
    p = p * x2 + jnp.float32(-2.95459980854025e-03)
    p = p * x2 + jnp.float32(-1.60960333262415e-02)
    p = p * x
    q = jnp.float32(-1.45660718464996e-05)
    q = q * x2 + jnp.float32(-2.13374055278905e-04)
    q = q * x2 + jnp.float32(-1.68282697438203e-03)
    q = q * x2 + jnp.float32(-7.37332916720468e-03)
    q = q * x2 + jnp.float32(-1.42647390514189e-02)
    if use_approx_recip:
        # Moves the (rows, H)-sized divide off the VALU onto the EUP slot.
        return p * pl.reciprocal(q, approx=True)
    return p / q


def _gelu(x, use_approx_recip=False):
    # exact (erf-based) GELU, matching torch.nn.GELU() default.
    # TODO(synk): on v5e (no bf16 VPU/EUP) a tanh/exp-based GELU variant would
    # shift more of this polynomial onto the EUP; kept erf form for fidelity.
    return 0.5 * x * (1.0 + _erf_f32(x * jnp.float32(0.7071067811865476),
                                     use_approx_recip))


# ------------------------------ Pallas kernel ------------------------------
def block_kernel(num_heads, token_chunk, compute_dtype, approx_recip,
                 x_ref, ln1_w, ln1_b, qkv_w, qkv_b, proj_w, proj_b,
                 ln2_w, ln2_b, fc1_w, fc1_b, fc2_w, fc2_b, g1, g2,
                 o_ref):
    f32 = jnp.float32
    cdt = compute_dtype
    x = x_ref[0].astype(f32)                          # (N, D)
    N, D = x.shape
    hd = D // num_heads

    # Hoist loop-invariant weight/bias loads out of the chunk loop.
    w_qkv, b_qkv = qkv_w[...], qkv_b[0]
    w_proj, b_proj = proj_w[...], proj_b[0]
    w_fc1, b_fc1 = fc1_w[...], fc1_b[0]
    w_fc2, b_fc2 = fc2_w[...], fc2_b[0]
    ln1w, ln1b = ln1_w[0], ln1_b[0]
    ln2w, ln2b = ln2_w[0], ln2_b[0]
    g1v, g2v = g1[0], g2[0]

    # ---- full-sequence qkv projection: one big K=D MXU matmul.
    #      (attention scale is pre-folded into the q columns / q bias host-side)
    h1 = _layernorm(x, ln1w, ln1b).astype(cdt)
    qkv = jnp.dot(h1, w_qkv, preferred_element_type=f32) + b_qkv      # (N, 3D) f32

    # Per-head K / V as read-only value slices (no VMEM scratch round trip,
    # no masked narrow stores).
    ks = [qkv[:, D + h * hd:D + (h + 1) * hd].astype(cdt) for h in range(num_heads)]
    vs = [qkv[:, 2 * D + h * hd:2 * D + (h + 1) * hd].astype(cdt) for h in range(num_heads)]

    score_dims = (((1,), (1,)), ((), ()))      # q @ k^T without a transpose op

    # Token-chunk loop: bounds live scores to (tq, N) per head and the GELU
    # intermediate to (tq, H); output stores are full-D lane-dense row slabs.
    for start in range(0, N, token_chunk):
        size = min(token_chunk, N - start)
        stop = start + size
        xc = x[start:stop]                                            # (tq, D) f32

        # ---------------- attention (this chunk's queries) ----------------
        heads_out = []
        for h in range(num_heads):
            q_h = qkv[start:stop, h * hd:(h + 1) * hd].astype(cdt)    # (tq, hd)
            s = lax.dot_general(q_h, ks[h], score_dims,
                                preferred_element_type=f32)           # (tq, N)
            s = s - jnp.max(s, axis=-1, keepdims=True)
            p = jnp.exp(s)
            denom = jnp.sum(p, axis=-1, keepdims=True)
            # PV on the UN-normalised probabilities ...
            o_h = jnp.dot(p.astype(cdt), vs[h], preferred_element_type=f32)  # (tq, hd)
            # ... deferred softmax normalisation: (tq, hd) multiply, not (tq, N)
            if approx_recip:
                o_h = o_h * pl.reciprocal(denom, approx=True)
            else:
                o_h = o_h / denom
            heads_out.append(o_h.astype(cdt))

        # Lane-dense head combine (value-level concat; no scratch stores),
        # then ONE fused K=D proj matmul.
        attn_c = jnp.concatenate(heads_out, axis=-1)                  # (tq, D)
        attn_c = jnp.dot(attn_c, w_proj, preferred_element_type=f32) + b_proj
        xc = xc + g1v * attn_c                                        # residual in f32

        # ------------------------------ MLP --------------------------------
        h2 = _layernorm(xc, ln2w, ln2b).astype(cdt)
        m = jnp.dot(h2, w_fc1, preferred_element_type=f32) + b_fc1    # (tq, H)
        m = _gelu(m, approx_recip).astype(cdt)
        m = jnp.dot(m, w_fc2, preferred_element_type=f32) + b_fc2
        o_ref[0, start:stop, :] = (xc + g2v * m).astype(o_ref.dtype)


# ------------------------------ wrapper ------------------------------------
def block_forward(x, params, num_heads, qk_scale=None,
                  compute_dtype=jnp.bfloat16, approx_softmax=None,
                  token_chunk=256):
    B, N, D = x.shape
    assert D % num_heads == 0
    hd = D // num_heads
    assert hd % 8 == 0, "head dim must be a multiple of 8 for TPU layouts"
    scale = float(qk_scale) if qk_scale is not None else float(hd) ** -0.5
    H = params["fc1_w"].shape[1]
    f32 = jnp.float32
    wdt = compute_dtype                      # matmul-weight dtype (bf16 / f32)
    if approx_softmax is None:
        approx_softmax = jnp.dtype(compute_dtype) == jnp.dtype(jnp.bfloat16)
    token_chunk = int(min(int(token_chunk), N))

    # Fold the attention scale into the q columns / q bias of qkv (host-side).
    qkv_w = params["qkv_w"].astype(f32)
    qkv_b = params["qkv_b"].astype(f32)
    col_scale = jnp.concatenate([jnp.full((D,), scale, f32), jnp.ones((2 * D,), f32)])
    qkv_w = qkv_w * col_scale[None, :]
    qkv_b = qkv_b * col_scale

    # Matmul weights in compute_dtype; LN params / biases / gammas stay f32.
    weights = [
        params["ln1_w"].reshape(1, D).astype(f32), params["ln1_b"].reshape(1, D).astype(f32),
        qkv_w.astype(wdt),                         qkv_b.reshape(1, 3 * D).astype(f32),
        params["proj_w"].astype(wdt),              params["proj_b"].reshape(1, D).astype(f32),
        params["ln2_w"].reshape(1, D).astype(f32), params["ln2_b"].reshape(1, D).astype(f32),
        params["fc1_w"].astype(wdt),               params["fc1_b"].reshape(1, H).astype(f32),
        params["fc2_w"].astype(wdt),               params["fc2_b"].reshape(1, D).astype(f32),
        params["gamma_1"].reshape(1, D).astype(f32), params["gamma_2"].reshape(1, D).astype(f32),
    ]

    # TODO(synk): on v7x, single-buffer these constant weight inputs
    # (pipeline_mode=pl.Buffered(1), or a one-time manual DMA) to halve the
    # ~14 MiB (ViT-B bf16) duplicated weight residency; kept at the default
    # double-buffering here for portability.
    def full_spec(a):
        nd = a.ndim
        return pl.BlockSpec(a.shape, lambda b, _nd=nd: (0,) * _nd)

    in_specs = [pl.BlockSpec((1, N, D), lambda b: (b, 0, 0))]
    in_specs += [full_spec(w) for w in weights]

    # Explicit scoped-VMEM budget sized from the real footprint (x2 margin),
    # clamped to [32 MiB, 0.9 * physical VMEM] so it is safe on v5e/v6e/v7x.
    itc = jnp.dtype(compute_dtype).itemsize
    itx = jnp.dtype(x.dtype).itemsize
    tq = token_chunk
    w_bytes = sum(int(np.prod(w.shape)) * jnp.dtype(w.dtype).itemsize for w in weights)
    act_bytes = (4 * N * D * 4                 # x (f32) + qkv (N,3D) f32
                 + 2 * N * D * itc             # per-head K/V slices
                 + tq * (2 * N + H) * 4        # per-chunk scores/exp + GELU interm.
                 + tq * (H + 4 * D) * itc)     # per-chunk casts / head combine
    est = 2 * w_bytes + 4 * N * D * itx + act_bytes
    try:
        phys_vmem = int(pltpu.get_tpu_info().vmem_capacity_bytes)
    except Exception:
        phys_vmem = 64 * 1024 * 1024
    vmem_limit = int(min(max(2 * est, 32 * 1024 * 1024), int(phys_vmem * 0.9)))

    kernel = functools.partial(block_kernel, num_heads, token_chunk,
                               compute_dtype, bool(approx_softmax))

    # TODO(synk): for B == 1 on v7x (2 TensorCores) promote the token-chunk
    # loop to a second "parallel" grid axis (with K/V staged across steps) so
    # both cores get work; with B >= 2 the batch axis already feeds both cores.
    # TODO(synk): fp8 weights (per-tile scales) on v7x if profiling shows the
    # big K=D matmuls become MXU-bound after the VPU/store fixes.
    return pl.pallas_call(
        kernel,
        out_shape=jax.ShapeDtypeStruct((B, N, D), x.dtype),
        grid=(B,),
        in_specs=in_specs,
        out_specs=pl.BlockSpec((1, N, D), lambda b: (b, 0, 0)),
        compiler_params=pltpu.CompilerParams(
            dimension_semantics=("parallel",),
            vmem_limit_bytes=vmem_limit,
        ),
    )(x, *weights)


# -------------------------- deterministic params ---------------------------
def init_params(key, dim, mlp_ratio=4.0, init_values=0.1):
    H = int(dim * mlp_ratio)
    ks = jax.random.split(key, 6)
    f32 = jnp.float32
    p = {}
    p["ln1_w"] = jnp.ones((dim,), f32)
    p["ln1_b"] = jnp.zeros((dim,), f32)
    # Linear weights stored pre-transposed as (in, out) so the kernel does h @ W.
    p["qkv_w"] = (0.02 * jax.random.normal(ks[0], (dim, 3 * dim))).astype(f32)
    q_bias = 0.02 * jax.random.normal(ks[1], (dim,))
    v_bias = 0.02 * jax.random.normal(ks[2], (dim,))
    # BEiT-style qkv bias: k bias is fixed to zeros.
    p["qkv_b"] = jnp.concatenate([q_bias, jnp.zeros((dim,)), v_bias]).astype(f32)
    p["proj_w"] = (0.02 * jax.random.normal(ks[3], (dim, dim))).astype(f32)
    p["proj_b"] = jnp.zeros((dim,), f32)
    p["ln2_w"] = jnp.ones((dim,), f32)
    p["ln2_b"] = jnp.zeros((dim,), f32)
    p["fc1_w"] = (0.02 * jax.random.normal(ks[4], (dim, H))).astype(f32)
    p["fc1_b"] = jnp.zeros((H,), f32)
    p["fc2_w"] = (0.02 * jax.random.normal(ks[5], (H, dim))).astype(f32)
    p["fc2_b"] = jnp.zeros((dim,), f32)
    p["gamma_1"] = init_values * jnp.ones((dim,), f32)
    p["gamma_2"] = init_values * jnp.ones((dim,), f32)
    return p


# ---------------------------- pure-JAX reference ----------------------------
def block_reference(x, params, num_heads, qk_scale=None):
    B, N, D = x.shape
    hd = D // num_heads
    scale = qk_scale if qk_scale is not None else hd ** -0.5

    h = _layernorm(x, params["ln1_w"], params["ln1_b"])
    qkv = h @ params["qkv_w"] + params["qkv_b"]                # (B, N, 3D)
    qkv = qkv.reshape(B, N, 3, num_heads, hd).transpose(2, 0, 3, 1, 4)
    q, k, v = qkv[0], qkv[1], qkv[2]                           # (B, heads, N, hd)
    s = (q * scale) @ jnp.swapaxes(k, -2, -1)
    p = jax.nn.softmax(s, axis=-1)
    attn = (p @ v).transpose(0, 2, 1, 3).reshape(B, N, D)
    attn = attn @ params["proj_w"] + params["proj_b"]
    x = x + params["gamma_1"] * attn

    h2 = _layernorm(x, params["ln2_w"], params["ln2_b"])
    m = _gelu(h2 @ params["fc1_w"] + params["fc1_b"])
    m = m @ params["fc2_w"] + params["fc2_b"]
    return x + params["gamma_2"] * m


# ---------------------------------- main ------------------------------------
if __name__ == "__main__":
    # small but tile-friendly shapes: dim=128, heads=4 (hd=32), mlp_hidden=512
    B, N, D, NUM_HEADS = 2, 128, 128, 4
    key = jax.random.PRNGKey(0)
    kx, kp = jax.random.split(key)
    x = jax.random.normal(kx, (B, N, D), dtype=jnp.float32)
    params = init_params(kp, D)

    ref = block_reference(x, params, NUM_HEADS)

    # exact-semantics path: f32 matmul inputs, exact reciprocals, single chunk
    out_f32 = jax.block_until_ready(
        block_forward(x, params, NUM_HEADS, compute_dtype=jnp.float32))
    assert out_f32.shape == (B, N, D) and out_f32.dtype == x.dtype
    np.testing.assert_allclose(np.asarray(out_f32), np.asarray(ref),
                               rtol=1e-4, atol=1e-4)

    # fast path: bf16 MXU inputs + f32 accumulation + approx (EUP) reciprocals;
    # token_chunk=64 also exercises the multi-chunk (token-tiled) code path.
    out_bf16 = jax.block_until_ready(
        block_forward(x, params, NUM_HEADS, compute_dtype=jnp.bfloat16,
                      token_chunk=64))
    np.testing.assert_allclose(np.asarray(out_bf16), np.asarray(ref),
                               rtol=2e-2, atol=2e-2)

    # TODO(synk): return_attention / return_qkv early-exit paths and DropPath
    # stochastic depth (training-mode only) are not kernelized; with drop=0
    # and rel_pos_bias=None they are identities / absent in this forward.
    print("KERNEL_OK")
</pallas_src>

<mosaic_0001>
module attributes {stable_mosaic.version = 11 : i64} {
  func.func @block_kernel(%arg0: i32, %arg1: memref<1x128x128xf32, #tpu.memory_space<vmem>>, %arg2: memref<1x128xf32, #tpu.memory_space<vmem>>, %arg3: memref<1x128xf32, #tpu.memory_space<vmem>>, %arg4: memref<128x384xf32, #tpu.memory_space<vmem>>, %arg5: memref<1x384xf32, #tpu.memory_space<vmem>>, %arg6: memref<128x128xf32, #tpu.memory_space<vmem>>, %arg7: memref<1x128xf32, #tpu.memory_space<vmem>>, %arg8: memref<1x128xf32, #tpu.memory_space<vmem>>, %arg9: memref<1x128xf32, #tpu.memory_space<vmem>>, %arg10: memref<128x512xf32, #tpu.memory_space<vmem>>, %arg11: memref<1x512xf32, #tpu.memory_space<vmem>>, %arg12: memref<512x128xf32, #tpu.memory_space<vmem>>, %arg13: memref<1x128xf32, #tpu.memory_space<vmem>>, %arg14: memref<1x128xf32, #tpu.memory_space<vmem>>, %arg15: memref<1x128xf32, #tpu.memory_space<vmem>>, %arg16: memref<1x128x128xf32, #tpu.memory_space<vmem>>) attributes {dimension_semantics = [#tpu.dimension_semantics<parallel>], iteration_bounds = array<i64: 2>, scalar_prefetch = 0 : i64, scratch_operands = 0 : i64, tpu.core_type = #tpu.core_type<tc>, window_params = [{transform_indices = @transform_0, window_bounds = array<i64: 1, 128, 128>}, {pipeline_mode = #tpu.pipeline_mode<synchronous>, transform_indices = @transform_1, window_bounds = array<i64: 1, 128>}, {pipeline_mode = #tpu.pipeline_mode<synchronous>, transform_indices = @transform_2, window_bounds = array<i64: 1, 128>}, {pipeline_mode = #tpu.pipeline_mode<synchronous>, transform_indices = @transform_3, window_bounds = array<i64: 128, 384>}, {pipeline_mode = #tpu.pipeline_mode<synchronous>, transform_indices = @transform_4, window_bounds = array<i64: 1, 384>}, {pipeline_mode = #tpu.pipeline_mode<synchronous>, transform_indices = @transform_5, window_bounds = array<i64: 128, 128>}, {pipeline_mode = #tpu.pipeline_mode<synchronous>, transform_indices = @transform_6, window_bounds = array<i64: 1, 128>}, {pipeline_mode = #tpu.pipeline_mode<synchronous>, transform_indices = @transform_7, window_bounds = array<i64: 1, 128>}, {pipeline_mode = #tpu.pipeline_mode<synchronous>, transform_indices = @transform_8, window_bounds = array<i64: 1, 128>}, {pipeline_mode = #tpu.pipeline_mode<synchronous>, transform_indices = @transform_9, window_bounds = array<i64: 128, 512>}, {pipeline_mode = #tpu.pipeline_mode<synchronous>, transform_indices = @transform_10, window_bounds = array<i64: 1, 512>}, {pipeline_mode = #tpu.pipeline_mode<synchronous>, transform_indices = @transform_11, window_bounds = array<i64: 512, 128>}, {pipeline_mode = #tpu.pipeline_mode<synchronous>, transform_indices = @transform_12, window_bounds = array<i64: 1, 128>}, {pipeline_mode = #tpu.pipeline_mode<synchronous>, transform_indices = @transform_13, window_bounds = array<i64: 1, 128>}, {pipeline_mode = #tpu.pipeline_mode<synchronous>, transform_indices = @transform_14, window_bounds = array<i64: 1, 128>}, {transform_indices = @transform_15, window_bounds = array<i64: 1, 128, 128>}]} {
    %c0 = arith.constant 0 : index
    %c0_0 = arith.constant 0 : index
    %c0_1 = arith.constant 0 : index
    %0 = vector.load %arg1[%c0, %c0_0, %c0_1] : memref<1x128x128xf32, #tpu.memory_space<vmem>>, vector<1x128x128xf32>
    %1 = vector.shape_cast %0 : vector<1x128x128xf32> to vector<128x128xf32>
    %c0_2 = arith.constant 0 : index
    %c0_3 = arith.constant 0 : index
    %2 = vector.load %arg4[%c0_2, %c0_3] : memref<128x384xf32, #tpu.memory_space<vmem>>, vector<128x384xf32>
    %c0_4 = arith.constant 0 : index
    %c0_5 = arith.constant 0 : index
    %3 = vector.load %arg5[%c0_4, %c0_5] : memref<1x384xf32, #tpu.memory_space<vmem>>, vector<1x384xf32>
    %4 = vector.shape_cast %3 : vector<1x384xf32> to vector<384xf32>
    %c0_6 = arith.constant 0 : index
    %c0_7 = arith.constant 0 : index
    %5 = vector.load %arg6[%c0_6, %c0_7] : memref<128x128xf32, #tpu.memory_space<vmem>>, vector<128x128xf32>
    %c0_8 = arith.constant 0 : index
    %c0_9 = arith.constant 0 : index
    %6 = vector.load %arg7[%c0_8, %c0_9] : memref<1x128xf32, #tpu.memory_space<vmem>>, vector<1x128xf32>
    %7 = vector.shape_cast %6 : vector<1x128xf32> to vector<128xf32>
    %c0_10 = arith.constant 0 : index
    %c0_11 = arith.constant 0 : index
    %8 = vector.load %arg10[%c0_10, %c0_11] : memref<128x512xf32, #tpu.memory_space<vmem>>, vector<128x512xf32>
    %c0_12 = arith.constant 0 : index
    %c0_13 = arith.constant 0 : index
    %9 = vector.load %arg11[%c0_12, %c0_13] : memref<1x512xf32, #tpu.memory_space<vmem>>, vector<1x512xf32>
    %10 = vector.shape_cast %9 : vector<1x512xf32> to vector<512xf32>
    %c0_14 = arith.constant 0 : index
    %c0_15 = arith.constant 0 : index
    %11 = vector.load %arg12[%c0_14, %c0_15] : memref<512x128xf32, #tpu.memory_space<vmem>>, vector<512x128xf32>
    %c0_16 = arith.constant 0 : index
    %c0_17 = arith.constant 0 : index
    %12 = vector.load %arg13[%c0_16, %c0_17] : memref<1x128xf32, #tpu.memory_space<vmem>>, vector<1x128xf32>
    %13 = vector.shape_cast %12 : vector<1x128xf32> to vector<128xf32>
    %c0_18 = arith.constant 0 : index
    %c0_19 = arith.constant 0 : index
    %14 = vector.load %arg2[%c0_18, %c0_19] : memref<1x128xf32, #tpu.memory_space<vmem>>, vector<1x128xf32>
    %15 = vector.shape_cast %14 : vector<1x128xf32> to vector<128xf32>
    %c0_20 = arith.constant 0 : index
    %c0_21 = arith.constant 0 : index
    %16 = vector.load %arg3[%c0_20, %c0_21] : memref<1x128xf32, #tpu.memory_space<vmem>>, vector<1x128xf32>
    %17 = vector.shape_cast %16 : vector<1x128xf32> to vector<128xf32>
    %c0_22 = arith.constant 0 : index
    %c0_23 = arith.constant 0 : index
    %18 = vector.load %arg8[%c0_22, %c0_23] : memref<1x128xf32, #tpu.memory_space<vmem>>, vector<1x128xf32>
    %19 = vector.shape_cast %18 : vector<1x128xf32> to vector<128xf32>
    %c0_24 = arith.constant 0 : index
    %c0_25 = arith.constant 0 : index
    %20 = vector.load %arg9[%c0_24, %c0_25] : memref<1x128xf32, #tpu.memory_space<vmem>>, vector<1x128xf32>
    %21 = vector.shape_cast %20 : vector<1x128xf32> to vector<128xf32>
    %c0_26 = arith.constant 0 : index
    %c0_27 = arith.constant 0 : index
    %22 = vector.load %arg14[%c0_26, %c0_27] : memref<1x128xf32, #tpu.memory_space<vmem>>, vector<1x128xf32>
    %23 = vector.shape_cast %22 : vector<1x128xf32> to vector<128xf32>
    %c0_28 = arith.constant 0 : index
    %c0_29 = arith.constant 0 : index
    %24 = vector.load %arg15[%c0_28, %c0_29] : memref<1x128xf32, #tpu.memory_space<vmem>>, vector<1x128xf32>
    %25 = vector.shape_cast %24 : vector<1x128xf32> to vector<128xf32>
    %cst = arith.constant dense<0.000000e+00> : vector<128xf32>
    %26 = vector.multi_reduction <add>, %1, %cst [1] : vector<128x128xf32> to vector<128xf32>
    %27 = vector.shape_cast %26 : vector<128xf32> to vector<128x1xf32>
    %cst_30 = arith.constant 1.280000e+02 : f32
    %28 = vector.broadcast %cst_30 : f32 to vector<128x1xf32>
    %29 = arith.divf %27, %28 : vector<128x1xf32>
    %30 = arith.mulf %1, %1 : vector<128x128xf32>
    %cst_31 = arith.constant dense<0.000000e+00> : vector<128xf32>
    %31 = vector.multi_reduction <add>, %30, %cst_31 [1] : vector<128x128xf32> to vector<128xf32>
    %32 = vector.shape_cast %31 : vector<128xf32> to vector<128x1xf32>
    %cst_32 = arith.constant 1.280000e+02 : f32
    %33 = vector.broadcast %cst_32 : f32 to vector<128x1xf32>
    %34 = arith.divf %32, %33 : vector<128x1xf32>
    %35 = arith.mulf %29, %29 : vector<128x1xf32>
    %36 = arith.subf %34, %35 : vector<128x1xf32>
    %cst_33 = arith.constant 0.000000e+00 : f32
    %37 = vector.broadcast %cst_33 : f32 to vector<128x1xf32>
    %38 = arith.maximumf %36, %37 : vector<128x1xf32>
    %cst_34 = arith.constant 9.99999974E-6 : f32
    %39 = vector.broadcast %cst_34 : f32 to vector<128x1xf32>
    %40 = arith.addf %38, %39 : vector<128x1xf32>
    %41 = math.rsqrt %40 : vector<128x1xf32>
    %42 = vector.shape_cast %15 : vector<128xf32> to vector<1x128xf32>
    %43 = vector.broadcast %41 : vector<128x1xf32> to vector<128x128xf32>
    %44 = vector.broadcast %42 : vector<1x128xf32> to vector<128x128xf32>
    %45 = arith.mulf %43, %44 : vector<128x128xf32>
    %46 = arith.mulf %1, %45 : vector<128x128xf32>
    %47 = vector.broadcast %29 : vector<128x1xf32> to vector<128x128xf32>
    %48 = arith.mulf %47, %45 : vector<128x128xf32>
    %49 = vector.shape_cast %17 : vector<128xf32> to vector<1x128xf32>
    %50 = vector.broadcast %49 : vector<1x128xf32> to vector<128x128xf32>
    %51 = arith.subf %50, %48 : vector<128x128xf32>
    %52 = arith.addf %46, %51 : vector<128x128xf32>
    %cst_35 = arith.constant dense<0.000000e+00> : vector<128x384xf32>
    %53 = tpu.matmul %52, %2, %cst_35 {dimension_numbers = #tpu.dot_dimension_numbers<[1], [0], [0], [1], [0, 0, 1, 1], [], []>} : vector<128x128xf32>, vector<128x384xf32>, vector<128x384xf32> -> vector<128x384xf32>
    %54 = vector.shape_cast %4 : vector<384xf32> to vector<1x384xf32>
    %55 = vector.broadcast %54 : vector<1x384xf32> to vector<128x384xf32>
    %56 = arith.addf %53, %55 : vector<128x384xf32>
    %57 = vector.extract_strided_slice %56 {offsets = [0, 128], sizes = [128, 32], strides = [1, 1]} : vector<128x384xf32> to vector<128x32xf32>
    %58 = vector.extract_strided_slice %56 {offsets = [0, 160], sizes = [128, 32], strides = [1, 1]} : vector<128x384xf32> to vector<128x32xf32>
    %59 = vector.extract_strided_slice %56 {offsets = [0, 192], sizes = [128, 32], strides = [1, 1]} : vector<128x384xf32> to vector<128x32xf32>
    %60 = vector.extract_strided_slice %56 {offsets = [0, 224], sizes = [128, 32], strides = [1, 1]} : vector<128x384xf32> to vector<128x32xf32>
    %61 = vector.extract_strided_slice %56 {offsets = [0, 256], sizes = [128, 32], strides = [1, 1]} : vector<128x384xf32> to vector<128x32xf32>
    %62 = vector.extract_strided_slice %56 {offsets = [0, 288], sizes = [128, 32], strides = [1, 1]} : vector<128x384xf32> to vector<128x32xf32>
    %63 = vector.extract_strided_slice %56 {offsets = [0, 320], sizes = [128, 32], strides = [1, 1]} : vector<128x384xf32> to vector<128x32xf32>
    %64 = vector.extract_strided_slice %56 {offsets = [0, 352], sizes = [128, 32], strides = [1, 1]} : vector<128x384xf32> to vector<128x32xf32>
    %65 = vector.extract_strided_slice %56 {offsets = [0, 0], sizes = [128, 32], strides = [1, 1]} : vector<128x384xf32> to vector<128x32xf32>
    %cst_36 = arith.constant dense<0.000000e+00> : vector<128x128xf32>
    %66 = tpu.matmul %65, %57, %cst_36 {dimension_numbers = #tpu.dot_dimension_numbers<[1], [1], [0], [0], [0, 0, 1, 0], [], []>} : vector<128x32xf32>, vector<128x32xf32>, vector<128x128xf32> -> vector<128x128xf32>
    %cst_37 = arith.constant dense<0xFF800000> : vector<128xf32>
    %67 = vector.multi_reduction <maximumf>, %66, %cst_37 [1] : vector<128x128xf32> to vector<128xf32>
    %68 = vector.shape_cast %67 : vector<128xf32> to vector<128x1xf32>
    %69 = vector.broadcast %68 : vector<128x1xf32> to vector<128x128xf32>
    %70 = arith.subf %66, %69 : vector<128x128xf32>
    %71 = math.exp %70 : vector<128x128xf32>
    %cst_38 = arith.constant dense<0.000000e+00> : vector<128xf32>
    %72 = vector.multi_reduction <add>, %71, %cst_38 [1] : vector<128x128xf32> to vector<128xf32>
    %73 = vector.shape_cast %72 : vector<128xf32> to vector<128x1xf32>
    %cst_39 = arith.constant dense<0.000000e+00> : vector<128x32xf32>
    %74 = tpu.matmul %71, %61, %cst_39 {dimension_numbers = #tpu.dot_dimension_numbers<[1], [0], [0], [1], [0, 0, 1, 1], [], []>} : vector<128x128xf32>, vector<128x32xf32>, vector<128x32xf32> -> vector<128x32xf32>
    %75 = vector.broadcast %73 : vector<128x1xf32> to vector<128x32xf32>
    %76 = arith.divf %74, %75 : vector<128x32xf32>
    %77 = vector.extract_strided_slice %56 {offsets = [0, 32], sizes = [128, 32], strides = [1, 1]} : vector<128x384xf32> to vector<128x32xf32>
    %cst_40 = arith.constant dense<0.000000e+00> : vector<128x128xf32>
    %78 = tpu.matmul %77, %58, %cst_40 {dimension_numbers = #tpu.dot_dimension_numbers<[1], [1], [0], [0], [0, 0, 1, 0], [], []>} : vector<128x32xf32>, vector<128x32xf32>, vector<128x128xf32> -> vector<128x128xf32>
    %cst_41 = arith.constant dense<0xFF800000> : vector<128xf32>
    %79 = vector.multi_reduction <maximumf>, %78, %cst_41 [1] : vector<128x128xf32> to vector<128xf32>
    %80 = vector.shape_cast %79 : vector<128xf32> to vector<128x1xf32>
    %81 = vector.broadcast %80 : vector<128x1xf32> to vector<128x128xf32>
    %82 = arith.subf %78, %81 : vector<128x128xf32>
    %83 = math.exp %82 : vector<128x128xf32>
    %cst_42 = arith.constant dense<0.000000e+00> : vector<128xf32>
    %84 = vector.multi_reduction <add>, %83, %cst_42 [1] : vector<128x128xf32> to vector<128xf32>
    %85 = vector.shape_cast %84 : vector<128xf32> to vector<128x1xf32>
    %cst_43 = arith.constant dense<0.000000e+00> : vector<128x32xf32>
    %86 = tpu.matmul %83, %62, %cst_43 {dimension_numbers = #tpu.dot_dimension_numbers<[1], [0], [0], [1], [0, 0, 1, 1], [], []>} : vector<128x128xf32>, vector<128x32xf32>, vector<128x32xf32> -> vector<128x32xf32>
    %87 = vector.broadcast %85 : vector<128x1xf32> to vector<128x32xf32>
    %88 = arith.divf %86, %87 : vector<128x32xf32>
    %89 = vector.extract_strided_slice %56 {offsets = [0, 64], sizes = [128, 32], strides = [1, 1]} : vector<128x384xf32> to vector<128x32xf32>
    %cst_44 = arith.constant dense<0.000000e+00> : vector<128x128xf32>
    %90 = tpu.matmul %89, %59, %cst_44 {dimension_numbers = #tpu.dot_dimension_numbers<[1], [1], [0], [0], [0, 0, 1, 0], [], []>} : vector<128x32xf32>, vector<128x32xf32>, vector<128x128xf32> -> vector<128x128xf32>
    %cst_45 = arith.constant dense<0xFF800000> : vector<128xf32>
    %91 = vector.multi_reduction <maximumf>, %90, %cst_45 [1] : vector<128x128xf32> to vector<128xf32>
    %92 = vector.shape_cast %91 : vector<128xf32> to vector<128x1xf32>
    %93 = vector.broadcast %92 : vector<128x1xf32> to vector<128x128xf32>
    %94 = arith.subf %90, %93 : vector<128x128xf32>
    %95 = math.exp %94 : vector<128x128xf32>
    %cst_46 = arith.constant dense<0.000000e+00> : vector<128xf32>
    %96 = vector.multi_reduction <add>, %95, %cst_46 [1] : vector<128x128xf32> to vector<128xf32>
    %97 = vector.shape_cast %96 : vector<128xf32> to vector<128x1xf32>
    %cst_47 = arith.constant dense<0.000000e+00> : vector<128x32xf32>
    %98 = tpu.matmul %95, %63, %cst_47 {dimension_numbers = #tpu.dot_dimension_numbers<[1], [0], [0], [1], [0, 0, 1, 1], [], []>} : vector<128x128xf32>, vector<128x32xf32>, vector<128x32xf32> -> vector<128x32xf32>
    %99 = vector.broadcast %97 : vector<128x1xf32> to vector<128x32xf32>
    %100 = arith.divf %98, %99 : vector<128x32xf32>
    %101 = vector.extract_strided_slice %56 {offsets = [0, 96], sizes = [128, 32], strides = [1, 1]} : vector<128x384xf32> to vector<128x32xf32>
    %cst_48 = arith.constant dense<0.000000e+00> : vector<128x128xf32>
    %102 = tpu.matmul %101, %60, %cst_48 {dimension_numbers = #tpu.dot_dimension_numbers<[1], [1], [0], [0], [0, 0, 1, 0], [], []>} : vector<128x32xf32>, vector<128x32xf32>, vector<128x128xf32> -> vector<128x128xf32>
    %cst_49 = arith.constant dense<0xFF800000> : vector<128xf32>
    %103 = vector.multi_reduction <maximumf>, %102, %cst_49 [1] : vector<128x128xf32> to vector<128xf32>
    %104 = vector.shape_cast %103 : vector<128xf32> to vector<128x1xf32>
    %105 = vector.broadcast %104 : vector<128x1xf32> to vector<128x128xf32>
    %106 = arith.subf %102, %105 : vector<128x128xf32>
    %107 = math.exp %106 : vector<128x128xf32>
    %cst_50 = arith.constant dense<0.000000e+00> : vector<128xf32>
    %108 = vector.multi_reduction <add>, %107, %cst_50 [1] : vector<128x128xf32> to vector<128xf32>
    %109 = vector.shape_cast %108 : vector<128xf32> to vector<128x1xf32>
    %cst_51 = arith.constant dense<0.000000e+00> : vector<128x32xf32>
    %110 = tpu.matmul %107, %64, %cst_51 {dimension_numbers = #tpu.dot_dimension_numbers<[1], [0], [0], [1], [0, 0, 1, 1], [], []>} : vector<128x128xf32>, vector<128x32xf32>, vector<128x32xf32> -> vector<128x32xf32>
    %111 = vector.broadcast %109 : vector<128x1xf32> to vector<128x32xf32>
    %112 = arith.divf %110, %111 : vector<128x32xf32>
    %113 = tpu.concatenate %76, %88, %100, %112 in 1 : vector<128x32xf32>, vector<128x32xf32>, vector<128x32xf32>, vector<128x32xf32> -> vector<128x128xf32>
    %cst_52 = arith.constant dense<0.000000e+00> : vector<128x128xf32>
    %114 = tpu.matmul %113, %5, %cst_52 {dimension_numbers = #tpu.dot_dimension_numbers<[1], [0], [0], [1], [0, 0, 1, 1], [], []>} : vector<128x128xf32>, vector<128x128xf32>, vector<128x128xf32> -> vector<128x128xf32>
    %115 = vector.shape_cast %7 : vector<128xf32> to vector<1x128xf32>
    %116 = vector.broadcast %115 : vector<1x128xf32> to vector<128x128xf32>
    %117 = arith.addf %114, %116 : vector<128x128xf32>
    %118 = vector.shape_cast %23 : vector<128xf32> to vector<1x128xf32>
    %119 = vector.broadcast %118 : vector<1x128xf32> to vector<128x128xf32>
    %120 = arith.mulf %119, %117 : vector<128x128xf32>
    %121 = arith.addf %1, %120 : vector<128x128xf32>
    %cst_53 = arith.constant dense<0.000000e+00> : vector<128xf32>
    %122 = vector.multi_reduction <add>, %121, %cst_53 [1] : vector<128x128xf32> to vector<128xf32>
    %123 = vector.shape_cast %122 : vector<128xf32> to vector<128x1xf32>
    %cst_54 = arith.constant 1.280000e+02 : f32
    %124 = vector.broadcast %cst_54 : f32 to vector<128x1xf32>
    %125 = arith.divf %123, %124 : vector<128x1xf32>
    %126 = arith.mulf %121, %121 : vector<128x128xf32>
    %cst_55 = arith.constant dense<0.000000e+00> : vector<128xf32>
    %127 = vector.multi_reduction <add>, %126, %cst_55 [1] : vector<128x128xf32> to vector<128xf32>
    %128 = vector.shape_cast %127 : vector<128xf32> to vector<128x1xf32>
    %cst_56 = arith.constant 1.280000e+02 : f32
    %129 = vector.broadcast %cst_56 : f32 to vector<128x1xf32>
    %130 = arith.divf %128, %129 : vector<128x1xf32>
    %131 = arith.mulf %125, %125 : vector<128x1xf32>
    %132 = arith.subf %130, %131 : vector<128x1xf32>
    %cst_57 = arith.constant 0.000000e+00 : f32
    %133 = vector.broadcast %cst_57 : f32 to vector<128x1xf32>
    %134 = arith.maximumf %132, %133 : vector<128x1xf32>
    %cst_58 = arith.constant 9.99999974E-6 : f32
    %135 = vector.broadcast %cst_58 : f32 to vector<128x1xf32>
    %136 = arith.addf %134, %135 : vector<128x1xf32>
    %137 = math.rsqrt %136 : vector<128x1xf32>
    %138 = vector.shape_cast %19 : vector<128xf32> to vector<1x128xf32>
    %139 = vector.broadcast %137 : vector<128x1xf32> to vector<128x128xf32>
    %140 = vector.broadcast %138 : vector<1x128xf32> to vector<128x128xf32>
    %141 = arith.mulf %139, %140 : vector<128x128xf32>
    %142 = arith.mulf %121, %141 : vector<128x128xf32>
    %143 = vector.broadcast %125 : vector<128x1xf32> to vector<128x128xf32>
    %144 = arith.mulf %143, %141 : vector<128x128xf32>
    %145 = vector.shape_cast %21 : vector<128xf32> to vector<1x128xf32>
    %146 = vector.broadcast %145 : vector<1x128xf32> to vector<128x128xf32>
    %147 = arith.subf %146, %144 : vector<128x128xf32>
    %148 = arith.addf %142, %147 : vector<128x128xf32>
    %cst_59 = arith.constant dense<0.000000e+00> : vector<128x512xf32>
    %149 = tpu.matmul %148, %8, %cst_59 {dimension_numbers = #tpu.dot_dimension_numbers<[1], [0], [0], [1], [0, 0, 1, 1], [], []>} : vector<128x128xf32>, vector<128x512xf32>, vector<128x512xf32> -> vector<128x512xf32>
    %150 = vector.shape_cast %10 : vector<512xf32> to vector<1x512xf32>
    %151 = vector.broadcast %150 : vector<1x512xf32> to vector<128x512xf32>
    %152 = arith.addf %149, %151 : vector<128x512xf32>
    %cst_60 = arith.constant 5.000000e-01 : f32
    %153 = vector.broadcast %cst_60 : f32 to vector<128x512xf32>
    %154 = arith.mulf %153, %152 : vector<128x512xf32>
    %cst_61 = arith.constant 0.707106769 : f32
    %155 = vector.broadcast %cst_61 : f32 to vector<128x512xf32>
    %156 = arith.mulf %152, %155 : vector<128x512xf32>
    %cst_62 = arith.constant -4.000000e+00 : f32
    %cst_63 = arith.constant 4.000000e+00 : f32
    %157 = vector.broadcast %cst_62 : f32 to vector<128x512xf32>
    %158 = arith.maximumf %157, %156 : vector<128x512xf32>
    %159 = vector.broadcast %cst_63 : f32 to vector<128x512xf32>
    %160 = arith.minimumf %159, %158 : vector<128x512xf32>
    %161 = arith.mulf %160, %160 : vector<128x512xf32>
    %cst_64 = arith.constant -2.72614237E-10 : f32
    %162 = vector.broadcast %cst_64 : f32 to vector<128x512xf32>
    %163 = arith.mulf %162, %161 : vector<128x512xf32>
    %cst_65 = arith.constant 2.77068146E-8 : f32
    %164 = vector.broadcast %cst_65 : f32 to vector<128x512xf32>
    %165 = arith.addf %163, %164 : vector<128x512xf32>
    %166 = arith.mulf %165, %161 : vector<128x512xf32>
    %cst_66 = arith.constant -2.10102394E-6 : f32
    %167 = vector.broadcast %cst_66 : f32 to vector<128x512xf32>
    %168 = arith.addf %166, %167 : vector<128x512xf32>
    %169 = arith.mulf %168, %161 : vector<128x512xf32>
    %cst_67 = arith.constant -5.69250624E-5 : f32
    %170 = vector.broadcast %cst_67 : f32 to vector<128x512xf32>
    %171 = arith.addf %169, %170 : vector<128x512xf32>
    %172 = arith.mulf %171, %161 : vector<128x512xf32>
    %cst_68 = arith.constant -7.34990637E-4 : f32
    %173 = vector.broadcast %cst_68 : f32 to vector<128x512xf32>
    %174 = arith.addf %172, %173 : vector<128x512xf32>
    %175 = arith.mulf %174, %161 : vector<128x512xf32>
    %cst_69 = arith.constant -2.954600e-03 : f32
    %176 = vector.broadcast %cst_69 : f32 to vector<128x512xf32>
    %177 = arith.addf %175, %176 : vector<128x512xf32>
    %178 = arith.mulf %177, %161 : vector<128x512xf32>
    %cst_70 = arith.constant -0.0160960332 : f32
    %179 = vector.broadcast %cst_70 : f32 to vector<128x512xf32>
    %180 = arith.addf %178, %179 : vector<128x512xf32>
    %181 = arith.mulf %180, %160 : vector<128x512xf32>
    %cst_71 = arith.constant -1.45660715E-5 : f32
    %182 = vector.broadcast %cst_71 : f32 to vector<128x512xf32>
    %183 = arith.mulf %182, %161 : vector<128x512xf32>
    %cst_72 = arith.constant -2.13374049E-4 : f32
    %184 = vector.broadcast %cst_72 : f32 to vector<128x512xf32>
    %185 = arith.addf %183, %184 : vector<128x512xf32>
    %186 = arith.mulf %185, %161 : vector<128x512xf32>
    %cst_73 = arith.constant -0.00168282702 : f32
    %187 = vector.broadcast %cst_73 : f32 to vector<128x512xf32>
    %188 = arith.addf %186, %187 : vector<128x512xf32>
    %189 = arith.mulf %188, %161 : vector<128x512xf32>
    %cst_74 = arith.constant -0.00737332925 : f32
    %190 = vector.broadcast %cst_74 : f32 to vector<128x512xf32>
    %191 = arith.addf %189, %190 : vector<128x512xf32>
    %192 = arith.mulf %191, %161 : vector<128x512xf32>
    %cst_75 = arith.constant -0.0142647391 : f32
    %193 = vector.broadcast %cst_75 : f32 to vector<128x512xf32>
    %194 = arith.addf %192, %193 : vector<128x512xf32>
    %195 = arith.divf %181, %194 : vector<128x512xf32>
    %cst_76 = arith.constant 1.000000e+00 : f32
    %196 = vector.broadcast %cst_76 : f32 to vector<128x512xf32>
    %197 = arith.addf %196, %195 : vector<128x512xf32>
    %198 = arith.mulf %154, %197 : vector<128x512xf32>
    %cst_77 = arith.constant dense<0.000000e+00> : vector<128x128xf32>
    %199 = tpu.matmul %198, %11, %cst_77 {dimension_numbers = #tpu.dot_dimension_numbers<[1], [0], [0], [1], [0, 0, 1, 1], [], []>} : vector<128x512xf32>, vector<512x128xf32>, vector<128x128xf32> -> vector<128x128xf32>
    %200 = vector.shape_cast %13 : vector<128xf32> to vector<1x128xf32>
    %201 = vector.broadcast %200 : vector<1x128xf32> to vector<128x128xf32>
    %202 = arith.addf %199, %201 : vector<128x128xf32>
    %203 = vector.shape_cast %25 : vector<128xf32> to vector<1x128xf32>
    %204 = vector.broadcast %203 : vector<1x128xf32> to vector<128x128xf32>
    %205 = arith.mulf %204, %202 : vector<128x128xf32>
    %206 = arith.addf %121, %205 : vector<128x128xf32>
    %c0_78 = arith.constant 0 : index
    %c0_79 = arith.constant 0 : index
    %c0_80 = arith.constant 0 : index
    %207 = vector.load %arg16[%c0_78, %c0_79, %c0_80] : memref<1x128x128xf32, #tpu.memory_space<vmem>>, vector<1x128x128xf32>
    %208 = vector.shape_cast %207 : vector<1x128x128xf32> to vector<128x128xf32>
    %209 = vector.shape_cast %206 : vector<128x128xf32> to vector<1x128x128xf32>
    tpu.vector_store %arg16[%c0_78, %c0_79, %c0_80], %209 {strides = array<i32>} : memref<1x128x128xf32, #tpu.memory_space<vmem>>, vector<1x128x128xf32>,
    return
  }
  func.func @transform_0(%arg0: i32) -> (i32, i32, i32) {
    %c0_i32 = arith.constant 0 : i32
    %c0_i32_0 = arith.constant 0 : i32
    %c0_i32_1 = arith.constant 0 : i32
    return %arg0, %c0_i32, %c0_i32_0 : i32, i32, i32
  }
  func.func @transform_1(%arg0: i32) -> (i32, i32) {
    %c0_i32 = arith.constant 0 : i32
    %c0_i32_0 = arith.constant 0 : i32
    %c0_i32_1 = arith.constant 0 : i32
    return %c0_i32, %c0_i32_0 : i32, i32
  }
  func.func @transform_2(%arg0: i32) -> (i32, i32) {
    %c0_i32 = arith.constant 0 : i32
    %c0_i32_0 = arith.constant 0 : i32
    %c0_i32_1 = arith.constant 0 : i32
    return %c0_i32, %c0_i32_0 : i32, i32
  }
  func.func @transform_3(%arg0: i32) -> (i32, i32) {
    %c0_i32 = arith.constant 0 : i32
    %c0_i32_0 = arith.constant 0 : i32
    %c0_i32_1 = arith.constant 0 : i32
    return %c0_i32, %c0_i32_0 : i32, i32
  }
  func.func @transform_4(%arg0: i32) -> (i32, i32) {
    %c0_i32 = arith.constant 0 : i32
    %c0_i32_0 = arith.constant 0 : i32
    %c0_i32_1 = arith.constant 0 : i32
    return %c0_i32, %c0_i32_0 : i32, i32
  }
  func.func @transform_5(%arg0: i32) -> (i32, i32) {
    %c0_i32 = arith.constant 0 : i32
    %c0_i32_0 = arith.constant 0 : i32
    %c0_i32_1 = arith.constant 0 : i32
    return %c0_i32, %c0_i32_0 : i32, i32
  }
  func.func @transform_6(%arg0: i32) -> (i32, i32) {
    %c0_i32 = arith.constant 0 : i32
    %c0_i32_0 = arith.constant 0 : i32
    %c0_i32_1 = arith.constant 0 : i32
    return %c0_i32, %c0_i32_0 : i32, i32
  }
  func.func @transform_7(%arg0: i32) -> (i32, i32) {
    %c0_i32 = arith.constant 0 : i32
    %c0_i32_0 = arith.constant 0 : i32
    %c0_i32_1 = arith.constant 0 : i32
    return %c0_i32, %c0_i32_0 : i32, i32
  }
  func.func @transform_8(%arg0: i32) -> (i32, i32) {
    %c0_i32 = arith.constant 0 : i32
    %c0_i32_0 = arith.constant 0 : i32
    %c0_i32_1 = arith.constant 0 : i32
    return %c0_i32, %c0_i32_0 : i32, i32
  }
  func.func @transform_9(%arg0: i32) -> (i32, i32) {
    %c0_i32 = arith.constant 0 : i32
    %c0_i32_0 = arith.constant 0 : i32
    %c0_i32_1 = arith.constant 0 : i32
    return %c0_i32, %c0_i32_0 : i32, i32
  }
  func.func @transform_10(%arg0: i32) -> (i32, i32) {
    %c0_i32 = arith.constant 0 : i32
    %c0_i32_0 = arith.constant 0 : i32
    %c0_i32_1 = arith.constant 0 : i32
    return %c0_i32, %c0_i32_0 : i32, i32
  }
  func.func @transform_11(%arg0: i32) -> (i32, i32) {
    %c0_i32 = arith.constant 0 : i32
    %c0_i32_0 = arith.constant 0 : i32
    %c0_i32_1 = arith.constant 0 : i32
    return %c0_i32, %c0_i32_0 : i32, i32
  }
  func.func @transform_12(%arg0: i32) -> (i32, i32) {
    %c0_i32 = arith.constant 0 : i32
    %c0_i32_0 = arith.constant 0 : i32
    %c0_i32_1 = arith.constant 0 : i32
    return %c0_i32, %c0_i32_0 : i32, i32
  }
  func.func @transform_13(%arg0: i32) -> (i32, i32) {
    %c0_i32 = arith.constant 0 : i32
    %c0_i32_0 = arith.constant 0 : i32
    %c0_i32_1 = arith.constant 0 : i32
    return %c0_i32, %c0_i32_0 : i32, i32
  }
  func.func @transform_14(%arg0: i32) -> (i32, i32) {
    %c0_i32 = arith.constant 0 : i32
    %c0_i32_0 = arith.constant 0 : i32
    %c0_i32_1 = arith.constant 0 : i32
    return %c0_i32, %c0_i32_0 : i32, i32
  }
  func.func @transform_15(%arg0: i32) -> (i32, i32, i32) {
    %c0_i32 = arith.constant 0 : i32
    %c0_i32_0 = arith.constant 0 : i32
    %c0_i32_1 = arith.constant 0 : i32
    return %arg0, %c0_i32, %c0_i32_0 : i32, i32, i32
  }
}

</mosaic_0001>

<bundles_post_ra>
// kernel: tpu_custom_call.1
= control target key start
LH: loop header
LB: loop body
LE: loop exit
PB: predicated region body
PF: predicated region fallthrough
CT: control target
= control target key end

     0   :  { %s14096_s0 = inlined_call_operand.hbm [shape: f32[2,128,128], index: 0, kind: input, shape index: {}]   ;;  %s14097_s1 = inlined_call_operand.hbm [shape: f32[1,128], index: 1, kind: input, shape index: {}]   ;;  %s14098_s2 = inlined_call_operand.hbm [shape: f32[1,128], index: 2, kind: input, shape index: {}]   ;;  %s14099_s3 = inlined_call_operand.hbm [shape: f32[128,384], index: 3, kind: input, shape index: {}]   ;;  %s14100_s4 = inlined_call_operand.vmem [shape: f32[1,384], index: 4, kind: input, shape index: {}]   ;;  %s14101_s5 = inlined_call_operand.hbm [shape: f32[128,128], index: 5, kind: input, shape index: {}]   ;;  %s14102_s6 = inlined_call_operand.vmem [shape: f32[1,128], index: 6, kind: input, shape index: {}]   ;;  %s14103_s7 = inlined_call_operand.vmem [shape: f32[1,128], index: 7, kind: input, shape index: {}]   ;;  %s14104_s8 = inlined_call_operand.vmem [shape: f32[1,128], index: 8, kind: input, shape index: {}]   ;;  %s14105_s9 = inlined_call_operand.hbm [shape: f32[128,512], index: 9, kind: input, shape index: {}]   ;;  %s14106_s10 = inlined_call_operand.vmem [shape: f32[1,512], index: 10, kind: input, shape index: {}]   ;;  %s14107_s11 = inlined_call_operand.hbm [shape: f32[512,128], index: 11, kind: input, shape index: {}]   ;;  %s14108_s12 = inlined_call_operand.vmem [shape: f32[1,128], index: 12, kind: input, shape index: {}]   ;;  %s14109_s13 = inlined_call_operand.vmem [shape: f32[1,128], index: 13, kind: input, shape index: {}]   ;;  %s14110_s14 = inlined_call_operand.vmem [shape: f32[1,128], index: 14, kind: input, shape index: {}]   ;;  %s14111_s15 = inlined_call_operand.hbm [shape: f32[2,128,128], index: 15, kind: output, shape index: {}]  }
   0x1   :  { %14217 = sst [smem:[#allocation94_spill]] %s14097_s1 }
   0x2   :  { %14218 = sst [smem:[#allocation95_spill]] %s14098_s2 }
   0x3   :  { %14219 = sst [smem:[#allocation96_spill]] %s14099_s3 }
   0x4   :  { %14220 = sst [smem:[#allocation97_spill]] %s14101_s5 }
   0x5   :  { %14221 = sst [smem:[#allocation98_spill]] %s14105_s9 }
   0x6   :  { %14222 = sst [smem:[#allocation99_spill]] %s14107_s11 }
   0x7   :  { %14223 = sst [smem:[#allocation100_spill]] %s14110_s14 }
   0x8   :  { %14224 = sst [smem:[#allocation101_spill]] %s14111_s15 }
   0x9   :  { %20 = vsyncpa [#allocation3], 0 }
   0xa   :  { %22 = vsyncpa [#allocation3 + $0x1], 0 }
   0xb   :  { %23 = vsyncpa [#allocation6], 0 }
   0xc   :  { %24 = vsyncpa [#allocation9], 0 }
   0xd   :  { %25 = vsyncpa [#allocation12], 0 }
   0xe   :  { %26 = vsyncpa [#allocation4], 0 }
   0xf   :  { %28 = vsyncpa [#allocation4 + $0x1], 0  ;;  %s9666_s18 = smov 0   ;;  %s9668_s19 = smov 0  }
  0x10   :  { %s9670_s20 = smov 0   ;;  %s9672_s21 = smov 0  }
  0x11 LB: > { %s9566_s22 = smov [#allocation5]   ;;  %s9687_s24 = sadd.s32 4294967295, %s9564_s21   ;;  %s9564_s21 = sphi %s9672_s21, %s14604_s21   ;;  %s9560_s20 = sphi %s9670_s20, %s14603_s20   ;;  %s9556_s19 = sphi %s9668_s19, %s14602_s19   ;;  %s9552_s18 = sphi %s9666_s18, %s14601_s18  }
  0x12   : > { %s398_s23 = sshll.u32 %s9566_s22, 4  ;;  %p7271_p0 = scmp.ge.s32.totalorder %s9564_s21, 1  ;;  %s399_s23 = int_to_ptr.vmem [resolvable:$true] %s398_s23 }
  0x13   : > { %p14113_p1 = scmp.eq.s32.totalorder %s9687_s24, 0  ;;  %p385_p2 = scmp.lt.s32.totalorder %s9564_s21, 3 }
  0x14   : > { %s9567_s26 = smov [#allocation8]   ;;  %s9568_s29 = smov [#allocation11]  }
  0x15   : > { %p9692_p3 = pnand %p7271_p0, %p385_p2  ;;  %s419_s27 = sshll.u32 %s9567_s26, 4  ;;  %s9699_s27 = int_to_ptr.vmem [resolvable:$true] %s419_s27 }
  0x16   : > { %s457_s30 = sshll.u32 %s9568_s29, 4  ;;  %s9315_s17 = scalar_lea.vmem %s399_s23, 16  ;;  %s9707_s30 = int_to_ptr.vmem [resolvable:$true] %s457_s30 }
  0x17   : > { %s14225_s25 = scalar_select %p9692_p3, 1, 0 }
  0x18   : > { %p8598_p5 = pneg %p9692_p3  ;;  %p9316_p8 = scmp.ne.s32.totalorder %s399_s23, %s9315_s17 }
  0x19   : > { %s9322_s22 = scalar_lea.vmem %s399_s23, 32  ;;  %p9323_p11 = scmp.lt.s32.totalorder %s399_s23, %s399_s23 }
  0x1a   : > { %p9703_p6 = pnand %p8598_p5, %p14113_p1  ;;  %p9324_p12 = scmp.lt.s32.totalorder %s9322_s22, %s9315_s17 }
  0x1c   : > { %p9711_p7 = pneg %p9703_p6  ;;  %p9325_p13 = por %p9324_p12, %p9323_p11 }
  0x1e   : > { %p9318_p9 = pnand %p9316_p8, %p9711_p7 }
  0x20   : > { %p9319_p10 = pneg %p9318_p9 }
  0x22   : > { %p9326_p0 = pnand %p9325_p13, %p9319_p10 }
  0x24   : > { %9329 = shalt.err (!%p9326_p0)
}
  0x25   : > { %s14228_s1 = sld [smem:[#allocation94_spill]]  ;;  %s9341_s15 = scalar_lea.vmem %s9699_s27, 6144 }
  0x26   : > { %p9342_p2 = scmp.ne.s32.totalorder %s9699_s27, %s9341_s15  ;;  %p9349_p9 = scmp.lt.s32.totalorder %s9699_s27, %s9699_s27 }
  0x27   : > { %p9350_p11 = scmp.lt.s32.totalorder %s9341_s15, %s9341_s15 }
  0x28   : > { %p9344_p5 = pnand %p9342_p2, %p9711_p7 }
  0x29   : > { %p9351_p10 = por %p9350_p11, %p9349_p9 }
  0x2a   : > { %p9345_p8 = pneg %p9344_p5 }
  0x2b   : > { %8601 = dma.hbm_to_vmem [thread:$0]  (!%p9703_p6), %s14228_s1, 16, %s399_s23, [#allocation6]  }
  0x2c   : > { %p9352_p12 = pnand %p9351_p10, %p9345_p8 }
  0x2e   : > { %9355 = shalt.err (!%p9352_p12)
}
  0x2f   : > { %s9569_s17 = smov 384   ;;  %s9570_s22 = smov 24  }
  0x30   : > { %s14229_s3 = sld [smem:[#allocation96_spill]]  ;;  %s9367_s29 = scalar_lea.vmem %s9707_s30, 8192 }
  0x31   : > { %p9368_p13 = scmp.ne.s32.totalorder %s9707_s30, %s9367_s29  ;;  %p9375_p5 = scmp.lt.s32.totalorder %s9707_s30, %s9707_s30 }
  0x32   : > { %p9376_p8 = scmp.lt.s32.totalorder %s9367_s29, %s9367_s29 }
  0x33   : > { %p9370_p0 = pnand %p9368_p13, %p9711_p7 }
  0x34   : > { %p9377_p9 = por %p9376_p8, %p9375_p5 }
  0x35   : > { %p9371_p2 = pneg %p9370_p0 }
  0x36   : > { %8607 = dma.hbm_to_vmem [thread:$0]  (!%p9703_p6), %s14229_s3, 6144, %s9699_s27, [#allocation9], %s9569_s17, %s9569_s17, %s9570_s22  }
  0x37   : > { %p9378_p11 = pnand %p9377_p9, %p9371_p2 }
  0x39   : > { %9381 = shalt.err (!%p9378_p11)
}
  0x3a   : > { %s9571_s15 = smov 512   ;;  %s9572_s1 = smov 32  }
  0x3b   : > { %s14230_s9 = sld [smem:[#allocation98_spill]]  ;;  %s9573_s27 = smov [#allocation7]  }
  0x3c   : > { %s409_s17 = sshll.u32 %s9573_s27, 4  ;;  %s9574_s22 = smov [#allocation10]   ;;  %s410_s17 = int_to_ptr.vmem [resolvable:$true] %s409_s17 }
  0x3d   : > { %s435_s26 = sshll.u32 %s9574_s22, 4  ;;  %s9393_s3 = scalar_lea.vmem %s410_s17, 16  ;;  %s436_s26 = int_to_ptr.vmem [resolvable:$true] %s435_s26 }
  0x3e   : > { %p9394_p10 = scmp.ne.s32.totalorder %s410_s17, %s9393_s3  ;;  %s9400_s29 = scalar_lea.vmem %s410_s17, 32 }
  0x3f   : > { %p9401_p0 = scmp.lt.s32.totalorder %s410_s17, %s410_s17  ;;  %p9402_p2 = scmp.lt.s32.totalorder %s9400_s29, %s9393_s3 }
  0x40   : > { %p9396_p12 = pnand %p9394_p10, %p9711_p7 }
  0x41   : > { %8613 = dma.hbm_to_vmem [thread:$0]  (!%p9703_p6), %s14230_s9, 8192, %s9707_s30, [#allocation12], %s9571_s15, %s9571_s15, %s9572_s1  }
  0x42   : > { %p9397_p13 = pneg %p9396_p12  ;;  %p9403_p5 = por %p9402_p2, %p9401_p0 }
  0x44   : > { %p9404_p8 = pnand %p9403_p5, %p9397_p13 }
  0x46   : > { %9407 = shalt.err (!%p9404_p8)
}
  0x47   : > { %s14231_s2 = sld [smem:[#allocation95_spill]]  ;;  %s9419_s30 = scalar_lea.vmem %s436_s26, 2048 }
  0x48   : > { %p9420_p9 = scmp.ne.s32.totalorder %s436_s26, %s9419_s30  ;;  %p9427_p12 = scmp.lt.s32.totalorder %s436_s26, %s436_s26 }
  0x49   : > { %p9428_p4 = scmp.lt.s32.totalorder %s9419_s30, %s9419_s30 }
  0x4a   : > { %p9422_p11 = pnand %p9420_p9, %p9711_p7 }
  0x4b   : > { %p9429_p1 = por %p9428_p4, %p9427_p12 }
  0x4c   : > { %p9423_p10 = pneg %p9422_p11 }
  0x4d   : > { %8604 = dma.hbm_to_vmem [thread:$0]  (!%p9703_p6), %s14231_s2, 16, %s410_s17, [#allocation6]  }
  0x4e   : > { %p9430_p3 = pnand %p9429_p1, %p9423_p10 }
  0x50   : > { %9433 = shalt.err (!%p9430_p3)
}
  0x51   : > { %s14115_s3 = smov 128   ;;  %s14116_s15 = smov 8  }
  0x52   : > { %s14232_s5 = sld [smem:[#allocation97_spill]]  ;;  %s9577_s17 = smov [#allocation13]  }
  0x53   : > { %s473_s22 = sshll.u32 %s9577_s17, 4  ;;  %s474_s22 = int_to_ptr.vmem [resolvable:$true] %s473_s22 }
  0x54   : > { %s9445_s29 = scalar_lea.vmem %s474_s22, 8192  ;;  %p9453_p4 = scmp.lt.s32.totalorder %s474_s22, %s474_s22 }
  0x55   : > { %p9446_p13 = scmp.ne.s32.totalorder %s474_s22, %s9445_s29  ;;  %p9454_p0 = scmp.lt.s32.totalorder %s9445_s29, %s9445_s29 }
  0x57   : > { %p9448_p1 = pnand %p9446_p13, %p9711_p7  ;;  %p9455_p2 = por %p9454_p0, %p9453_p4 }
  0x58   : > { %8610 = dma.hbm_to_vmem [thread:$0]  (!%p9703_p6), %s14232_s5, 2048, %s436_s26, [#allocation9], %s14115_s3, %s14115_s3, %s14116_s15  }
  0x59   : > { %p9449_p3 = pneg %p9448_p1 }
  0x5b   : > { %p9456_p5 = pnand %p9455_p2, %p9449_p3 }
  0x5d   : > { %9459 = shalt.err (!%p9456_p5)
}
  0x5e   : > { %s14233_s11 = sld [smem:[#allocation99_spill]]  ;;  %s7270_s28 = sadd.s32 4294967294, %s9564_s21  }
  0x5f   : > { %s9775_s16 = sadd.s32 1, %s9564_s21   ;;  %s41_s30 = sadd.s32 1, %s9560_s20 }
  0x60   : > { %s38_s1 = ssub.s32 %s9564_s21, %s9775_s16  ;;  %p48_p8 = scmp.ne.s32.totalorder %s9560_s20, %s9556_s19 }
  0x61   : > { %p39_p7 = scmp.eq.s32.totalorder %s38_s1, 0  ;;  %p49_p9 = scmp.eq.s32.totalorder %s9564_s21, 0 }
  0x62   : > { %p54_p11 = scmp.ne.s32.totalorder %s9556_s19, %s9552_s18  ;;  %p14236_p12 = scmp.eq.s32.totalorder %s9687_s24, 0 }
  0x63   : > { %s9786_s23 = scalar_select %p39_p7, %s9560_s20, %s41_s30  }
  0x64   : > { %8616 = dma.hbm_to_vmem [thread:$0]  (!%p9703_p6), %s14233_s11, 8192, %s474_s22, [#allocation12], %s14115_s3, %s14115_s3, %s14116_s15  }
  0x65   : > { %14234 = sst [smem:[#allocation20_spill]] %s9786_s23  ;;  %p9788_p10 = por %p49_p9, %p48_p8 }
  0x66   : > { %p9794_p6 = por %p14236_p12, %p54_p11  ;;  %p372_p13 = scmp.eq.s32.totalorder %s9687_s24, 1 }
  0x67   : > { %p378_p1 = scmp.eq.s32.totalorder %s7270_s28, 1  ;;  %p8631_p3 = scmp.lt.s32.totalorder %s9564_s21, 2 }
  0x68   : > { %s14237_s17 = scalar_select %p9794_p6, 1, 0 }
  0x69   : > { %s496_s22 = sand.u32 1, %s9560_s20   ;;  %p9801_p4 = por %p372_p13, %p48_p8 }
  0x6a   : > { %p9805_p0 = por %p378_p1, %p54_p11  ;;  %s7279_s26 = sshll.u32 %s496_s22, 7 }
  0x6b   : > { %s14238_s29 = scalar_select %p9801_p4, 1, 0 }
  0x6c   : > { %s14239_s14 = scalar_select %p9805_p0, 1, 0 }
  0x6d   : > { %s7496_s1 = sshll.u32 %s9564_s21, 11  ;;  %s500_s28 = scalar_lea.vmem [#allocation2], %s7279_s26 }
  0x6e   : > { %s9813_s15 = scalar_lea.hbm %s14096_s0, %s7496_s1  ;;  %s507_s2 = sshll.u32 %s500_s28, 4  ;;  %s9815_s2 = int_to_ptr.vmem [resolvable:$true] %s507_s2 }
  0x6f   : > { %p9819_p2 = pnand %p8631_p3, %p9788_p10  ;;  %s9823_s9 = scalar_lea.sflag [#allocation3], %s496_s22 }
  0x70   : > { %s9460_s11 = scalar_lea.hbm %s9813_s15, 2048  ;;  %s9465_s26 = scalar_lea.hbm %s14096_s0, 4096 }
  0x71   : > { %p9461_p5 = scmp.ne.s32.totalorder %s9813_s15, %s9460_s11  ;;  %p9462_p7 = pneg %p9819_p2 }
  0x72   : > { %p9466_p11 = scmp.lt.s32.totalorder %s9813_s15, %s14096_s0  ;;  %p9467_p10 = scmp.lt.s32.totalorder %s9465_s26, %s9460_s11 }
  0x73   : > { %p9463_p8 = pnand %p9462_p7, %p9461_p5 }
  0x74   : > { %p9468_p12 = por %p9467_p10, %p9466_p11 }
  0x75   : > { %p9464_p9 = pneg %p9463_p8 }
  0x77   : > { %p9469_p13 = pnand %p9468_p12, %p9464_p9 }
  0x79   : > { %9472 = shalt.err (!%p9469_p13)
}
  0x7a   : > { %s9473_s27 = scalar_lea.vmem %s9815_s2, 2048  ;;  %s9578_s22 = smov [#allocation2]  }
  0x7b   : > { %p9474_p1 = scmp.ne.s32.totalorder %s9815_s2, %s9473_s27  ;;  %s9478_s23 = sshll.u32 %s9578_s22, 4  ;;  %s9479_s23 = int_to_ptr.vmem [resolvable:$false] %s9478_s23 }
  0x7c   : > { %s9480_s3 = scalar_lea.vmem %s9479_s23, 4096  ;;  %p9481_p8 = scmp.lt.s32.totalorder %s9815_s2, %s9479_s23 }
  0x7d   : > { %p9476_p3 = pnand %p9474_p1, %p9462_p7  ;;  %p9482_p0 = scmp.lt.s32.totalorder %s9480_s3, %s9473_s27 }
  0x7f   : > { %p9477_p5 = pneg %p9476_p3  ;;  %p9483_p4 = por %p9482_p0, %p9481_p8 }
  0x81   : > { %p9484_p6 = pnand %p9483_p4, %p9477_p5 }
  0x83   : > { %9487 = shalt.err (!%p9484_p6)
}
  0x84   : > { %s14241_s11 = smov 8   ;;  %s14242_s1 = smov 128  }
  0x85   : > { %8620 = dma.hbm_to_vmem [thread:$0]  (!%p9819_p2), %s9813_s15, 2048, %s9815_s2, %s9823_s9, %s14242_s1, %s14242_s1, %s14241_s11  }
  0x86   : > { %p14243_p7 = scmp.ne.s32.totalorder %s14225_s25, 0 }
  0x88   : > { %519 = sbr.rel (%p14243_p7) target bundleno = 4010 (0xfaa), region = 80 }
  0x8d   : > { %s9850_s26 = sand.u32 1, %s9556_s19   ;;  %p14244_p6 = scmp.ne.s32.totalorder %s14237_s17, 0 }
  0x8e   : > { %s7283_s23 = sshll.u32 %s9850_s26, 7  ;;  %s522_s30 = scalar_lea.sflag [#allocation3], %s9850_s26 }
  0x8f   : > { %s9856_s5 = scalar_lea.vmem [#allocation2], %s7283_s23 }
  0x90   : > { %9531 = dma.done.wait (%p14244_p6), %s522_s30, 2048  }
  0x91   : > { %9533 = vsyncadd (%p14244_p6), %s522_s30, 4294965248  ;;  %p14245_p4 = scmp.eq.s32.totalorder %s9687_s24, 0 }
  0x93   : > { %9535 = dma.done.wait (%p14245_p4), [#allocation6], 32   ;;  %p14246_p0 = pmov %p14245_p4 }
  0x95   : > { %9537 = vsyncadd (%p14246_p0), [#allocation6], 4294967264  ;;  %p14247_p2 = pmov %p14246_p0 }
  0x96   : > { %p14248_p9 = pmov %p14246_p0 }
  0x97   : > { %9539 = dma.done.wait (%p14247_p2), [#allocation9], 8192  }
  0x98   : > { %9541 = vsyncadd (%p14248_p9), [#allocation9], 4294959104  ;;  %p14249_p11 = pmov %p14246_p0 }
  0x99   : > { %p14250_p10 = pmov %p14246_p0 }
  0x9a   : > { %9543 = dma.done.wait (%p14249_p11), [#allocation12], 16384  }
  0x9b   : > { %9545 = vsyncadd (%p14250_p10), [#allocation12], 4294950912  ;;  %v9875_v0 = vld [vmem:[%s9856_s5 + $0x8] sm:$0xff]  ;;  %v9878_v1 = vld [vmem:[%s9856_s5] sm:$0xff]  ;;  %vm1421_vm0 = vcmask 261120   ;;  %s9580_s25 = smov 96  }
  0x9c   : > { %816 = vadd.xlane.f32.xlu1 %v9875_v0  ;;  %814 = vadd.xlane.f32.xlu0 %v9878_v1  ;;  %v864_v2 = vmul.f32 %v9875_v0, %v9875_v0  ;;  %v863_v3 = vmul.f32 %v9878_v1, %v9878_v1  ;;  %v9887_v4 = vld [vmem:[%s9856_s5 + $0x10] sm:$0xff]  ;;  %v9892_v6 = vld [vmem:[%s9856_s5 + $0x18] sm:$0xff]  ;;  %v9898_v8 = vld [vmem:[%s9856_s5 + $0x20] sm:$0xff]  ;;  %s9581_s15 = smov 64   ;;  %s9582_s17 = smov 32   ;;  %vm4006_vm1 = vcmask 523264  }
  0x9d   : > { %v865_v5 = vmul.f32 %v9887_v4, %v9887_v4  ;;  %v866_v7 = vmul.f32 %v9892_v6, %v9892_v6  ;;  %v658_v9 = vld [vmem:[#allocation8 + $0x170] sm:$0xff]  ;;  %v867_v10 = vmul.f32 %v9898_v8, %v9898_v8  ;;  %v657_v11 = vld [vmem:[#allocation8 + $0x168] sm:$0xff]  ;;  %v659_v12 = vld [vmem:[#allocation8 + $0x178] sm:$0xff]  ;;  %vm4023_vm2 = vcmask 785408   ;;  %s14540_s27 = sld [smem:[#allocation100_spill]]  ;;  %s13911_s22 = scalar_lea.vmem [#allocation14], %s7283_s23 }
  0x9e   : > { %v9904_v13 = vld [vmem:[%s9856_s5 + $0x28] sm:$0xff]  ;;  %1115 = vmatprep.subr.mxu0 %v658_v9  ;;  %7978 = vmatprep.subr.mxu1 %v659_v12  ;;  %v655_v14 = vld [vmem:[#allocation8 + $0x158] sm:$0xff]  ;;  %v654_v15 = vld [vmem:[#allocation8 + $0x150] sm:$0xff]  ;;  %s7497_s23 = sshll.u32 %s9687_s24, 11  ;;  %s7140_s3 = sshll.u32 %s13911_s22, 4  ;;  %s14051_s3 = int_to_ptr.vmem [resolvable:$true] %s7140_s3 }
  0x9f   : > { %1116 = vmatpush1.msra.mxu0 %v657_v11  ;;  %7979 = vmatpush3.msra.mxu1 %v659_v12  ;;  %v656_v16 = vld [vmem:[#allocation8 + $0x160] sm:$0xff]  ;;  %v868_v17 = vmul.f32 %v9904_v13, %v9904_v13  ;;  %v9910_v19 = vld [vmem:[%s9856_s5 + $0x30] sm:$0xff]  ;;  %v651_v20 = vld [vmem:[#allocation8 + $0x138] sm:$0xff]  ;;  %s14595_s30 = sld [smem:[#allocation101_spill]]  ;;  %s7127_s2 = scalar_lea.sflag [#allocation4], %s9850_s26 }
  0xa0   : > { %881 = vadd.xlane.f32.xlu1 %v864_v2  ;;  %879 = vadd.xlane.f32.xlu0 %v863_v3  ;;  %v652_v18 = vld [vmem:[#allocation8 + $0x140] sm:$0xff]  ;;  %v653_v21 = vld [vmem:[#allocation8 + $0x148] sm:$0xff]  ;;  %v650_v24 = vld [vmem:[#allocation8 + $0x130] sm:$0xff]  ;;  %v869_v25 = vmul.f32 %v9910_v19, %v9910_v19  ;;  %s9488_s9 = scalar_lea.vmem %s14051_s3, 2048  ;;  %p14597_p13 = scmp.ne.s32.totalorder %s14238_s29, 0 }
  0xa1   : > { %1117 = vmatprep.subr.mxu0 %v655_v14  ;;  %7980 = vmatprep.subr.mxu1 %v656_v16  ;;  %v649_v22 = vld [vmem:[#allocation8 + $0x128] sm:$0xff]  ;;  %v648_v23 = vld [vmem:[#allocation8 + $0x120] sm:$0xff]  ;;  %v646_v26 = vld [vmem:[#allocation8 + $0x110] sm:$0xff]  ;;  %p9489_p12 = scmp.ne.s32.totalorder %s14051_s3, %s9488_s9  ;;  %s9583_s24 = smov [#allocation14]  }
  0xa2   : > { %1118 = vmatpush1.msra.mxu0 %v654_v15  ;;  %7981 = vmatpush3.msra.mxu1 %v656_v16  ;;  %v9916_v27 = vld [vmem:[%s9856_s5 + $0x38] sm:$0xff]  ;;  %v645_v28 = vld [vmem:[#allocation8 + $0x108] sm:$0xff]  ;;  %v644_v33 = vld [vmem:[#allocation8 + $0x100] sm:$0xff] }
  0xa3   : > { %1119 = vmatprep.subr.mxu0 %v652_v18  ;;  %7982 = vmatprep.subr.mxu1 %v653_v21  ;;  %v647_v29 = vld [vmem:[#allocation8 + $0x118] sm:$0xff]  ;;  %v870_v31 = vmul.f32 %v9916_v27, %v9916_v27  ;;  %v642_v32 = vld [vmem:[#allocation8 + $0xf0] sm:$0xff]  ;;  %v640_v35 = vld [vmem:[#allocation8 + $0xe0] sm:$0xff]  ;;  %p9490_p1 = pnand %p9489_p12, %p14597_p13 }
  0xa4   : > { %818 = vadd.xlane.f32.xlu0 %v9887_v4  ;;  %883 = vadd.xlane.f32.xlu1 %v865_v5  ;;  %v643_v30 = vld [vmem:[#allocation8 + $0xf8] sm:$0xff]  ;;  %v641_v37 = vld [vmem:[#allocation8 + $0xe8] sm:$0xff]  ;;  %v636_v41 = vld [vmem:[#allocation8 + $0xc0] sm:$0xff] }
  0xa5   : > { %1120 = vmatpush1.msra.mxu0 %v651_v20  ;;  %7983 = vmatpush3.msra.mxu1 %v653_v21  ;;  %v9922_v34 = vld [vmem:[%s9856_s5 + $0x40] sm:$0xff]  ;;  %v637_v39 = vld [vmem:[#allocation8 + $0xc8] sm:$0xff]  ;;  %v638_v42 = vld [vmem:[#allocation8 + $0xd0] sm:$0xff]  ;;  %p9491_p3 = pneg %p9490_p1 }
  0xa6   : > { %1121 = vmatprep.subr.mxu0 %v649_v22  ;;  %7984 = vmatprep.subr.mxu1 %v650_v24  ;;  %v639_v36 = vld [vmem:[#allocation8 + $0xd8] sm:$0xff]  ;;  %v871_v38 = vmul.f32 %v9922_v34, %v9922_v34  ;;  %v9928_v40 = vld [vmem:[%s9856_s5 + $0x48] sm:$0xff]  ;;  %v634_v43 = vld [vmem:[#allocation8 + $0xb0] sm:$0xff]  ;;  %v14122_v22 = vmov 0.0  }
  0xa7   : > { %1122 = vmatpush1.msra.mxu0 %v648_v23  ;;  %7985 = vmatpush3.msra.mxu1 %v650_v24  ;;  %v872_v44 = vmul.f32 %v9928_v40, %v9928_v40  ;;  %v633_v45 = vld [vmem:[#allocation8 + $0xa8] sm:$0xff]  ;;  %v635_v46 = vld [vmem:[#allocation8 + $0xb8] sm:$0xff]  ;;  %v630_v49 = vld [vmem:[#allocation8 + $0x90] sm:$0xff] }
  0xa8   : > { %820 = vadd.xlane.f32.xlu0 %v9892_v6  ;;  %885 = vadd.xlane.f32.xlu1 %v866_v7  ;;  %v9934_v47 = vld [vmem:[%s9856_s5 + $0x50] sm:$0xff]  ;;  %v631_v48 = vld [vmem:[#allocation8 + $0x98] sm:$0xff]  ;;  %v632_v50 = vld [vmem:[#allocation8 + $0xa0] sm:$0xff] }
  0xa9   : > { %1123 = vmatprep.subr.mxu0 %v646_v26  ;;  %7986 = vmatprep.subr.mxu1 %v647_v29  ;;  %v873_v51 = vmul.f32 %v9934_v47, %v9934_v47  ;;  %v628_v52 = vld [vmem:[#allocation8 + $0x80] sm:$0xff]  ;;  %v9940_v53 = vld [vmem:[%s9856_s5 + $0x58] sm:$0xff]  ;;  %v629_v55 = vld [vmem:[#allocation8 + $0x88] sm:$0xff] }
  0xaa   : > { %1124 = vmatpush1.msra.mxu0 %v645_v28  ;;  %7987 = vmatpush3.msra.mxu1 %v647_v29  ;;  %v627_v54 = vld [vmem:[#allocation8 + $0x78] sm:$0xff]  ;;  %v625_v56 = vld [vmem:[#allocation8 + $0x68] sm:$0xff]  ;;  %v874_v57 = vmul.f32 %v9940_v53, %v9940_v53  ;;  %v624_v58 = vld [vmem:[#allocation8 + $0x60] sm:$0xff] }
  0xab   : > { %1125 = vmatprep.subr.mxu0 %v643_v30  ;;  %7988 = vmatprep.subr.mxu1 %v644_v33  ;;  %v626_v59 = vld [vmem:[#allocation8 + $0x70] sm:$0xff]  ;;  %v9946_v60 = vld [vmem:[%s9856_s5 + $0x60] sm:$0xff]  ;;  %v621_v62 = vld [vmem:[#allocation8 + $0x48] sm:$0xff] }
  0xac   : > { %822 = vadd.xlane.f32.xlu0 %v9898_v8  ;;  %887 = vadd.xlane.f32.xlu1 %v867_v10  ;;  %v622_v61 = vld [vmem:[#allocation8 + $0x50] sm:$0xff]  ;;  %v623_v63 = vld [vmem:[#allocation8 + $0x58] sm:$0xff]  ;;  %v875_v2 = vmul.f32 %v9946_v60, %v9946_v60  ;;  %v9952_v5 = vld [vmem:[%s9856_s5 + $0x68] sm:$0xff] }
  0xad   : > { %1126 = vmatpush1.msra.mxu0 %v642_v32  ;;  %7989 = vmatpush3.msra.mxu1 %v644_v33  ;;  %v619_v3 = vld [vmem:[#allocation8 + $0x38] sm:$0xff]  ;;  %v618_v7 = vld [vmem:[#allocation8 + $0x30] sm:$0xff]  ;;  %v620_v9 = vld [vmem:[#allocation8 + $0x40] sm:$0xff]  ;;  %v876_v11 = vmul.f32 %v9952_v5, %v9952_v5 }
  0xae   : > { %1127 = vmatprep.subr.mxu0 %v640_v35  ;;  %7990 = vmatprep.subr.mxu1 %v641_v37  ;;  %v616_v10 = vld [vmem:[#allocation8 + $0x20] sm:$0xff]  ;;  %v615_v12 = vld [vmem:[#allocation8 + $0x18] sm:$0xff]  ;;  %v617_v14 = vld [vmem:[#allocation8 + $0x28] sm:$0xff] }
  0xaf   : > { %1128 = vmatpush1.msra.mxu0 %v639_v36  ;;  %7991 = vmatpush3.msra.mxu1 %v641_v37  ;;  %v9958_v15 = vld [vmem:[%s9856_s5 + $0x70] sm:$0xff]  ;;  %v9964_v21 = vld [vmem:[%s9856_s5 + $0x78] sm:$0xff] }
  0xb0   : > { %824 = vadd.xlane.f32.xlu0 %v9904_v13  ;;  %889 = vadd.xlane.f32.xlu1 %v868_v17  ;;  %v613_v16 = vld [vmem:[#allocation8 + $0x8] sm:$0xff]  ;;  %v612_v17 = vld [vmem:[#allocation8] sm:$0xff]  ;;  %v877_v18 = vmul.f32 %v9958_v15, %v9958_v15  ;;  %v614_v20 = vld [vmem:[#allocation8 + $0x10] sm:$0xff]  ;;  %v878_v23 = vmul.f32 %v9964_v21, %v9964_v21 }
  0xb1   : > { %1129 = vmatprep.subr.mxu0 %v637_v39  ;;  %7992 = vmatprep.subr.mxu1 %v638_v42 }
  0xb2   : > { %1130 = vmatpush1.msra.mxu0 %v636_v41  ;;  %7993 = vmatpush3.msra.mxu1 %v638_v42 }
  0xb3   : > { %1131 = vmatprep.subr.mxu0 %v634_v43  ;;  %7994 = vmatprep.subr.mxu1 %v635_v46 }
  0xb4   : > { %826 = vadd.xlane.f32.xlu0 %v9910_v19  ;;  %891 = vadd.xlane.f32.xlu1 %v869_v25 }
  0xb5   : > { %1132 = vmatpush1.msra.mxu0 %v633_v45  ;;  %7995 = vmatpush3.msra.mxu1 %v635_v46 }
  0xb6   : > { %1133 = vmatprep.subr.mxu0 %v631_v48  ;;  %7996 = vmatprep.subr.mxu1 %v632_v50 }
  0xb7   : > { %1134 = vmatpush1.msra.mxu0 %v630_v49  ;;  %7997 = vmatpush3.msra.mxu1 %v632_v50 }
  0xb8   : > { %828 = vadd.xlane.f32.xlu0 %v9916_v27  ;;  %893 = vadd.xlane.f32.xlu1 %v870_v31 }
  0xb9   : > { %1135 = vmatprep.subr.mxu0 %v628_v52  ;;  %7998 = vmatprep.subr.mxu1 %v629_v55 }
  0xba   : > { %1136 = vmatpush1.msra.mxu0 %v627_v54  ;;  %7999 = vmatpush3.msra.mxu1 %v629_v55 }
  0xbb   : > { %1137 = vmatprep.subr.mxu0 %v625_v56  ;;  %8000 = vmatprep.subr.mxu1 %v626_v59 }
  0xbc   : > { %830 = vadd.xlane.f32.xlu0 %v9922_v34  ;;  %895 = vadd.xlane.f32.xlu1 %v871_v38 }
  0xbd   : > { %1138 = vmatpush1.msra.mxu0 %v624_v58  ;;  %8001 = vmatpush3.msra.mxu1 %v626_v59 }
  0xbe   : > { %1139 = vmatprep.subr.mxu0 %v622_v61  ;;  %8002 = vmatprep.subr.mxu1 %v623_v63 }
  0xbf   : > { %1140 = vmatpush1.msra.mxu0 %v621_v62  ;;  %8003 = vmatpush3.msra.mxu1 %v623_v63 }
  0xc0   : > { %832 = vadd.xlane.f32.xlu0 %v9928_v40  ;;  %897 = vadd.xlane.f32.xlu1 %v872_v44 }
  0xc1   : > { %1141 = vmatprep.subr.mxu0 %v619_v3  ;;  %8004 = vmatprep.subr.mxu1 %v620_v9 }
  0xc2   : > { %1142 = vmatpush1.msra.mxu0 %v618_v7  ;;  %8005 = vmatpush3.msra.mxu1 %v620_v9 }
  0xc3   : > { %1143 = vmatprep.subr.mxu0 %v616_v10  ;;  %8006 = vmatprep.subr.mxu1 %v617_v14 }
  0xc4   : > { %834 = vadd.xlane.f32.xlu0 %v9934_v47  ;;  %899 = vadd.xlane.f32.xlu1 %v873_v51 }
  0xc5   : > { %1144 = vmatpush1.msra.mxu0 %v615_v12  ;;  %8007 = vmatpush3.msra.mxu1 %v617_v14 }
  0xc6   : > { %1145 = vmatprep.subr.mxu0 %v613_v16  ;;  %1179 = vmatprep.mubr.f32.mxu0 %v14122_v22 }
  0xc7   : > { %1146 = vmatpush1.msra.mxu0 %v612_v17  ;;  %8008 = vmatprep.subr.mxu1 %v614_v20 }
  0xc8   : > { %836 = vadd.xlane.f32.xlu0 %v9940_v53  ;;  %901 = vadd.xlane.f32.xlu1 %v874_v57 }
  0xc9   : > { %8009 = vmatpush3.msra.mxu1 %v614_v20 }
  0xcc   : > { %838 = vadd.xlane.f32.xlu0 %v9946_v60  ;;  %903 = vadd.xlane.f32.xlu1 %v875_v2 }
  0xd0   : > { %840 = vadd.xlane.f32.xlu0 %v9952_v5  ;;  %905 = vadd.xlane.f32.xlu1 %v876_v11 }
  0xd4   : > { %842 = vadd.xlane.f32.xlu0 %v9958_v15  ;;  %907 = vadd.xlane.f32.xlu1 %v877_v18 }
  0xd8   : > { %844 = vadd.xlane.f32.xlu0 %v9964_v21  ;;  %909 = vadd.xlane.f32.xlu1 %v878_v23  ;;  %v9995_v23 = vld [vmem:[#allocation5] ss:$0 sm:$0xff] }
 0x125   : > { %v817_v24 = vpop.xlane.xlu1 %816  ;;  %v815_v25 = vpop.xlane.xlu0 %814 }
 0x126   : > { %v9971_v26 = vmul.f32 0.0078125, %v817_v24  ;;  %v9973_v28 = vmul.f32 0.0078125, %v815_v25 }
 0x128   : > { %v928_v29 = vmul.f32 %v9971_v26, %v9971_v26  ;;  %v927_v32 = vmul.f32 %v9973_v28, %v9973_v28 }
 0x129   : > { %v882_v30 = vpop.xlane.xlu1 %881  ;;  %v880_v31 = vpop.xlane.xlu0 %879 }
 0x12a   : > { %v912_v33 = vmul.f32 0.0078125, %v882_v30  ;;  %v911_v35 = vmul.f32 0.0078125, %v880_v31 }
 0x12c   : > { %v944_v36 = vsub.f32 %v912_v33, %v928_v29  ;;  %v943_v37 = vsub.f32 %v911_v35, %v927_v32 }
 0x12d   : > { %v819_v38 = vpop.xlane.xlu0 %818  ;;  %v884_v39 = vpop.xlane.xlu1 %883 }
 0x12e   : > { %v960_v41 = vmax.f32 %v944_v36, 0.0  ;;  %v959_v42 = vmax.f32 %v943_v37, 0.0  ;;  %v9979_v43 = vmul.f32 0.0078125, %v819_v38  ;;  %v913_v44 = vmul.f32 0.0078125, %v884_v39 }
 0x130   : > { %v976_v45 = vadd.f32 1e-05, %v960_v41  ;;  %v975_v46 = vadd.f32 1e-05, %v959_v42  ;;  %v929_v48 = vmul.f32 %v9979_v43, %v9979_v43 }
 0x131   : > { %v821_v49 = vpop.xlane.xlu0 %820  ;;  %v886_v50 = vpop.xlane.xlu1 %885 }
 0x132   : > { %8809 = vrsqrt.f32 %v976_v45  ;;  %v945_v51 = vsub.f32 %v913_v44, %v929_v48  ;;  %v9983_v52 = vmul.f32 0.0078125, %v821_v49  ;;  %v914_v54 = vmul.f32 0.0078125, %v886_v50 }
 0x133   : > { %8811 = vrsqrt.f32 %v975_v46  ;;  %v10005_v46 = vld [vmem:[#allocation7] ss:$0 sm:$0xff] }
 0x134   : > { %v961_v55 = vmax.f32 %v945_v51, 0.0  ;;  %v930_v56 = vmul.f32 %v9983_v52, %v9983_v52 }
 0x135   : > { %v823_v57 = vpop.xlane.xlu0 %822  ;;  %v888_v58 = vpop.xlane.xlu1 %887 }
 0x136   : > { %v977_v59 = vadd.f32 1e-05, %v961_v55  ;;  %v946_v61 = vsub.f32 %v914_v54, %v930_v56  ;;  %v9987_v62 = vmul.f32 0.0078125, %v823_v57  ;;  %v915_v63 = vmul.f32 0.0078125, %v888_v58 }
 0x138   : > { %8813 = vrsqrt.f32 %v977_v59  ;;  %v962_v2 = vmax.f32 %v946_v61, 0.0  ;;  %v931_v3 = vmul.f32 %v9987_v62, %v9987_v62 }
 0x139   : > { %v825_v7 = vpop.xlane.xlu0 %824  ;;  %v890_v9 = vpop.xlane.xlu1 %889 }
 0x13a   : > { %v978_v10 = vadd.f32 1e-05, %v962_v2  ;;  %v947_v11 = vsub.f32 %v915_v63, %v931_v3  ;;  %v9991_v12 = vmul.f32 0.0078125, %v825_v7  ;;  %v916_v14 = vmul.f32 0.0078125, %v890_v9 }
 0x13c   : > { %8815 = vrsqrt.f32 %v978_v10  ;;  %v963_v16 = vmax.f32 %v947_v11, 0.0  ;;  %v932_v17 = vmul.f32 %v9991_v12, %v9991_v12 }
 0x13d   : > { %v827_v18 = vpop.xlane.xlu0 %826  ;;  %v892_v20 = vpop.xlane.xlu1 %891 }
 0x13e   : > { %v979_v24 = vadd.f32 1e-05, %v963_v16  ;;  %v948_v25 = vsub.f32 %v916_v14, %v932_v17  ;;  %v9997_v29 = vmul.f32 0.0078125, %v827_v18  ;;  %v917_v30 = vmul.f32 0.0078125, %v892_v20 }
 0x13f   : > { %v8810_v31 = vpop.eup %8809 }
 0x140   : > { %v8812_v32 = vpop.eup %8811  ;;  %8817 = vrsqrt.f32 %v979_v24  ;;  %v964_v33 = vmax.f32 %v948_v25, 0.0  ;;  %v933_v35 = vmul.f32 %v9997_v29, %v9997_v29  ;;  %v1014_v36 = vmul.f32 %v8810_v31, %v9995_v23 }
 0x141   : > { %v829_v37 = vpop.xlane.xlu0 %828  ;;  %v894_v38 = vpop.xlane.xlu1 %893  ;;  %v1013_v39 = vmul.f32 %v8812_v32, %v9995_v23 }
 0x142   : > { %v980_v41 = vadd.f32 1e-05, %v964_v33  ;;  %v949_v42 = vsub.f32 %v917_v30, %v933_v35  ;;  %v10003_v44 = vmul.f32 0.0078125, %v829_v37  ;;  %v918_v45 = vmul.f32 0.0078125, %v894_v38 }
 0x143   : > { %v1045_v48 = vmul.f32 %v1013_v39, %v9973_v28  ;;  %v1030_v49 = vmul.f32 %v1014_v36, %v9875_v0  ;;  %v1046_v50 = vmul.f32 %v1014_v36, %v9971_v26  ;;  %v1029_v58 = vmul.f32 %v1013_v39, %v9878_v1 }
 0x144   : > { %8819 = vrsqrt.f32 %v980_v41  ;;  %v965_v51 = vmax.f32 %v949_v42, 0.0  ;;  %v934_v54 = vmul.f32 %v10003_v44, %v10003_v44 }
 0x145   : > { %v8814_v55 = vpop.eup %8813  ;;  %v831_v56 = vpop.xlane.xlu0 %830  ;;  %v1067_v59 = vsub.f32 %v10005_v46, %v1045_v48  ;;  %v1068_v61 = vsub.f32 %v10005_v46, %v1046_v50 }
 0x146   : > { %v896_v57 = vpop.xlane.xlu1 %895  ;;  %v981_v63 = vadd.f32 1e-05, %v965_v51  ;;  %v950_v28 = vsub.f32 %v918_v45, %v934_v54  ;;  %v10015_v2 = vmul.f32 0.0078125, %v831_v56  ;;  %v1015_v7 = vmul.f32 %v8814_v55, %v9995_v23 }
 0x147   : > { %v919_v0 = vmul.f32 0.0078125, %v896_v57  ;;  %v1083_v26 = vadd.f32 %v1067_v59, %v1029_v58  ;;  %v1084_v3 = vadd.f32 %v1068_v61, %v1030_v49 }
 0x148   : > { %8821 = vrsqrt.f32 %v981_v63  ;;  %v966_v9 = vmax.f32 %v950_v28, 0.0  ;;  %v935_v10 = vmul.f32 %v10015_v2, %v10015_v2  ;;  %v1031_v16 = vmul.f32 %v1015_v7, %v9887_v4 }
 0x149   : > { %v8816_v11 = vpop.eup %8815  ;;  %1180 = vmatmul.mubr.f32.vlgmr.msra.gmra.mxu0 %v1083_v26  ;;  %8010 = vmatprep.mubr.f32.mxu1 %v1083_v26  ;;  %v833_v1 = vpop.xlane.xlu0 %832  ;;  %v1047_v17 = vmul.f32 %v1015_v7, %v9979_v43 }
 0x14a   : > { %v898_v14 = vpop.xlane.xlu1 %897  ;;  %v982_v18 = vadd.f32 1e-05, %v966_v9  ;;  %v951_v20 = vsub.f32 %v919_v0, %v935_v10  ;;  %8011 = vmatmul.mubr.f32.vlgmr.msra.gmra.mxu1 %v1084_v3  ;;  %v10022_v24 = vmul.f32 0.0078125, %v833_v1  ;;  %1185 = vmatprep.mubr.f32.mxu0 %v14122_v22  ;;  %v1016_v31 = vmul.f32 %v8816_v11, %v9995_v23 }
 0x14b   : > { %v920_v25 = vmul.f32 0.0078125, %v898_v14  ;;  %v1069_v30 = vsub.f32 %v10005_v46, %v1047_v17 }
 0x14c   : > { %8823 = vrsqrt.f32 %v982_v18  ;;  %v967_v32 = vmax.f32 %v951_v20, 0.0  ;;  %v936_v33 = vmul.f32 %v10022_v24, %v10022_v24  ;;  %v1032_v37 = vmul.f32 %v1016_v31, %v9892_v6 }
 0x14d   : > { %v8818_v4 = vpop.eup %8817  ;;  %1186 = vmatmul.mubr.f32.gmra.mxu0 %v1084_v3  ;;  %v835_v43 = vpop.xlane.xlu0 %834  ;;  %v1085_v35 = vadd.f32 %v1069_v30, %v1031_v16  ;;  %v1048_v38 = vmul.f32 %v1016_v31, %v9983_v52 }
 0x14e   : > { %v900_v36 = vpop.xlane.xlu1 %899  ;;  %v983_v39 = vadd.f32 1e-05, %v967_v32  ;;  %v952_v41 = vsub.f32 %v920_v25, %v936_v33  ;;  %v10031_v42 = vmul.f32 0.0078125, %v835_v43  ;;  %1191 = vmatprep.mubr.f32.mxu0 %v14122_v22  ;;  %v1017_v49 = vmul.f32 %v8818_v4, %v9995_v23 }
 0x14f   : > { %v921_v45 = vmul.f32 0.0078125, %v900_v36  ;;  %8013 = vmatprep.mubr.f32.mxu1 %v1085_v35  ;;  %v1070_v48 = vsub.f32 %v10005_v46, %v1048_v38 }
 0x150   : > { %8825 = vrsqrt.f32 %v983_v39  ;;  %v968_v50 = vmax.f32 %v952_v41, 0.0  ;;  %v937_v51 = vmul.f32 %v10031_v42, %v10031_v42  ;;  %v1033_v56 = vmul.f32 %v1017_v49, %v9898_v8 }
 0x151   : > { %v8820_v6 = vpop.eup %8819  ;;  %1192 = vmatmul.mubr.f32.gmra.mxu0 %v1085_v35  ;;  %v837_v52 = vpop.xlane.xlu0 %836  ;;  %v1086_v54 = vadd.f32 %v1070_v48, %v1032_v37  ;;  %v1049_v57 = vmul.f32 %v1017_v49, %v9987_v62 }
 0x152   : > { %v902_v55 = vpop.xlane.xlu1 %901  ;;  %v984_v58 = vadd.f32 1e-05, %v968_v50  ;;  %v953_v59 = vsub.f32 %v921_v45, %v937_v51  ;;  %v10040_v61 = vmul.f32 0.0078125, %v837_v52  ;;  %1197 = vmatprep.mubr.f32.mxu0 %v14122_v22  ;;  %v1018_v0 = vmul.f32 %v8820_v6, %v9995_v23 }
 0x153   : > { %v922_v63 = vmul.f32 0.0078125, %v902_v55  ;;  %8014 = vmatmul.mubr.f32.gmra.mxu1 %v1086_v54  ;;  %v1071_v28 = vsub.f32 %v10005_v46, %v1049_v57 }
 0x154   : > { %8827 = vrsqrt.f32 %v984_v58  ;;  %v969_v26 = vmax.f32 %v953_v59, 0.0  ;;  %v938_v3 = vmul.f32 %v10040_v61, %v10040_v61  ;;  %v1034_v10 = vmul.f32 %v1018_v0, %v9904_v13 }
 0x155   : > { %v8822_v8 = vpop.eup %8821  ;;  %1198 = vmatmul.mubr.f32.gmra.mxu0 %v1086_v54  ;;  %v839_v62 = vpop.xlane.xlu0 %838  ;;  %v1087_v7 = vadd.f32 %v1071_v28, %v1033_v56  ;;  %v1050_v11 = vmul.f32 %v1018_v0, %v9991_v12 }
 0x156   : > { %v904_v9 = vpop.xlane.xlu1 %903  ;;  %v985_v1 = vadd.f32 1e-05, %v969_v26  ;;  %v954_v14 = vsub.f32 %v922_v63, %v938_v3  ;;  %v10049_v16 = vmul.f32 0.0078125, %v839_v62  ;;  %1203 = vmatprep.mubr.f32.mxu0 %v14122_v22  ;;  %v1019_v20 = vmul.f32 %v8822_v8, %v9995_v23 }
 0x157   : > { %v923_v17 = vmul.f32 0.0078125, %v904_v9  ;;  %8016 = vmatprep.mubr.f32.mxu1 %v1087_v7  ;;  %v1072_v18 = vsub.f32 %v10005_v46, %v1050_v11 }
 0x158   : > { %8829 = vrsqrt.f32 %v985_v1  ;;  %v970_v25 = vmax.f32 %v954_v14, 0.0  ;;  %v939_v30 = vmul.f32 %v10049_v16, %v10049_v16  ;;  %v1035_v33 = vmul.f32 %v1019_v20, %v9910_v19 }
 0x159   : > { %v8824_v13 = vpop.eup %8823  ;;  %1204 = vmatmul.mubr.f32.gmra.mxu0 %v1087_v7  ;;  %v841_v12 = vpop.xlane.xlu0 %840  ;;  %v1088_v31 = vadd.f32 %v1072_v18, %v1034_v10  ;;  %v1051_v4 = vmul.f32 %v1019_v20, %v9997_v29 }
 0x15a   : > { %v906_v32 = vpop.xlane.xlu1 %905  ;;  %v986_v43 = vadd.f32 1e-05, %v970_v25  ;;  %v955_v35 = vsub.f32 %v923_v17, %v939_v30  ;;  %v10058_v36 = vmul.f32 0.0078125, %v841_v12  ;;  %1209 = vmatprep.mubr.f32.mxu0 %v14122_v22  ;;  %v1020_v39 = vmul.f32 %v8824_v13, %v9995_v23 }
 0x15b   : > { %v924_v37 = vmul.f32 0.0078125, %v906_v32  ;;  %8017 = vmatmul.mubr.f32.gmra.mxu1 %v1088_v31  ;;  %v1073_v38 = vsub.f32 %v10005_v46, %v1051_v4 }
 0x15c   : > { %8831 = vrsqrt.f32 %v986_v43  ;;  %v971_v41 = vmax.f32 %v955_v35, 0.0  ;;  %v940_v45 = vmul.f32 %v10058_v36, %v10058_v36  ;;  %v1036_v50 = vmul.f32 %v1020_v39, %v9916_v27 }
 0x15d   : > { %v8826_v19 = vpop.eup %8825  ;;  %1210 = vmatmul.mubr.f32.gmra.mxu0 %v1088_v31  ;;  %v843_v29 = vpop.xlane.xlu0 %842  ;;  %v1089_v48 = vadd.f32 %v1073_v38, %v1035_v33  ;;  %v1052_v51 = vmul.f32 %v1020_v39, %v10003_v44 }
 0x15e   : > { %v908_v49 = vpop.xlane.xlu1 %907  ;;  %v987_v6 = vadd.f32 1e-05, %v971_v41  ;;  %v956_v52 = vsub.f32 %v924_v37, %v940_v45  ;;  %v10067_v54 = vmul.f32 0.0078125, %v843_v29  ;;  %1215 = vmatprep.mubr.f32.mxu0 %v14122_v22  ;;  %v1021_v57 = vmul.f32 %v8826_v19, %v9995_v23 }
 0x15f   : > { %v925_v55 = vmul.f32 0.0078125, %v908_v49  ;;  %8019 = vmatprep.mubr.f32.mxu1 %v1089_v48  ;;  %v1074_v56 = vsub.f32 %v10005_v46, %v1052_v51 }
 0x160   : > { %8833 = vrsqrt.f32 %v987_v6  ;;  %v972_v58 = vmax.f32 %v956_v52, 0.0  ;;  %v941_v59 = vmul.f32 %v10067_v54, %v10067_v54  ;;  %v1037_v0 = vmul.f32 %v1021_v57, %v9922_v34 }
 0x161   : > { %v8828_v27 = vpop.eup %8827  ;;  %1216 = vmatmul.mubr.f32.gmra.mxu0 %v1089_v48  ;;  %v845_v44 = vpop.xlane.xlu0 %844  ;;  %v1090_v63 = vadd.f32 %v1074_v56, %v1036_v50  ;;  %v1053_v26 = vmul.f32 %v1021_v57, %v10015_v2 }
 0x162   : > { %v910_v28 = vpop.xlane.xlu1 %909  ;;  %v988_v3 = vadd.f32 1e-05, %v972_v58  ;;  %v957_v8 = vsub.f32 %v925_v55, %v941_v59  ;;  %v10076_v62 = vmul.f32 0.0078125, %v845_v44  ;;  %1221 = vmatprep.mubr.f32.mxu0 %v14122_v22  ;;  %v1022_v10 = vmul.f32 %v8828_v27, %v9995_v23 }
 0x163   : > { %v926_v7 = vmul.f32 0.0078125, %v910_v28  ;;  %8020 = vmatmul.mubr.f32.gmra.mxu1 %v1090_v63  ;;  %v1075_v9 = vsub.f32 %v10005_v46, %v1053_v26  ;;  %v1100_v59 = vlaneseq }
 0x164   : > { %8835 = vrsqrt.f32 %v988_v3  ;;  %v973_v11 = vmax.f32 %v957_v8, 0.0  ;;  %v942_v1 = vmul.f32 %v10076_v62, %v10076_v62  ;;  %v1038_v14 = vmul.f32 %v1022_v10, %v9928_v40 }
 0x165   : > { %v8830_v34 = vpop.eup %8829  ;;  %1222 = vmatmul.mubr.f32.gmra.mxu0 %v1090_v63  ;;  %v1091_v2 = vadd.f32 %v1075_v9, %v1037_v0  ;;  %v1054_v17 = vmul.f32 %v1022_v10, %v10022_v24  ;;  %v10118_v27 = vshrl.u32 %v1100_v59, 7 }
 0x166   : > { %v989_v18 = vadd.f32 1e-05, %v973_v11  ;;  %v958_v20 = vsub.f32 %v926_v7, %v942_v1  ;;  %1227 = vmatprep.mubr.f32.mxu0 %v14122_v22  ;;  %v1023_v25 = vmul.f32 %v8830_v34, %v9995_v23 }
 0x167   : > { %8022 = vmatprep.mubr.f32.mxu1 %v1091_v2  ;;  %v1076_v30 = vsub.f32 %v10005_v46, %v1054_v17  ;;  %14251 = vst [vmem:[#allocation21_spill] sm:$0xff] %v10118_v27  ;;  %v14120_v59 = vsub.s32 2, %v10118_v27 }
 0x168   : > { %8837 = vrsqrt.f32 %v989_v18  ;;  %v974_v13 = vmax.f32 %v958_v20, 0.0  ;;  %v1039_v12 = vmul.f32 %v1023_v25, %v9934_v47  ;;  %v1055_v31 = vmul.f32 %v1023_v25, %v10031_v42 }
 0x169   : > { %v8832_v32 = vpop.eup %8831  ;;  %1228 = vmatmul.mubr.f32.gmra.mxu0 %v1091_v2  ;;  %v1092_v40 = vadd.f32 %v1076_v30, %v1038_v14 }
 0x16a   : > { %v990_v33 = vadd.f32 1e-05, %v974_v13  ;;  %1233 = vmatprep.mubr.f32.mxu0 %v14122_v22  ;;  %v1077_v24 = vsub.f32 %v10005_v46, %v1055_v31  ;;  %v1024_v4 = vmul.f32 %v8832_v32, %v9995_v23 }
 0x16b   : > { %8023 = vmatmul.mubr.f32.gmra.mxu1 %v1092_v40 }
 0x16c   : > { %8839 = vrsqrt.f32 %v990_v33  ;;  %v1093_v43 = vadd.f32 %v1077_v24, %v1039_v12  ;;  %v1040_v35 = vmul.f32 %v1024_v4, %v9940_v53  ;;  %v1056_v37 = vmul.f32 %v1024_v4, %v10040_v61 }
 0x16d   : > { %v8834_v47 = vpop.eup %8833  ;;  %1234 = vmatmul.mubr.f32.gmra.mxu0 %v1092_v40 }
 0x16e   : > { %8025 = vmatprep.mubr.f32.mxu1 %v1093_v43  ;;  %1239 = vmatprep.mubr.f32.mxu0 %v14122_v22  ;;  %v1078_v42 = vsub.f32 %v10005_v46, %v1056_v37  ;;  %v1025_v38 = vmul.f32 %v8834_v47, %v9995_v23  ;;  %v14119_v37 = vsub.s32 1, %v10118_v27 }
 0x170   : > { %v1094_v39 = vadd.f32 %v1078_v42, %v1040_v35  ;;  %v1041_v41 = vmul.f32 %v1025_v38, %v9946_v60  ;;  %v1057_v45 = vmul.f32 %v1025_v38, %v10049_v16 }
 0x171   : > { %v8836_v19 = vpop.eup %8835  ;;  %1240 = vmatmul.mubr.f32.gmra.mxu0 %v1093_v43 }
 0x172   : > { %8026 = vmatmul.mubr.f32.gmra.mxu1 %v1094_v39  ;;  %1245 = vmatprep.mubr.f32.mxu0 %v14122_v22  ;;  %v1079_v53 = vsub.f32 %v10005_v46, %v1057_v45  ;;  %v1026_v61 = vmul.f32 %v8836_v19, %v9995_v23 }
 0x174   : > { %v1095_v29 = vadd.f32 %v1079_v53, %v1041_v41  ;;  %v1042_v48 = vmul.f32 %v1026_v61, %v9952_v5  ;;  %v1058_v49 = vmul.f32 %v1026_v61, %v10058_v36 }
 0x175   : > { %v8838_v50 = vpop.eup %8837  ;;  %1246 = vmatmul.mubr.f32.gmra.mxu0 %v1094_v39 }
 0x176   : > { %8028 = vmatprep.mubr.f32.mxu1 %v1095_v29  ;;  %1251 = vmatprep.mubr.f32.mxu0 %v14122_v22  ;;  %v1080_v60 = vsub.f32 %v10005_v46, %v1058_v49  ;;  %v1027_v16 = vmul.f32 %v8838_v50, %v9995_v23 }
 0x178   : > { %v1096_v51 = vadd.f32 %v1080_v60, %v1042_v48  ;;  %v1043_v6 = vmul.f32 %v1027_v16, %v9958_v15  ;;  %v1059_v52 = vmul.f32 %v1027_v16, %v10067_v54 }
 0x179   : > { %v8840_v55 = vpop.eup %8839  ;;  %1252 = vmatmul.mubr.f32.gmra.mxu0 %v1095_v29 }
 0x17a   : > { %8029 = vmatmul.mubr.f32.gmra.mxu1 %v1096_v51  ;;  %1257 = vmatprep.mubr.f32.mxu0 %v14122_v22  ;;  %v1081_v5 = vsub.f32 %v10005_v46, %v1059_v52  ;;  %v1028_v36 = vmul.f32 %v8840_v55, %v9995_v23  ;;  %v14121_v23 = vsub.s32 0, %v10118_v27 }
 0x17c   : > { %v1097_v56 = vadd.f32 %v1081_v5, %v1043_v6  ;;  %v1044_v57 = vmul.f32 %v1028_v36, %v9964_v21  ;;  %v1060_v58 = vmul.f32 %v1028_v36, %v10076_v62  ;;  %v10124_v21 = vld [vmem:[%s14100_s4] sm:$0x7] }
 0x17d   : > { %1258 = vmatmul.mubr.f32.gmra.mxu0 %v1096_v51  ;;  %v10196_v41 = vrot.slane %v10124_v21, %v14119_v37 }
 0x17e   : > { %8031 = vmatprep.mubr.f32.mxu1 %v1097_v56  ;;  %1263 = vmatprep.mubr.f32.mxu0 %v14122_v22  ;;  %v1082_v15 = vsub.f32 %v10005_v46, %v1060_v58  ;;  %v10129_v46 = vrot.slane %v10124_v21, %v14121_v23 }
 0x180   : > { %v1098_v54 = vadd.f32 %v1082_v15, %v1044_v57 }
 0x181   : > { %1264 = vmatmul.mubr.f32.gmra.mxu0 %v1097_v56 }
 0x182   : > { %8032 = vmatmul.mubr.f32.gmra.mxu1 %v1098_v54  ;;  %1269 = vmatprep.mubr.f32.mxu0 %v14122_v22 }
 0x185   : > { %1270 = vmatmul.mubr.f32.gmra.mxu0 %v1098_v54 }
 0x209   : > { %v1181_v44 = vpop.f32.mrf.mxu0 }
 0x20a   : > { %v10132_v63 = vadd.f32 %v1181_v44, %v10129_v46  ;;  %v10153_v1 = vpop.f32.mrf.mxu1 }
 0x20b   : > { %v10134_v28 = vpop.f32.mrf.mxu0 }
 0x20c   : > { %14252 = vst [vmem:[#allocation22_spill] sm:$0xff] %v10132_v63  ;;  %8066 = vmatprep.mubr.msk.f32.mxu0 %vm1421_vm0, %v10132_v63  ;;  %v10160_v17 = vpop.f32.mrf.mxu1 }
 0x20d   : > { %v1187_v0 = vpop.f32.mrf.mxu0 }
 0x20e   : > { %v10139_v26 = vadd.f32 %v1187_v0, %v10129_v46 }
 0x20f   : > { %v10141_v3 = vpop.f32.mrf.mxu0 }
 0x210   : > { %14253 = vst [vmem:[#allocation23_spill] sm:$0xff] %v10139_v26 }
 0x211   : > { %v1193_v8 = vpop.f32.mrf.mxu0 }
 0x212   : > { %v10144_v62 = vadd.f32 %v1193_v8, %v10129_v46 }
 0x213   : > { %v10146_v7 = vpop.f32.mrf.mxu0  ;;  %v10162_v20 = vpop.f32.mrf.mxu1 }
 0x214   : > { %14254 = vst [vmem:[#allocation24_spill] sm:$0xff] %v10144_v62 }
 0x215   : > { %v1199_v9 = vpop.f32.mrf.mxu0  ;;  %v10169_v12 = vpop.f32.mrf.mxu1 }
 0x216   : > { %v10149_v10 = vadd.f32 %v1199_v9, %v10129_v46 }
 0x217   : > { %v10151_v11 = vpop.f32.mrf.mxu0 }
 0x218   : > { %14255 = vst [vmem:[#allocation25_spill] sm:$0xff] %v10149_v10 }
 0x219   : > { %v1205_v34 = vpop.f32.mrf.mxu0 }
 0x21a   : > { %v10156_v2 = vadd.f32 %v1205_v34, %v10129_v46 }
 0x21b   : > { %v10158_v14 = vpop.f32.mrf.mxu0  ;;  %v10176_v40 = vpop.f32.mrf.mxu1 }
 0x21c   : > { %14256 = vst [vmem:[#allocation26_spill] sm:$0xff] %v10156_v2 }
 0x21d   : > { %v1211_v18 = vpop.f32.mrf.mxu0  ;;  %v10183_v43 = vpop.f32.mrf.mxu1 }
 0x21e   : > { %v10165_v25 = vadd.f32 %v1211_v18, %v10129_v46  ;;  %v10244_v18 = vrot.slane %v10124_v21, %v14120_v59 }
 0x21f   : > { %v10167_v30 = vpop.f32.mrf.mxu0 }
 0x220   : > { %14257 = vst [vmem:[#allocation27_spill] sm:$0xff] %v10165_v25 }
 0x221   : > { %v1217_v13 = vpop.f32.mrf.mxu0 }
 0x222   : > { %v10172_v31 = vadd.f32 %v1217_v13, %v10129_v46 }
 0x223   : > { %v10174_v32 = vpop.f32.mrf.mxu0  ;;  %v10186_v47 = vpop.f32.mrf.mxu1 }
 0x224   : > { %14258 = vst [vmem:[#allocation28_spill] sm:$0xff] %v10172_v31 }
 0x225   : > { %v1223_v33 = vpop.f32.mrf.mxu0  ;;  %v10198_v45 = vpop.f32.mrf.mxu1 }
 0x226   : > { %v10179_v24 = vadd.f32 %v1223_v33, %v10129_v46 }
 0x227   : > { %v10181_v4 = vpop.f32.mrf.mxu0 }
 0x228   : > { %14259 = vst [vmem:[#allocation29_spill] sm:$0xff] %v10179_v24 }
 0x229   : > { %v1229_v35 = vpop.f32.mrf.mxu0 }
 0x22a   : > { %v10189_v42 = vadd.f32 %v1229_v35, %v10129_v46 }
 0x22b   : > { %v10191_v38 = vpop.f32.mrf.mxu0  ;;  %v10203_v61 = vpop.f32.mrf.mxu1 }
 0x22c   : > { %14260 = vst [vmem:[#allocation30_spill] sm:$0xff] %v10189_v42 }
 0x22d   : > { %v1235_v39 = vpop.f32.mrf.mxu0  ;;  %v1382_v60 = vpop.f32.mrf.mxu1 }
 0x22e   : > { %v10201_v19 = vadd.f32 %v1235_v39, %v10129_v46 }
 0x22f   : > { %v1237_v53 = vpop.f32.mrf.mxu0 }
 0x230   : > { %14261 = vst [vmem:[#allocation31_spill] sm:$0xff] %v10201_v19  ;;  %v10206_v29 = vadd.f32 %v1237_v53, %v10196_v41 }
 0x231   : > { %v1241_v48 = vpop.f32.mrf.mxu0 }
 0x232   : > { %v10209_v49 = vadd.f32 %v1241_v48, %v10129_v46  ;;  %2002 = vrot.lane.b32.xlu0 %v10206_v29, %s9580_s25  ;;  %v8027_v6 = vpop.f32.mrf.mxu1 }
 0x233   : > { %v1243_v50 = vpop.f32.mrf.mxu0 }
 0x234   : > { %14262 = vst [vmem:[#allocation32_spill] sm:$0xff] %v10209_v49  ;;  %v10214_v16 = vadd.f32 %v1243_v50, %v10196_v41  ;;  %v1392_v56 = vpop.f32.mrf.mxu1 }
 0x235   : > { %v1247_v51 = vpop.f32.mrf.mxu0 }
 0x236   : > { %14263 = vst [vmem:[#allocation33_spill] sm:$0xff] %v10214_v16  ;;  %v10217_v52 = vadd.f32 %v1247_v51, %v10129_v46  ;;  %2004 = vrot.lane.b32.xlu1 %v10214_v16, %s9580_s25 }
 0x237   : > { %v1249_v55 = vpop.f32.mrf.mxu0 }
 0x238   : > { %14264 = vst [vmem:[#allocation34_spill] sm:$0xff] %v10217_v52  ;;  %v10222_v5 = vadd.f32 %v1249_v55, %v10196_v41 }
 0x239   : > { %v1253_v36 = vpop.f32.mrf.mxu0 }
 0x23a   : > { %v10225_v57 = vadd.f32 %v1253_v36, %v10129_v46  ;;  %2006 = vrot.lane.b32.xlu0 %v10222_v5, %s9580_s25  ;;  %v8030_v54 = vpop.f32.mrf.mxu1 }
 0x23b   : > { %v1255_v58 = vpop.f32.mrf.mxu0  ;;  %v10268_v36 = vadd.f32 %v8030_v54, %v10244_v18  ;;  %v10287_v54 = vadd.f32 %v8027_v6, %v10244_v18  ;;  %v10302_v6 = vadd.f32 %v10203_v61, %v10244_v18  ;;  %v10317_v61 = vadd.f32 %v10186_v47, %v10244_v18 }
 0x23c   : > { %14265 = vst [vmem:[#allocation35_spill] sm:$0xff] %v10225_v57  ;;  %v10230_v15 = vadd.f32 %v1255_v58, %v10196_v41  ;;  %v1402_v9 = vpop.f32.mrf.mxu1  ;;  %v10333_v47 = vadd.f32 %v10176_v40, %v10244_v18  ;;  %v10349_v40 = vadd.f32 %v10162_v20, %v10244_v18  ;;  %v10365_v20 = vadd.f32 %v10153_v1, %v10244_v18 }
 0x23d   : > { %v1259_v44 = vpop.f32.mrf.mxu0  ;;  %14270 = vst [vmem:[#allocation40_spill] sm:$0xff] %v10268_v36  ;;  %14271 = vst [vmem:[#allocation41_spill] sm:$0xff] %v10287_v54  ;;  %v10389_v1 = vadd.f32 %v10181_v4, %v10196_v41  ;;  %v10405_v4 = vadd.f32 %v10167_v30, %v10196_v41  ;;  %v10421_v30 = vadd.f32 %v10151_v11, %v10196_v41 }
 0x23e   : > { %v10234_v0 = vadd.f32 %v1259_v44, %v10129_v46  ;;  %2008 = vrot.lane.b32.xlu1 %v10230_v15, %s9580_s25  ;;  %v10437_v11 = vadd.f32 %v10141_v3, %v10196_v41 }
 0x23f   : > { %v1261_v8 = vpop.f32.mrf.mxu0 }
 0x240   : > { %14266 = vst [vmem:[#allocation36_spill] sm:$0xff] %v10234_v0  ;;  %v10239_v34 = vadd.f32 %v1261_v8, %v10196_v41  ;;  %v10294_v8 = vadd.f32 %v1392_v56, %v10244_v18  ;;  %v10309_v56 = vadd.f32 %v1382_v60, %v10244_v18  ;;  %v10325_v60 = vadd.f32 %v10198_v45, %v10244_v18 }
 0x241   : > { %v1265_v13 = vpop.f32.mrf.mxu0  ;;  %v10341_v45 = vadd.f32 %v10183_v43, %v10244_v18  ;;  %v10357_v43 = vadd.f32 %v10169_v12, %v10244_v18  ;;  %v10373_v12 = vadd.f32 %v10160_v17, %v10244_v18  ;;  %v10397_v17 = vadd.f32 %v10174_v32, %v10196_v41  ;;  %14275 = vst [vmem:[#allocation45_spill] sm:$0xff] %v10437_v11 }
 0x242   : > { %v10247_v33 = vadd.f32 %v1265_v13, %v10129_v46  ;;  %2010 = vrot.lane.b32.xlu0 %v10239_v34, %s9580_s25  ;;  %v8033_v35 = vpop.f32.mrf.mxu1  ;;  %v10413_v32 = vadd.f32 %v10158_v14, %v10196_v41  ;;  %v10429_v14 = vadd.f32 %v10146_v7, %v10196_v41  ;;  %v10445_v7 = vadd.f32 %v10134_v28, %v10196_v41 }
 0x243   : > { %v1267_v39 = vpop.f32.mrf.mxu0  ;;  %v10252_v53 = vadd.f32 %v8033_v35, %v10244_v18  ;;  %14273 = vst [vmem:[#allocation43_spill] sm:$0xff] %v10397_v17 }
 0x244   : > { %14267 = vst [vmem:[#allocation37_spill] sm:$0xff] %v10247_v33  ;;  %v10255_v48 = vadd.f32 %v1267_v39, %v10196_v41  ;;  %v1412_v50 = vpop.f32.mrf.mxu1  ;;  %14274 = vst [vmem:[#allocation44_spill] sm:$0xff] %v10429_v14 }
 0x245   : > { %14268 = vst [vmem:[#allocation38_spill] sm:$0xff] %v10252_v53  ;;  %v1271_v51 = vpop.f32.mrf.mxu0  ;;  %v10258_v21 = vadd.f32 %v1412_v50, %v10244_v18  ;;  %8090 = vmatprep.subr.mxu1 %v10252_v53  ;;  %14276 = vst [vmem:[#allocation46_spill] sm:$0xff] %v10445_v7 }
 0x246   : > { %v10262_v55 = vadd.f32 %v1271_v51, %v10129_v46  ;;  %2012 = vrot.lane.b32.xlu1 %v10255_v48, %s9580_s25  ;;  %8091 = vmatpush3.msra.mxu1 %v10252_v53  ;;  %v10277_v46 = vadd.f32 %v1402_v9, %v10244_v18  ;;  %v10377_v9 = vadd.f32 %v10191_v38, %v10196_v41 }
 0x247   : > { %v1273_v58 = vpop.f32.mrf.mxu0  ;;  %8092 = vmatprep.subr.mxu1 %v10258_v21 }
 0x248   : > { %14269 = vst [vmem:[#allocation39_spill] sm:$0xff] %v10262_v55  ;;  %v10272_v44 = vadd.f32 %v1273_v58, %v10196_v41  ;;  %8093 = vmatpush3.msra.mxu1 %v10258_v21  ;;  %14272 = vst [vmem:[#allocation42_spill] sm:$0xff] %v10377_v9 }
 0x249   : > { %8094 = vmatprep.subr.mxu1 %v10268_v36 }
 0x24a   : > { %2014 = vrot.lane.b32.xlu0 %v10272_v44, %s9580_s25  ;;  %8034 = vmatprep.subr.msk.mxu0 %vm1421_vm0, %v10272_v44 }
 0x24b   : > { %8035 = vmatpush3.xpose.msk.msra.mxu0 %vm1421_vm0, %v10272_v44  ;;  %8095 = vmatpush3.msra.mxu1 %v10268_v36 }
 0x24c   : > { %8036 = vmatprep.subr.msk.mxu0 %vm1421_vm0, %v10255_v48  ;;  %8096 = vmatprep.subr.mxu1 %v10277_v46 }
 0x24d   : > { %8097 = vmatpush3.msra.mxu1 %v10277_v46 }
 0x24e   : > { %8098 = vmatprep.subr.mxu1 %v10287_v54 }
 0x24f   : > { %8037 = vmatpush3.xpose.msk.msra.mxu0 %vm1421_vm0, %v10255_v48  ;;  %8099 = vmatpush3.msra.mxu1 %v10287_v54 }
 0x250   : > { %8038 = vmatprep.subr.msk.mxu0 %vm1421_vm0, %v10239_v34  ;;  %8100 = vmatprep.subr.mxu1 %v10294_v8 }
 0x251   : > { %8101 = vmatpush3.msra.mxu1 %v10294_v8 }
 0x252   : > { %8102 = vmatprep.subr.mxu1 %v10302_v6 }
 0x253   : > { %8039 = vmatpush3.xpose.msk.msra.mxu0 %vm1421_vm0, %v10239_v34  ;;  %8103 = vmatpush3.msra.mxu1 %v10302_v6 }
 0x254   : > { %8040 = vmatprep.subr.msk.mxu0 %vm1421_vm0, %v10230_v15  ;;  %8104 = vmatprep.subr.mxu1 %v10309_v56 }
 0x255   : > { %8105 = vmatpush3.msra.mxu1 %v10309_v56 }
 0x256   : > { %8106 = vmatprep.subr.mxu1 %v10317_v61 }
 0x257   : > { %8041 = vmatpush3.xpose.msk.msra.mxu0 %vm1421_vm0, %v10230_v15  ;;  %8107 = vmatpush3.msra.mxu1 %v10317_v61 }
 0x258   : > { %8042 = vmatprep.subr.msk.mxu0 %vm1421_vm0, %v10222_v5  ;;  %8108 = vmatprep.subr.mxu1 %v10325_v60 }
 0x259   : > { %8109 = vmatpush3.msra.mxu1 %v10325_v60 }
 0x25a   : > { %8110 = vmatprep.subr.mxu1 %v10333_v47 }
 0x25b   : > { %8043 = vmatpush3.xpose.msk.msra.mxu0 %vm1421_vm0, %v10222_v5  ;;  %8111 = vmatpush3.msra.mxu1 %v10333_v47 }
 0x25c   : > { %8044 = vmatprep.subr.msk.mxu0 %vm1421_vm0, %v10214_v16  ;;  %8112 = vmatprep.subr.mxu1 %v10341_v45 }
 0x25d   : > { %8113 = vmatpush3.msra.mxu1 %v10341_v45 }
 0x25e   : > { %8114 = vmatprep.subr.mxu1 %v10349_v40 }
 0x25f   : > { %8045 = vmatpush3.xpose.msk.msra.mxu0 %vm1421_vm0, %v10214_v16  ;;  %8115 = vmatpush3.msra.mxu1 %v10349_v40 }
 0x260   : > { %8046 = vmatprep.subr.msk.mxu0 %vm1421_vm0, %v10206_v29  ;;  %8116 = vmatprep.subr.mxu1 %v10357_v43 }
 0x261   : > { %8117 = vmatpush3.msra.mxu1 %v10357_v43 }
 0x262   : > { %8118 = vmatprep.subr.mxu1 %v10365_v20 }
 0x263   : > { %8047 = vmatpush3.xpose.msk.msra.mxu0 %vm1421_vm0, %v10206_v29  ;;  %8119 = vmatpush3.msra.mxu1 %v10365_v20 }
 0x264   : > { %8048 = vmatprep.subr.msk.mxu0 %vm1421_vm0, %v10377_v9  ;;  %8120 = vmatprep.subr.mxu1 %v10373_v12 }
 0x265   : > { %8121 = vmatpush3.msra.mxu1 %v10373_v12 }
 0x267   : > { %8049 = vmatpush3.xpose.msk.msra.mxu0 %vm1421_vm0, %v10377_v9 }
 0x268   : > { %8050 = vmatprep.subr.msk.mxu0 %vm1421_vm0, %v10389_v1 }
 0x26b   : > { %8051 = vmatpush3.xpose.msk.msra.mxu0 %vm1421_vm0, %v10389_v1 }
 0x26c   : > { %8052 = vmatprep.subr.msk.mxu0 %vm1421_vm0, %v10397_v17 }
 0x26f   : > { %8053 = vmatpush3.xpose.msk.msra.mxu0 %vm1421_vm0, %v10397_v17 }
 0x270   : > { %8054 = vmatprep.subr.msk.mxu0 %vm1421_vm0, %v10405_v4 }
 0x273   : > { %8055 = vmatpush3.xpose.msk.msra.mxu0 %vm1421_vm0, %v10405_v4 }
 0x274   : > { %8056 = vmatprep.subr.msk.mxu0 %vm1421_vm0, %v10413_v32 }
 0x277   : > { %8057 = vmatpush3.xpose.msk.msra.mxu0 %vm1421_vm0, %v10413_v32 }
 0x278   : > { %8058 = vmatprep.subr.msk.mxu0 %vm1421_vm0, %v10421_v30 }
 0x27b   : > { %8059 = vmatpush3.xpose.msk.msra.mxu0 %vm1421_vm0, %v10421_v30 }
 0x27c   : > { %8060 = vmatprep.subr.msk.mxu0 %vm1421_vm0, %v10429_v14 }
 0x27f   : > { %8061 = vmatpush3.xpose.msk.msra.mxu0 %vm1421_vm0, %v10429_v14 }
 0x280   : > { %8062 = vmatprep.subr.msk.mxu0 %vm1421_vm0, %v10437_v11 }
 0x283   : > { %8063 = vmatpush3.xpose.msk.msra.mxu0 %vm1421_vm0, %v10437_v11 }
 0x284   : > { %8064 = vmatprep.subr.msk.mxu0 %vm1421_vm0, %v10445_v7 }
 0x287   : > { %8065 = vmatpush3.xpose.msk.msra.mxu0 %vm1421_vm0, %v10445_v7 }
 0x28a   : > { %8067 = vmatmul.mubr.msk.f32.vlgmr.msra.gmra.mxu0 %vm1421_vm0, %v10139_v26 }
 0x28b   : > { %8069 = vmatprep.mubr.msk.f32.mxu0 %vm1421_vm0, %v10144_v62 }
 0x28e   : > { %8070 = vmatmul.mubr.msk.f32.gmra.mxu0 %vm1421_vm0, %v10149_v10 }
 0x28f   : > { %8072 = vmatprep.mubr.msk.f32.mxu0 %vm1421_vm0, %v10156_v2 }
 0x292   : > { %8073 = vmatmul.mubr.msk.f32.gmra.mxu0 %vm1421_vm0, %v10165_v25 }
 0x293   : > { %8075 = vmatprep.mubr.msk.f32.mxu0 %vm1421_vm0, %v10172_v31 }
 0x296   : > { %8076 = vmatmul.mubr.msk.f32.gmra.mxu0 %vm1421_vm0, %v10179_v24 }
 0x297   : > { %8078 = vmatprep.mubr.msk.f32.mxu0 %vm1421_vm0, %v10189_v42 }
 0x29a   : > { %8079 = vmatmul.mubr.msk.f32.gmra.mxu0 %vm1421_vm0, %v10201_v19 }
 0x29b   : > { %8081 = vmatprep.mubr.msk.f32.mxu0 %vm1421_vm0, %v10209_v49 }
 0x29e   : > { %8082 = vmatmul.mubr.msk.f32.gmra.mxu0 %vm1421_vm0, %v10217_v52 }
 0x29f   : > { %8084 = vmatprep.mubr.msk.f32.mxu0 %vm1421_vm0, %v10225_v57 }
 0x2a2   : > { %8085 = vmatmul.mubr.msk.f32.gmra.mxu0 %vm1421_vm0, %v10234_v0 }
 0x2a3   : > { %8087 = vmatprep.mubr.msk.f32.mxu0 %vm1421_vm0, %v10247_v33 }
 0x2a4   : > { %v10483_v28 = vpop.permute.xlu0 %2002 }
 0x2a6   : > { %8088 = vmatmul.mubr.msk.f32.gmra.mxu0 %vm1421_vm0, %v10262_v55 }
 0x2ac   : > { %v10485_v3 = vpop.permute.xlu0 %2006 }
 0x2b4   : > { %v10487_v38 = vpop.permute.xlu0 %2010 }
 0x2bc   : > { %v10489_v41 = vpop.permute.xlu0 %2014 }
 0x2bd   : > { %8146 = vmatprep.subr.msk.mxu1 %vm1421_vm0, %v10489_v41 }
 0x34a   : > { %v8068_v18 = vpop.f32.mrf.mxu0 }
 0x34b   : > { %1665 = vmax.xlane.f32.xlu1 %v8068_v18 }
 0x34c   : > { %v1584_v13 = vpop.f32.mrf.mxu0 }
 0x34d   : > { %1663 = vmax.xlane.f32.xlu0 %v1584_v13 }
 0x34e   : > { %v10495_v35 = vpop.f32.mrf.mxu0 }
 0x350   : > { %v10499_v39 = vpop.f32.mrf.mxu0 }
 0x352   : > { %v10505_v50 = vpop.f32.mrf.mxu0 }
 0x354   : > { %v10509_v51 = vpop.f32.mrf.mxu0 }
 0x356   : > { %v10511_v58 = vpop.f32.mrf.mxu0 }
 0x358   : > { %v10513_v37 = vpop.f32.mrf.mxu0 }
 0x35a   : > { %v10515_v59 = vpop.f32.mrf.mxu0 }
 0x35c   : > { %1998 = vrot.lane.b32.xlu1 %v10389_v1, %s9580_s25  ;;  %v10517_v23 = vpop.f32.mrf.mxu0 }
 0x35e   : > { %v10519_v22 = vpop.f32.mrf.mxu0 }
 0x360   : > { %1996 = vrot.lane.b32.xlu1 %v10397_v17, %s9580_s25  ;;  %v10521_v27 = vpop.f32.mrf.mxu0 }
 0x362   : > { %v10524_v17 = vpop.f32.mrf.mxu0 }
 0x363   : > { %2000 = vrot.lane.b32.xlu0 %v10377_v9, %s9580_s25 }
 0x364   : > { %1994 = vrot.lane.b32.xlu1 %v10405_v4, %s9580_s25  ;;  %v10527_v9 = vpop.f32.mrf.mxu0 }
 0x366   : > { %v10531_v16 = vpop.f32.mrf.mxu0 }
 0x368   : > { %1992 = vrot.lane.b32.xlu1 %v10413_v32, %s9580_s25 }
 0x382   : > { %1669 = vmax.xlane.f32.xlu0 %v10495_v35 }
 0x386   : > { %1675 = vmax.xlane.f32.xlu0 %v10513_v37 }
 0x38a   : > { %1683 = vmax.xlane.f32.xlu0 %v10521_v27 }
 0x38c   : > { %1667 = vmax.xlane.f32.xlu1 %v10499_v39 }
 0x38e   : > { %1693 = vmax.xlane.f32.xlu0 %v10531_v16 }
 0x390   : > { %1673 = vmax.xlane.f32.xlu1 %v10505_v50 }
 0x394   : > { %1671 = vmax.xlane.f32.xlu1 %v10509_v51 }
 0x398   : > { %1677 = vmax.xlane.f32.xlu1 %v10511_v58 }
 0x39c   : > { %1681 = vmax.xlane.f32.xlu1 %v10515_v59 }
 0x3a0   : > { %1679 = vmax.xlane.f32.xlu1 %v10517_v23 }
 0x3a4   : > { %1685 = vmax.xlane.f32.xlu1 %v10519_v22  ;;  %1990 = vrot.lane.b32.xlu0 %v10421_v30, %s9580_s25 }
 0x3a8   : > { %1689 = vmax.xlane.f32.xlu1 %v10524_v17  ;;  %1958 = vrot.lane.b32.xlu0 %v10149_v10, %s9580_s25 }
 0x3ac   : > { %1687 = vmax.xlane.f32.xlu1 %v10527_v9  ;;  %1962 = vrot.lane.b32.xlu0 %v10165_v25, %s9580_s25 }
 0x3b0   : > { %1966 = vrot.lane.b32.xlu0 %v10179_v24, %s9580_s25 }
 0x3b4   : > { %1970 = vrot.lane.b32.xlu0 %v10201_v19, %s9580_s25  ;;  %v2005_v19 = vpop.permute.xlu1 %2004 }
 0x3b8   : > { %1974 = vrot.lane.b32.xlu0 %v10217_v52, %s9580_s25 }
 0x3bc   : > { %1978 = vrot.lane.b32.xlu0 %v10234_v0, %s9580_s25  ;;  %v2009_v0 = vpop.permute.xlu1 %2008 }
 0x3bd   : > { %1988 = vrot.lane.b32.xlu1 %v10429_v14, %s9580_s25 }
 0x3c0   : > { %1982 = vrot.lane.b32.xlu0 %v10262_v55, %s9580_s25  ;;  %v2013_v55 = vpop.permute.xlu1 %2012 }
 0x3c1   : > { %1986 = vrot.lane.b32.xlu1 %v10437_v11, %s9580_s25 }
 0x3c4   : > { %2379 = vrot.lane.b32.xlu0 %v10268_v36, %s9580_s25 }
 0x3c5   : > { %1984 = vrot.lane.b32.xlu1 %v10445_v7, %s9580_s25 }
 0x3c8   : > { %2375 = vrot.lane.b32.xlu0 %v10287_v54, %s9580_s25 }
 0x3c9   : > { %1952 = vrot.lane.b32.xlu1 %v10132_v63, %s9580_s25 }
 0x3cc   : > { %2373 = vrot.lane.b32.xlu0 %v10294_v8, %s9580_s25 }
 0x3d0   : > { %2369 = vrot.lane.b32.xlu0 %v10309_v56, %s9580_s25 }
 0x3d4   : > { %v1666_v52 = vpop.xlane.xlu1 %1665  ;;  %2365 = vrot.lane.b32.xlu0 %v10325_v60, %s9580_s25 }
 0x3d5   : > { %v1696_v36 = vsub.f32 %v8068_v18, %v1666_v52 }
 0x3d6   : > { %v1664_v24 = vpop.xlane.xlu0 %1663 }
 0x3d7   : > { %v1695_v25 = vsub.f32 %v1584_v13, %v1664_v24  ;;  %v1713_v10 = vmul.f32 1.442695, %v1696_v36 }
 0x3d8   : > { %2361 = vrot.lane.b32.xlu0 %v10341_v45, %s9580_s25 }
 0x3d9   : > { %v1711_v54 = vmul.f32 1.442695, %v1695_v25  ;;  %v1999_v25 = vpop.permute.xlu1 %1998 }
 0x3db   : > { %8841 = vpow2.f32 %v1711_v54 }
 0x3dc   : > { %8843 = vpow2.f32 %v1713_v10  ;;  %2357 = vrot.lane.b32.xlu0 %v10357_v43, %s9580_s25  ;;  %v10594_v10 = vpop.f32.mrf.mxu0 }
 0x3e0   : > { %2353 = vrot.lane.b32.xlu0 %v10373_v12, %s9580_s25 }
 0x3e4   : > { %2638 = vrot.lane.b32.xlu0 %v10255_v48, %s9581_s15 }
 0x3e8   : > { %v10584_v52 = vpop.eup %8841  ;;  %2636 = vrot.lane.b32.xlu0 %v10239_v34, %s9581_s15 }
 0x3e9   : > { %14277 = vst [vmem:[#allocation47_spill] sm:$0xff] %v10584_v52  ;;  %v10588_v24 = vpop.eup %8843  ;;  %8122 = vmatprep.mubr.f32.mxu1 %v10584_v52  ;;  %v14314_v52 = vld [vmem:[#allocation27_spill] sm:$0xff] }
 0x3ea   : > { %14278 = vst [vmem:[#allocation48_spill] sm:$0xff] %v10588_v24  ;;  %8123 = vmatmul.mubr.f32.vlgmr.msra.gmra.mxu1 %v10588_v24 }
 0x3eb   : > { %8147 = vmatpush3.xpose.msk.msra.mxu1 %vm1421_vm0, %v10489_v41 }
 0x3ec   : > { %8148 = vmatprep.subr.msk.mxu1 %vm1421_vm0, %v2013_v55  ;;  %2632 = vrot.lane.b32.xlu0 %v10222_v5, %s9581_s15 }
 0x3ed   : > { %1691 = vmax.xlane.f32.xlu1 %v10594_v10 }
 0x3ef   : > { %8149 = vmatpush3.xpose.msk.msra.mxu1 %vm1421_vm0, %v2013_v55  ;;  %v1997_v55 = vpop.permute.xlu1 %1996 }
 0x3f0   : > { %8150 = vmatprep.subr.msk.mxu1 %vm1421_vm0, %v10487_v38  ;;  %2628 = vrot.lane.b32.xlu0 %v10206_v29, %s9581_s15 }
 0x3f3   : > { %8151 = vmatpush3.xpose.msk.msra.mxu1 %vm1421_vm0, %v10487_v38 }
 0x3f4   : > { %8152 = vmatprep.subr.msk.mxu1 %vm1421_vm0, %v2009_v0  ;;  %2624 = vrot.lane.b32.xlu0 %v10389_v1, %s9581_s15 }
 0x3f7   : > { %8153 = vmatpush3.xpose.msk.msra.mxu1 %vm1421_vm0, %v2009_v0  ;;  %v2001_v0 = vpop.permute.xlu0 %2000 }
 0x3f8   : > { %8154 = vmatprep.subr.msk.mxu1 %vm1421_vm0, %v10485_v3  ;;  %2620 = vrot.lane.b32.xlu0 %v10405_v4, %s9581_s15 }
 0x3fb   : > { %8155 = vmatpush3.xpose.msk.msra.mxu1 %vm1421_vm0, %v10485_v3 }
 0x3fc   : > { %8156 = vmatprep.subr.msk.mxu1 %vm1421_vm0, %v2005_v19  ;;  %2618 = vrot.lane.b32.xlu0 %v10413_v32, %s9581_s15 }
 0x3fe   : > { %1954 = vrot.lane.b32.xlu1 %v10139_v26, %s9580_s25 }
 0x3ff   : > { %8157 = vmatpush3.xpose.msk.msra.mxu1 %vm1421_vm0, %v2005_v19  ;;  %v1995_v19 = vpop.permute.xlu1 %1994 }
 0x400   : > { %8158 = vmatprep.subr.msk.mxu1 %vm1421_vm0, %v10483_v28  ;;  %2616 = vrot.lane.b32.xlu0 %v10421_v30, %s9581_s15 }
 0x402   : > { %1956 = vrot.lane.b32.xlu1 %v10144_v62, %s9580_s25 }
 0x403   : > { %8159 = vmatpush3.xpose.msk.msra.mxu1 %vm1421_vm0, %v10483_v28  ;;  %v1993_v28 = vpop.permute.xlu1 %1992 }
 0x404   : > { %8160 = vmatprep.subr.msk.mxu1 %vm1421_vm0, %v2001_v0 }
 0x406   : > { %1960 = vrot.lane.b32.xlu1 %v10156_v2, %s9580_s25 }
 0x407   : > { %8161 = vmatpush3.xpose.msk.msra.mxu1 %vm1421_vm0, %v2001_v0 }
 0x408   : > { %8162 = vmatprep.subr.msk.mxu1 %vm1421_vm0, %v1999_v25 }
 0x40a   : > { %1964 = vrot.lane.b32.xlu1 %v10172_v31, %s9580_s25 }
 0x40b   : > { %8163 = vmatpush3.xpose.msk.msra.mxu1 %vm1421_vm0, %v1999_v25  ;;  %v1670_v36 = vpop.xlane.xlu0 %1669 }
 0x40c   : > { %8164 = vmatprep.subr.msk.mxu1 %vm1421_vm0, %v1997_v55  ;;  %v1698_v3 = vsub.f32 %v10495_v35, %v1670_v36 }
 0x40e   : > { %1968 = vrot.lane.b32.xlu1 %v10189_v42, %s9580_s25  ;;  %v1717_v13 = vmul.f32 1.442695, %v1698_v3 }
 0x40f   : > { %8165 = vmatpush3.xpose.msk.msra.mxu1 %vm1421_vm0, %v1997_v55  ;;  %v1676_v54 = vpop.xlane.xlu0 %1675 }
 0x410   : > { %8166 = vmatprep.subr.msk.mxu1 %vm1421_vm0, %v1995_v19 }
 0x412   : > { %1972 = vrot.lane.b32.xlu1 %v10209_v49, %s9580_s25 }
 0x413   : > { %8167 = vmatpush3.xpose.msk.msra.mxu1 %vm1421_vm0, %v1995_v19  ;;  %v1684_v38 = vpop.xlane.xlu0 %1683 }
 0x414   : > { %8168 = vmatprep.subr.msk.mxu1 %vm1421_vm0, %v1993_v28 }
 0x415   : > { %v1668_v41 = vpop.xlane.xlu1 %1667 }
 0x416   : > { %v1697_v18 = vsub.f32 %v10499_v39, %v1668_v41  ;;  %1976 = vrot.lane.b32.xlu1 %v10225_v57, %s9580_s25  ;;  %v1701_v39 = vsub.f32 %v10513_v37, %v1676_v54 }
 0x417   : > { %8169 = vmatpush3.xpose.msk.msra.mxu1 %vm1421_vm0, %v1993_v28  ;;  %v10653_v25 = vpop.xlane.xlu0 %1693 }
 0x418   : > { %v1715_v0 = vmul.f32 1.442695, %v1697_v18  ;;  %v1723_v41 = vmul.f32 1.442695, %v1701_v39 }
 0x419   : > { %v1674_v55 = vpop.xlane.xlu1 %1673 }
 0x41a   : > { %8845 = vpow2.f32 %v1715_v0  ;;  %1980 = vrot.lane.b32.xlu1 %v10247_v33, %s9580_s25  ;;  %v1700_v35 = vsub.f32 %v10505_v50, %v1674_v55 }
 0x41b   : > { %8847 = vpow2.f32 %v1717_v13  ;;  %v1991_v19 = vpop.permute.xlu0 %1990 }
 0x41c   : > { %8170 = vmatprep.subr.msk.mxu1 %vm1421_vm0, %v1991_v19  ;;  %v1721_v3 = vmul.f32 1.442695, %v1700_v35  ;;  %v1705_v35 = vsub.f32 %v10521_v27, %v1684_v38 }
 0x41d   : > { %v1672_v36 = vpop.xlane.xlu1 %1671  ;;  %8171 = vmatpush3.xpose.msk.msra.mxu1 %vm1421_vm0, %v1991_v19 }
 0x41e   : > { %v1699_v28 = vsub.f32 %v10509_v51, %v1672_v36  ;;  %2383 = vrot.lane.b32.xlu1 %v10252_v53, %s9580_s25  ;;  %v1731_v36 = vmul.f32 1.442695, %v1705_v35 }
 0x420   : > { %v1719_v18 = vmul.f32 1.442695, %v1699_v28 }
 0x421   : > { %v1678_v0 = vpop.xlane.xlu1 %1677 }
 0x422   : > { %8849 = vpow2.f32 %v1719_v18  ;;  %v1702_v50 = vsub.f32 %v10511_v58, %v1678_v0  ;;  %2381 = vrot.lane.b32.xlu1 %v10258_v21, %s9580_s25 }
 0x423   : > { %8851 = vpow2.f32 %v1721_v3 }
 0x424   : > { %8853 = vpow2.f32 %v1723_v41  ;;  %v1725_v37 = vmul.f32 1.442695, %v1702_v50 }
 0x425   : > { %v1682_v54 = vpop.xlane.xlu1 %1681 }
 0x426   : > { %8855 = vpow2.f32 %v1725_v37  ;;  %2377 = vrot.lane.b32.xlu1 %v10277_v46, %s9580_s25  ;;  %v1704_v13 = vsub.f32 %v10515_v59, %v1682_v54 }
 0x427   : > { %v10669_v51 = vpop.eup %8845 }
 0x428   : > { %14279 = vst [vmem:[#allocation49_spill] sm:$0xff] %v10669_v51  ;;  %v10672_v55 = vpop.eup %8847  ;;  %8125 = vmatprep.mubr.f32.mxu1 %v10669_v51  ;;  %v1729_v39 = vmul.f32 1.442695, %v1704_v13  ;;  %v14315_v51 = vld [vmem:[#allocation29_spill] sm:$0xff] }
 0x429   : > { %14280 = vst [vmem:[#allocation50_spill] sm:$0xff] %v10672_v55  ;;  %v1680_v58 = vpop.xlane.xlu1 %1679  ;;  %8126 = vmatmul.mubr.f32.gmra.mxu1 %v10672_v55 }
 0x42a   : > { %v1703_v19 = vsub.f32 %v10517_v23, %v1680_v58  ;;  %2371 = vrot.lane.b32.xlu1 %v10302_v6, %s9580_s25 }
 0x42c   : > { %v1727_v28 = vmul.f32 1.442695, %v1703_v19 }
 0x42d   : > { %v1686_v3 = vpop.xlane.xlu1 %1685 }
 0x42e   : > { %8857 = vpow2.f32 %v1727_v28  ;;  %v1706_v59 = vsub.f32 %v10519_v22, %v1686_v3  ;;  %2367 = vrot.lane.b32.xlu1 %v10317_v61, %s9580_s25  ;;  %v14289_v28 = vld [vmem:[#allocation33_spill] sm:$0xff] }
 0x42f   : > { %v10683_v27 = vpop.eup %8849  ;;  %8859 = vpow2.f32 %v1729_v39 }
 0x430   : > { %14281 = vst [vmem:[#allocation51_spill] sm:$0xff] %v10683_v27  ;;  %v10685_v38 = vpop.eup %8851  ;;  %8861 = vpow2.f32 %v1731_v36  ;;  %v1733_v23 = vmul.f32 1.442695, %v1706_v59  ;;  %8128 = vmatprep.mubr.f32.mxu1 %v10683_v27 }
 0x431   : > { %14282 = vst [vmem:[#allocation52_spill] sm:$0xff] %v10685_v38  ;;  %v10688_v41 = vpop.eup %8853  ;;  %v1690_v18 = vpop.xlane.xlu1 %1689  ;;  %8129 = vmatmul.mubr.f32.gmra.mxu1 %v10685_v38 }
 0x432   : > { %14283 = vst [vmem:[#allocation53_spill] sm:$0xff] %v10688_v41  ;;  %8863 = vpow2.f32 %v1733_v23  ;;  %2363 = vrot.lane.b32.xlu1 %v10333_v47, %s9580_s25  ;;  %8131 = vmatprep.mubr.f32.mxu1 %v10688_v41  ;;  %v1708_v0 = vsub.f32 %v10524_v17, %v1690_v18  ;;  %v14292_v23 = vld [vmem:[#allocation42_spill] sm:$0xff]  ;;  %v14293_v18 = vld [vmem:[#allocation43_spill] sm:$0xff] }
 0x433   : > { %v10694_v22 = vpop.eup %8855 }
 0x434   : > { %14284 = vst [vmem:[#allocation54_spill] sm:$0xff] %v10694_v22  ;;  %v1737_v54 = vmul.f32 1.442695, %v1708_v0  ;;  %v1959_v0 = vpop.permute.xlu0 %1958 }
 0x435   : > { %v1688_v50 = vpop.xlane.xlu1 %1687  ;;  %8132 = vmatmul.mubr.f32.gmra.mxu1 %v10694_v22 }
 0x436   : > { %v1707_v37 = vsub.f32 %v10527_v9, %v1688_v50  ;;  %2359 = vrot.lane.b32.xlu1 %v10349_v40, %s9580_s25 }
 0x438   : > { %v1735_v13 = vmul.f32 1.442695, %v1707_v37  ;;  %v1963_v50 = vpop.permute.xlu0 %1962 }
 0x439   : > { %v1989_v35 = vpop.permute.xlu1 %1988 }
 0x43a   : > { %8865 = vpow2.f32 %v1735_v13  ;;  %2355 = vrot.lane.b32.xlu1 %v10365_v20, %s9580_s25  ;;  %8172 = vmatprep.subr.msk.mxu1 %vm1421_vm0, %v1989_v35  ;;  %v1710_v13 = vsub.f32 %v10531_v16, %v10653_v25 }
 0x43b   : > { %v10704_v58 = vpop.eup %8857  ;;  %8867 = vpow2.f32 %v1737_v54  ;;  %8173 = vmatpush3.xpose.msk.msra.mxu1 %vm1421_vm0, %v1989_v35 }
 0x43c   : > { %14285 = vst [vmem:[#allocation55_spill] sm:$0xff] %v10704_v58  ;;  %v10707_v17 = vpop.eup %8859  ;;  %8134 = vmatprep.mubr.f32.mxu1 %v10704_v58  ;;  %v1967_v37 = vpop.permute.xlu0 %1966 }
 0x43d   : > { %14286 = vst [vmem:[#allocation56_spill] sm:$0xff] %v10707_v17  ;;  %v10710_v9 = vpop.eup %8861  ;;  %v1987_v19 = vpop.permute.xlu1 %1986  ;;  %8135 = vmatmul.mubr.f32.gmra.mxu1 %v10707_v17 }
 0x43e   : > { %14287 = vst [vmem:[#allocation57_spill] sm:$0xff] %v10710_v9  ;;  %2640 = vrot.lane.b32.xlu1 %v10272_v44, %s9581_s15  ;;  %8137 = vmatprep.mubr.f32.mxu1 %v10710_v9 }
 0x43f   : > { %v10716_v39 = vpop.eup %8863  ;;  %8174 = vmatprep.subr.msk.mxu1 %vm1421_vm0, %v1987_v19 }
 0x440   : > { %14288 = vst [vmem:[#allocation58_spill] sm:$0xff] %v10716_v39  ;;  %8175 = vmatpush3.xpose.msk.msra.mxu1 %vm1421_vm0, %v1987_v19 }
 0x441   : > { %v1985_v36 = vpop.permute.xlu1 %1984  ;;  %8138 = vmatmul.mubr.f32.gmra.mxu1 %v10716_v39 }
 0x442   : > { %2634 = vrot.lane.b32.xlu1 %v10230_v15, %s9581_s15  ;;  %8176 = vmatprep.subr.msk.mxu1 %vm1421_vm0, %v1985_v36 }
 0x444   : > { %8177 = vmatpush3.xpose.msk.msra.mxu1 %vm1421_vm0, %v1985_v36  ;;  %v1741_v36 = vmul.f32 1.442695, %v1710_v13 }
 0x445   : > { %v1953_v54 = vpop.permute.xlu1 %1952 }
 0x446   : > { %2630 = vrot.lane.b32.xlu1 %v14289_v28, %s9581_s15 }
 0x447   : > { %v10727_v3 = vpop.eup %8865 }
 0x448   : > { %14290 = vst [vmem:[#allocation33_spill] sm:$0xff] %v10727_v3  ;;  %v10729_v59 = vpop.eup %8867  ;;  %8140 = vmatprep.mubr.f32.mxu1 %v10727_v3  ;;  %v1971_v3 = vpop.permute.xlu0 %1970 }
 0x449   : > { %14291 = vst [vmem:[#allocation59_spill] sm:$0xff] %v10729_v59  ;;  %8141 = vmatmul.mubr.f32.gmra.mxu1 %v10729_v59 }
 0x44a   : > { %2626 = vrot.lane.b32.xlu1 %v14292_v23, %s9581_s15 }
 0x44c   : > { %v1975_v9 = vpop.permute.xlu0 %1974 }
 0x44e   : > { %2622 = vrot.lane.b32.xlu1 %v14293_v18, %s9581_s15 }
 0x450   : > { %v1979_v22 = vpop.permute.xlu0 %1978 }
 0x454   : > { %v1983_v16 = vpop.permute.xlu0 %1982 }
 0x476   : > { %v1692_v35 = vpop.xlane.xlu1 %1691 }
 0x477   : > { %v1709_v19 = vsub.f32 %v10594_v10, %v1692_v35 }
 0x479   : > { %v1739_v39 = vmul.f32 1.442695, %v1709_v19 }
 0x47a   : > { %v1955_v59 = vpop.permute.xlu1 %1954 }
 0x47b   : > { %8869 = vpow2.f32 %v1739_v39  ;;  %v2380_v39 = vpop.permute.xlu0 %2379 }
 0x47c   : > { %8871 = vpow2.f32 %v1741_v36 }
 0x47e   : > { %v1957_v58 = vpop.permute.xlu1 %1956 }
 0x47f   : > { %v2376_v35 = vpop.permute.xlu0 %2375 }
 0x482   : > { %v1961_v17 = vpop.permute.xlu1 %1960 }
 0x486   : > { %v1965_v38 = vpop.permute.xlu1 %1964 }
 0x488   : > { %v10740_v55 = vpop.eup %8869 }
 0x489   : > { %14294 = vst [vmem:[#allocation42_spill] sm:$0xff] %v10740_v55  ;;  %v10742_v41 = vpop.eup %8871  ;;  %8143 = vmatprep.mubr.f32.mxu1 %v10740_v55 }
 0x48a   : > { %14295 = vst [vmem:[#allocation43_spill] sm:$0xff] %v10742_v41  ;;  %v1969_v25 = vpop.permute.xlu1 %1968  ;;  %8144 = vmatmul.mubr.f32.gmra.mxu1 %v10742_v41 }
 0x48b   : > { %8178 = vmatprep.mubr.msk.f32.mxu1 %vm1421_vm0, %v1953_v54 }
 0x48e   : > { %v1973_v10 = vpop.permute.xlu1 %1972  ;;  %8179 = vmatmul.mubr.msk.f32.vlgmr.msra.gmra.mxu1 %vm1421_vm0, %v1955_v59  ;;  %v2374_v59 = vpop.permute.xlu0 %2373 }
 0x48f   : > { %8181 = vmatprep.mubr.msk.f32.mxu1 %vm1421_vm0, %v1957_v58 }
 0x492   : > { %v1977_v13 = vpop.permute.xlu1 %1976  ;;  %8182 = vmatmul.mubr.msk.f32.gmra.mxu1 %vm1421_vm0, %v1959_v0 }
 0x493   : > { %8184 = vmatprep.mubr.msk.f32.mxu1 %vm1421_vm0, %v1961_v17  ;;  %v2370_v17 = vpop.permute.xlu0 %2369 }
 0x496   : > { %v1981_v19 = vpop.permute.xlu1 %1980  ;;  %8185 = vmatmul.mubr.msk.f32.gmra.mxu1 %vm1421_vm0, %v1963_v50 }
 0x497   : > { %8187 = vmatprep.mubr.msk.f32.mxu1 %vm1421_vm0, %v1965_v38 }
 0x49a   : > { %v2384_v36 = vpop.permute.xlu1 %2383  ;;  %8188 = vmatmul.mubr.msk.f32.gmra.mxu1 %vm1421_vm0, %v1967_v37 }
 0x49b   : > { %8190 = vmatprep.mubr.msk.f32.mxu1 %vm1421_vm0, %v1969_v25  ;;  %8202 = vmatprep.subr.mxu0 %v2384_v36 }
 0x49c   : > { %8203 = vmatpush3.msra.mxu0 %v2384_v36 }
 0x49e   : > { %v2382_v58 = vpop.permute.xlu1 %2381  ;;  %8191 = vmatmul.mubr.msk.f32.gmra.mxu1 %vm1421_vm0, %v1971_v3  ;;  %v2366_v3 = vpop.permute.xlu0 %2365 }
 0x49f   : > { %8193 = vmatprep.mubr.msk.f32.mxu1 %vm1421_vm0, %v1973_v10  ;;  %8204 = vmatprep.subr.mxu0 %v2382_v58 }
 0x4a0   : > { %8205 = vmatpush3.msra.mxu0 %v2382_v58 }
 0x4a1   : > { %8206 = vmatprep.subr.mxu0 %v2380_v39 }
 0x4a2   : > { %v2378_v0 = vpop.permute.xlu1 %2377  ;;  %8194 = vmatmul.mubr.msk.f32.gmra.mxu1 %vm1421_vm0, %v1975_v9  ;;  %8207 = vmatpush3.msra.mxu0 %v2380_v39  ;;  %v2362_v9 = vpop.permute.xlu0 %2361 }
 0x4a3   : > { %8196 = vmatprep.mubr.msk.f32.mxu1 %vm1421_vm0, %v1977_v13  ;;  %8208 = vmatprep.subr.mxu0 %v2378_v0 }
 0x4a4   : > { %8209 = vmatpush3.msra.mxu0 %v2378_v0 }
 0x4a5   : > { %8210 = vmatprep.subr.mxu0 %v2376_v35 }
 0x4a6   : > { %v2372_v38 = vpop.permute.xlu1 %2371  ;;  %8197 = vmatmul.mubr.msk.f32.gmra.mxu1 %vm1421_vm0, %v1979_v22  ;;  %8211 = vmatpush3.msra.mxu0 %v2376_v35  ;;  %v2358_v54 = vpop.permute.xlu0 %2357 }
 0x4a7   : > { %8199 = vmatprep.mubr.msk.f32.mxu1 %vm1421_vm0, %v1981_v19  ;;  %8212 = vmatprep.subr.mxu0 %v2374_v59 }
 0x4a8   : > { %8213 = vmatpush3.msra.mxu0 %v2374_v59 }
 0x4a9   : > { %8214 = vmatprep.subr.mxu0 %v2372_v38 }
 0x4aa   : > { %v2368_v50 = vpop.permute.xlu1 %2367  ;;  %8200 = vmatmul.mubr.msk.f32.gmra.mxu1 %vm1421_vm0, %v1983_v16  ;;  %8215 = vmatpush3.msra.mxu0 %v2372_v38  ;;  %v2354_v16 = vpop.permute.xlu0 %2353 }
 0x4ab   : > { %8216 = vmatprep.subr.mxu0 %v2370_v17  ;;  %v10766_v39 = vpop.f32.mrf.mxu1 }
 0x4ac   : > { %8217 = vmatpush3.msra.mxu0 %v2370_v17  ;;  %14296 = vst [vmem:[#allocation60_spill] sm:$0xff] %v10766_v39  ;;  %v14313_v39 = vld [vmem:[#allocation25_spill] sm:$0xff] }
 0x4ad   : > { %8218 = vmatprep.subr.mxu0 %v2368_v50  ;;  %v10768_v13 = vpop.f32.mrf.mxu1 }
 0x4ae   : > { %v2364_v37 = vpop.permute.xlu1 %2363  ;;  %8219 = vmatpush3.msra.mxu0 %v2368_v50  ;;  %14297 = vst [vmem:[#allocation61_spill] sm:$0xff] %v10768_v13 }
 0x4af   : > { %8220 = vmatprep.subr.mxu0 %v2366_v3 }
 0x4b0   : > { %8221 = vmatpush3.msra.mxu0 %v2366_v3 }
 0x4b1   : > { %8222 = vmatprep.subr.mxu0 %v2364_v37 }
 0x4b2   : > { %v2360_v22 = vpop.permute.xlu1 %2359  ;;  %8223 = vmatpush3.msra.mxu0 %v2364_v37 }
 0x4b3   : > { %8224 = vmatprep.subr.mxu0 %v2362_v9 }
 0x4b4   : > { %8225 = vmatpush3.msra.mxu0 %v2362_v9 }
 0x4b5   : > { %8226 = vmatprep.subr.mxu0 %v2360_v22 }
 0x4b6   : > { %v2356_v25 = vpop.permute.xlu1 %2355  ;;  %8227 = vmatpush3.msra.mxu0 %v2360_v22 }
 0x4b7   : > { %8228 = vmatprep.subr.mxu0 %v2358_v54 }
 0x4b8   : > { %8229 = vmatpush3.msra.mxu0 %v2358_v54 }
 0x4b9   : > { %8230 = vmatprep.subr.mxu0 %v2356_v25 }
 0x4ba   : > { %8231 = vmatpush3.msra.mxu0 %v2356_v25  ;;  %v10762_v10 = vpop.permute.xlu1 %2640 }
 0x4bb   : > { %8232 = vmatprep.subr.mxu0 %v2354_v16 }
 0x4bc   : > { %8233 = vmatpush3.msra.mxu0 %v2354_v16 }
 0x4bd   : > { %8258 = vmatprep.subr.msk.mxu0 %vm1421_vm0, %v10762_v10 }
 0x4be   : > { %v10874_v24 = vpop.permute.xlu1 %2634 }
 0x4e9   : > { %v10770_v35 = vpop.f32.mrf.mxu1 }
 0x4ea   : > { %14298 = vst [vmem:[#allocation62_spill] sm:$0xff] %v10770_v35  ;;  %v10850_v35 = vpop.permute.xlu0 %2638 }
 0x4eb   : > { %v10772_v19 = vpop.f32.mrf.mxu1 }
 0x4ec   : > { %14299 = vst [vmem:[#allocation63_spill] sm:$0xff] %v10772_v19 }
 0x4ee   : > { %v10854_v19 = vpop.permute.xlu0 %2636 }
 0x4f1   : > { %v10774_v36 = vpop.f32.mrf.mxu1 }
 0x4f2   : > { %14300 = vst [vmem:[#allocation64_spill] sm:$0xff] %v10774_v36  ;;  %v10860_v13 = vpop.permute.xlu0 %2632 }
 0x4f3   : > { %v10776_v59 = vpop.f32.mrf.mxu1 }
 0x4f4   : > { %14301 = vst [vmem:[#allocation65_spill] sm:$0xff] %v10776_v59 }
 0x4f5   : > { %v10778_v58 = vpop.f32.mrf.mxu1 }
 0x4f6   : > { %14302 = vst [vmem:[#allocation66_spill] sm:$0xff] %v10778_v58  ;;  %v10868_v27 = vpop.permute.xlu0 %2628 }
 0x4f7   : > { %v10780_v17 = vpop.f32.mrf.mxu1 }
 0x4f8   : > { %14303 = vst [vmem:[#allocation67_spill] sm:$0xff] %v10780_v17 }
 0x4fd   : > { %v10782_v0 = vpop.f32.mrf.mxu1 }
 0x4fe   : > { %14304 = vst [vmem:[#allocation68_spill] sm:$0xff] %v10782_v0 }
 0x4ff   : > { %v10784_v38 = vpop.f32.mrf.mxu1 }
 0x500   : > { %14305 = vst [vmem:[#allocation69_spill] sm:$0xff] %v10784_v38 }
 0x501   : > { %v10786_v3 = vpop.f32.mrf.mxu1 }
 0x502   : > { %14306 = vst [vmem:[#allocation70_spill] sm:$0xff] %v10786_v3 }
 0x503   : > { %v10788_v50 = vpop.f32.mrf.mxu1 }
 0x504   : > { %14307 = vst [vmem:[#allocation71_spill] sm:$0xff] %v10788_v50 }
 0x509   : > { %v10790_v9 = vpop.f32.mrf.mxu1 }
 0x50a   : > { %14308 = vst [vmem:[#allocation72_spill] sm:$0xff] %v10790_v9 }
 0x50b   : > { %v10792_v37 = vpop.f32.mrf.mxu1 }
 0x50c   : > { %14309 = vst [vmem:[#allocation73_spill] sm:$0xff] %v10792_v37 }
 0x54a   : > { %v10794_v22 = vpop.f32.mrf.mxu1 }
 0x54b   : > { %14310 = vst [vmem:[#allocation74_spill] sm:$0xff] %v10794_v22 }
 0x54c   : > { %v10796_v54 = vpop.f32.mrf.mxu1 }
 0x54d   : > { %14311 = vst [vmem:[#allocation75_spill] sm:$0xff] %v10796_v54 }
 0x54e   : > { %v10798_v25 = vpop.f32.mrf.mxu1 }
 0x54f   : > { %2227 = vmax.xlane.f32.xlu1 %v10798_v25 }
 0x550   : > { %v10801_v16 = vpop.f32.mrf.mxu1 }
 0x551   : > { %2225 = vmax.xlane.f32.xlu0 %v10801_v16 }
 0x552   : > { %v10804_v0 = vpop.f32.mrf.mxu1 }
 0x554   : > { %v10806_v3 = vpop.f32.mrf.mxu1 }
 0x555   : > { %2231 = vmax.xlane.f32.xlu0 %v10804_v0  ;;  %2229 = vmax.xlane.f32.xlu1 %v10806_v3 }
 0x556   : > { %v10810_v9 = vpop.f32.mrf.mxu1 }
 0x558   : > { %v10812_v22 = vpop.f32.mrf.mxu1 }
 0x559   : > { %2235 = vmax.xlane.f32.xlu1 %v10810_v9 }
 0x55a   : > { %v10815_v54 = vpop.f32.mrf.mxu1 }
 0x55c   : > { %v10817_v37 = vpop.f32.mrf.mxu1 }
 0x55d   : > { %2233 = vmax.xlane.f32.xlu1 %v10812_v22  ;;  %2237 = vmax.xlane.f32.xlu0 %v10817_v37 }
 0x55e   : > { %v10826_v50 = vpop.f32.mrf.mxu1 }
 0x560   : > { %v10828_v38 = vpop.f32.mrf.mxu1 }
 0x561   : > { %2239 = vmax.xlane.f32.xlu1 %v10815_v54 }
 0x562   : > { %v10830_v55 = vpop.f32.mrf.mxu1 }
 0x564   : > { %v10832_v41 = vpop.f32.mrf.mxu1 }
 0x566   : > { %v10834_v58 = vpop.f32.mrf.mxu1 }
 0x568   : > { %v10837_v17 = vpop.f32.mrf.mxu1 }
 0x56a   : > { %v10841_v36 = vpop.f32.mrf.mxu1 }
 0x56c   : > { %v10847_v59 = vpop.f32.mrf.mxu1 }
 0x56d   : > { %14312 = vst [vmem:[#allocation76_spill] sm:$0xff] %v10847_v59 }
 0x572   : > { %2612 = vrot.lane.b32.xlu1 %v10437_v11, %s9581_s15 }
 0x573   : > { %2614 = vrot.lane.b32.xlu0 %v10429_v14, %s9581_s15 }
 0x592   : > { %2245 = vmax.xlane.f32.xlu0 %v10832_v41 }
 0x596   : > { %2243 = vmax.xlane.f32.xlu1 %v10826_v50  ;;  %2251 = vmax.xlane.f32.xlu0 %v10834_v58 }
 0x59a   : > { %2241 = vmax.xlane.f32.xlu1 %v10828_v38  ;;  %2255 = vmax.xlane.f32.xlu0 %v10841_v36 }
 0x59e   : > { %2247 = vmax.xlane.f32.xlu1 %v10830_v55 }
 0x5a2   : > { %2249 = vmax.xlane.f32.xlu1 %v10837_v17 }
 0x5a6   : > { %2253 = vmax.xlane.f32.xlu1 %v10847_v59 }
 0x5b0   : > { %2610 = vrot.lane.b32.xlu0 %v10445_v7, %s9581_s15 }
 0x5b4   : > { %2580 = vrot.lane.b32.xlu0 %v10139_v26, %s9581_s15 }
 0x5b7   : > { %2578 = vrot.lane.b32.xlu1 %v10132_v63, %s9581_s15 }
 0x5b8   : > { %2584 = vrot.lane.b32.xlu0 %v14313_v39, %s9581_s15  ;;  %v10878_v39 = vpop.permute.xlu0 %2624 }
 0x5bb   : > { %2582 = vrot.lane.b32.xlu1 %v10144_v62, %s9581_s15  ;;  %v14316_v62 = vld [vmem:[#allocation31_spill] sm:$0xff] }
 0x5bc   : > { %2588 = vrot.lane.b32.xlu0 %v14314_v52, %s9581_s15  ;;  %v10884_v52 = vpop.permute.xlu1 %2630  ;;  %v10888_v63 = vpop.permute.xlu0 %2620 }
 0x5bf   : > { %2586 = vrot.lane.b32.xlu1 %v10156_v2, %s9581_s15  ;;  %v14317_v2 = vld [vmem:[#allocation34_spill] sm:$0xff] }
 0x5c0   : > { %2592 = vrot.lane.b32.xlu0 %v14315_v51, %s9581_s15  ;;  %v10894_v51 = vpop.permute.xlu1 %2626 }
 0x5c3   : > { %2590 = vrot.lane.b32.xlu1 %v10172_v31, %s9581_s15  ;;  %v14318_v31 = vld [vmem:[#allocation36_spill] sm:$0xff] }
 0x5c4   : > { %2596 = vrot.lane.b32.xlu0 %v14316_v62, %s9581_s15  ;;  %v10898_v62 = vpop.permute.xlu0 %2618 }
 0x5c7   : > { %2594 = vrot.lane.b32.xlu1 %v10189_v42, %s9581_s15  ;;  %v14319_v42 = vld [vmem:[#allocation39_spill] sm:$0xff] }
 0x5c8   : > { %2600 = vrot.lane.b32.xlu0 %v14317_v2, %s9581_s15  ;;  %v10904_v2 = vpop.permute.xlu1 %2622  ;;  %v10908_v26 = vpop.permute.xlu0 %2616 }
 0x5cb   : > { %2598 = vrot.lane.b32.xlu1 %v10209_v49, %s9581_s15  ;;  %v14320_v49 = vld [vmem:[#allocation40_spill] sm:$0xff] }
 0x5cc   : > { %2604 = vrot.lane.b32.xlu0 %v14318_v31, %s9581_s15 }
 0x5cf   : > { %2602 = vrot.lane.b32.xlu1 %v10225_v57, %s9581_s15  ;;  %v14321_v57 = vld [vmem:[#allocation41_spill] sm:$0xff] }
 0x5d0   : > { %2608 = vrot.lane.b32.xlu0 %v14319_v42, %s9581_s15 }
 0x5d3   : > { %2606 = vrot.lane.b32.xlu1 %v10247_v33, %s9581_s15 }
 0x5d4   : > { %2989 = vrot.lane.b32.xlu0 %v14320_v49, %s9581_s15 }
 0x5d7   : > { %2993 = vrot.lane.b32.xlu1 %v10252_v53, %s9581_s15 }
 0x5d8   : > { %v2228_v31 = vpop.xlane.xlu1 %2227  ;;  %2985 = vrot.lane.b32.xlu0 %v14321_v57, %s9581_s15 }
 0x5d9   : > { %v2258_v7 = vsub.f32 %v10798_v25, %v2228_v31 }
 0x5da   : > { %v2226_v42 = vpop.xlane.xlu0 %2225 }
 0x5db   : > { %v2257_v14 = vsub.f32 %v10801_v16, %v2226_v42  ;;  %2991 = vrot.lane.b32.xlu1 %v10258_v21, %s9581_s15  ;;  %v2275_v33 = vmul.f32 1.442695, %v2258_v7 }
 0x5dc   : > { %2983 = vrot.lane.b32.xlu0 %v10294_v8, %s9581_s15 }
 0x5dd   : > { %v2273_v49 = vmul.f32 1.442695, %v2257_v14 }
 0x5de   : > { %v2230_v11 = vpop.xlane.xlu1 %2229  ;;  %v2232_v59 = vpop.xlane.xlu0 %2231 }
 0x5df   : > { %8873 = vpow2.f32 %v2273_v49  ;;  %v2259_v53 = vsub.f32 %v10806_v3, %v2230_v11  ;;  %v2260_v57 = vsub.f32 %v10804_v0, %v2232_v59  ;;  %2987 = vrot.lane.b32.xlu1 %v10277_v46, %s9581_s15 }
 0x5e0   : > { %8875 = vpow2.f32 %v2275_v33  ;;  %2979 = vrot.lane.b32.xlu0 %v10309_v56, %s9581_s15 }
 0x5e1   : > { %v2277_v31 = vmul.f32 1.442695, %v2259_v53  ;;  %v2279_v42 = vmul.f32 1.442695, %v2260_v57 }
 0x5e2   : > { %v2236_v7 = vpop.xlane.xlu1 %2235 }
 0x5e3   : > { %8877 = vpow2.f32 %v2277_v31  ;;  %2981 = vrot.lane.b32.xlu1 %v10302_v6, %s9581_s15  ;;  %v2262_v49 = vsub.f32 %v10810_v9, %v2236_v7  ;;  %v14322_v31 = vld [vmem:[#allocation76_spill] sm:$0xff] }
 0x5e4   : > { %8879 = vpow2.f32 %v2279_v42  ;;  %2975 = vrot.lane.b32.xlu0 %v10325_v60, %s9581_s15 }
 0x5e5   : > { %v2283_v57 = vmul.f32 1.442695, %v2262_v49 }
 0x5e6   : > { %v2234_v14 = vpop.xlane.xlu1 %2233  ;;  %v2238_v11 = vpop.xlane.xlu0 %2237 }
 0x5e7   : > { %v2261_v33 = vsub.f32 %v10812_v22, %v2234_v14  ;;  %v2263_v59 = vsub.f32 %v10817_v37, %v2238_v11  ;;  %2977 = vrot.lane.b32.xlu1 %v10317_v61, %s9581_s15 }
 0x5e8   : > { %2971 = vrot.lane.b32.xlu0 %v10341_v45, %s9581_s15 }
 0x5e9   : > { %v2281_v53 = vmul.f32 1.442695, %v2261_v33  ;;  %v2285_v0 = vmul.f32 1.442695, %v2263_v59 }
 0x5ea   : > { %v2240_v3 = vpop.xlane.xlu1 %2239 }
 0x5eb   : > { %8881 = vpow2.f32 %v2281_v53  ;;  %v2264_v9 = vsub.f32 %v10815_v54, %v2240_v3  ;;  %2973 = vrot.lane.b32.xlu1 %v10333_v47, %s9581_s15 }
 0x5ec   : > { %v10940_v25 = vpop.eup %8873  ;;  %8883 = vpow2.f32 %v2283_v57  ;;  %2967 = vrot.lane.b32.xlu0 %v10357_v43, %s9581_s15 }
 0x5ed   : > { %v10944_v37 = vpop.eup %8875  ;;  %v2287_v22 = vmul.f32 1.442695, %v2264_v9  ;;  %8234 = vmatprep.mubr.f32.mxu0 %v10940_v25  ;;  %8885 = vpow2.f32 %v2285_v0 }
 0x5ee   : > { %8235 = vmatmul.mubr.f32.vlgmr.msra.gmra.mxu0 %v10944_v37 }
 0x5ef   : > { %8887 = vpow2.f32 %v2287_v22  ;;  %8259 = vmatpush3.xpose.msk.msra.mxu0 %vm1421_vm0, %v10762_v10  ;;  %2969 = vrot.lane.b32.xlu1 %v10349_v40, %s9581_s15 }
 0x5f0   : > { %v10952_v54 = vpop.eup %8877  ;;  %8260 = vmatprep.subr.msk.mxu0 %vm1421_vm0, %v10850_v35  ;;  %2963 = vrot.lane.b32.xlu0 %v10373_v12, %s9581_s15 }
 0x5f1   : > { %v10958_v16 = vpop.eup %8879  ;;  %8237 = vmatprep.mubr.f32.mxu0 %v10952_v54 }
 0x5f2   : > { %8238 = vmatmul.mubr.f32.gmra.mxu0 %v10958_v16 }
 0x5f3   : > { %8261 = vmatpush3.xpose.msk.msra.mxu0 %vm1421_vm0, %v10850_v35  ;;  %2965 = vrot.lane.b32.xlu1 %v10365_v20, %s9581_s15 }
 0x5f4   : > { %8262 = vmatprep.subr.msk.mxu0 %vm1421_vm0, %v10854_v19  ;;  %3248 = vrot.lane.b32.xlu0 %v10255_v48, %s9582_s17 }
 0x5f7   : > { %8263 = vmatpush3.xpose.msk.msra.mxu0 %vm1421_vm0, %v10854_v19  ;;  %3250 = vrot.lane.b32.xlu1 %v10272_v44, %s9582_s17 }
 0x5f8   : > { %v10974_v10 = vpop.eup %8881  ;;  %8264 = vmatprep.subr.msk.mxu0 %vm1421_vm0, %v10874_v24  ;;  %3246 = vrot.lane.b32.xlu0 %v10239_v34, %s9582_s17 }
 0x5f9   : > { %v10980_v35 = vpop.eup %8883  ;;  %8240 = vmatprep.mubr.f32.mxu0 %v10974_v10 }
 0x5fa   : > { %8241 = vmatmul.mubr.f32.gmra.mxu0 %v10980_v35  ;;  %v10984_v48 = vpop.eup %8885 }
 0x5fb   : > { %8265 = vmatpush3.xpose.msk.msra.mxu0 %vm1421_vm0, %v10874_v24  ;;  %3244 = vrot.lane.b32.xlu1 %v10230_v15, %s9582_s17 }
 0x5fc   : > { %v10990_v44 = vpop.eup %8887  ;;  %8243 = vmatprep.mubr.f32.mxu0 %v10984_v48  ;;  %8266 = vmatprep.subr.msk.mxu0 %vm1421_vm0, %v10860_v13 }
 0x5fd   : > { %3242 = vrot.lane.b32.xlu0 %v10222_v5, %s9582_s17  ;;  %v2613_v5 = vpop.permute.xlu1 %2612 }
 0x5fe   : > { %8244 = vmatmul.mubr.f32.gmra.mxu0 %v10990_v44 }
 0x5ff   : > { %8267 = vmatpush3.xpose.msk.msra.mxu0 %vm1421_vm0, %v10860_v13  ;;  %3240 = vrot.lane.b32.xlu1 %v14289_v28, %s9582_s17 }
 0x600   : > { %8268 = vmatprep.subr.msk.mxu0 %vm1421_vm0, %v10884_v52 }
 0x601   : > { %3238 = vrot.lane.b32.xlu0 %v10206_v29, %s9582_s17  ;;  %v2615_v29 = vpop.permute.xlu0 %2614 }
 0x603   : > { %8269 = vmatpush3.xpose.msk.msra.mxu0 %vm1421_vm0, %v10884_v52  ;;  %3236 = vrot.lane.b32.xlu1 %v14292_v23, %s9582_s17 }
 0x604   : > { %8270 = vmatprep.subr.msk.mxu0 %vm1421_vm0, %v10868_v27 }
 0x605   : > { %3234 = vrot.lane.b32.xlu0 %v10389_v1, %s9582_s17 }
 0x607   : > { %8271 = vmatpush3.xpose.msk.msra.mxu0 %vm1421_vm0, %v10868_v27  ;;  %3232 = vrot.lane.b32.xlu1 %v14293_v18, %s9582_s17 }
 0x608   : > { %8272 = vmatprep.subr.msk.mxu0 %vm1421_vm0, %v10894_v51 }
 0x609   : > { %3230 = vrot.lane.b32.xlu0 %v10405_v4, %s9582_s17 }
 0x60b   : > { %8273 = vmatpush3.xpose.msk.msra.mxu0 %vm1421_vm0, %v10894_v51 }
 0x60c   : > { %8274 = vmatprep.subr.msk.mxu0 %vm1421_vm0, %v10878_v39 }
 0x60d   : > { %3228 = vrot.lane.b32.xlu0 %v10413_v32, %s9582_s17 }
 0x60f   : > { %8275 = vmatpush3.xpose.msk.msra.mxu0 %vm1421_vm0, %v10878_v39 }
 0x610   : > { %8276 = vmatprep.subr.msk.mxu0 %vm1421_vm0, %v10904_v2 }
 0x611   : > { %3226 = vrot.lane.b32.xlu0 %v10421_v30, %s9582_s17 }
 0x613   : > { %8277 = vmatpush3.xpose.msk.msra.mxu0 %vm1421_vm0, %v10904_v2 }
 0x614   : > { %8278 = vmatprep.subr.msk.mxu0 %vm1421_vm0, %v10888_v63 }
 0x617   : > { %8279 = vmatpush3.xpose.msk.msra.mxu0 %vm1421_vm0, %v10888_v63 }
 0x618   : > { %8280 = vmatprep.subr.msk.mxu0 %vm1421_vm0, %v10898_v62 }
 0x61b   : > { %8281 = vmatpush3.xpose.msk.msra.mxu0 %vm1421_vm0, %v10898_v62  ;;  %v2246_v15 = vpop.xlane.xlu0 %2245 }
 0x61c   : > { %8282 = vmatprep.subr.msk.mxu0 %vm1421_vm0, %v10908_v26  ;;  %v2267_v1 = vsub.f32 %v10832_v41, %v2246_v15 }
 0x61e   : > { %v2293_v52 = vmul.f32 1.442695, %v2267_v1 }
 0x61f   : > { %8283 = vmatpush3.xpose.msk.msra.mxu0 %vm1421_vm0, %v10908_v26  ;;  %v2244_v2 = vpop.xlane.xlu1 %2243  ;;  %v2252_v34 = vpop.xlane.xlu0 %2251 }
 0x620   : > { %8284 = vmatprep.subr.msk.mxu0 %vm1421_vm0, %v2615_v29  ;;  %v2266_v63 = vsub.f32 %v10826_v50, %v2244_v2  ;;  %v2270_v41 = vsub.f32 %v10834_v58, %v2252_v34 }
 0x622   : > { %v2291_v30 = vmul.f32 1.442695, %v2266_v63  ;;  %v2299_v13 = vmul.f32 1.442695, %v2270_v41 }
 0x623   : > { %8285 = vmatpush3.xpose.msk.msra.mxu0 %vm1421_vm0, %v2615_v29  ;;  %v2242_v4 = vpop.xlane.xlu1 %2241  ;;  %v2256_v32 = vpop.xlane.xlu0 %2255 }
 0x624   : > { %v2265_v62 = vsub.f32 %v10828_v38, %v2242_v4  ;;  %8286 = vmatprep.subr.msk.mxu0 %vm1421_vm0, %v2613_v5  ;;  %v2272_v19 = vsub.f32 %v10841_v36, %v2256_v32 }
 0x626   : > { %v2289_v24 = vmul.f32 1.442695, %v2265_v62  ;;  %v2303_v58 = vmul.f32 1.442695, %v2272_v19 }
 0x627   : > { %8287 = vmatpush3.xpose.msk.msra.mxu0 %vm1421_vm0, %v2613_v5  ;;  %v2248_v26 = vpop.xlane.xlu1 %2247  ;;  %v2611_v51 = vpop.permute.xlu0 %2610 }
 0x628   : > { %8889 = vpow2.f32 %v2289_v24  ;;  %v2268_v27 = vsub.f32 %v10830_v55, %v2248_v26  ;;  %8288 = vmatprep.subr.msk.mxu0 %vm1421_vm0, %v2611_v51 }
 0x629   : > { %8891 = vpow2.f32 %v2291_v30 }
 0x62a   : > { %8893 = vpow2.f32 %v2293_v52  ;;  %v2295_v28 = vmul.f32 1.442695, %v2268_v27 }
 0x62b   : > { %8289 = vmatpush3.xpose.msk.msra.mxu0 %vm1421_vm0, %v2611_v51  ;;  %v2250_v23 = vpop.xlane.xlu1 %2249  ;;  %v2581_v18 = vpop.permute.xlu0 %2580 }
 0x62c   : > { %8895 = vpow2.f32 %v2295_v28  ;;  %v2269_v39 = vsub.f32 %v10837_v17, %v2250_v23 }
 0x62e   : > { %v2297_v38 = vmul.f32 1.442695, %v2269_v39 }
 0x62f   : > { %v2254_v50 = vpop.xlane.xlu1 %2253  ;;  %v2585_v55 = vpop.permute.xlu0 %2584 }
 0x630   : > { %8897 = vpow2.f32 %v2297_v38  ;;  %v2271_v42 = vsub.f32 %v14322_v31, %v2254_v50 }
 0x631   : > { %8899 = vpow2.f32 %v2299_v13 }
 0x632   : > { %v2301_v7 = vmul.f32 1.442695, %v2271_v42 }
 0x633   : > { %v2579_v49 = vpop.permute.xlu1 %2578  ;;  %v2589_v14 = vpop.permute.xlu0 %2588 }
 0x634   : > { %8901 = vpow2.f32 %v2301_v7 }
 0x635   : > { %v11062_v11 = vpop.eup %8889  ;;  %8903 = vpow2.f32 %v2303_v58 }
 0x636   : > { %v11064_v33 = vpop.eup %8891  ;;  %8246 = vmatprep.mubr.f32.mxu0 %v11062_v11 }
 0x637   : > { %v11067_v36 = vpop.eup %8893  ;;  %v2583_v17 = vpop.permute.xlu1 %2582  ;;  %8247 = vmatmul.mubr.f32.gmra.mxu0 %v11064_v33 }
 0x638   : > { %v2593_v59 = vpop.permute.xlu0 %2592  ;;  %8249 = vmatprep.mubr.f32.mxu0 %v11067_v36 }
 0x639   : > { %v11071_v57 = vpop.eup %8895 }
 0x63b   : > { %v2587_v53 = vpop.permute.xlu1 %2586  ;;  %8250 = vmatmul.mubr.f32.gmra.mxu0 %v11071_v57 }
 0x63c   : > { %v2597_v0 = vpop.permute.xlu0 %2596 }
 0x63d   : > { %v11074_v3 = vpop.eup %8897 }
 0x63e   : > { %v11076_v9 = vpop.eup %8899  ;;  %8252 = vmatprep.mubr.f32.mxu0 %v11074_v3 }
 0x63f   : > { %14323 = vst [vmem:[#allocation76_spill] sm:$0xff] %v11076_v9  ;;  %v2591_v22 = vpop.permute.xlu1 %2590  ;;  %8253 = vmatmul.mubr.f32.gmra.mxu0 %v11076_v9 }
 0x640   : > { %v2601_v29 = vpop.permute.xlu0 %2600 }
 0x641   : > { %v11080_v5 = vpop.eup %8901 }
 0x642   : > { %v11082_v15 = vpop.eup %8903  ;;  %8255 = vmatprep.mubr.f32.mxu0 %v11080_v5 }
 0x643   : > { %14324 = vst [vmem:[#allocation77_spill] sm:$0xff] %v11082_v15  ;;  %v2595_v2 = vpop.permute.xlu1 %2594  ;;  %8256 = vmatmul.mubr.f32.gmra.mxu0 %v11082_v15 }
 0x644   : > { %v2605_v34 = vpop.permute.xlu0 %2604  ;;  %8290 = vmatprep.mubr.msk.f32.mxu0 %vm1421_vm0, %v2579_v49 }
 0x647   : > { %v2599_v63 = vpop.permute.xlu1 %2598  ;;  %8291 = vmatmul.mubr.msk.f32.vlgmr.msra.gmra.mxu0 %vm1421_vm0, %v2581_v18 }
 0x648   : > { %v2609_v1 = vpop.permute.xlu0 %2608  ;;  %8293 = vmatprep.mubr.msk.f32.mxu0 %vm1421_vm0, %v2583_v17 }
 0x64b   : > { %v2603_v4 = vpop.permute.xlu1 %2602  ;;  %8294 = vmatmul.mubr.msk.f32.gmra.mxu0 %vm1421_vm0, %v2585_v55 }
 0x64c   : > { %v2990_v32 = vpop.permute.xlu0 %2989  ;;  %8296 = vmatprep.mubr.msk.f32.mxu0 %vm1421_vm0, %v2587_v53 }
 0x64f   : > { %v2607_v62 = vpop.permute.xlu1 %2606  ;;  %8297 = vmatmul.mubr.msk.f32.gmra.mxu0 %vm1421_vm0, %v2589_v14 }
 0x650   : > { %v2986_v30 = vpop.permute.xlu0 %2985  ;;  %8299 = vmatprep.mubr.msk.f32.mxu0 %vm1421_vm0, %v2591_v22 }
 0x653   : > { %v2994_v52 = vpop.permute.xlu1 %2993  ;;  %8300 = vmatmul.mubr.msk.f32.gmra.mxu0 %vm1421_vm0, %v2593_v59 }
 0x654   : > { %8302 = vmatprep.mubr.msk.f32.mxu0 %vm1421_vm0, %v2595_v2  ;;  %8314 = vmatprep.subr.mxu1 %v2994_v52  ;;  %v2984_v24 = vpop.permute.xlu0 %2983 }
 0x655   : > { %8315 = vmatpush3.msra.mxu1 %v2994_v52 }
 0x657   : > { %v2992_v26 = vpop.permute.xlu1 %2991  ;;  %8303 = vmatmul.mubr.msk.f32.gmra.mxu0 %vm1421_vm0, %v2597_v0 }
 0x658   : > { %8305 = vmatprep.mubr.msk.f32.mxu0 %vm1421_vm0, %v2599_v63  ;;  %8316 = vmatprep.subr.mxu1 %v2992_v26  ;;  %v2980_v51 = vpop.permute.xlu0 %2979 }
 0x659   : > { %8317 = vmatpush3.msra.mxu1 %v2992_v26 }
 0x65a   : > { %8318 = vmatprep.subr.mxu1 %v2990_v32 }
 0x65b   : > { %v2988_v27 = vpop.permute.xlu1 %2987  ;;  %8306 = vmatmul.mubr.msk.f32.gmra.mxu0 %vm1421_vm0, %v2601_v29  ;;  %8319 = vmatpush3.msra.mxu1 %v2990_v32 }
 0x65c   : > { %8308 = vmatprep.mubr.msk.f32.mxu0 %vm1421_vm0, %v2603_v4  ;;  %8320 = vmatprep.subr.mxu1 %v2988_v27  ;;  %v2976_v28 = vpop.permute.xlu0 %2975 }
 0x65d   : > { %8321 = vmatpush3.msra.mxu1 %v2988_v27  ;;  %v14341_v27 = vld [vmem:[#allocation45_spill] sm:$0xff] }
 0x65e   : > { %8322 = vmatprep.subr.mxu1 %v2986_v30 }
 0x65f   : > { %v2982_v41 = vpop.permute.xlu1 %2981  ;;  %8309 = vmatmul.mubr.msk.f32.gmra.mxu0 %vm1421_vm0, %v2605_v34  ;;  %8323 = vmatpush3.msra.mxu1 %v2986_v30 }
 0x660   : > { %8311 = vmatprep.mubr.msk.f32.mxu0 %vm1421_vm0, %v2607_v62  ;;  %8324 = vmatprep.subr.mxu1 %v2984_v24  ;;  %v2972_v18 = vpop.permute.xlu0 %2971 }
 0x661   : > { %8325 = vmatpush3.msra.mxu1 %v2984_v24 }
 0x662   : > { %8326 = vmatprep.subr.mxu1 %v2982_v41 }
 0x663   : > { %v2978_v23 = vpop.permute.xlu1 %2977  ;;  %8312 = vmatmul.mubr.msk.f32.gmra.mxu0 %vm1421_vm0, %v2609_v1  ;;  %8327 = vmatpush3.msra.mxu1 %v2982_v41  ;;  %v14342_v41 = vld [vmem:[#allocation44_spill] sm:$0xff] }
 0x664   : > { %8328 = vmatprep.subr.mxu1 %v2980_v51  ;;  %v2968_v19 = vpop.permute.xlu0 %2967 }
 0x665   : > { %8329 = vmatpush3.msra.mxu1 %v2980_v51 }
 0x666   : > { %8330 = vmatprep.subr.mxu1 %v2978_v23 }
 0x667   : > { %v2974_v39 = vpop.permute.xlu1 %2973  ;;  %8331 = vmatpush3.msra.mxu1 %v2978_v23 }
 0x668   : > { %8332 = vmatprep.subr.mxu1 %v2976_v28  ;;  %v2964_v50 = vpop.permute.xlu0 %2963 }
 0x669   : > { %8333 = vmatpush3.msra.mxu1 %v2976_v28 }
 0x66a   : > { %8334 = vmatprep.subr.mxu1 %v2974_v39 }
 0x66b   : > { %v2970_v13 = vpop.permute.xlu1 %2969  ;;  %8335 = vmatpush3.msra.mxu1 %v2974_v39 }
 0x66c   : > { %8336 = vmatprep.subr.mxu1 %v2972_v18 }
 0x66d   : > { %8337 = vmatpush3.msra.mxu1 %v2972_v18 }
 0x66e   : > { %8338 = vmatprep.subr.mxu1 %v2970_v13 }
 0x66f   : > { %v2966_v38 = vpop.permute.xlu1 %2965  ;;  %8339 = vmatpush3.msra.mxu1 %v2970_v13 }
 0x670   : > { %8340 = vmatprep.subr.mxu1 %v2968_v19 }
 0x671   : > { %8341 = vmatpush3.msra.mxu1 %v2968_v19 }
 0x672   : > { %8342 = vmatprep.subr.mxu1 %v2966_v38 }
 0x673   : > { %8343 = vmatpush3.msra.mxu1 %v2966_v38  ;;  %v11102_v55 = vpop.permute.xlu1 %3250 }
 0x674   : > { %8344 = vmatprep.subr.mxu1 %v2964_v50 }
 0x675   : > { %8345 = vmatpush3.msra.mxu1 %v2964_v50 }
 0x676   : > { %8370 = vmatprep.subr.msk.mxu1 %vm1421_vm0, %v11102_v55 }
 0x6ae   : > { %v11106_v31 = vpop.f32.mrf.mxu0 }
 0x6af   : > { %14325 = vst [vmem:[#allocation78_spill] sm:$0xff] %v11106_v31 }
 0x6b0   : > { %v11108_v42 = vpop.f32.mrf.mxu0 }
 0x6b1   : > { %14326 = vst [vmem:[#allocation79_spill] sm:$0xff] %v11108_v42 }
 0x6b2   : > { %v11110_v58 = vpop.f32.mrf.mxu0 }
 0x6b3   : > { %14327 = vst [vmem:[#allocation80_spill] sm:$0xff] %v11110_v58 }
 0x6b4   : > { %v11112_v7 = vpop.f32.mrf.mxu0 }
 0x6b5   : > { %14328 = vst [vmem:[#allocation81_spill] sm:$0xff] %v11112_v7 }
 0x6ba   : > { %v11114_v49 = vpop.f32.mrf.mxu0 }
 0x6bb   : > { %14329 = vst [vmem:[#allocation82_spill] sm:$0xff] %v11114_v49 }
 0x6bc   : > { %v11116_v14 = vpop.f32.mrf.mxu0 }
 0x6bd   : > { %14330 = vst [vmem:[#allocation83_spill] sm:$0xff] %v11116_v14 }
 0x6be   : > { %v11118_v17 = vpop.f32.mrf.mxu0 }
 0x6bf   : > { %14331 = vst [vmem:[#allocation84_spill] sm:$0xff] %v11118_v17 }
 0x6c0   : > { %v11120_v59 = vpop.f32.mrf.mxu0 }
 0x6c1   : > { %14332 = vst [vmem:[#allocation85_spill] sm:$0xff] %v11120_v59  ;;  %v14352_v59 = vld [vmem:[#allocation28_spill] sm:$0xff] }
 0x6f7   : > { %v11122_v53 = vpop.f32.mrf.mxu0 }
 0x6f8   : > { %14333 = vst [vmem:[#allocation86_spill] sm:$0xff] %v11122_v53  ;;  %v14350_v53 = vld [vmem:[#allocation26_spill] sm:$0xff] }
 0x6f9   : > { %v11124_v0 = vpop.f32.mrf.mxu0 }
 0x6fa   : > { %14334 = vst [vmem:[#allocation87_spill] sm:$0xff] %v11124_v0  ;;  %v14349_v0 = vld [vmem:[#allocation27_spill] sm:$0xff] }
 0x6fb   : > { %v11126_v22 = vpop.f32.mrf.mxu0 }
 0x6fc   : > { %14335 = vst [vmem:[#allocation88_spill] sm:$0xff] %v11126_v22  ;;  %v14348_v22 = vld [vmem:[#allocation24_spill] sm:$0xff] }
 0x6fd   : > { %v11128_v29 = vpop.f32.mrf.mxu0 }
 0x6fe   : > { %14336 = vst [vmem:[#allocation89_spill] sm:$0xff] %v11128_v29  ;;  %v14347_v29 = vld [vmem:[#allocation25_spill] sm:$0xff] }
 0x6ff   : > { %v11130_v2 = vpop.f32.mrf.mxu0 }
 0x700   : > { %14337 = vst [vmem:[#allocation90_spill] sm:$0xff] %v11130_v2 }
 0x701   : > { %v11132_v34 = vpop.f32.mrf.mxu0 }
 0x702   : > { %14338 = vst [vmem:[#allocation91_spill] sm:$0xff] %v11132_v34  ;;  %v14346_v34 = vld [vmem:[#allocation22_spill] sm:$0xff] }
 0x703   : > { %v11134_v63 = vpop.f32.mrf.mxu0 }
 0x704   : > { %14339 = vst [vmem:[#allocation92_spill] sm:$0xff] %v11134_v63  ;;  %v14345_v63 = vld [vmem:[#allocation23_spill] sm:$0xff] }
 0x705   : > { %v11136_v1 = vpop.f32.mrf.mxu0 }
 0x706   : > { %14340 = vst [vmem:[#allocation93_spill] sm:$0xff] %v11136_v1 }
 0x707   : > { %v11138_v4 = vpop.f32.mrf.mxu0 }
 0x708   : > { %2853 = vmax.xlane.f32.xlu1 %v11138_v4 }
 0x709   : > { %v11141_v32 = vpop.f32.mrf.mxu0 }
 0x70a   : > { %2851 = vmax.xlane.f32.xlu0 %v11141_v32 }
 0x70b   : > { %v11144_v62 = vpop.f32.mrf.mxu0 }
 0x70d   : > { %v11146_v30 = vpop.f32.mrf.mxu0 }
 0x70e   : > { %2857 = vmax.xlane.f32.xlu0 %v11144_v62  ;;  %2855 = vmax.xlane.f32.xlu1 %v11146_v30 }
 0x70f   : > { %v11150_v52 = vpop.f32.mrf.mxu0 }
 0x711   : > { %v11152_v24 = vpop.f32.mrf.mxu0 }
 0x712   : > { %2861 = vmax.xlane.f32.xlu1 %v11150_v52 }
 0x713   : > { %v11155_v26 = vpop.f32.mrf.mxu0 }
 0x715   : > { %v11157_v51 = vpop.f32.mrf.mxu0 }
 0x716   : > { %2859 = vmax.xlane.f32.xlu1 %v11152_v24  ;;  %2863 = vmax.xlane.f32.xlu0 %v11157_v51 }
 0x717   : > { %v11166_v28 = vpop.f32.mrf.mxu0 }
 0x719   : > { %v11168_v23 = vpop.f32.mrf.mxu0 }
 0x71a   : > { %2865 = vmax.xlane.f32.xlu1 %v11155_v26 }
 0x71b   : > { %v11170_v18 = vpop.f32.mrf.mxu0 }
 0x71d   : > { %v11172_v39 = vpop.f32.mrf.mxu0 }
 0x71f   : > { %v11174_v13 = vpop.f32.mrf.mxu0 }
 0x721   : > { %v11177_v19 = vpop.f32.mrf.mxu0 }
 0x723   : > { %v11181_v38 = vpop.f32.mrf.mxu0 }
 0x725   : > { %v11187_v50 = vpop.f32.mrf.mxu0 }
 0x726   : > { %14343 = vst [vmem:[#allocation45_spill] sm:$0xff] %v11187_v50 }
 0x72b   : > { %3222 = vrot.lane.b32.xlu1 %v14341_v27, %s9582_s17  ;;  %v11190_v27 = vpop.permute.xlu0 %3248 }
 0x72c   : > { %3224 = vrot.lane.b32.xlu0 %v14342_v41, %s9582_s17  ;;  %v14344_v41 = vld [vmem:[#allocation46_spill] sm:$0xff] }
 0x72f   : > { %v11194_v1 = vpop.permute.xlu0 %3246 }
 0x733   : > { %v11200_v2 = vpop.permute.xlu0 %3242 }
 0x74b   : > { %2871 = vmax.xlane.f32.xlu0 %v11172_v39 }
 0x74f   : > { %2869 = vmax.xlane.f32.xlu1 %v11166_v28  ;;  %2877 = vmax.xlane.f32.xlu0 %v11174_v13 }
 0x753   : > { %2867 = vmax.xlane.f32.xlu1 %v11168_v23  ;;  %2881 = vmax.xlane.f32.xlu0 %v11181_v38 }
 0x757   : > { %2873 = vmax.xlane.f32.xlu1 %v11170_v18 }
 0x75b   : > { %2875 = vmax.xlane.f32.xlu1 %v11177_v19 }
 0x75f   : > { %2879 = vmax.xlane.f32.xlu1 %v11187_v50 }
 0x769   : > { %3220 = vrot.lane.b32.xlu0 %v14344_v41, %s9582_s17  ;;  %v11208_v41 = vpop.permute.xlu0 %3238 }
 0x76d   : > { %3190 = vrot.lane.b32.xlu0 %v14345_v63, %s9582_s17  ;;  %v14351_v63 = vld [vmem:[#allocation29_spill] sm:$0xff] }
 0x770   : > { %3188 = vrot.lane.b32.xlu1 %v14346_v34, %s9582_s17  ;;  %v11214_v34 = vpop.permute.xlu1 %3244 }
 0x771   : > { %3194 = vrot.lane.b32.xlu0 %v14347_v29, %s9582_s17  ;;  %v11218_v29 = vpop.permute.xlu0 %3234 }
 0x774   : > { %3192 = vrot.lane.b32.xlu1 %v14348_v22, %s9582_s17  ;;  %v14353_v22 = vld [vmem:[#allocation31_spill] sm:$0xff]  ;;  %v11224_v17 = vpop.permute.xlu1 %3240 }
 0x775   : > { %3198 = vrot.lane.b32.xlu0 %v14349_v0, %s9582_s17  ;;  %v14354_v0 = vld [vmem:[#allocation30_spill] sm:$0xff]  ;;  %v11228_v14 = vpop.permute.xlu0 %3230 }
 0x778   : > { %3196 = vrot.lane.b32.xlu1 %v14350_v53, %s9582_s17  ;;  %v14355_v53 = vld [vmem:[#allocation34_spill] sm:$0xff]  ;;  %v11234_v49 = vpop.permute.xlu1 %3236 }
 0x779   : > { %3202 = vrot.lane.b32.xlu0 %v14351_v63, %s9582_s17  ;;  %v14356_v63 = vld [vmem:[#allocation32_spill] sm:$0xff]  ;;  %v11238_v7 = vpop.permute.xlu0 %3228 }
 0x77c   : > { %3200 = vrot.lane.b32.xlu1 %v14352_v59, %s9582_s17  ;;  %v14357_v59 = vld [vmem:[#allocation36_spill] sm:$0xff]  ;;  %v11244_v58 = vpop.permute.xlu1 %3232 }
 0x77d   : > { %3206 = vrot.lane.b32.xlu0 %v14353_v22, %s9582_s17  ;;  %v14358_v22 = vld [vmem:[#allocation35_spill] sm:$0xff] }
 0x780   : > { %3204 = vrot.lane.b32.xlu1 %v14354_v0, %s9582_s17  ;;  %v14359_v0 = vld [vmem:[#allocation39_spill] sm:$0xff] }
 0x781   : > { %3210 = vrot.lane.b32.xlu0 %v14355_v53, %s9582_s17  ;;  %v14360_v53 = vld [vmem:[#allocation37_spill] sm:$0xff] }
 0x784   : > { %3208 = vrot.lane.b32.xlu1 %v14356_v63, %s9582_s17  ;;  %v11248_v63 = vpop.permute.xlu0 %3226 }
 0x785   : > { %3214 = vrot.lane.b32.xlu0 %v14357_v59, %s9582_s17  ;;  %v14361_v59 = vld [vmem:[#allocation38_spill] sm:$0xff] }
 0x788   : > { %3212 = vrot.lane.b32.xlu1 %v14358_v22, %s9582_s17 }
 0x789   : > { %3218 = vrot.lane.b32.xlu0 %v14359_v0, %s9582_s17 }
 0x78c   : > { %3216 = vrot.lane.b32.xlu1 %v14360_v53, %s9582_s17  ;;  %v14362_v53 = vld [vmem:[#allocation40_spill] sm:$0xff] }
 0x78d   : > { %3601 = vrot.lane.b32.xlu0 %v10258_v21, %s9582_s17 }
 0x790   : > { %3603 = vrot.lane.b32.xlu1 %v14361_v59, %s9582_s17 }
 0x791   : > { %v2854_v42 = vpop.xlane.xlu1 %2853  ;;  %3597 = vrot.lane.b32.xlu0 %v10277_v46, %s9582_s17 }
 0x792   : > { %v2884_v22 = vsub.f32 %v11138_v4, %v2854_v42  ;;  %v14363_v42 = vld [vmem:[#allocation41_spill] sm:$0xff] }
 0x793   : > { %v2852_v0 = vpop.xlane.xlu0 %2851 }
 0x794   : > { %v2883_v31 = vsub.f32 %v11141_v32, %v2852_v0  ;;  %3599 = vrot.lane.b32.xlu1 %v14362_v53, %s9582_s17  ;;  %v2901_v15 = vmul.f32 1.442695, %v2884_v22  ;;  %v14368_v0 = vld [vmem:[#allocation77_spill] sm:$0xff] }
 0x795   : > { %3593 = vrot.lane.b32.xlu0 %v10294_v8, %s9582_s17 }
 0x796   : > { %v2899_v21 = vmul.f32 1.442695, %v2883_v31 }
 0x797   : > { %v2856_v50 = vpop.xlane.xlu1 %2855  ;;  %v2858_v9 = vpop.xlane.xlu0 %2857 }
 0x798   : > { %8905 = vpow2.f32 %v2899_v21  ;;  %v2885_v59 = vsub.f32 %v11146_v30, %v2856_v50  ;;  %v2886_v46 = vsub.f32 %v11144_v62, %v2858_v9  ;;  %3595 = vrot.lane.b32.xlu1 %v14363_v42, %s9582_s17 }
 0x799   : > { %8907 = vpow2.f32 %v2901_v15  ;;  %3589 = vrot.lane.b32.xlu0 %v10309_v56, %s9582_s17 }
 0x79a   : > { %v2903_v4 = vmul.f32 1.442695, %v2885_v59  ;;  %v2905_v32 = vmul.f32 1.442695, %v2886_v46  ;;  %v14369_v46 = vld [vmem:[#allocation51_spill] sm:$0xff] }
 0x79b   : > { %v2862_v22 = vpop.xlane.xlu1 %2861 }
 0x79c   : > { %8909 = vpow2.f32 %v2903_v4  ;;  %3591 = vrot.lane.b32.xlu1 %v10302_v6, %s9582_s17  ;;  %v2888_v8 = vsub.f32 %v11150_v52, %v2862_v22  ;;  %v14370_v4 = vld [vmem:[#allocation47_spill] sm:$0xff] }
 0x79d   : > { %8911 = vpow2.f32 %v2905_v32  ;;  %3585 = vrot.lane.b32.xlu0 %v10325_v60, %s9582_s17 }
 0x79e   : > { %v2909_v56 = vmul.f32 1.442695, %v2888_v8  ;;  %v14371_v8 = vld [vmem:[#allocation53_spill] sm:$0xff] }
 0x79f   : > { %v2860_v9 = vpop.xlane.xlu1 %2859  ;;  %v2864_v31 = vpop.xlane.xlu0 %2863 }
 0x7a0   : > { %v2887_v15 = vsub.f32 %v11152_v24, %v2860_v9  ;;  %v2889_v62 = vsub.f32 %v11157_v51, %v2864_v31  ;;  %3587 = vrot.lane.b32.xlu1 %v10317_v61, %s9582_s17  ;;  %v14372_v31 = vld [vmem:[#allocation50_spill] sm:$0xff] }
 0x7a1   : > { %3581 = vrot.lane.b32.xlu0 %v10341_v45, %s9582_s17 }
 0x7a2   : > { %v2907_v6 = vmul.f32 1.442695, %v2887_v15  ;;  %v2911_v30 = vmul.f32 1.442695, %v2889_v62 }
 0x7a3   : > { %v2866_v50 = vpop.xlane.xlu1 %2865 }
 0x7a4   : > { %8913 = vpow2.f32 %v2907_v6  ;;  %v2890_v52 = vsub.f32 %v11155_v26, %v2866_v50  ;;  %3583 = vrot.lane.b32.xlu1 %v10333_v47, %s9582_s17 }
 0x7a5   : > { %v11280_v60 = vpop.eup %8905  ;;  %8915 = vpow2.f32 %v2909_v56  ;;  %3577 = vrot.lane.b32.xlu0 %v10357_v43, %s9582_s17 }
 0x7a6   : > { %v11284_v61 = vpop.eup %8907  ;;  %8917 = vpow2.f32 %v2911_v30  ;;  %v2913_v24 = vmul.f32 1.442695, %v2890_v52  ;;  %8346 = vmatprep.mubr.f32.mxu1 %v11280_v60  ;;  %v14373_v30 = vld [vmem:[#allocation52_spill] sm:$0xff] }
 0x7a7   : > { %8347 = vmatmul.mubr.f32.vlgmr.msra.gmra.mxu1 %v11284_v61 }
 0x7a8   : > { %8919 = vpow2.f32 %v2913_v24  ;;  %8371 = vmatpush3.xpose.msk.msra.mxu1 %vm1421_vm0, %v11102_v55  ;;  %3579 = vrot.lane.b32.xlu1 %v10349_v40, %s9582_s17  ;;  %v3225_v55 = vpop.permute.xlu0 %3224 }
 0x7a9   : > { %v11292_v47 = vpop.eup %8909  ;;  %8372 = vmatprep.subr.msk.mxu1 %vm1421_vm0, %v11190_v27  ;;  %3573 = vrot.lane.b32.xlu0 %v10373_v12, %s9582_s17 }
 0x7aa   : > { %v11298_v45 = vpop.eup %8911  ;;  %8349 = vmatprep.mubr.f32.mxu1 %v11292_v47 }
 0x7ab   : > { %8350 = vmatmul.mubr.f32.gmra.mxu1 %v11298_v45 }
 0x7ac   : > { %8373 = vmatpush3.xpose.msk.msra.mxu1 %vm1421_vm0, %v11190_v27  ;;  %3575 = vrot.lane.b32.xlu1 %v10365_v20, %s9582_s17  ;;  %v14365_v27 = vld [vmem:[#allocation76_spill] sm:$0xff] }
 0x7ad   : > { %8374 = vmatprep.subr.msk.mxu1 %vm1421_vm0, %v11194_v1 }
 0x7b0   : > { %8375 = vmatpush3.xpose.msk.msra.mxu1 %vm1421_vm0, %v11194_v1 }
 0x7b1   : > { %v11310_v40 = vpop.eup %8913  ;;  %8376 = vmatprep.subr.msk.mxu1 %vm1421_vm0, %v11214_v34 }
 0x7b2   : > { %v11314_v43 = vpop.eup %8915  ;;  %8352 = vmatprep.mubr.f32.mxu1 %v11310_v40 }
 0x7b3   : > { %v11317_v12 = vpop.eup %8917  ;;  %8353 = vmatmul.mubr.f32.gmra.mxu1 %v11314_v43 }
 0x7b4   : > { %8377 = vmatpush3.xpose.msk.msra.mxu1 %vm1421_vm0, %v11214_v34  ;;  %8355 = vmatprep.mubr.f32.mxu1 %v11317_v12 }
 0x7b5   : > { %v11323_v20 = vpop.eup %8919  ;;  %8378 = vmatprep.subr.msk.mxu1 %vm1421_vm0, %v11200_v2 }
 0x7b7   : > { %8356 = vmatmul.mubr.f32.gmra.mxu1 %v11323_v20 }
 0x7b8   : > { %8379 = vmatpush3.xpose.msk.msra.mxu1 %vm1421_vm0, %v11200_v2 }
 0x7b9   : > { %8380 = vmatprep.subr.msk.mxu1 %vm1421_vm0, %v11224_v17 }
 0x7bc   : > { %8381 = vmatpush3.xpose.msk.msra.mxu1 %vm1421_vm0, %v11224_v17 }
 0x7bd   : > { %8382 = vmatprep.subr.msk.mxu1 %vm1421_vm0, %v11208_v41 }
 0x7c0   : > { %8383 = vmatpush3.xpose.msk.msra.mxu1 %vm1421_vm0, %v11208_v41  ;;  %v14366_v41 = vld [vmem:[#allocation45_spill] sm:$0xff] }
 0x7c1   : > { %8384 = vmatprep.subr.msk.mxu1 %vm1421_vm0, %v11234_v49 }
 0x7c4   : > { %8385 = vmatpush3.xpose.msk.msra.mxu1 %vm1421_vm0, %v11234_v49 }
 0x7c5   : > { %8386 = vmatprep.subr.msk.mxu1 %vm1421_vm0, %v11218_v29 }
 0x7c8   : > { %8387 = vmatpush3.xpose.msk.msra.mxu1 %vm1421_vm0, %v11218_v29  ;;  %2305 = vadd.xlane.f32.xlu0 %v10940_v25  ;;  %v3223_v25 = vpop.permute.xlu1 %3222 }
 0x7c9   : > { %8388 = vmatprep.subr.msk.mxu1 %vm1421_vm0, %v11244_v58 }
 0x7cc   : > { %8389 = vmatpush3.xpose.msk.msra.mxu1 %vm1421_vm0, %v11244_v58  ;;  %2309 = vadd.xlane.f32.xlu0 %v10952_v54 }
 0x7cd   : > { %8390 = vmatprep.subr.msk.mxu1 %vm1421_vm0, %v11228_v14 }
 0x7d0   : > { %8391 = vmatpush3.xpose.msk.msra.mxu1 %vm1421_vm0, %v11228_v14  ;;  %2313 = vadd.xlane.f32.xlu0 %v10974_v10 }
 0x7d1   : > { %2307 = vadd.xlane.f32.xlu1 %v10944_v37  ;;  %8392 = vmatprep.subr.msk.mxu1 %vm1421_vm0, %v11238_v7 }
 0x7d4   : > { %8393 = vmatpush3.xpose.msk.msra.mxu1 %vm1421_vm0, %v11238_v7  ;;  %2317 = vadd.xlane.f32.xlu0 %v10984_v48  ;;  %v2872_v54 = vpop.xlane.xlu0 %2871 }
 0x7d5   : > { %2311 = vadd.xlane.f32.xlu1 %v10958_v16  ;;  %8394 = vmatprep.subr.msk.mxu1 %vm1421_vm0, %v11248_v63  ;;  %v2893_v48 = vsub.f32 %v11172_v39, %v2872_v54 }
 0x7d8   : > { %8395 = vmatpush3.xpose.msk.msra.mxu1 %vm1421_vm0, %v11248_v63  ;;  %v2870_v10 = vpop.xlane.xlu1 %2869  ;;  %2321 = vadd.xlane.f32.xlu0 %v11062_v11  ;;  %v2878_v37 = vpop.xlane.xlu0 %2877 }
 0x7d9   : > { %2315 = vadd.xlane.f32.xlu1 %v10980_v35  ;;  %8396 = vmatprep.subr.msk.mxu1 %vm1421_vm0, %v3225_v55  ;;  %v2892_v58 = vsub.f32 %v11166_v28, %v2870_v10  ;;  %v2919_v35 = vmul.f32 1.442695, %v2893_v48 }
 0x7db   : > { %v2917_v11 = vmul.f32 1.442695, %v2892_v58 }
 0x7dc   : > { %8397 = vmatpush3.xpose.msk.msra.mxu1 %vm1421_vm0, %v3225_v55  ;;  %v2868_v16 = vpop.xlane.xlu1 %2867  ;;  %2325 = vadd.xlane.f32.xlu0 %v11067_v36  ;;  %v2882_v7 = vpop.xlane.xlu0 %2881 }
 0x7dd   : > { %v2891_v49 = vsub.f32 %v11168_v23, %v2868_v16  ;;  %2319 = vadd.xlane.f32.xlu1 %v10990_v44  ;;  %8398 = vmatprep.subr.msk.mxu1 %vm1421_vm0, %v3223_v25  ;;  %v2896_v44 = vsub.f32 %v11174_v13, %v2878_v37 }
 0x7df   : > { %v2915_v14 = vmul.f32 1.442695, %v2891_v49  ;;  %v2925_v28 = vmul.f32 1.442695, %v2896_v44 }
 0x7e0   : > { %8399 = vmatpush3.xpose.msk.msra.mxu1 %vm1421_vm0, %v3223_v25  ;;  %v2874_v17 = vpop.xlane.xlu1 %2873  ;;  %2329 = vadd.xlane.f32.xlu0 %v11074_v3  ;;  %v3221_v2 = vpop.permute.xlu0 %3220  ;;  %v14374_v25 = vld [vmem:[#allocation54_spill] sm:$0xff] }
 0x7e1   : > { %8921 = vpow2.f32 %v2915_v14  ;;  %v2894_v1 = vsub.f32 %v11170_v18, %v2874_v17  ;;  %2323 = vadd.xlane.f32.xlu1 %v11064_v33  ;;  %8400 = vmatprep.subr.msk.mxu1 %vm1421_vm0, %v3221_v2  ;;  %v2898_v33 = vsub.f32 %v11181_v38, %v2882_v7  ;;  %v14364_v18 = vld [vmem:[#allocation48_spill] sm:$0xff]  ;;  %v14375_v7 = vmov 0.0  }
 0x7e2   : > { %8923 = vpow2.f32 %v2917_v11 }
 0x7e3   : > { %8925 = vpow2.f32 %v2919_v35  ;;  %v2921_v36 = vmul.f32 1.442695, %v2894_v1 }
 0x7e4   : > { %8401 = vmatpush3.xpose.msk.msra.mxu1 %vm1421_vm0, %v3221_v2  ;;  %v2876_v26 = vpop.xlane.xlu1 %2875  ;;  %2333 = vadd.xlane.f32.xlu0 %v11080_v5  ;;  %v3191_v51 = vpop.permute.xlu0 %3190  ;;  %v2929_v5 = vmul.f32 1.442695, %v2898_v33 }
 0x7e5   : > { %8927 = vpow2.f32 %v2921_v36  ;;  %v2895_v3 = vsub.f32 %v11177_v19, %v2876_v26  ;;  %2327 = vadd.xlane.f32.xlu1 %v11071_v57  ;;  %v14367_v19 = vld [vmem:[#allocation49_spill] sm:$0xff] }
 0x7e7   : > { %v2923_v23 = vmul.f32 1.442695, %v2895_v3 }
 0x7e8   : > { %1745 = vadd.xlane.f32.xlu0 %v14364_v18  ;;  %v2880_v39 = vpop.xlane.xlu1 %2879  ;;  %v3195_v13 = vpop.permute.xlu0 %3194 }
 0x7e9   : > { %8929 = vpow2.f32 %v2923_v23  ;;  %2331 = vadd.xlane.f32.xlu1 %v14365_v27  ;;  %v2897_v34 = vsub.f32 %v14366_v41, %v2880_v39 }
 0x7ea   : > { %8931 = vpow2.f32 %v2925_v28 }
 0x7eb   : > { %v2927_v29 = vmul.f32 1.442695, %v2897_v34 }
 0x7ec   : > { %v3189_v63 = vpop.permute.xlu1 %3188  ;;  %1747 = vadd.xlane.f32.xlu0 %v14367_v19  ;;  %v3199_v57 = vpop.permute.xlu0 %3198 }
 0x7ed   : > { %8933 = vpow2.f32 %v2927_v29  ;;  %2335 = vadd.xlane.f32.xlu1 %v14368_v0 }
 0x7ee   : > { %v8922_v38 = vpop.eup %8921  ;;  %8935 = vpow2.f32 %v2929_v5 }
 0x7ef   : > { %v8924_v53 = vpop.eup %8923  ;;  %8358 = vmatprep.mubr.f32.mxu1 %v8922_v38 }
 0x7f0   : > { %v8926_v21 = vpop.eup %8925  ;;  %v3193_v59 = vpop.permute.xlu1 %3192  ;;  %1751 = vadd.xlane.f32.xlu0 %v14369_v46  ;;  %8359 = vmatmul.mubr.f32.gmra.mxu1 %v8924_v53 }
 0x7f1   : > { %v3203_v42 = vpop.permute.xlu0 %3202  ;;  %1743 = vadd.xlane.f32.xlu1 %v14370_v4  ;;  %8361 = vmatprep.mubr.f32.mxu1 %v8926_v21 }
 0x7f2   : > { %v8928_v32 = vpop.eup %8927 }
 0x7f4   : > { %v3197_v22 = vpop.permute.xlu1 %3196  ;;  %1755 = vadd.xlane.f32.xlu0 %v14371_v8  ;;  %8362 = vmatmul.mubr.f32.gmra.mxu1 %v8928_v32 }
 0x7f5   : > { %v3207_v9 = vpop.permute.xlu0 %3206  ;;  %1749 = vadd.xlane.f32.xlu1 %v14372_v31 }
 0x7f6   : > { %v8930_v15 = vpop.eup %8929 }
 0x7f7   : > { %v11398_v62 = vpop.eup %8931  ;;  %8364 = vmatprep.mubr.f32.mxu1 %v8930_v15 }
 0x7f8   : > { %v3201_v56 = vpop.permute.xlu1 %3200  ;;  %2931 = vadd.xlane.f32.xlu0 %v11280_v60  ;;  %8365 = vmatmul.mubr.f32.gmra.mxu1 %v11398_v62 }
 0x7f9   : > { %v3211_v6 = vpop.permute.xlu0 %3210  ;;  %1753 = vadd.xlane.f32.xlu1 %v14373_v30 }
 0x7fa   : > { %v8934_v50 = vpop.eup %8933 }
 0x7fb   : > { %v8936_v52 = vpop.eup %8935  ;;  %8367 = vmatprep.mubr.f32.mxu1 %v8934_v50 }
 0x7fc   : > { %v3205_v24 = vpop.permute.xlu1 %3204  ;;  %2935 = vadd.xlane.f32.xlu0 %v11292_v47  ;;  %8368 = vmatmul.mubr.f32.gmra.mxu1 %v8936_v52 }
 0x7fd   : > { %v3215_v55 = vpop.permute.xlu0 %3214  ;;  %1757 = vadd.xlane.f32.xlu1 %v14374_v25  ;;  %8402 = vmatprep.mubr.msk.f32.mxu1 %vm1421_vm0, %v3189_v63 }
 0x800   : > { %v3209_v54 = vpop.permute.xlu1 %3208  ;;  %2939 = vadd.xlane.f32.xlu0 %v11310_v40  ;;  %8403 = vmatmul.mubr.msk.f32.vlgmr.msra.gmra.mxu1 %vm1421_vm0, %v3191_v51 }
 0x801   : > { %v3219_v60 = vpop.permute.xlu0 %3218  ;;  %2933 = vadd.xlane.f32.xlu1 %v11284_v61  ;;  %8405 = vmatprep.mubr.msk.f32.mxu1 %vm1421_vm0, %v3193_v59 }
 0x804   : > { %v3213_v10 = vpop.permute.xlu1 %3212  ;;  %2943 = vadd.xlane.f32.xlu0 %v11317_v12  ;;  %8406 = vmatmul.mubr.msk.f32.gmra.mxu1 %vm1421_vm0, %v3195_v13 }
 0x805   : > { %v3602_v47 = vpop.permute.xlu0 %3601  ;;  %2937 = vadd.xlane.f32.xlu1 %v11298_v45  ;;  %8408 = vmatprep.mubr.msk.f32.mxu1 %vm1421_vm0, %v3197_v22 }
 0x808   : > { %v3217_v37 = vpop.permute.xlu1 %3216  ;;  %2947 = vadd.xlane.f32.xlu0 %v8922_v38  ;;  %8409 = vmatmul.mubr.msk.f32.gmra.mxu1 %vm1421_vm0, %v3199_v57 }
 0x809   : > { %v3598_v40 = vpop.permute.xlu0 %3597  ;;  %2941 = vadd.xlane.f32.xlu1 %v11314_v43  ;;  %8411 = vmatprep.mubr.msk.f32.mxu1 %vm1421_vm0, %v3201_v56 }
 0x80c   : > { %v3604_v61 = vpop.permute.xlu1 %3603  ;;  %2951 = vadd.xlane.f32.xlu0 %v8926_v21  ;;  %8412 = vmatmul.mubr.msk.f32.gmra.mxu1 %vm1421_vm0, %v3203_v42 }
 0x80d   : > { %2945 = vadd.xlane.f32.xlu1 %v11323_v20  ;;  %8414 = vmatprep.mubr.msk.f32.mxu1 %vm1421_vm0, %v3205_v24  ;;  %v3594_v45 = vpop.permute.xlu0 %3593 }
 0x80e   : > { %8426 = vmatprep.subr.mxu0 %v3604_v61 }
 0x80f   : > { %8427 = vmatpush3.msra.mxu0 %v3604_v61 }
 0x810   : > { %8428 = vmatprep.subr.mxu0 %v3602_v47  ;;  %v3600_v12 = vpop.permute.xlu1 %3599  ;;  %2955 = vadd.xlane.f32.xlu0 %v8930_v15 }
 0x811   : > { %2949 = vadd.xlane.f32.xlu1 %v8924_v53  ;;  %8415 = vmatmul.mubr.msk.f32.gmra.mxu1 %vm1421_vm0, %v3207_v9  ;;  %v3590_v43 = vpop.permute.xlu0 %3589 }
 0x812   : > { %8429 = vmatpush3.msra.mxu0 %v3602_v47  ;;  %8417 = vmatprep.mubr.msk.f32.mxu1 %vm1421_vm0, %v3209_v54 }
 0x813   : > { %8430 = vmatprep.subr.mxu0 %v3600_v12 }
 0x814   : > { %8431 = vmatpush3.msra.mxu0 %v3600_v12  ;;  %v3596_v58 = vpop.permute.xlu1 %3595  ;;  %2961 = vadd.xlane.f32.xlu0 %v8936_v52 }
 0x815   : > { %8432 = vmatprep.subr.mxu0 %v3598_v40  ;;  %2953 = vadd.xlane.f32.xlu1 %v8928_v32  ;;  %v3586_v48 = vpop.permute.xlu0 %3585 }
 0x816   : > { %8418 = vmatmul.mubr.msk.f32.gmra.mxu1 %vm1421_vm0, %v3211_v6  ;;  %8433 = vmatpush3.msra.mxu0 %v3598_v40 }
 0x817   : > { %8420 = vmatprep.mubr.msk.f32.mxu1 %vm1421_vm0, %v3213_v10  ;;  %8434 = vmatprep.subr.mxu0 %v3596_v58 }
 0x818   : > { %8435 = vmatpush3.msra.mxu0 %v3596_v58  ;;  %v3592_v20 = vpop.permute.xlu1 %3591  ;;  %2959 = vadd.xlane.f32.xlu0 %v8934_v50 }
 0x819   : > { %8436 = vmatprep.subr.mxu0 %v3594_v45  ;;  %2957 = vadd.xlane.f32.xlu1 %v11398_v62  ;;  %v3582_v49 = vpop.permute.xlu0 %3581 }
 0x81a   : > { %8421 = vmatmul.mubr.msk.f32.gmra.mxu1 %vm1421_vm0, %v3215_v55  ;;  %8437 = vmatpush3.msra.mxu0 %v3594_v45 }
 0x81b   : > { %8423 = vmatprep.mubr.msk.f32.mxu1 %vm1421_vm0, %v3217_v37  ;;  %8438 = vmatprep.subr.mxu0 %v3592_v20 }
 0x81c   : > { %8439 = vmatpush3.msra.mxu0 %v3592_v20  ;;  %v3588_v16 = vpop.permute.xlu1 %3587 }
 0x81d   : > { %8440 = vmatprep.subr.mxu0 %v3590_v43  ;;  %v3578_v14 = vpop.permute.xlu0 %3577 }
 0x81e   : > { %8424 = vmatmul.mubr.msk.f32.gmra.mxu1 %vm1421_vm0, %v3219_v60  ;;  %8441 = vmatpush3.msra.mxu0 %v3590_v43 }
 0x81f   : > { %8442 = vmatprep.subr.mxu0 %v3588_v16  ;;  %4598 = vmatprep.mubr.f32.mxu1 %v14375_v7 }
 0x820   : > { %8443 = vmatpush3.msra.mxu0 %v3588_v16  ;;  %v3584_v11 = vpop.permute.xlu1 %3583 }
 0x821   : > { %8444 = vmatprep.subr.mxu0 %v3586_v48  ;;  %v3574_v2 = vpop.permute.xlu0 %3573 }
 0x822   : > { %8445 = vmatpush3.msra.mxu0 %v3586_v48 }
 0x823   : > { %8446 = vmatprep.subr.mxu0 %v3584_v11 }
 0x824   : > { %8447 = vmatpush3.msra.mxu0 %v3584_v11  ;;  %v3580_v35 = vpop.permute.xlu1 %3579 }
 0x825   : > { %8448 = vmatprep.subr.mxu0 %v3582_v49 }
 0x826   : > { %8449 = vmatpush3.msra.mxu0 %v3582_v49 }
 0x827   : > { %8450 = vmatprep.subr.mxu0 %v3580_v35 }
 0x828   : > { %8451 = vmatpush3.msra.mxu0 %v3580_v35  ;;  %v3576_v17 = vpop.permute.xlu1 %3575 }
 0x829   : > { %8452 = vmatprep.subr.mxu0 %v3578_v14 }
 0x82a   : > { %8453 = vmatpush3.msra.mxu0 %v3578_v14 }
 0x82b   : > { %8454 = vmatprep.subr.mxu0 %v3576_v17 }
 0x82c   : > { %8455 = vmatpush3.msra.mxu0 %v3576_v17 }
 0x82d   : > { %8456 = vmatprep.subr.mxu0 %v3574_v2 }
 0x82e   : > { %8457 = vmatpush3.msra.mxu0 %v3574_v2 }
 0x851   : > { %v11429_v1 = vpop.xlane.xlu0 %2305 }
 0x855   : > { %v11431_v44 = vpop.xlane.xlu0 %2309 }
 0x859   : > { %v11433_v36 = vpop.xlane.xlu0 %2313 }
 0x85a   : > { %v11435_v26 = vpop.xlane.xlu1 %2307 }
 0x85d   : > { %v11437_v51 = vpop.xlane.xlu0 %2317 }
 0x85e   : > { %v11439_v3 = vpop.xlane.xlu1 %2311 }
 0x861   : > { %v11441_v28 = vpop.xlane.xlu0 %2321 }
 0x862   : > { %v11443_v33 = vpop.xlane.xlu1 %2315 }
 0x865   : > { %v11445_v23 = vpop.xlane.xlu0 %2325 }
 0x866   : > { %v11447_v18 = vpop.xlane.xlu1 %2319 }
 0x867   : > { %v11479_v42 = vpop.f32.mrf.mxu1 }
 0x869   : > { %v11449_v39 = vpop.xlane.xlu0 %2329  ;;  %v11483_v22 = vpop.f32.mrf.mxu1 }
 0x86a   : > { %v11451_v13 = vpop.xlane.xlu1 %2323 }
 0x86b   : > { %v8351_v31 = vpop.f32.mrf.mxu1 }
 0x86d   : > { %v11453_v27 = vpop.xlane.xlu0 %2333  ;;  %v3087_v62 = vpop.f32.mrf.mxu1 }
 0x86e   : > { %v11455_v41 = vpop.xlane.xlu1 %2327 }
 0x871   : > { %v11457_v34 = vpop.xlane.xlu0 %1745 }
 0x872   : > { %v11459_v5 = vpop.xlane.xlu1 %2331 }
 0x873   : > { %v8354_v30 = vpop.f32.mrf.mxu1 }
 0x875   : > { %v11461_v29 = vpop.xlane.xlu0 %1747  ;;  %v3097_v24 = vpop.f32.mrf.mxu1 }
 0x876   : > { %v11463_v63 = vpop.xlane.xlu1 %2335 }
 0x877   : > { %v8357_v40 = vpop.f32.mrf.mxu1 }
 0x879   : > { %v11465_v19 = vpop.xlane.xlu0 %1751  ;;  %v3107_v48 = vpop.f32.mrf.mxu1 }
 0x87a   : > { %v11467_v57 = vpop.xlane.xlu1 %1743 }
 0x87d   : > { %v11469_v0 = vpop.xlane.xlu0 %1755 }
 0x87e   : > { %v11471_v38 = vpop.xlane.xlu1 %1749 }
 0x881   : > { %v11473_v53 = vpop.xlane.xlu0 %2931 }
 0x882   : > { %v11475_v21 = vpop.xlane.xlu1 %1753 }
 0x885   : > { %v2936_v59 = vpop.xlane.xlu0 %2935 }
 0x886   : > { %v11477_v46 = vpop.xlane.xlu1 %1757  ;;  %8937 = vrcp.f32 %v2936_v59 }
 0x889   : > { %v2940_v32 = vpop.xlane.xlu0 %2939 }
 0x88a   : > { %v11481_v4 = vpop.xlane.xlu1 %2933 }
 0x88d   : > { %v2944_v9 = vpop.xlane.xlu0 %2943 }
 0x88e   : > { %v2938_v8 = vpop.xlane.xlu1 %2937 }
 0x88f   : > { %8939 = vrcp.f32 %v2938_v8 }
 0x890   : > { %8941 = vrcp.f32 %v2940_v32 }
 0x891   : > { %v2948_v56 = vpop.xlane.xlu0 %2947 }
 0x892   : > { %v2942_v15 = vpop.xlane.xlu1 %2941 }
 0x893   : > { %8943 = vrcp.f32 %v2942_v15  ;;  %v8938_v50 = vpop.eup %8937 }
 0x894   : > { %8945 = vrcp.f32 %v2944_v9  ;;  %v11485_v25 = vmul.f32 %v8938_v50, %v3087_v62 }
 0x895   : > { %v2952_v55 = vpop.xlane.xlu0 %2951 }
 0x896   : > { %v2946_v6 = vpop.xlane.xlu1 %2945 }
 0x897   : > { %8947 = vrcp.f32 %v2946_v6 }
 0x898   : > { %8949 = vrcp.f32 %v2948_v56 }
 0x899   : > { %v2956_v43 = vpop.xlane.xlu0 %2955 }
 0x89a   : > { %v2950_v10 = vpop.xlane.xlu1 %2949 }
 0x89b   : > { %8951 = vrcp.f32 %v2950_v10 }
 0x89c   : > { %v8940_v52 = vpop.eup %8939  ;;  %8953 = vrcp.f32 %v2952_v55 }
 0x89d   : > { %v11487_v54 = vmul.f32 %v8940_v52, %v8351_v31  ;;  %v8942_v60 = vpop.eup %8941  ;;  %v2962_v14 = vpop.xlane.xlu0 %2961 }
 0x89e   : > { %v11491_v61 = vmul.f32 %v8942_v60, %v3097_v24  ;;  %v2954_v16 = vpop.xlane.xlu1 %2953 }
 0x89f   : > { %v8704_v47 = vpack.i.bf16 %v11487_v54, %v11485_v25  ;;  %8955 = vrcp.f32 %v2954_v16  ;;  %v14377_v16 = vld [vmem:[#allocation79_spill] sm:$0xff] }
 0x8a0   : > { %v8944_v37 = vpop.eup %8943  ;;  %8957 = vrcp.f32 %v2956_v43 }
 0x8a1   : > { %v11493_v45 = vmul.f32 %v8944_v37, %v8354_v30  ;;  %v8946_v12 = vpop.eup %8945  ;;  %v2960_v2 = vpop.xlane.xlu0 %2959 }
 0x8a2   : > { %v11497_v49 = vmul.f32 %v8946_v12, %v3107_v48  ;;  %v2958_v17 = vpop.xlane.xlu1 %2957 }
 0x8a3   : > { %v8714_v58 = vpack.i.bf16 %v11493_v45, %v11491_v61  ;;  %8959 = vrcp.f32 %v2958_v17 }
 0x8a4   : > { %v8948_v20 = vpop.eup %8947  ;;  %8961 = vrcp.f32 %v2962_v14 }
 0x8a5   : > { %v11499_v11 = vmul.f32 %v8948_v20, %v8357_v40  ;;  %v8950_v32 = vpop.eup %8949  ;;  %8963 = vrcp.f32 %v2960_v2 }
 0x8a6   : > { %8965 = vrcp.f32 %v11481_v4 }
 0x8a7   : > { %8967 = vrcp.f32 %v11473_v53 }
 0x8a8   : > { %v8952_v8 = vpop.eup %8951  ;;  %8969 = vrcp.f32 %v11435_v26 }
 0x8a9   : > { %v8954_v56 = vpop.eup %8953  ;;  %8971 = vrcp.f32 %v11429_v1 }
 0x8aa   : > { %8973 = vrcp.f32 %v11439_v3  ;;  %v14383_v3 = vld [vmem:[#allocation58_spill] sm:$0xff] }
 0x8ab   : > { %8975 = vrcp.f32 %v11431_v44 }
 0x8ac   : > { %v8956_v30 = vpop.eup %8955  ;;  %8977 = vrcp.f32 %v11443_v33 }
 0x8ad   : > { %v8958_v60 = vpop.eup %8957  ;;  %8979 = vrcp.f32 %v11433_v36 }
 0x8ae   : > { %8981 = vrcp.f32 %v11457_v34 }
 0x8af   : > { %8983 = vrcp.f32 %v11467_v57 }
 0x8b0   : > { %v8360_v59 = vpop.f32.mrf.mxu1  ;;  %v8960_v37 = vpop.eup %8959 }
 0x8b1   : > { %v11503_v31 = vmul.f32 %v8952_v8, %v8360_v59  ;;  %v8962_v20 = vpop.eup %8961 }
 0x8b2   : > { %v3117_v9 = vpop.f32.mrf.mxu1  ;;  %v8964_v17 = vpop.eup %8963 }
 0x8b3   : > { %v11505_v15 = vmul.f32 %v8950_v32, %v3117_v9  ;;  %v8966_v4 = vpop.eup %8965 }
 0x8b4   : > { %v8363_v62 = vpop.f32.mrf.mxu1  ;;  %v3159_v53 = vmul.f32 %v8966_v4, %v11479_v42  ;;  %v14378_v42 = vld [vmem:[#allocation56_spill] sm:$0xff]  ;;  %v14379_v4 = vld [vmem:[#allocation55_spill] sm:$0xff] }
 0x8b5   : > { %v11509_v52 = vmul.f32 %v8956_v30, %v8363_v62 }
 0x8b6   : > { %v3127_v50 = vpop.f32.mrf.mxu1 }
 0x8b7   : > { %v11511_v24 = vmul.f32 %v8954_v56, %v3127_v50 }
 0x8b8   : > { %v8366_v55 = vpop.f32.mrf.mxu1 }
 0x8b9   : > { %v11515_v12 = vmul.f32 %v8960_v37, %v8366_v55  ;;  %v8968_v37 = vpop.eup %8967 }
 0x8ba   : > { %v3137_v40 = vpop.f32.mrf.mxu1 }
 0x8bb   : > { %v11517_v43 = vmul.f32 %v8958_v60, %v3137_v40  ;;  %v3157_v40 = vmul.f32 %v8968_v37, %v11483_v22 }
 0x8bc   : > { %v8369_v48 = vpop.f32.mrf.mxu1 }
 0x8bd   : > { %v11521_v14 = vmul.f32 %v8962_v20, %v8369_v48  ;;  %v8970_v20 = vpop.eup %8969  ;;  %v8694_v48 = vpack.i.bf16 %v3159_v53, %v3157_v40 }
 0x8be   : > { %v3147_v2 = vpop.f32.mrf.mxu1 }
 0x8bf   : > { %v11523_v59 = vmul.f32 %v8964_v17, %v3147_v2  ;;  %v8972_v17 = vpop.eup %8971  ;;  %v14376_v2 = vld [vmem:[#allocation78_spill] sm:$0xff] }
 0x8c0   : > { %v11525_v32 = vpop.f32.mrf.mxu1  ;;  %v2549_v8 = vmul.f32 %v8970_v20, %v14376_v2  ;;  %v2547_v10 = vmul.f32 %v8972_v17, %v14377_v16  ;;  %v8974_v53 = vpop.eup %8973  ;;  %v14380_v20 = vld [vmem:[#allocation80_spill] sm:$0xff]  ;;  %v14381_v17 = vld [vmem:[#allocation81_spill] sm:$0xff] }
 0x8c1   : > { %3463 = vmax.xlane.f32.xlu1 %v11525_v32  ;;  %v8976_v40 = vpop.eup %8975 }
 0x8c2   : > { %v11530_v9 = vpop.f32.mrf.mxu1  ;;  %v8689_v26 = vpack.i.bf16 %v2549_v8, %v2547_v10  ;;  %v2551_v2 = vmul.f32 %v8976_v40, %v14381_v17  ;;  %v8978_v57 = vpop.eup %8977 }
 0x8c3   : > { %3461 = vmax.xlane.f32.xlu0 %v11530_v9 }
 0x8c4   : > { %v11533_v62 = vpop.f32.mrf.mxu1 }
 0x8c5   : > { %3467 = vmax.xlane.f32.xlu1 %v11533_v62 }
 0x8c6   : > { %v11536_v56 = vpop.f32.mrf.mxu1 }
 0x8c7   : > { %3465 = vmax.xlane.f32.xlu0 %v11536_v56 }
 0x8c8   : > { %v11540_v30 = vpop.f32.mrf.mxu1 }
 0x8c9   : > { %3471 = vmax.xlane.f32.xlu1 %v11540_v30 }
 0x8ca   : > { %v11544_v50 = vpop.f32.mrf.mxu1 }
 0x8cb   : > { %3469 = vmax.xlane.f32.xlu0 %v11544_v50 }
 0x8cc   : > { %v11547_v55 = vpop.f32.mrf.mxu1 }
 0x8cd   : > { %3475 = vmax.xlane.f32.xlu1 %v11547_v55 }
 0x8ce   : > { %v11550_v60 = vpop.f32.mrf.mxu1 }
 0x8cf   : > { %3473 = vmax.xlane.f32.xlu0 %v11550_v60 }
 0x8d1   : > { %v11561_v6 = vpop.f32.mrf.mxu1 }
 0x8d3   : > { %v11563_v1 = vpop.f32.mrf.mxu1 }
 0x8d6   : > { %v11565_v35 = vpop.f32.mrf.mxu1 }
 0x8d8   : > { %v11568_v22 = vpop.f32.mrf.mxu1 }
 0x8da   : > { %v11572_v37 = vpop.f32.mrf.mxu1 }
 0x8dc   : > { %v11576_v10 = vpop.f32.mrf.mxu1 }
 0x8de   : > { %8695 = vrot.lane.b32.xlu1 %v8694_v48, %s9581_s15  ;;  %v11580_v16 = vpop.f32.mrf.mxu1  ;;  %v2553_v48 = vmul.f32 %v8974_v53, %v14380_v20 }
 0x8e0   : > { %v11584_v8 = vpop.f32.mrf.mxu1 }
 0x8e5   : > { %8690 = vrot.lane.b32.xlu0 %v8689_v26, %s9582_s17  ;;  %v8699_v26 = vpack.i.bf16 %v2553_v48, %v2551_v2 }
 0x902   : > { %1761 = vadd.xlane.f32.xlu1 %v14378_v42  ;;  %v14382_v42 = vld [vmem:[#allocation57_spill] sm:$0xff] }
 0x904   : > { %1759 = vadd.xlane.f32.xlu0 %v14379_v4 }
 0x906   : > { %3477 = vmax.xlane.f32.xlu1 %v11563_v1 }
 0x908   : > { %3479 = vmax.xlane.f32.xlu0 %v11561_v6 }
 0x90a   : > { %3483 = vmax.xlane.f32.xlu1 %v11565_v35 }
 0x90c   : > { %3481 = vmax.xlane.f32.xlu0 %v11568_v22 }
 0x90e   : > { %3487 = vmax.xlane.f32.xlu1 %v11572_v37 }
 0x910   : > { %3485 = vmax.xlane.f32.xlu0 %v11576_v10 }
 0x912   : > { %3491 = vmax.xlane.f32.xlu1 %v11580_v16 }
 0x914   : > { %3489 = vmax.xlane.f32.xlu0 %v11584_v8 }
 0x923   : > { %8705 = vrot.lane.b32.xlu1 %v8704_v47, %s9581_s15 }
 0x92a   : > { %8700 = vrot.lane.b32.xlu0 %v8699_v26, %s9582_s17 }
 0x947   : > { %1763 = vadd.xlane.f32.xlu1 %v14382_v42 }
 0x949   : > { %1765 = vadd.xlane.f32.xlu0 %v14383_v3  ;;  %v8980_v3 = vpop.eup %8979 }
 0x94a   : > { %v3464_v44 = vpop.xlane.xlu1 %3463 }
 0x94b   : > { %v3494_v25 = vsub.f32 %v11525_v32, %v3464_v44 }
 0x94c   : > { %v3462_v54 = vpop.xlane.xlu0 %3461 }
 0x94d   : > { %v3493_v47 = vsub.f32 %v11530_v9, %v3462_v54  ;;  %v3511_v4 = vmul.f32 1.442695, %v3494_v25  ;;  %v8982_v25 = vpop.eup %8981 }
 0x94e   : > { %v3468_v53 = vpop.xlane.xlu1 %3467 }
 0x94f   : > { %v3509_v40 = vmul.f32 1.442695, %v3493_v47  ;;  %v3496_v20 = vsub.f32 %v11533_v62, %v3468_v53  ;;  %v8984_v47 = vpop.eup %8983  ;;  %v14385_v53 = vld [vmem:[#allocation83_spill] sm:$0xff] }
 0x950   : > { %v3466_v33 = vpop.xlane.xlu0 %3465 }
 0x951   : > { %8985 = vpow2.f32 %v3509_v40  ;;  %v3495_v48 = vsub.f32 %v11536_v56, %v3466_v33  ;;  %v3515_v36 = vmul.f32 1.442695, %v3496_v20  ;;  %v2555_v40 = vmul.f32 %v8980_v3, %v14385_v53 }
 0x952   : > { %8987 = vpow2.f32 %v3511_v4  ;;  %v3472_v17 = vpop.xlane.xlu1 %3471 }
 0x953   : > { %v3513_v34 = vmul.f32 1.442695, %v3495_v48  ;;  %v3498_v32 = vsub.f32 %v11540_v30, %v3472_v17  ;;  %v14384_v30 = vld [vmem:[#allocation82_spill] sm:$0xff] }
 0x954   : > { %v3470_v2 = vpop.xlane.xlu0 %3469  ;;  %v2557_v54 = vmul.f32 %v8978_v57, %v14384_v30 }
 0x955   : > { %8989 = vpow2.f32 %v3513_v34  ;;  %v3497_v9 = vsub.f32 %v11544_v50, %v3470_v2  ;;  %v3519_v26 = vmul.f32 1.442695, %v3498_v32  ;;  %v14387_v34 = vld [vmem:[#allocation61_spill] sm:$0xff] }
 0x956   : > { %8991 = vpow2.f32 %v3515_v36  ;;  %v3476_v42 = vpop.xlane.xlu1 %3475  ;;  %v8709_v17 = vpack.i.bf16 %v2557_v54, %v2555_v40  ;;  %v1921_v61 = vmul.f32 %v8984_v47, %v14387_v34  ;;  %v14388_v47 = vld [vmem:[#allocation59_spill] sm:$0xff] }
 0x957   : > { %v3517_v62 = vmul.f32 1.442695, %v3497_v9  ;;  %v3500_v44 = vsub.f32 %v11547_v55, %v3476_v42  ;;  %v14386_v55 = vld [vmem:[#allocation60_spill] sm:$0xff] }
 0x958   : > { %8715 = vrot.lane.b32.xlu1 %v8714_v58, %s9581_s15  ;;  %v3474_v56 = vpop.xlane.xlu0 %3473  ;;  %v1923_v48 = vmul.f32 %v8982_v25, %v14386_v55 }
 0x959   : > { %8993 = vpow2.f32 %v3517_v62  ;;  %v3499_v50 = vsub.f32 %v11550_v60, %v3474_v56  ;;  %v3523_v4 = vmul.f32 1.442695, %v3500_v44 }
 0x95a   : > { %8995 = vpow2.f32 %v3519_v26  ;;  %v8696_v33 = vpop.permute.xlu1 %8695 }
 0x95b   : > { %v3521_v20 = vmul.f32 1.442695, %v3499_v50  ;;  %v8698_v2 = vunpack.i.h.bf16 %v8696_v33  ;;  %v8697_v60 = vunpack.i.l.bf16 %v8696_v33  ;;  %v14389_v50 = vld [vmem:[#allocation33_spill] sm:$0xff] }
 0x95c   : > { %v8691_v36 = vpop.permute.xlu0 %8690 }
 0x95d   : > { %8997 = vpow2.f32 %v3521_v20  ;;  %v8693_v45 = vunpack.i.h.bf16 %v8691_v36  ;;  %v8692_v58 = vunpack.i.l.bf16 %v8691_v36 }
 0x95e   : > { %v8986_v32 = vpop.eup %8985  ;;  %8999 = vpow2.f32 %v3523_v4 }
 0x95f   : > { %v8988_v57 = vpop.eup %8987  ;;  %v3991_v9 = vsel %vm1421_vm0, %v1923_v48, %v8693_v45  ;;  %8710 = vrot.lane.b32.xlu0 %v8709_v17, %s9582_s17  ;;  %8458 = vmatprep.mubr.f32.mxu0 %v8986_v32  ;;  %v3990_v26 = vsel %vm1421_vm0, %v1921_v61, %v8692_v58  ;;  %9001 = vrcp.f32 %v11447_v18  ;;  %v14390_v48 = vpack.i.bf16 %v11499_v11, %v11497_v49  ;;  %v14391_v17 = vld [vmem:[#allocation84_spill] sm:$0xff]  ;;  %v14392_v58 = vld [vmem:[#allocation85_spill] sm:$0xff] }
 0x960   : > { %8459 = vmatmul.mubr.f32.vlgmr.msra.gmra.mxu0 %v8988_v57  ;;  %v11622_v42 = vsel %vm4006_vm1, %v3990_v26, %v8697_v60  ;;  %v11625_v3 = vsel %vm4006_vm1, %v3991_v9, %v8698_v2  ;;  %9003 = vrcp.f32 %v11437_v51 }
 0x961   : > { %9005 = vrcp.f32 %v11461_v29 }
 0x962   : > { %v11627_v62 = vpop.eup %8989  ;;  %9007 = vrcp.f32 %v11471_v38 }
 0x963   : > { %v11629_v44 = vpop.eup %8991  ;;  %8461 = vmatprep.mubr.f32.mxu0 %v11627_v62 }
 0x964   : > { %8462 = vmatmul.mubr.f32.gmra.mxu0 %v11629_v44 }
 0x966   : > { %v11633_v25 = vpop.eup %8993 }
 0x967   : > { %v11635_v56 = vpop.eup %8995  ;;  %8464 = vmatprep.mubr.f32.mxu0 %v11633_v25 }
 0x968   : > { %8465 = vmatmul.mubr.f32.gmra.mxu0 %v11635_v56 }
 0x96a   : > { %v11639_v30 = vpop.eup %8997 }
 0x96b   : > { %v11641_v54 = vpop.eup %8999  ;;  %8467 = vmatprep.mubr.f32.mxu0 %v11639_v30 }
 0x96c   : > { %8468 = vmatmul.mubr.f32.gmra.mxu0 %v11641_v54  ;;  %v9002_v40 = vpop.eup %9001 }
 0x96d   : > { %v9004_v55 = vpop.eup %9003  ;;  %v2561_v34 = vmul.f32 %v9002_v40, %v14391_v17 }
 0x96e   : > { %v2559_v29 = vmul.f32 %v9004_v55, %v14392_v58 }
 0x970   : > { %v8719_v11 = vpack.i.bf16 %v2561_v34, %v2559_v29 }
 0x97c   : > { %1769 = vadd.xlane.f32.xlu1 %v14388_v47 }
 0x97e   : > { %1767 = vadd.xlane.f32.xlu0 %v14389_v50 }
 0x980   : > { %3543 = vadd.xlane.f32.xlu1 %v8988_v57 }
 0x982   : > { %3541 = vadd.xlane.f32.xlu0 %v8986_v32 }
 0x98b   : > { %v11649_v4 = vpop.xlane.xlu1 %1761 }
 0x98d   : > { %v11651_v53 = vpop.xlane.xlu0 %1759 }
 0x98f   : > { %v3478_v20 = vpop.xlane.xlu1 %3477 }
 0x990   : > { %v3501_v33 = vsub.f32 %v11563_v1, %v3478_v20 }
 0x991   : > { %8725 = vrot.lane.b32.xlu1 %v14390_v48, %s9581_s15  ;;  %v3480_v18 = vpop.xlane.xlu0 %3479 }
 0x992   : > { %v3525_v51 = vmul.f32 1.442695, %v3501_v33  ;;  %v3502_v36 = vsub.f32 %v11561_v6, %v3480_v18 }
 0x993   : > { %v3484_v61 = vpop.xlane.xlu1 %3483 }
 0x994   : > { %9009 = vpow2.f32 %v3525_v51  ;;  %v3527_v45 = vmul.f32 1.442695, %v3502_v36  ;;  %v3504_v1 = vsub.f32 %v11565_v35, %v3484_v61  ;;  %v14393_v36 = vld [vmem:[#allocation63_spill] sm:$0xff]  ;;  %v14394_v61 = vld [vmem:[#allocation62_spill] sm:$0xff] }
 0x995   : > { %v3482_v32 = vpop.xlane.xlu0 %3481 }
 0x996   : > { %9011 = vpow2.f32 %v3527_v45  ;;  %v3503_v49 = vsub.f32 %v11568_v22, %v3482_v32  ;;  %v3531_v2 = vmul.f32 1.442695, %v3504_v1  ;;  %v9006_v22 = vpop.eup %9005 }
 0x997   : > { %v3488_v60 = vpop.xlane.xlu1 %3487  ;;  %v9008_v33 = vpop.eup %9007 }
 0x998   : > { %v3529_v38 = vmul.f32 1.442695, %v3503_v49  ;;  %v3506_v57 = vsub.f32 %v11572_v37, %v3488_v60  ;;  %8720 = vrot.lane.b32.xlu0 %v8719_v11, %s9582_s17 }
 0x999   : > { %v3486_v6 = vpop.xlane.xlu0 %3485 }
 0x99a   : > { %9013 = vpow2.f32 %v3529_v38  ;;  %v3505_v9 = vsub.f32 %v11576_v10, %v3486_v6  ;;  %v3535_v35 = vmul.f32 1.442695, %v3506_v57  ;;  %v1925_v10 = vmul.f32 %v9006_v22, %v14393_v36  ;;  %v672_v36 = vld [vmem:[#allocation10 + $0x58] sm:$0xff] }
 0x99b   : > { %9015 = vpow2.f32 %v3531_v2  ;;  %v3492_v26 = vpop.xlane.xlu1 %3491 }
 0x99c   : > { %v3533_v47 = vmul.f32 1.442695, %v3505_v9  ;;  %v3508_v50 = vsub.f32 %v11580_v16, %v3492_v26  ;;  %v1927_v16 = vmul.f32 %v9008_v33, %v14394_v61  ;;  %v14395_v26 = vld [vmem:[#allocation65_spill] sm:$0xff] }
 0x99d   : > { %v3490_v40 = vpop.xlane.xlu0 %3489 }
 0x99e   : > { %9017 = vpow2.f32 %v3533_v47  ;;  %v3507_v20 = vsub.f32 %v11584_v8, %v3490_v40  ;;  %v3539_v37 = vmul.f32 1.442695, %v3508_v50 }
 0x99f   : > { %9019 = vpow2.f32 %v3535_v35  ;;  %v8706_v48 = vpop.permute.xlu1 %8705 }
 0x9a0   : > { %v3537_v55 = vmul.f32 1.442695, %v3507_v20  ;;  %v8708_v1 = vunpack.i.h.bf16 %v8706_v48  ;;  %v8707_v58 = vunpack.i.l.bf16 %v8706_v48  ;;  %v675_v48 = vld [vmem:[#allocation10 + $0x70] sm:$0xff] }
 0x9a1   : > { %v9010_v18 = vpop.eup %9009  ;;  %v8701_v51 = vpop.permute.xlu0 %8700 }
 0x9a2   : > { %9021 = vpow2.f32 %v3537_v55  ;;  %v8703_v17 = vunpack.i.h.bf16 %v8701_v51  ;;  %v8702_v34 = vunpack.i.l.bf16 %v8701_v51  ;;  %8470 = vmatprep.mubr.f32.mxu0 %v9010_v18  ;;  %v676_v55 = vld [vmem:[#allocation10 + $0x78] sm:$0xff]  ;;  %v673_v51 = vld [vmem:[#allocation10 + $0x60] sm:$0xff] }
 0x9a3   : > { %v9012_v45 = vpop.eup %9011  ;;  %9023 = vpow2.f32 %v3539_v37  ;;  %8482 = vmatprep.subr.mxu0 %v676_v55 }
 0x9a4   : > { %8471 = vmatmul.mubr.f32.gmra.mxu0 %v9012_v45  ;;  %v3992_v8 = vsel %vm1421_vm0, %v1925_v10, %v8702_v34  ;;  %v3993_v29 = vsel %vm1421_vm0, %v1927_v16, %v8703_v17  ;;  %9025 = vrcp.f32 %v11465_v19  ;;  %v14396_v19 = vld [vmem:[#allocation64_spill] sm:$0xff]  ;;  %v671_v10 = vld [vmem:[#allocation10 + $0x50] sm:$0xff]  ;;  %v670_v34 = vld [vmem:[#allocation10 + $0x48] sm:$0xff] }
 0x9a5   : > { %v11675_v32 = vsel %vm4006_vm1, %v3992_v8, %v8707_v58  ;;  %v11678_v49 = vsel %vm4006_vm1, %v3993_v29, %v8708_v1  ;;  %9027 = vrcp.f32 %v11475_v21  ;;  %8483 = vmatpush3.msra.mxu0 %v676_v55  ;;  %v668_v1 = vld [vmem:[#allocation10 + $0x38] sm:$0xff]  ;;  %v667_v58 = vld [vmem:[#allocation10 + $0x30] sm:$0xff] }
 0x9a6   : > { %8484 = vmatprep.subr.mxu0 %v675_v48  ;;  %9029 = vrcp.f32 %v11469_v0  ;;  %v669_v0 = vld [vmem:[#allocation10 + $0x40] sm:$0xff] }
 0x9a7   : > { %v9014_v11 = vpop.eup %9013  ;;  %8485 = vmatpush3.msra.mxu0 %v675_v48  ;;  %9031 = vrcp.f32 %v11477_v46 }
 0x9a8   : > { %v9016_v2 = vpop.eup %9015  ;;  %8473 = vmatprep.mubr.f32.mxu0 %v9014_v11 }
 0x9a9   : > { %8474 = vmatmul.mubr.f32.gmra.mxu0 %v9016_v2 }
 0x9ab   : > { %v9018_v60 = vpop.eup %9017 }
 0x9ac   : > { %v9020_v38 = vpop.eup %9019  ;;  %8476 = vmatprep.mubr.f32.mxu0 %v9018_v60 }
 0x9ad   : > { %8477 = vmatmul.mubr.f32.gmra.mxu0 %v9020_v38 }
 0x9af   : > { %v9022_v57 = vpop.eup %9021 }
 0x9b0   : > { %v9024_v6 = vpop.eup %9023  ;;  %8479 = vmatprep.mubr.f32.mxu0 %v9022_v57 }
 0x9b1   : > { %8480 = vmatmul.mubr.f32.gmra.mxu0 %v9024_v6 }
 0x9b5   : > { %3547 = vadd.xlane.f32.xlu1 %v11629_v44 }
 0x9b7   : > { %3545 = vadd.xlane.f32.xlu0 %v11627_v62 }
 0x9b9   : > { %3551 = vadd.xlane.f32.xlu1 %v11635_v56 }
 0x9bb   : > { %3549 = vadd.xlane.f32.xlu0 %v11633_v25  ;;  %v9026_v25 = vpop.eup %9025 }
 0x9bc   : > { %v9028_v56 = vpop.eup %9027  ;;  %v1929_v47 = vmul.f32 %v9026_v25, %v14395_v26 }
 0x9bd   : > { %3555 = vadd.xlane.f32.xlu1 %v11641_v54  ;;  %v1931_v50 = vmul.f32 %v9028_v56, %v14396_v19  ;;  %v14398_v56 = vld [vmem:[#allocation66_spill] sm:$0xff] }
 0x9bf   : > { %3553 = vadd.xlane.f32.xlu0 %v11639_v30 }
 0x9c1   : > { %3559 = vadd.xlane.f32.xlu1 %v9012_v45  ;;  %v9030_v45 = vpop.eup %9029 }
 0x9c2   : > { %v9032_v8 = vpop.eup %9031 }
 0x9c3   : > { %3557 = vadd.xlane.f32.xlu0 %v9010_v18  ;;  %v674_v18 = vld [vmem:[#allocation10 + $0x68] sm:$0xff] }
 0x9c4   : > { %8486 = vmatprep.subr.mxu0 %v674_v18 }
 0x9c5   : > { %3563 = vadd.xlane.f32.xlu1 %v9016_v2  ;;  %8487 = vmatpush3.msra.mxu0 %v674_v18 }
 0x9c6   : > { %8488 = vmatprep.subr.mxu0 %v673_v51 }
 0x9c7   : > { %3561 = vadd.xlane.f32.xlu0 %v9014_v11  ;;  %8489 = vmatpush3.msra.mxu0 %v673_v51 }
 0x9c8   : > { %8490 = vmatprep.subr.mxu0 %v672_v36 }
 0x9c9   : > { %3567 = vadd.xlane.f32.xlu1 %v9020_v38  ;;  %8491 = vmatpush3.msra.mxu0 %v672_v36  ;;  %v666_v38 = vld [vmem:[#allocation10 + $0x28] sm:$0xff] }
 0x9ca   : > { %8492 = vmatprep.subr.mxu0 %v671_v10 }
 0x9cb   : > { %3565 = vadd.xlane.f32.xlu0 %v9018_v60  ;;  %8493 = vmatpush3.msra.mxu0 %v671_v10 }
 0x9cc   : > { %8494 = vmatprep.subr.mxu0 %v670_v34 }
 0x9cd   : > { %3571 = vadd.xlane.f32.xlu1 %v9024_v6  ;;  %8495 = vmatpush3.msra.mxu0 %v670_v34  ;;  %v14397_v6 = vld [vmem:[#allocation67_spill] sm:$0xff] }
 0x9ce   : > { %8496 = vmatprep.subr.mxu0 %v669_v0  ;;  %v1933_v25 = vmul.f32 %v9030_v45, %v14397_v6 }
 0x9cf   : > { %8497 = vmatpush3.msra.mxu0 %v669_v0 }
 0x9d0   : > { %v11688_v62 = vpop.xlane.xlu1 %1763  ;;  %8498 = vmatprep.subr.mxu0 %v668_v1 }
 0x9d1   : > { %3569 = vadd.xlane.f32.xlu1 %v9022_v57  ;;  %8499 = vmatpush3.msra.mxu0 %v668_v1  ;;  %v665_v57 = vld [vmem:[#allocation10 + $0x20] sm:$0xff] }
 0x9d2   : > { %v11690_v44 = vpop.xlane.xlu0 %1765  ;;  %8500 = vmatprep.subr.mxu0 %v667_v58 }
 0x9d3   : > { %8501 = vmatpush3.msra.mxu0 %v667_v58 }
 0x9d4   : > { %v8716_v54 = vpop.permute.xlu1 %8715  ;;  %8502 = vmatprep.subr.mxu0 %v666_v38 }
 0x9d5   : > { %v8718_v21 = vunpack.i.h.bf16 %v8716_v54  ;;  %v8717_v40 = vunpack.i.l.bf16 %v8716_v54  ;;  %v1935_v54 = vmul.f32 %v9032_v8, %v14398_v56  ;;  %8503 = vmatpush3.msra.mxu0 %v666_v38 }
 0x9d6   : > { %v8711_v30 = vpop.permute.xlu0 %8710  ;;  %8504 = vmatprep.subr.mxu0 %v665_v57 }
 0x9d7   : > { %v8713_v9 = vunpack.i.h.bf16 %v8711_v30  ;;  %v8712_v35 = vunpack.i.l.bf16 %v8711_v30  ;;  %8505 = vmatpush3.msra.mxu0 %v665_v57 }
 0x9d9   : > { %v3994_v22 = vsel %vm1421_vm0, %v1929_v47, %v8712_v35  ;;  %v3995_v20 = vsel %vm1421_vm0, %v1931_v50, %v8713_v9  ;;  %v664_v50 = vld [vmem:[#allocation10 + $0x18] sm:$0xff] }
 0x9da   : > { %v11697_v33 = vsel %vm4006_vm1, %v3994_v22, %v8717_v40  ;;  %v11700_v37 = vsel %vm4006_vm1, %v3995_v20, %v8718_v21  ;;  %v663_v21 = vld [vmem:[#allocation10 + $0x10] sm:$0xff]  ;;  %8506 = vmatprep.subr.mxu0 %v664_v50  ;;  %v662_v40 = vld [vmem:[#allocation10 + $0x8] sm:$0xff]  ;;  %v661_v22 = vld [vmem:[#allocation10] sm:$0xff] }
 0x9db   : > { %8507 = vmatpush3.msra.mxu0 %v664_v50 }
 0x9dc   : > { %8508 = vmatprep.subr.mxu0 %v663_v21 }
 0x9dd   : > { %8509 = vmatpush3.msra.mxu0 %v663_v21 }
 0x9de   : > { %8510 = vmatprep.subr.mxu0 %v662_v40 }
 0x9df   : > { %8511 = vmatpush3.msra.mxu0 %v662_v40 }
 0x9e0   : > { %8512 = vmatprep.subr.mxu0 %v661_v22 }
 0x9e1   : > { %8513 = vmatpush3.msra.mxu0 %v661_v22 }
 0xa05   : > { %v11704_v17 = vpop.xlane.xlu1 %1769 }
 0xa07   : > { %v11706_v61 = vpop.xlane.xlu0 %1767 }
 0xa09   : > { %v3544_v16 = vpop.xlane.xlu1 %3543 }
 0xa0a   : > { %9033 = vrcp.f32 %v3544_v16 }
 0xa0b   : > { %v3542_v46 = vpop.xlane.xlu0 %3541 }
 0xa0c   : > { %9035 = vrcp.f32 %v3542_v46 }
 0xa0d   : > { %v8726_v29 = vpop.permute.xlu1 %8725 }
 0xa0e   : > { %v8728_v30 = vunpack.i.h.bf16 %v8726_v29  ;;  %v8727_v9 = vunpack.i.l.bf16 %v8726_v29 }
 0xa0f   : > { %v8721_v11 = vpop.permute.xlu0 %8720 }
 0xa10   : > { %v8723_v2 = vunpack.i.h.bf16 %v8721_v11  ;;  %v8722_v60 = vunpack.i.l.bf16 %v8721_v11 }
 0xa12   : > { %v3996_v35 = vsel %vm1421_vm0, %v1933_v25, %v8722_v60  ;;  %v3997_v26 = vsel %vm1421_vm0, %v1935_v54, %v8723_v2 }
 0xa13   : > { %v11713_v47 = vsel %vm4006_vm1, %v3996_v35, %v8727_v9  ;;  %v11716_v19 = vsel %vm4006_vm1, %v3997_v26, %v8728_v30 }
 0xa17   : > { %v9034_v55 = vpop.eup %9033 }
 0xa19   : > { %v9036_v48 = vpop.eup %9035 }
 0xa20   : > { %v8460_v20 = vpop.f32.mrf.mxu0 }
 0xa21   : > { %v3769_v51 = vmul.f32 %v9034_v55, %v8460_v20 }
 0xa22   : > { %v3687_v18 = vpop.f32.mrf.mxu0 }
 0xa23   : > { %v3767_v36 = vmul.f32 %v9036_v48, %v3687_v18  ;;  %v14399_v18 = vld [vmem:[#allocation43_spill] sm:$0xff] }
 0xa24   : > { %v8463_v16 = vpop.f32.mrf.mxu0 }
 0xa25   : > { %v8729_v10 = vpack.i.bf16 %v3769_v51, %v3767_v36  ;;  %v14400_v36 = vld [vmem:[#allocation42_spill] sm:$0xff] }
 0xa26   : > { %v3697_v1 = vpop.f32.mrf.mxu0 }
 0xa27   : > { %8730 = vrot.lane.b32.xlu1 %v8729_v10, %s9580_s25 }
 0xa28   : > { %v8466_v29 = vpop.f32.mrf.mxu0 }
 0xa2a   : > { %v3707_v60 = vpop.f32.mrf.mxu0 }
 0xa2c   : > { %v8469_v54 = vpop.f32.mrf.mxu0 }
 0xa2e   : > { %v3717_v21 = vpop.f32.mrf.mxu0 }
 0xa3e   : > { %v3548_v34 = vpop.xlane.xlu1 %3547 }
 0xa3f   : > { %9037 = vrcp.f32 %v3548_v34 }
 0xa40   : > { %v3546_v0 = vpop.xlane.xlu0 %3545 }
 0xa41   : > { %9039 = vrcp.f32 %v3546_v0 }
 0xa42   : > { %v3552_v46 = vpop.xlane.xlu1 %3551 }
 0xa43   : > { %9041 = vrcp.f32 %v3552_v46 }
 0xa44   : > { %v3550_v45 = vpop.xlane.xlu0 %3549 }
 0xa45   : > { %9043 = vrcp.f32 %v3550_v45 }
 0xa46   : > { %v3556_v58 = vpop.xlane.xlu1 %3555 }
 0xa47   : > { %9045 = vrcp.f32 %v3556_v58 }
 0xa48   : > { %v3554_v8 = vpop.xlane.xlu0 %3553 }
 0xa49   : > { %9047 = vrcp.f32 %v3554_v8  ;;  %v14401_v8 = vld [vmem:[#allocation86_spill] sm:$0xff] }
 0xa4a   : > { %v3560_v55 = vpop.xlane.xlu1 %3559  ;;  %9049 = vrcp.f32 %v11451_v13 }
 0xa4b   : > { %9051 = vrcp.f32 %v11441_v28 }
 0xa4c   : > { %v9038_v11 = vpop.eup %9037  ;;  %v3558_v48 = vpop.xlane.xlu0 %3557 }
 0xa4d   : > { %v3773_v57 = vmul.f32 %v9038_v11, %v8463_v16  ;;  %9053 = vrcp.f32 %v3558_v48  ;;  %v14407_v48 = vpack.i.bf16 %v11509_v52, %v11511_v24 }
 0xa4e   : > { %v9040_v2 = vpop.eup %9039  ;;  %v3564_v51 = vpop.xlane.xlu1 %3563  ;;  %9055 = vrcp.f32 %v11455_v41 }
 0xa4f   : > { %v3771_v38 = vmul.f32 %v9040_v2, %v3697_v1  ;;  %9057 = vrcp.f32 %v3560_v55  ;;  %v14402_v2 = vpack.i.bf16 %v11503_v31, %v11505_v15 }
 0xa50   : > { %v9042_v6 = vpop.eup %9041  ;;  %v3562_v10 = vpop.xlane.xlu0 %3561  ;;  %9059 = vrcp.f32 %v11445_v23 }
 0xa51   : > { %v8734_v25 = vpack.i.bf16 %v3773_v57, %v3771_v38  ;;  %v3777_v9 = vmul.f32 %v9042_v6, %v8466_v29  ;;  %9061 = vrcp.f32 %v11459_v5 }
 0xa52   : > { %v9044_v56 = vpop.eup %9043  ;;  %v3568_v0 = vpop.xlane.xlu1 %3567  ;;  %9063 = vrcp.f32 %v11449_v39 }
 0xa53   : > { %8735 = vrot.lane.b32.xlu0 %v8734_v25, %s9580_s25  ;;  %v3775_v30 = vmul.f32 %v9044_v56, %v3707_v60  ;;  %9065 = vrcp.f32 %v3562_v10  ;;  %v14403_v60 = vld [vmem:[#allocation87_spill] sm:$0xff]  ;;  %v14404_v56 = vld [vmem:[#allocation88_spill] sm:$0xff] }
 0xa54   : > { %v9046_v35 = vpop.eup %9045  ;;  %v3566_v16 = vpop.xlane.xlu0 %3565  ;;  %9067 = vrcp.f32 %v3564_v51 }
 0xa55   : > { %v8739_v26 = vpack.i.bf16 %v3777_v9, %v3775_v30  ;;  %v3781_v22 = vmul.f32 %v9046_v35, %v8469_v54  ;;  %9069 = vrcp.f32 %v3566_v16 }
 0xa56   : > { %v9048_v50 = vpop.eup %9047  ;;  %v3572_v46 = vpop.xlane.xlu1 %3571  ;;  %9071 = vrcp.f32 %v11463_v63 }
 0xa57   : > { %8740 = vrot.lane.b32.xlu1 %v8739_v26, %s9580_s25  ;;  %v3779_v40 = vmul.f32 %v9048_v50, %v3717_v21  ;;  %v9050_v28 = vpop.eup %9049  ;;  %9073 = vrcp.f32 %v3568_v0  ;;  %v14406_v21 = vld [vmem:[#allocation90_spill] sm:$0xff] }
 0xa58   : > { %v9052_v1 = vpop.eup %9051  ;;  %v2565_v29 = vmul.f32 %v9050_v28, %v14401_v8  ;;  %9075 = vrcp.f32 %v11453_v27  ;;  %v14405_v27 = vld [vmem:[#allocation89_spill] sm:$0xff] }
 0xa59   : > { %v8744_v20 = vpack.i.bf16 %v3781_v22, %v3779_v40  ;;  %v2563_v38 = vmul.f32 %v9052_v1, %v14403_v60 }
 0xa5a   : > { %v9054_v41 = vpop.eup %9053  ;;  %v3570_v6 = vpop.xlane.xlu1 %3569 }
 0xa5b   : > { %8745 = vrot.lane.b32.xlu0 %v8744_v20, %s9580_s25  ;;  %v9056_v58 = vpop.eup %9055  ;;  %v8749_v25 = vpack.i.bf16 %v2565_v29, %v2563_v38  ;;  %9077 = vrcp.f32 %v3570_v6  ;;  %v14410_v29 = vpack.i.bf16 %v11515_v12, %v11517_v43  ;;  %v14412_v12 = vpack.i.bf16 %v11521_v14, %v11523_v59 }
 0xa5c   : > { %v9058_v5 = vpop.eup %9057  ;;  %v2569_v54 = vmul.f32 %v9056_v58, %v14404_v56  ;;  %9079 = vrcp.f32 %v3572_v46  ;;  %v14409_v58 = vld [vmem:[#allocation92_spill] sm:$0xff] }
 0xa5d   : > { %v9060_v57 = vpop.eup %9059  ;;  %9081 = vrcp.f32 %v11649_v4 }
 0xa5e   : > { %v9062_v30 = vpop.eup %9061  ;;  %v2567_v26 = vmul.f32 %v9060_v57, %v14405_v27  ;;  %9083 = vrcp.f32 %v11651_v53 }
 0xa5f   : > { %v9064_v35 = vpop.eup %9063  ;;  %v2573_v40 = vmul.f32 %v9062_v30, %v14406_v21  ;;  %9085 = vrcp.f32 %v11688_v62 }
 0xa60   : > { %v9066_v31 = vpop.eup %9065  ;;  %v8764_v50 = vpack.i.bf16 %v2569_v54, %v2567_v26  ;;  %9087 = vrcp.f32 %v11690_v44 }
 0xa61   : > { %v9068_v22 = vpop.eup %9067  ;;  %9089 = vrcp.f32 %v11704_v17 }
 0xa62   : > { %9091 = vrcp.f32 %v11706_v61 }
 0xa64   : > { %v8472_v34 = vpop.f32.mrf.mxu0 }
 0xa65   : > { %v3785_v39 = vmul.f32 %v9058_v5, %v8472_v34 }
 0xa66   : > { %v3727_v13 = vpop.f32.mrf.mxu0 }
 0xa67   : > { %v3783_v23 = vmul.f32 %v9054_v41, %v3727_v13 }
 0xa69   : > { %v8475_v45 = vpop.f32.mrf.mxu0  ;;  %v8759_v63 = vpack.i.bf16 %v3785_v39, %v3783_v23  ;;  %v14411_v39 = vld [vmem:[#allocation93_spill] sm:$0xff] }
 0xa6a   : > { %v3789_v55 = vmul.f32 %v9068_v22, %v8475_v45  ;;  %v14413_v22 = vld [vmem:[#allocation69_spill] sm:$0xff] }
 0xa6b   : > { %v3737_v11 = vpop.f32.mrf.mxu0 }
 0xa6c   : > { %v3787_v15 = vmul.f32 %v9066_v31, %v3737_v11 }
 0xa6d   : > { %v8478_v9 = vpop.f32.mrf.mxu0 }
 0xa6e   : > { %v8774_v34 = vpack.i.bf16 %v3789_v55, %v3787_v15 }
 0xa6f   : > { %v3747_v20 = vpop.f32.mrf.mxu0 }
 0xa71   : > { %v8481_v28 = vpop.f32.mrf.mxu0 }
 0xa73   : > { %v3757_v8 = vpop.f32.mrf.mxu0 }
 0xa7a   : > { %1773 = vadd.xlane.f32.xlu0 %v14399_v18  ;;  %v14408_v18 = vld [vmem:[#allocation91_spill] sm:$0xff] }
 0xa7b   : > { %1771 = vadd.xlane.f32.xlu1 %v14400_v36  ;;  %v2571_v51 = vmul.f32 %v9064_v35, %v14408_v18  ;;  %v9070_v36 = vpop.eup %9069 }
 0xa7c   : > { %v9072_v10 = vpop.eup %9071  ;;  %v3791_v0 = vmul.f32 %v9070_v36, %v3747_v20  ;;  %v14414_v20 = vld [vmem:[#allocation68_spill] sm:$0xff] }
 0xa7d   : > { %v8779_v13 = vpack.i.bf16 %v2573_v40, %v2571_v51  ;;  %v9074_v16 = vpop.eup %9073  ;;  %v2577_v23 = vmul.f32 %v9072_v10, %v14409_v58 }
 0xa7e   : > { %v3793_v46 = vmul.f32 %v9074_v16, %v8478_v9  ;;  %v9076_v45 = vpop.eup %9075 }
 0xa7f   : > { %v9078_v60 = vpop.eup %9077 }
 0xa80   : > { %v8789_v41 = vpack.i.bf16 %v3793_v46, %v3791_v0  ;;  %v3795_v38 = vmul.f32 %v9078_v60, %v3757_v8  ;;  %v9080_v6 = vpop.eup %9079 }
 0xa81   : > { %v9082_v15 = vpop.eup %9081 }
 0xa82   : > { %v1939_v53 = vmul.f32 %v9082_v15, %v14414_v20 }
 0xa8c   : > { %8755 = vrot.lane.b32.xlu1 %v14402_v2, %s9581_s15  ;;  %v2575_v2 = vmul.f32 %v9076_v45, %v14411_v39 }
 0xa8e   : > { %v8794_v57 = vpack.i.bf16 %v2577_v23, %v2575_v2 }
 0xa90   : > { %8750 = vrot.lane.b32.xlu0 %v8749_v25, %s9582_s17  ;;  %8760 = vrot.lane.b32.xlu1 %v8759_v63, %s9580_s25  ;;  %v3797_v63 = vmul.f32 %v9080_v6, %v8481_v28 }
 0xa92   : > { %v8804_v43 = vpack.i.bf16 %v3797_v63, %v3795_v38 }
 0xa94   : > { %8765 = vrot.lane.b32.xlu0 %v8764_v50, %s9582_s17  ;;  %8770 = vrot.lane.b32.xlu1 %v14407_v48, %s9581_s15 }
 0xa98   : > { %8780 = vrot.lane.b32.xlu1 %v8779_v13, %s9582_s17  ;;  %8775 = vrot.lane.b32.xlu0 %v8774_v34, %s9580_s25 }
 0xa99   : > { %v8731_v1 = vpop.permute.xlu1 %8730 }
 0xa9a   : > { %v8733_v52 = vunpack.i.h.bf16 %v8731_v1  ;;  %v8732_v24 = vunpack.i.l.bf16 %v8731_v1 }
 0xa9c   : > { %8785 = vrot.lane.b32.xlu0 %v14410_v29, %s9581_s15  ;;  %8790 = vrot.lane.b32.xlu1 %v8789_v41, %s9580_s25  ;;  %v4024_v5 = vsel %vm4023_vm2, %v11622_v42, %v8732_v24  ;;  %v4025_v11 = vsel %vm4023_vm2, %v11625_v3, %v8733_v52  ;;  %v14415_v41 = vld [vmem:[#allocation71_spill] sm:$0xff]  ;;  %v14416_v24 = vld [vmem:[#allocation70_spill] sm:$0xff] }
 0xa9d   : > { %8514 = vmatprep.mubr.f32.mxu0 %v4024_v5 }
 0xa9e   : > { %8515 = vmatmul.mubr.f32.vlgmr.msra.gmra.mxu0 %v4025_v11 }
 0xaa0   : > { %8795 = vrot.lane.b32.xlu0 %v8794_v57, %s9582_s17  ;;  %8800 = vrot.lane.b32.xlu1 %v14412_v12, %s9581_s15 }
 0xaa4   : > { %8805 = vrot.lane.b32.xlu0 %v8804_v43, %s9580_s25  ;;  %s9492_s25 = sshll.u32 %s9583_s24, 4  ;;  %s9493_s25 = int_to_ptr.vmem [resolvable:$false] %s9492_s25 }
 0xaa5   : > { %s9494_s15 = scalar_lea.vmem %s9493_s25, 4096  ;;  %p9495_p5 = scmp.lt.s32.totalorder %s14051_s3, %s9493_s25 }
 0xaa6   : > { %p9496_p8 = scmp.lt.s32.totalorder %s9494_s15, %s9488_s9 }
 0xaa8   : > { %p9497_p7 = por %p9496_p8, %p9495_p5 }
 0xaaa   : > { %p9498_p6 = pnand %p9497_p7, %p9491_p3 }
 0xac5   : > { %v8736_v42 = vpop.permute.xlu0 %8735 }
 0xac6   : > { %v8738_v3 = vunpack.i.h.bf16 %v8736_v42  ;;  %v8737_v25 = vunpack.i.l.bf16 %v8736_v42 }
 0xac8   : > { %v4026_v56 = vsel %vm4023_vm2, %v11675_v32, %v8737_v25  ;;  %v4027_v54 = vsel %vm4023_vm2, %v11678_v49, %v8738_v3  ;;  %v14417_v25 = vld [vmem:[#allocation73_spill] sm:$0xff] }
 0xac9   : > { %v8741_v30 = vpop.permute.xlu1 %8740  ;;  %8517 = vmatprep.mubr.f32.mxu0 %v4026_v56 }
 0xaca   : > { %v8743_v9 = vunpack.i.h.bf16 %v8741_v30  ;;  %v8742_v35 = vunpack.i.l.bf16 %v8741_v30  ;;  %8518 = vmatmul.mubr.f32.gmra.mxu0 %v4027_v54  ;;  %v14418_v54 = vld [vmem:[#allocation72_spill] sm:$0xff] }
 0xacc   : > { %v4028_v14 = vsel %vm4023_vm2, %v11697_v33, %v8742_v35  ;;  %v4029_v59 = vsel %vm4023_vm2, %v11700_v37, %v8743_v9 }
 0xacd   : > { %v8746_v27 = vpop.permute.xlu0 %8745  ;;  %8520 = vmatprep.mubr.f32.mxu0 %v4028_v14 }
 0xace   : > { %v8748_v26 = vunpack.i.h.bf16 %v8746_v27  ;;  %v8747_v31 = vunpack.i.l.bf16 %v8746_v27  ;;  %8521 = vmatmul.mubr.f32.gmra.mxu0 %v4029_v59 }
 0xad0   : > { %v4030_v32 = vsel %vm4023_vm2, %v11713_v47, %v8747_v31  ;;  %v4031_v49 = vsel %vm4023_vm2, %v11716_v19, %v8748_v26  ;;  %v9084_v47 = vpop.eup %9083 }
 0xad1   : > { %8523 = vmatprep.mubr.f32.mxu0 %v4030_v32  ;;  %v1937_v4 = vmul.f32 %v9084_v47, %v14413_v22  ;;  %v9086_v18 = vpop.eup %9085 }
 0xad2   : > { %8524 = vmatmul.mubr.f32.gmra.mxu0 %v4031_v49  ;;  %v9088_v51 = vpop.eup %9087  ;;  %v1941_v52 = vmul.f32 %v9086_v18, %v14415_v41 }
 0xad3   : > { %v1943_v58 = vmul.f32 %v9088_v51, %v14416_v24  ;;  %v9090_v23 = vpop.eup %9089 }
 0xad4   : > { %v9092_v5 = vpop.eup %9091  ;;  %v1947_v30 = vmul.f32 %v9090_v23, %v14418_v54  ;;  %v728_v54 = vld [vmem:[#allocation11 + $0x190] sm:$0xff] }
 0xad5   : > { %v1945_v56 = vmul.f32 %v9092_v5, %v14417_v25  ;;  %v739_v5 = vld [vmem:[#allocation11 + $0x1e8] sm:$0xff]  ;;  %v729_v25 = vld [vmem:[#allocation11 + $0x198] sm:$0xff] }
 0xad6   : > { %4534 = vmatprep.subr.mxu1 %v739_v5  ;;  %v688_v5 = vld [vmem:[#allocation11 + $0x50] sm:$0xff] }
 0xb03   : > { %v1774_v33 = vpop.xlane.xlu0 %1773 }
 0xb04   : > { %v1772_v37 = vpop.xlane.xlu1 %1771  ;;  %9093 = vrcp.f32 %v1774_v33 }
 0xb05   : > { %9095 = vrcp.f32 %v1772_v37 }
 0xb07   : > { %v8751_v50 = vpop.permute.xlu0 %8750 }
 0xb08   : > { %v8753_v19 = vunpack.i.h.bf16 %v8751_v50  ;;  %v8752_v21 = vunpack.i.l.bf16 %v8751_v50  ;;  %v8756_v40 = vpop.permute.xlu1 %8755 }
 0xb09   : > { %v8758_v55 = vunpack.i.h.bf16 %v8756_v40  ;;  %v8757_v62 = vunpack.i.l.bf16 %v8756_v40 }
 0xb0a   : > { %v3998_v48 = vsel %vm1421_vm0, %v1937_v4, %v8752_v21  ;;  %v3999_v17 = vsel %vm1421_vm0, %v1939_v53, %v8753_v19  ;;  %v14419_v4 = vld [vmem:[#allocation75_spill] sm:$0xff]  ;;  %v14420_v53 = vld [vmem:[#allocation74_spill] sm:$0xff] }
 0xb0b   : > { %v8766_v44 = vpop.permute.xlu0 %8765  ;;  %v4015_v13 = vsel %vm4006_vm1, %v3998_v48, %v8757_v62  ;;  %v4016_v16 = vsel %vm4006_vm1, %v3999_v17, %v8758_v55 }
 0xb0c   : > { %v8761_v61 = vpop.permute.xlu1 %8760  ;;  %v8768_v34 = vunpack.i.h.bf16 %v8766_v44  ;;  %v8767_v0 = vunpack.i.l.bf16 %v8766_v44 }
 0xb0d   : > { %v8763_v36 = vunpack.i.h.bf16 %v8761_v61  ;;  %v8762_v10 = vunpack.i.l.bf16 %v8761_v61 }
 0xb0e   : > { %v4000_v2 = vsel %vm1421_vm0, %v1941_v52, %v8767_v0  ;;  %v4001_v60 = vsel %vm1421_vm0, %v1943_v58, %v8768_v34  ;;  %v11822_v0 = vld [vmem:[%s14102_s6] ss:$0 sm:$0xff]  ;;  %v9257_v52 = vld [vmem:[%s9856_s5 + $0x8] sm:$0xff] }
 0xb0f   : > { %v8776_v28 = vpop.permute.xlu0 %8775  ;;  %v4032_v46 = vsel %vm4023_vm2, %v4015_v13, %v8762_v10  ;;  %v4033_v45 = vsel %vm4023_vm2, %v4016_v16, %v8763_v36  ;;  %v11827_v13 = vld [vmem:[%s14109_s13] ss:$0 sm:$0xff] }
 0xb10   : > { %v8771_v1 = vpop.permute.xlu1 %8770  ;;  %8526 = vmatprep.mubr.f32.mxu0 %v4032_v46  ;;  %v8778_v11 = vunpack.i.h.bf16 %v8776_v28  ;;  %v8777_v39 = vunpack.i.l.bf16 %v8776_v28  ;;  %v9258_v58 = vld [vmem:[%s9856_s5] sm:$0xff] }
 0xb11   : > { %v8773_v8 = vunpack.i.h.bf16 %v8771_v1  ;;  %v8772_v29 = vunpack.i.l.bf16 %v8771_v1  ;;  %8527 = vmatmul.mubr.f32.gmra.mxu0 %v4033_v45  ;;  %v9094_v59 = vpop.eup %9093 }
 0xb12   : > { %v9096_v32 = vpop.eup %9095  ;;  %v1951_v55 = vmul.f32 %v9094_v59, %v14420_v53  ;;  %v719_v59 = vld [vmem:[#allocation11 + $0x148] sm:$0xff]  ;;  %v705_v53 = vld [vmem:[#allocation11 + $0xd8] sm:$0xff] }
 0xb13   : > { %v8786_v38 = vpop.permute.xlu0 %8785  ;;  %v4017_v57 = vsel %vm4006_vm1, %v4000_v2, %v8772_v29  ;;  %v4018_v6 = vsel %vm4006_vm1, %v4001_v60, %v8773_v8  ;;  %v1949_v20 = vmul.f32 %v9096_v32, %v14419_v4  ;;  %v740_v2 = vld [vmem:[#allocation11 + $0x1f0] sm:$0xff]  ;;  %v735_v60 = vld [vmem:[#allocation11 + $0x1c8] sm:$0xff] }
 0xb14   : > { %v8781_v63 = vpop.permute.xlu1 %8780  ;;  %v4034_v12 = vsel %vm4023_vm2, %v4017_v57, %v8777_v39  ;;  %v4035_v43 = vsel %vm4023_vm2, %v4018_v6, %v8778_v11  ;;  %v8788_v27 = vunpack.i.h.bf16 %v8786_v38  ;;  %v8787_v26 = vunpack.i.l.bf16 %v8786_v38  ;;  %v741_v11 = vld [vmem:[#allocation11 + $0x1f8] sm:$0xff]  ;;  %v738_v39 = vld [vmem:[#allocation11 + $0x1e0] sm:$0xff]  ;;  %v736_v6 = vld [vmem:[#allocation11 + $0x1d0] sm:$0xff] }
 0xb15   : > { %v8783_v42 = vunpack.i.h.bf16 %v8781_v63  ;;  %v8782_v3 = vunpack.i.l.bf16 %v8781_v63  ;;  %8529 = vmatprep.mubr.f32.mxu0 %v4034_v12  ;;  %4695 = vmatprep.subr.mxu0 %v741_v11  ;;  %v737_v38 = vld [vmem:[#allocation11 + $0x1d8] sm:$0xff]  ;;  %v734_v57 = vld [vmem:[#allocation11 + $0x1c0] sm:$0xff]  ;;  %v731_v63 = vld [vmem:[#allocation11 + $0x1a8] sm:$0xff] }
 0xb16   : > { %8530 = vmatmul.mubr.f32.gmra.mxu0 %v4035_v43  ;;  %4535 = vmatpush1.msra.mxu1 %v738_v39  ;;  %v733_v12 = vld [vmem:[#allocation11 + $0x1b8] sm:$0xff]  ;;  %v730_v43 = vld [vmem:[#allocation11 + $0x1a0] sm:$0xff]  ;;  %v715_v32 = vld [vmem:[#allocation11 + $0x128] sm:$0xff] }
 0xb17   : > { %v8796_v9 = vpop.permute.xlu0 %8795  ;;  %v4002_v35 = vsel %vm1421_vm0, %v1945_v56, %v8782_v3  ;;  %v4003_v14 = vsel %vm1421_vm0, %v1947_v30, %v8783_v42  ;;  %4696 = vmatpush1.msra.mxu0 %v740_v2  ;;  %4536 = vmatprep.subr.mxu1 %v735_v60  ;;  %v732_v42 = vld [vmem:[#allocation11 + $0x1b0] sm:$0xff]  ;;  %v727_v3 = vld [vmem:[#allocation11 + $0x188] sm:$0xff]  ;;  %v726_v56 = vld [vmem:[#allocation11 + $0x180] sm:$0xff] }
 0xb18   : > { %v8791_v31 = vpop.permute.xlu1 %8790  ;;  %v8798_v37 = vunpack.i.h.bf16 %v8796_v9  ;;  %v8797_v15 = vunpack.i.l.bf16 %v8796_v9  ;;  %v4019_v47 = vsel %vm4006_vm1, %v4002_v35, %v8787_v26  ;;  %v4020_v50 = vsel %vm4006_vm1, %v4003_v14, %v8788_v27  ;;  %4697 = vmatprep.subr.mxu0 %v737_v38  ;;  %4537 = vmatpush1.msra.mxu1 %v734_v57  ;;  %v723_v30 = vld [vmem:[#allocation11 + $0x168] sm:$0xff]  ;;  %v725_v9 = vld [vmem:[#allocation11 + $0x178] sm:$0xff]  ;;  %v722_v35 = vld [vmem:[#allocation11 + $0x160] sm:$0xff] }
 0xb19   : > { %v8793_v49 = vunpack.i.h.bf16 %v8791_v31  ;;  %v8792_v33 = vunpack.i.l.bf16 %v8791_v31  ;;  %4698 = vmatpush1.msra.mxu0 %v736_v6  ;;  %4538 = vmatprep.subr.mxu1 %v731_v63  ;;  %v724_v14 = vld [vmem:[#allocation11 + $0x170] sm:$0xff]  ;;  %v721_v27 = vld [vmem:[#allocation11 + $0x158] sm:$0xff]  ;;  %v718_v26 = vld [vmem:[#allocation11 + $0x140] sm:$0xff] }
 0xb1a   : > { %v4004_v18 = vsel %vm1421_vm0, %v1949_v20, %v8797_v15  ;;  %v4005_v61 = vsel %vm1421_vm0, %v1951_v55, %v8798_v37  ;;  %4699 = vmatprep.subr.mxu0 %v733_v12  ;;  %4539 = vmatpush1.msra.mxu1 %v730_v43  ;;  %v720_v31 = vld [vmem:[#allocation11 + $0x150] sm:$0xff]  ;;  %v711_v15 = vld [vmem:[#allocation11 + $0x108] sm:$0xff]  ;;  %v702_v55 = vld [vmem:[#allocation11 + $0xc0] sm:$0xff] }
 0xb1b   : > { %v8806_v19 = vpop.permute.xlu0 %8805  ;;  %v4036_v21 = vsel %vm4023_vm2, %v4019_v47, %v8792_v33  ;;  %v4037_v40 = vsel %vm4023_vm2, %v4020_v50, %v8793_v49  ;;  %4700 = vmatpush1.msra.mxu0 %v732_v42  ;;  %4540 = vmatprep.subr.mxu1 %v727_v3  ;;  %v717_v49 = vld [vmem:[#allocation11 + $0x138] sm:$0xff]  ;;  %v714_v33 = vld [vmem:[#allocation11 + $0x120] sm:$0xff]  ;;  %v716_v37 = vld [vmem:[#allocation11 + $0x130] sm:$0xff] }
 0xb1c   : > { %v8801_v22 = vpop.permute.xlu1 %8800  ;;  %8532 = vmatprep.mubr.f32.mxu0 %v4036_v21  ;;  %v8808_v48 = vunpack.i.h.bf16 %v8806_v19  ;;  %v8807_v17 = vunpack.i.l.bf16 %v8806_v19  ;;  %4701 = vmatprep.subr.mxu0 %v729_v25  ;;  %v713_v47 = vld [vmem:[#allocation11 + $0x118] sm:$0xff]  ;;  %v710_v50 = vld [vmem:[#allocation11 + $0x100] sm:$0xff]  ;;  %v712_v19 = vld [vmem:[#allocation11 + $0x110] sm:$0xff] }
 0xb1d   : > { %v8803_v62 = vunpack.i.h.bf16 %v8801_v22  ;;  %v8802_v44 = vunpack.i.l.bf16 %v8801_v22  ;;  %8533 = vmatmul.mubr.f32.gmra.mxu0 %v4037_v40  ;;  %4541 = vmatpush1.msra.mxu1 %v726_v56  ;;  %v707_v21 = vld [vmem:[#allocation11 + $0xe8] sm:$0xff]  ;;  %v709_v40 = vld [vmem:[#allocation11 + $0xf8] sm:$0xff]  ;;  %v706_v22 = vld [vmem:[#allocation11 + $0xe0] sm:$0xff] }
 0xb1e   : > { %4702 = vmatpush1.msra.mxu0 %v728_v54  ;;  %4542 = vmatprep.subr.mxu1 %v723_v30  ;;  %v708_v4 = vld [vmem:[#allocation11 + $0xf0] sm:$0xff]  ;;  %v703_v20 = vld [vmem:[#allocation11 + $0xc8] sm:$0xff]  ;;  %v685_v2 = vld [vmem:[#allocation11 + $0x38] sm:$0xff] }
 0xb1f   : > { %v4021_v51 = vsel %vm4006_vm1, %v4004_v18, %v8802_v44  ;;  %v4022_v36 = vsel %vm4006_vm1, %v4005_v61, %v8803_v62  ;;  %4703 = vmatprep.subr.mxu0 %v725_v9  ;;  %4543 = vmatpush1.msra.mxu1 %v722_v35  ;;  %v704_v62 = vld [vmem:[#allocation11 + $0xd0] sm:$0xff]  ;;  %v699_v44 = vld [vmem:[#allocation11 + $0xa8] sm:$0xff]  ;;  %v682_v57 = vld [vmem:[#allocation11 + $0x20] sm:$0xff] }
 0xb20   : > { %v4038_v10 = vsel %vm4023_vm2, %v4021_v51, %v8807_v17  ;;  %v4039_v34 = vsel %vm4023_vm2, %v4022_v36, %v8808_v48  ;;  %4704 = vmatpush1.msra.mxu0 %v724_v14  ;;  %4544 = vmatprep.subr.mxu1 %v719_v59  ;;  %v701_v48 = vld [vmem:[#allocation11 + $0xb8] sm:$0xff]  ;;  %v698_v17 = vld [vmem:[#allocation11 + $0xa0] sm:$0xff]  ;;  %v700_v18 = vld [vmem:[#allocation11 + $0xb0] sm:$0xff] }
 0xb21   : > { %8535 = vmatprep.mubr.f32.mxu0 %v4038_v10  ;;  %4705 = vmatprep.subr.mxu0 %v721_v27  ;;  %v695_v61 = vld [vmem:[#allocation11 + $0x88] sm:$0xff]  ;;  %v697_v51 = vld [vmem:[#allocation11 + $0x98] sm:$0xff]  ;;  %v694_v36 = vld [vmem:[#allocation11 + $0x80] sm:$0xff] }
 0xb22   : > { %8536 = vmatmul.mubr.f32.gmra.mxu0 %v4039_v34  ;;  %4545 = vmatpush1.msra.mxu1 %v718_v26  ;;  %v696_v10 = vld [vmem:[#allocation11 + $0x90] sm:$0xff]  ;;  %v683_v39 = vld [vmem:[#allocation11 + $0x28] sm:$0xff]  ;;  %v681_v43 = vld [vmem:[#allocation11 + $0x18] sm:$0xff] }
 0xb23   : > { %4759 = vmatprep.mubr.f32.mxu0 %v14375_v7  ;;  %4706 = vmatpush1.msra.mxu0 %v720_v31  ;;  %v684_v6 = vld [vmem:[#allocation11 + $0x30] sm:$0xff]  ;;  %v679_v12 = vld [vmem:[#allocation11 + $0x8] sm:$0xff]  ;;  %v678_v56 = vld [vmem:[#allocation11] sm:$0xff] }
 0xb24   : > { %4546 = vmatprep.subr.mxu1 %v715_v32  ;;  %4707 = vmatprep.subr.mxu0 %v717_v49  ;;  %v9259_v42 = vld [vmem:[%s9856_s5 + $0x10] sm:$0xff]  ;;  %v9260_v9 = vld [vmem:[%s9856_s5 + $0x18] sm:$0xff]  ;;  %v9261_v32 = vld [vmem:[%s9856_s5 + $0x20] sm:$0xff] }
 0xb25   : > { %4547 = vmatpush1.msra.mxu1 %v714_v33  ;;  %4708 = vmatpush1.msra.mxu0 %v716_v37  ;;  %v680_v54 = vld [vmem:[#allocation11 + $0x10] sm:$0xff] }
 0xb26   : > { %4548 = vmatprep.subr.mxu1 %v711_v15  ;;  %4709 = vmatprep.subr.mxu0 %v713_v47  ;;  %v9262_v15 = vld [vmem:[%s9856_s5 + $0x28] sm:$0xff] }
 0xb27   : > { %4549 = vmatpush1.msra.mxu1 %v710_v50  ;;  %4710 = vmatpush1.msra.mxu0 %v712_v19 }
 0xb28   : > { %4550 = vmatprep.subr.mxu1 %v707_v21  ;;  %4711 = vmatprep.subr.mxu0 %v709_v40 }
 0xb29   : > { %4551 = vmatpush1.msra.mxu1 %v706_v22  ;;  %4712 = vmatpush1.msra.mxu0 %v708_v4  ;;  %v9263_v22 = vld [vmem:[%s9856_s5 + $0x30] sm:$0xff] }
 0xb2a   : > { %4552 = vmatprep.subr.mxu1 %v703_v20  ;;  %4713 = vmatprep.subr.mxu0 %v705_v53  ;;  %v9264_v53 = vld [vmem:[%s9856_s5 + $0x38] sm:$0xff] }
 0xb2b   : > { %4553 = vmatpush1.msra.mxu1 %v702_v55  ;;  %4714 = vmatpush1.msra.mxu0 %v704_v62 }
 0xb2c   : > { %4554 = vmatprep.subr.mxu1 %v699_v44  ;;  %4715 = vmatprep.subr.mxu0 %v701_v48 }
 0xb2d   : > { %4555 = vmatpush1.msra.mxu1 %v698_v17  ;;  %4716 = vmatpush1.msra.mxu0 %v700_v18 }
 0xb2e   : > { %4556 = vmatprep.subr.mxu1 %v695_v61  ;;  %4717 = vmatprep.subr.mxu0 %v697_v51 }
 0xb2f   : > { %4557 = vmatpush1.msra.mxu1 %v694_v36  ;;  %4718 = vmatpush1.msra.mxu0 %v696_v10 }
 0xb5e   : > { %v8516_v16 = vpop.f32.mrf.mxu0 }
 0xb5f   : > { %v4118_v28 = vadd.f32 %v8516_v16, %v11822_v0  ;;  %v691_v16 = vld [vmem:[#allocation11 + $0x68] sm:$0xff] }
 0xb60   : > { %v4112_v46 = vpop.f32.mrf.mxu0  ;;  %4558 = vmatprep.subr.mxu1 %v691_v16 }
 0xb61   : > { %v4198_v45 = vmul.f32 %v11827_v13, %v4118_v28  ;;  %v4113_v1 = vadd.f32 %v11822_v0, %v4112_v46  ;;  %v693_v28 = vld [vmem:[#allocation11 + $0x78] sm:$0xff] }
 0xb62   : > { %4719 = vmatprep.subr.mxu0 %v693_v28 }
 0xb63   : > { %v4197_v41 = vmul.f32 %v11827_v13, %v4113_v1  ;;  %v11834_v24 = vadd.f32 %v9257_v52, %v4198_v45  ;;  %v690_v45 = vld [vmem:[#allocation11 + $0x60] sm:$0xff]  ;;  %v692_v1 = vld [vmem:[#allocation11 + $0x70] sm:$0xff]  ;;  %v687_v52 = vld [vmem:[#allocation11 + $0x48] sm:$0xff] }
 0xb64   : > { %4559 = vmatpush1.msra.mxu1 %v690_v45  ;;  %4720 = vmatpush1.msra.mxu0 %v692_v1  ;;  %v9266_v45 = vld [vmem:[%s9856_s5 + $0x48] sm:$0xff] }
 0xb65   : > { %14421 = vst [vmem:[#allocation44_spill] sm:$0xff] %v11834_v24  ;;  %v11837_v23 = vadd.f32 %v9258_v58, %v4197_v41  ;;  %v4278_v29 = vmul.f32 %v11834_v24, %v11834_v24  ;;  %v689_v58 = vld [vmem:[#allocation11 + $0x58] sm:$0xff]  ;;  %4560 = vmatprep.subr.mxu1 %v687_v52 }
 0xb66   : > { %4721 = vmatprep.subr.mxu0 %v689_v58 }
 0xb67   : > { %14422 = vst [vmem:[#allocation46_spill] sm:$0xff] %v11837_v23  ;;  %4229 = vadd.xlane.f32.xlu1 %v11837_v23  ;;  %v4277_v8 = vmul.f32 %v11837_v23, %v11837_v23  ;;  %4722 = vmatpush1.msra.mxu0 %v688_v5  ;;  %v9267_v5 = vld [vmem:[%s9856_s5 + $0x50] sm:$0xff] }
 0xb68   : > { %4723 = vmatprep.subr.mxu0 %v685_v2 }
 0xb69   : > { %4293 = vadd.xlane.f32.xlu0 %v4277_v8  ;;  %4724 = vmatpush1.msra.mxu0 %v684_v6 }
 0xb6a   : > { %4725 = vmatprep.subr.mxu0 %v681_v43 }
 0xb6b   : > { %4295 = vadd.xlane.f32.xlu1 %v4278_v29  ;;  %v686_v29 = vld [vmem:[#allocation11 + $0x40] sm:$0xff]  ;;  %4726 = vmatpush1.msra.mxu0 %v680_v54 }
 0xb6c   : > { %4561 = vmatpush1.msra.mxu1 %v686_v29 }
 0xb6d   : > { %4231 = vadd.xlane.f32.xlu0 %v11834_v24  ;;  %4562 = vmatprep.subr.mxu1 %v683_v39 }
 0xb6e   : > { %4563 = vmatpush1.msra.mxu1 %v682_v57 }
 0xb6f   : > { %4564 = vmatprep.subr.mxu1 %v679_v12 }
 0xb70   : > { %4565 = vmatpush1.msra.mxu1 %v678_v56  ;;  %v9269_v56 = vld [vmem:[%s9856_s5 + $0x60] sm:$0xff] }
 0xb8a   : > { %v8519_v34 = vpop.f32.mrf.mxu0 }
 0xb8b   : > { %v4128_v46 = vadd.f32 %v8519_v34, %v11822_v0  ;;  %v9265_v34 = vld [vmem:[%s9856_s5 + $0x40] sm:$0xff] }
 0xb8c   : > { %v4122_v41 = vpop.f32.mrf.mxu0 }
 0xb8d   : > { %v4123_v8 = vadd.f32 %v11822_v0, %v4122_v41  ;;  %v4200_v60 = vmul.f32 %v11827_v13, %v4128_v46 }
 0xb8e   : > { %v8522_v11 = vpop.f32.mrf.mxu0 }
 0xb8f   : > { %v4199_v38 = vmul.f32 %v11827_v13, %v4123_v8  ;;  %v11854_v35 = vadd.f32 %v9260_v9, %v4200_v60  ;;  %v4138_v14 = vadd.f32 %v8522_v11, %v11822_v0 }
 0xb90   : > { %v4132_v63 = vpop.f32.mrf.mxu0 }
 0xb91   : > { %v11850_v3 = vadd.f32 %v9259_v42, %v4199_v38  ;;  %v4133_v25 = vadd.f32 %v11822_v0, %v4132_v63  ;;  %14424 = vst [vmem:[#allocation22_spill] sm:$0xff] %v11854_v35  ;;  %v4202_v31 = vmul.f32 %v11827_v13, %v4138_v14  ;;  %v4280_v37 = vmul.f32 %v11854_v35, %v11854_v35  ;;  %v9268_v38 = vld [vmem:[%s9856_s5 + $0x58] sm:$0xff]  ;;  %v9270_v14 = vld [vmem:[%s9856_s5 + $0x68] sm:$0xff] }
 0xb92   : > { %v8525_v30 = vpop.f32.mrf.mxu0 }
 0xb93   : > { %14423 = vst [vmem:[#allocation23_spill] sm:$0xff] %v11850_v3  ;;  %v4201_v59 = vmul.f32 %v11827_v13, %v4133_v25  ;;  %4233 = vadd.xlane.f32.xlu0 %v11850_v3  ;;  %v4279_v27 = vmul.f32 %v11850_v3, %v11850_v3  ;;  %v11870_v47 = vadd.f32 %v9262_v15, %v4202_v31 }
 0xb94   : > { %v4142_v26 = vpop.f32.mrf.mxu0  ;;  %v4148_v50 = vadd.f32 %v8525_v30, %v11822_v0 }
 0xb95   : > { %4297 = vadd.xlane.f32.xlu1 %v4279_v27  ;;  %v11863_v49 = vadd.f32 %v9261_v32, %v4201_v59  ;;  %v4143_v33 = vadd.f32 %v11822_v0, %v4142_v26  ;;  %14426 = vst [vmem:[#allocation24_spill] sm:$0xff] %v11870_v47  ;;  %v4282_v20 = vmul.f32 %v11870_v47, %v11870_v47 }
 0xb96   : > { %v4204_v40 = vmul.f32 %v11827_v13, %v4148_v50 }
 0xb97   : > { %14425 = vst [vmem:[#allocation25_spill] sm:$0xff] %v11863_v49  ;;  %4235 = vadd.xlane.f32.xlu0 %v11854_v35  ;;  %v4203_v19 = vmul.f32 %v11827_v13, %v4143_v33  ;;  %v4281_v21 = vmul.f32 %v11863_v49, %v11863_v49  ;;  %v9271_v33 = vld [vmem:[%s9856_s5 + $0x70] sm:$0xff] }
 0xb98   : > { %v11885_v55 = vadd.f32 %v9264_v53, %v4204_v40 }
 0xb99   : > { %4299 = vadd.xlane.f32.xlu1 %v4280_v37  ;;  %v11879_v4 = vadd.f32 %v9263_v22, %v4203_v19  ;;  %v9272_v19 = vld [vmem:[%s9856_s5 + $0x78] sm:$0xff]  ;;  %s14049_s5 = scalar_lea.hbm %s14595_s30, %s7497_s23 }
 0xb9a   : > { %14428 = vst [vmem:[#allocation26_spill] sm:$0xff] %v11885_v55  ;;  %v4284_v44 = vmul.f32 %v11885_v55, %v11885_v55 }
 0xb9b   : > { %4237 = vadd.xlane.f32.xlu0 %v11863_v49  ;;  %14427 = vst [vmem:[#allocation27_spill] sm:$0xff] %v11879_v4  ;;  %v4283_v62 = vmul.f32 %v11879_v4, %v11879_v4 }
 0xb9d   : > { %4301 = vadd.xlane.f32.xlu1 %v4281_v21 }
 0xb9f   : > { %4239 = vadd.xlane.f32.xlu0 %v11870_v47 }
 0xba1   : > { %4303 = vadd.xlane.f32.xlu1 %v4282_v20 }
 0xba3   : > { %4241 = vadd.xlane.f32.xlu0 %v11879_v4 }
 0xba5   : > { %4305 = vadd.xlane.f32.xlu1 %v4283_v62 }
 0xba7   : > { %4243 = vadd.xlane.f32.xlu0 %v11885_v55 }
 0xba9   : > { %4307 = vadd.xlane.f32.xlu1 %v4284_v44 }
 0xbd1   : > { %v8528_v48 = vpop.f32.mrf.mxu0 }
 0xbd2   : > { %v4158_v17 = vadd.f32 %v8528_v48, %v11822_v0 }
 0xbd3   : > { %v4152_v18 = vpop.f32.mrf.mxu0 }
 0xbd4   : > { %v4153_v61 = vadd.f32 %v11822_v0, %v4152_v18  ;;  %v4206_v51 = vmul.f32 %v11827_v13, %v4158_v17 }
 0xbd6   : > { %v4205_v36 = vmul.f32 %v11827_v13, %v4153_v61  ;;  %v8531_v10 = vpop.f32.mrf.mxu0  ;;  %v11902_v1 = vadd.f32 %v9266_v45, %v4206_v51 }
 0xbd7   : > { %v4168_v41 = vadd.f32 %v8531_v10, %v11822_v0 }
 0xbd8   : > { %v11898_v16 = vadd.f32 %v9265_v34, %v4205_v36  ;;  %v4162_v28 = vpop.f32.mrf.mxu0  ;;  %14430 = vst [vmem:[#allocation28_spill] sm:$0xff] %v11902_v1  ;;  %v4286_v39 = vmul.f32 %v11902_v1, %v11902_v1 }
 0xbd9   : > { %v4163_v46 = vadd.f32 %v11822_v0, %v4162_v28  ;;  %v4208_v29 = vmul.f32 %v11827_v13, %v4168_v41 }
 0xbda   : > { %14429 = vst [vmem:[#allocation29_spill] sm:$0xff] %v11898_v16  ;;  %4245 = vadd.xlane.f32.xlu0 %v11898_v16  ;;  %v4285_v52 = vmul.f32 %v11898_v16, %v11898_v16 }
 0xbdb   : > { %v4207_v58 = vmul.f32 %v11827_v13, %v4163_v46  ;;  %v11918_v57 = vadd.f32 %v9268_v38, %v4208_v29  ;;  %v11960_v46 = vld [vmem:[%s14103_s7] ss:$0 sm:$0xff] }
 0xbdc   : > { %4309 = vadd.xlane.f32.xlu1 %v4285_v52  ;;  %v11966_v52 = vld [vmem:[%s14104_s8] ss:$0 sm:$0xff] }
 0xbdd   : > { %v8534_v8 = vpop.f32.mrf.mxu0  ;;  %v11911_v11 = vadd.f32 %v9267_v5, %v4207_v58  ;;  %14432 = vst [vmem:[#allocation30_spill] sm:$0xff] %v11918_v57  ;;  %v4288_v9 = vmul.f32 %v11918_v57, %v11918_v57 }
 0xbde   : > { %4247 = vadd.xlane.f32.xlu0 %v11902_v1  ;;  %v4178_v6 = vadd.f32 %v8534_v8, %v11822_v0 }
 0xbdf   : > { %14431 = vst [vmem:[#allocation31_spill] sm:$0xff] %v11911_v11  ;;  %v4172_v2 = vpop.f32.mrf.mxu0  ;;  %v4287_v43 = vmul.f32 %v11911_v11, %v11911_v11 }
 0xbe0   : > { %v4173_v60 = vadd.f32 %v11822_v0, %v4172_v2  ;;  %4311 = vadd.xlane.f32.xlu1 %v4286_v39  ;;  %v4210_v25 = vmul.f32 %v11827_v13, %v4178_v6 }
 0xbe2   : > { %v4209_v63 = vmul.f32 %v11827_v13, %v4173_v60  ;;  %v8537_v12 = vpop.f32.mrf.mxu0  ;;  %4249 = vadd.xlane.f32.xlu0 %v11911_v11  ;;  %v11934_v59 = vadd.f32 %v9270_v14, %v4210_v25 }
 0xbe3   : > { %v4188_v27 = vadd.f32 %v8537_v12, %v11822_v0 }
 0xbe4   : > { %v4182_v42 = vpop.f32.mrf.mxu0  ;;  %4313 = vadd.xlane.f32.xlu1 %v4287_v43  ;;  %v11927_v54 = vadd.f32 %v9269_v56, %v4209_v63  ;;  %14434 = vst [vmem:[#allocation32_spill] sm:$0xff] %v11934_v59  ;;  %v4290_v15 = vmul.f32 %v11934_v59, %v11934_v59 }
 0xbe5   : > { %v4183_v30 = vadd.f32 %v11822_v0, %v4182_v42  ;;  %v4212_v32 = vmul.f32 %v11827_v13, %v4188_v27 }
 0xbe6   : > { %14433 = vst [vmem:[#allocation34_spill] sm:$0xff] %v11927_v54  ;;  %4251 = vadd.xlane.f32.xlu0 %v11918_v57  ;;  %v4289_v31 = vmul.f32 %v11927_v54, %v11927_v54 }
 0xbe7   : > { %v4211_v26 = vmul.f32 %v11827_v13, %v4183_v30  ;;  %v11949_v21 = vadd.f32 %v9272_v19, %v4212_v32 }
 0xbe8   : > { %4315 = vadd.xlane.f32.xlu1 %v4288_v9 }
 0xbe9   : > { %v11943_v37 = vadd.f32 %v9271_v33, %v4211_v26  ;;  %14436 = vst [vmem:[#allocation35_spill] sm:$0xff] %v11949_v21  ;;  %v4292_v48 = vmul.f32 %v11949_v21, %v11949_v21 }
 0xbea   : > { %4253 = vadd.xlane.f32.xlu0 %v11927_v54 }
 0xbeb   : > { %14435 = vst [vmem:[#allocation36_spill] sm:$0xff] %v11943_v37  ;;  %v4291_v13 = vmul.f32 %v11943_v37, %v11943_v37 }
 0xbec   : > { %4317 = vadd.xlane.f32.xlu1 %v4289_v31 }
 0xbee   : > { %4255 = vadd.xlane.f32.xlu0 %v11934_v59 }
 0xbf0   : > { %4319 = vadd.xlane.f32.xlu1 %v4290_v15  ;;  %v4230_v0 = vpop.xlane.xlu1 %4229 }
 0xbf1   : > { %v4261_v50 = vmul.f32 0.0078125, %v4230_v0 }
 0xbf2   : > { %4257 = vadd.xlane.f32.xlu0 %v11943_v37  ;;  %v4294_v40 = vpop.xlane.xlu0 %4293 }
 0xbf3   : > { %v4341_v22 = vmul.f32 %v4261_v50, %v4261_v50  ;;  %v4325_v20 = vmul.f32 0.0078125, %v4294_v40 }
 0xbf4   : > { %4321 = vadd.xlane.f32.xlu1 %v4291_v13  ;;  %v4296_v62 = vpop.xlane.xlu1 %4295 }
 0xbf5   : > { %v4357_v53 = vsub.f32 %v4325_v20, %v4341_v22  ;;  %v4326_v51 = vmul.f32 0.0078125, %v4296_v62 }
 0xbf6   : > { %4259 = vadd.xlane.f32.xlu0 %v11949_v21  ;;  %v4232_v44 = vpop.xlane.xlu0 %4231 }
 0xbf7   : > { %v4373_v17 = vmax.f32 %v4357_v53, 0.0  ;;  %v4262_v18 = vmul.f32 0.0078125, %v4232_v44 }
 0xbf8   : > { %4323 = vadd.xlane.f32.xlu1 %v4292_v48 }
 0xbf9   : > { %v4389_v61 = vadd.f32 1e-05, %v4373_v17  ;;  %v4342_v36 = vmul.f32 %v4262_v18, %v4262_v18 }
 0xbfb   : > { %9097 = vrsqrt.f32 %v4389_v61  ;;  %v4358_v10 = vsub.f32 %v4326_v51, %v4342_v36 }
 0xbfd   : > { %v4374_v34 = vmax.f32 %v4358_v10, 0.0 }
 0xbff   : > { %v4390_v28 = vadd.f32 1e-05, %v4374_v34 }
 0xc01   : > { %9099 = vrsqrt.f32 %v4390_v28 }
 0xc08   : > { %v9098_v45 = vpop.eup %9097 }
 0xc09   : > { %v4427_v41 = vmul.f32 %v9098_v45, %v11960_v46 }
 0xc0b   : > { %v4459_v58 = vmul.f32 %v4427_v41, %v4261_v50  ;;  %v4443_v8 = vmul.f32 %v4427_v41, %v11837_v23 }
 0xc0d   : > { %v4481_v29 = vsub.f32 %v11966_v52, %v4459_v58 }
 0xc0e   : > { %v9100_v5 = vpop.eup %9099 }
 0xc0f   : > { %v4428_v39 = vmul.f32 %v9100_v5, %v11960_v46  ;;  %v4497_v2 = vadd.f32 %v4481_v29, %v4443_v8 }
 0xc11   : > { %v4460_v60 = vmul.f32 %v4428_v39, %v4262_v18  ;;  %4599 = vmatmul.mubr.f32.vlgmr.msra.gmra.mxu1 %v4497_v2  ;;  %4760 = vmatmul.mubr.f32.vlgmr.msra.gmra.mxu0 %v4497_v2  ;;  %v4444_v6 = vmul.f32 %v4428_v39, %v11834_v24 }
 0xc12   : > { %4604 = vmatprep.mubr.f32.mxu1 %v14375_v7  ;;  %4765 = vmatprep.mubr.f32.mxu0 %v14375_v7 }
 0xc13   : > { %v4482_v38 = vsub.f32 %v11966_v52, %v4460_v60 }
 0xc15   : > { %v4498_v63 = vadd.f32 %v4482_v38, %v4444_v6 }
 0xc17   : > { %4605 = vmatmul.mubr.f32.gmra.mxu1 %v4498_v63  ;;  %4766 = vmatmul.mubr.f32.gmra.mxu0 %v4498_v63 }
 0xc18   : > { %4610 = vmatprep.mubr.f32.mxu1 %v14375_v7  ;;  %4771 = vmatprep.mubr.f32.mxu0 %v14375_v7 }
 0xc1c   : > { %v4234_v12 = vpop.xlane.xlu0 %4233 }
 0xc1d   : > { %v4263_v43 = vmul.f32 0.0078125, %v4234_v12 }
 0xc1e   : > { %v4298_v42 = vpop.xlane.xlu1 %4297 }
 0xc1f   : > { %v4343_v25 = vmul.f32 %v4263_v43, %v4263_v43  ;;  %v4327_v56 = vmul.f32 0.0078125, %v4298_v42 }
 0xc20   : > { %v4236_v30 = vpop.xlane.xlu0 %4235 }
 0xc21   : > { %v4359_v9 = vsub.f32 %v4327_v56, %v4343_v25  ;;  %v4264_v14 = vmul.f32 0.0078125, %v4236_v30 }
 0xc22   : > { %v4300_v27 = vpop.xlane.xlu1 %4299 }
 0xc23   : > { %v4375_v26 = vmax.f32 %v4359_v9, 0.0  ;;  %v4344_v31 = vmul.f32 %v4264_v14, %v4264_v14  ;;  %v4328_v32 = vmul.f32 0.0078125, %v4300_v27 }
 0xc24   : > { %v4238_v33 = vpop.xlane.xlu0 %4237 }
 0xc25   : > { %v4391_v15 = vadd.f32 1e-05, %v4375_v26  ;;  %v4360_v0 = vsub.f32 %v4328_v32, %v4344_v31  ;;  %v4265_v50 = vmul.f32 0.0078125, %v4238_v33 }
 0xc26   : > { %v4302_v19 = vpop.xlane.xlu1 %4301 }
 0xc27   : > { %9101 = vrsqrt.f32 %v4391_v15  ;;  %v4376_v40 = vmax.f32 %v4360_v0, 0.0  ;;  %v4345_v13 = vmul.f32 %v4265_v50, %v4265_v50  ;;  %v4329_v22 = vmul.f32 0.0078125, %v4302_v19 }
 0xc28   : > { %v4240_v20 = vpop.xlane.xlu0 %4239 }
 0xc29   : > { %v4392_v53 = vadd.f32 1e-05, %v4376_v40  ;;  %v4361_v62 = vsub.f32 %v4329_v22, %v4345_v13  ;;  %v4266_v44 = vmul.f32 0.0078125, %v4240_v20 }
 0xc2a   : > { %v4304_v48 = vpop.xlane.xlu1 %4303 }
 0xc2b   : > { %9103 = vrsqrt.f32 %v4392_v53  ;;  %v4377_v17 = vmax.f32 %v4361_v62, 0.0  ;;  %v4346_v18 = vmul.f32 %v4266_v44, %v4266_v44  ;;  %v4330_v61 = vmul.f32 0.0078125, %v4304_v48 }
 0xc2c   : > { %v4242_v51 = vpop.xlane.xlu0 %4241 }
 0xc2d   : > { %v4393_v36 = vadd.f32 1e-05, %v4377_v17  ;;  %v4362_v10 = vsub.f32 %v4330_v61, %v4346_v18  ;;  %v4267_v34 = vmul.f32 0.0078125, %v4242_v51 }
 0xc2e   : > { %v4306_v28 = vpop.xlane.xlu1 %4305 }
 0xc2f   : > { %9105 = vrsqrt.f32 %v4393_v36  ;;  %v4378_v45 = vmax.f32 %v4362_v10, 0.0  ;;  %v4347_v41 = vmul.f32 %v4267_v34, %v4267_v34  ;;  %v4331_v58 = vmul.f32 0.0078125, %v4306_v28 }
 0xc30   : > { %v4244_v8 = vpop.xlane.xlu0 %4243 }
 0xc31   : > { %v4394_v29 = vadd.f32 1e-05, %v4378_v45  ;;  %v4363_v5 = vsub.f32 %v4331_v58, %v4347_v41  ;;  %v4268_v39 = vmul.f32 0.0078125, %v4244_v8 }
 0xc32   : > { %v4308_v2 = vpop.xlane.xlu1 %4307 }
 0xc33   : > { %9107 = vrsqrt.f32 %v4394_v29  ;;  %v4379_v60 = vmax.f32 %v4363_v5, 0.0  ;;  %v4348_v38 = vmul.f32 %v4268_v39, %v4268_v39  ;;  %v4332_v6 = vmul.f32 0.0078125, %v4308_v2 }
 0xc34   : > { %v9102_v63 = vpop.eup %9101 }
 0xc35   : > { %v4395_v12 = vadd.f32 1e-05, %v4379_v60  ;;  %v4364_v42 = vsub.f32 %v4332_v6, %v4348_v38  ;;  %v4429_v25 = vmul.f32 %v9102_v63, %v11960_v46 }
 0xc37   : > { %9109 = vrsqrt.f32 %v4395_v12  ;;  %v4380_v56 = vmax.f32 %v4364_v42, 0.0  ;;  %v4461_v30 = vmul.f32 %v4429_v25, %v4263_v43  ;;  %v4445_v26 = vmul.f32 %v4429_v25, %v11850_v3 }
 0xc38   : > { %v9104_v9 = vpop.eup %9103 }
 0xc39   : > { %v4396_v27 = vadd.f32 1e-05, %v4380_v56  ;;  %v4483_v31 = vsub.f32 %v11966_v52, %v4461_v30  ;;  %v4430_v32 = vmul.f32 %v9104_v9, %v11960_v46 }
 0xc3b   : > { %9111 = vrsqrt.f32 %v4396_v27  ;;  %v4499_v33 = vadd.f32 %v4483_v31, %v4445_v26  ;;  %v4462_v15 = vmul.f32 %v4430_v32, %v4264_v14  ;;  %v4446_v19 = vmul.f32 %v4430_v32, %v11854_v35 }
 0xc3c   : > { %v9106_v0 = vpop.eup %9105 }
 0xc3d   : > { %4611 = vmatmul.mubr.f32.gmra.mxu1 %v4499_v33  ;;  %4772 = vmatmul.mubr.f32.gmra.mxu0 %v4499_v33  ;;  %v4484_v40 = vsub.f32 %v11966_v52, %v4462_v15  ;;  %v4431_v43 = vmul.f32 %v9106_v0, %v11960_v46 }
 0xc3e   : > { %4616 = vmatprep.mubr.f32.mxu1 %v14375_v7  ;;  %4777 = vmatprep.mubr.f32.mxu0 %v14375_v7 }
 0xc3f   : > { %v4500_v13 = vadd.f32 %v4484_v40, %v4446_v19  ;;  %v4463_v22 = vmul.f32 %v4431_v43, %v4265_v50  ;;  %v4447_v14 = vmul.f32 %v4431_v43, %v11863_v49 }
 0xc40   : > { %v9108_v20 = vpop.eup %9107 }
 0xc41   : > { %4617 = vmatmul.mubr.f32.gmra.mxu1 %v4500_v13  ;;  %4778 = vmatmul.mubr.f32.gmra.mxu0 %v4500_v13  ;;  %v4485_v53 = vsub.f32 %v11966_v52, %v4463_v22  ;;  %v4432_v62 = vmul.f32 %v9108_v20, %v11960_v46 }
 0xc42   : > { %4622 = vmatprep.mubr.f32.mxu1 %v14375_v7  ;;  %4783 = vmatprep.mubr.f32.mxu0 %v14375_v7 }
 0xc43   : > { %v4501_v48 = vadd.f32 %v4485_v53, %v4447_v14  ;;  %v4464_v17 = vmul.f32 %v4432_v62, %v4266_v44  ;;  %v4448_v50 = vmul.f32 %v4432_v62, %v11870_v47 }
 0xc44   : > { %v9110_v18 = vpop.eup %9109 }
 0xc45   : > { %4623 = vmatmul.mubr.f32.gmra.mxu1 %v4501_v48  ;;  %4784 = vmatmul.mubr.f32.gmra.mxu0 %v4501_v48  ;;  %v4486_v61 = vsub.f32 %v11966_v52, %v4464_v17  ;;  %v4433_v51 = vmul.f32 %v9110_v18, %v11960_v46 }
 0xc46   : > { %4628 = vmatprep.mubr.f32.mxu1 %v14375_v7  ;;  %4789 = vmatprep.mubr.f32.mxu0 %v14375_v7 }
 0xc47   : > { %v4502_v36 = vadd.f32 %v4486_v61, %v4448_v50  ;;  %v4465_v10 = vmul.f32 %v4433_v51, %v4267_v34  ;;  %v4449_v44 = vmul.f32 %v4433_v51, %v11879_v4 }
 0xc48   : > { %v9112_v28 = vpop.eup %9111 }
 0xc49   : > { %4629 = vmatmul.mubr.f32.gmra.mxu1 %v4502_v36  ;;  %4790 = vmatmul.mubr.f32.gmra.mxu0 %v4502_v36  ;;  %v4487_v45 = vsub.f32 %v11966_v52, %v4465_v10  ;;  %v4434_v41 = vmul.f32 %v9112_v28, %v11960_v46 }
 0xc4a   : > { %4634 = vmatprep.mubr.f32.mxu1 %v14375_v7  ;;  %4795 = vmatprep.mubr.f32.mxu0 %v14375_v7 }
 0xc4b   : > { %v4503_v58 = vadd.f32 %v4487_v45, %v4449_v44  ;;  %v4466_v8 = vmul.f32 %v4434_v41, %v4268_v39  ;;  %v4450_v29 = vmul.f32 %v4434_v41, %v11885_v55 }
 0xc4d   : > { %4635 = vmatmul.mubr.f32.gmra.mxu1 %v4503_v58  ;;  %4796 = vmatmul.mubr.f32.gmra.mxu0 %v4503_v58  ;;  %v4488_v34 = vsub.f32 %v11966_v52, %v4466_v8 }
 0xc4e   : > { %4640 = vmatprep.mubr.f32.mxu1 %v14375_v7  ;;  %4801 = vmatprep.mubr.f32.mxu0 %v14375_v7 }
 0xc4f   : > { %v4504_v5 = vadd.f32 %v4488_v34, %v4450_v29 }
 0xc51   : > { %4641 = vmatmul.mubr.f32.gmra.mxu1 %v4504_v5  ;;  %4802 = vmatmul.mubr.f32.gmra.mxu0 %v4504_v5 }
 0xc52   : > { %4646 = vmatprep.mubr.f32.mxu1 %v14375_v7  ;;  %4807 = vmatprep.mubr.f32.mxu0 %v14375_v7 }
 0xc63   : > { %v4246_v2 = vpop.xlane.xlu0 %4245 }
 0xc64   : > { %v12007_v60 = vmul.f32 0.0078125, %v4246_v2 }
 0xc65   : > { %v4310_v39 = vpop.xlane.xlu1 %4309 }
 0xc66   : > { %v4349_v38 = vmul.f32 %v12007_v60, %v12007_v60  ;;  %v4333_v6 = vmul.f32 0.0078125, %v4310_v39  ;;  %v774_v39 = vld [vmem:[#allocation13 + $0xf8] sm:$0xff] }
 0xc67   : > { %v4248_v63 = vpop.xlane.xlu0 %4247  ;;  %7818 = vmatprep.subr.mxu1 %v774_v39  ;;  %v770_v39 = vld [vmem:[#allocation13 + $0xd8] sm:$0xff] }
 0xc68   : > { %v4365_v12 = vsub.f32 %v4333_v6, %v4349_v38  ;;  %v12011_v42 = vmul.f32 0.0078125, %v4248_v63  ;;  %v12031_v38 = vld [vmem:[#allocation13 + $0x1f8] sm:$0xff] }
 0xc69   : > { %v4312_v25 = vpop.xlane.xlu1 %4311  ;;  %7898 = vmatprep.subr.mxu0 %v12031_v38 }
 0xc6a   : > { %v4381_v56 = vmax.f32 %v4365_v12, 0.0  ;;  %v4350_v30 = vmul.f32 %v12011_v42, %v12011_v42  ;;  %v4334_v9 = vmul.f32 0.0078125, %v4312_v25 }
 0xc6b   : > { %v4250_v27 = vpop.xlane.xlu0 %4249 }
 0xc6c   : > { %v4397_v26 = vadd.f32 1e-05, %v4381_v56  ;;  %v4366_v31 = vsub.f32 %v4334_v9, %v4350_v30  ;;  %v12015_v32 = vmul.f32 0.0078125, %v4250_v27  ;;  %v758_v56 = vld [vmem:[#allocation13 + $0x78] sm:$0xff]  ;;  %v773_v27 = vld [vmem:[#allocation13 + $0xf0] sm:$0xff] }
 0xc6d   : > { %v4314_v33 = vpop.xlane.xlu1 %4313  ;;  %v790_v30 = vld [vmem:[#allocation13 + $0x178] sm:$0xff]  ;;  %7819 = vmatpush3.msra.mxu1 %v758_v56 }
 0xc6e   : > { %9113 = vrsqrt.f32 %v4397_v26  ;;  %v4382_v15 = vmax.f32 %v4366_v31, 0.0  ;;  %v4351_v0 = vmul.f32 %v12015_v32, %v12015_v32  ;;  %v4335_v19 = vmul.f32 0.0078125, %v4314_v33  ;;  %7899 = vmatpush3.msra.mxu0 %v790_v30  ;;  %v805_v26 = vld [vmem:[#allocation13 + $0x1f0] sm:$0xff]  ;;  %7820 = vmatprep.subr.mxu1 %v773_v27  ;;  %v754_v30 = vld [vmem:[#allocation13 + $0x58] sm:$0xff] }
 0xc6f   : > { %v4252_v40 = vpop.xlane.xlu0 %4251  ;;  %7900 = vmatprep.subr.mxu0 %v805_v26 }
 0xc70   : > { %v4398_v43 = vadd.f32 1e-05, %v4382_v15  ;;  %v4367_v13 = vsub.f32 %v4335_v19, %v4351_v0  ;;  %v12019_v22 = vmul.f32 0.0078125, %v4252_v40  ;;  %v757_v0 = vld [vmem:[#allocation13 + $0x70] sm:$0xff] }
 0xc71   : > { %v4316_v20 = vpop.xlane.xlu1 %4315  ;;  %v789_v19 = vld [vmem:[#allocation13 + $0x170] sm:$0xff]  ;;  %7821 = vmatpush3.msra.mxu1 %v757_v0 }
 0xc72   : > { %9115 = vrsqrt.f32 %v4398_v43  ;;  %v4383_v14 = vmax.f32 %v4367_v13, 0.0  ;;  %v4352_v53 = vmul.f32 %v12019_v22, %v12019_v22  ;;  %v4336_v62 = vmul.f32 0.0078125, %v4316_v20  ;;  %7901 = vmatpush3.msra.mxu0 %v789_v19  ;;  %v772_v20 = vld [vmem:[#allocation13 + $0xe8] sm:$0xff] }
 0xc73   : > { %v4254_v48 = vpop.xlane.xlu0 %4253  ;;  %7822 = vmatprep.subr.mxu1 %v772_v20 }
 0xc74   : > { %v4399_v17 = vadd.f32 1e-05, %v4383_v14  ;;  %v4368_v18 = vsub.f32 %v4336_v62, %v4352_v53  ;;  %v12023_v50 = vmul.f32 0.0078125, %v4254_v48  ;;  %v804_v14 = vld [vmem:[#allocation13 + $0x1e8] sm:$0xff] }
 0xc75   : > { %v4318_v61 = vpop.xlane.xlu1 %4317  ;;  %7902 = vmatprep.subr.mxu0 %v804_v14  ;;  %v753_v14 = vld [vmem:[#allocation13 + $0x50] sm:$0xff] }
 0xc76   : > { %9117 = vrsqrt.f32 %v4399_v17  ;;  %v4384_v51 = vmax.f32 %v4368_v18, 0.0  ;;  %v4353_v36 = vmul.f32 %v12023_v50, %v12023_v50  ;;  %v4337_v10 = vmul.f32 0.0078125, %v4318_v61  ;;  %v756_v18 = vld [vmem:[#allocation13 + $0x68] sm:$0xff] }
 0xc77   : > { %v4256_v28 = vpop.xlane.xlu0 %4255  ;;  %v788_v61 = vld [vmem:[#allocation13 + $0x168] sm:$0xff]  ;;  %7823 = vmatpush3.msra.mxu1 %v756_v18 }
 0xc78   : > { %v4400_v44 = vadd.f32 1e-05, %v4384_v51  ;;  %v4369_v45 = vsub.f32 %v4337_v10, %v4353_v36  ;;  %v12027_v41 = vmul.f32 0.0078125, %v4256_v28  ;;  %7903 = vmatpush3.msra.mxu0 %v788_v61  ;;  %v803_v28 = vld [vmem:[#allocation13 + $0x1e0] sm:$0xff] }
 0xc79   : > { %v4320_v58 = vpop.xlane.xlu1 %4319  ;;  %7904 = vmatprep.subr.mxu0 %v803_v28  ;;  %v784_v28 = vld [vmem:[#allocation13 + $0x148] sm:$0xff] }
 0xc7a   : > { %9119 = vrsqrt.f32 %v4400_v44  ;;  %v4385_v8 = vmax.f32 %v4369_v45, 0.0  ;;  %v4354_v29 = vmul.f32 %v12027_v41, %v12027_v41  ;;  %v4338_v34 = vmul.f32 0.0078125, %v4320_v58 }
 0xc7b   : > { %v9114_v5 = vpop.eup %9113  ;;  %v4258_v2 = vpop.xlane.xlu0 %4257 }
 0xc7c   : > { %v4401_v6 = vadd.f32 1e-05, %v4385_v8  ;;  %v4370_v63 = vsub.f32 %v4338_v34, %v4354_v29  ;;  %v12033_v12 = vmul.f32 0.0078125, %v4258_v2  ;;  %v4435_v25 = vmul.f32 %v9114_v5, %v11960_v46  ;;  %v755_v8 = vld [vmem:[#allocation13 + $0x60] sm:$0xff] }
 0xc7d   : > { %v4322_v9 = vpop.xlane.xlu1 %4321  ;;  %v787_v29 = vld [vmem:[#allocation13 + $0x160] sm:$0xff] }
 0xc7e   : > { %9121 = vrsqrt.f32 %v4401_v6  ;;  %v4386_v31 = vmax.f32 %v4370_v63, 0.0  ;;  %v4355_v33 = vmul.f32 %v12033_v12, %v12033_v12  ;;  %v4339_v15 = vmul.f32 0.0078125, %v4322_v9  ;;  %7905 = vmatpush3.msra.mxu0 %v787_v29  ;;  %v802_v6 = vld [vmem:[#allocation13 + $0x1d8] sm:$0xff] }
 0xc7f   : > { %v9116_v40 = vpop.eup %9115  ;;  %v4260_v43 = vpop.xlane.xlu0 %4259  ;;  %v4467_v13 = vmul.f32 %v4435_v25, %v12007_v60  ;;  %v4451_v36 = vmul.f32 %v4435_v25, %v11898_v16  ;;  %v771_v60 = vld [vmem:[#allocation13 + $0xe0] sm:$0xff]  ;;  %7906 = vmatprep.subr.mxu0 %v802_v6  ;;  %v786_v9 = vld [vmem:[#allocation13 + $0x158] sm:$0xff] }
 0xc80   : > { %v4402_v53 = vadd.f32 1e-05, %v4386_v31  ;;  %v4371_v62 = vsub.f32 %v4339_v15, %v4355_v33  ;;  %v12040_v48 = vmul.f32 0.0078125, %v4260_v43  ;;  %v4436_v17 = vmul.f32 %v9116_v40, %v11960_v46  ;;  %7824 = vmatprep.subr.mxu1 %v771_v60  ;;  %v769_v31 = vld [vmem:[#allocation13 + $0xd0] sm:$0xff]  ;;  %7907 = vmatpush3.msra.mxu0 %v786_v9  ;;  %v752_v60 = vld [vmem:[#allocation13 + $0x48] sm:$0xff]  ;;  %v766_v6 = vld [vmem:[#allocation13 + $0xb8] sm:$0xff] }
 0xc81   : > { %v4324_v51 = vpop.xlane.xlu1 %4323  ;;  %v4489_v10 = vsub.f32 %v11966_v52, %v4467_v13  ;;  %7825 = vmatpush3.msra.mxu1 %v755_v8 }
 0xc82   : > { %9123 = vrsqrt.f32 %v4402_v53  ;;  %v4387_v44 = vmax.f32 %v4371_v62, 0.0  ;;  %v4356_v45 = vmul.f32 %v12040_v48, %v12040_v48  ;;  %v4340_v58 = vmul.f32 0.0078125, %v4324_v51  ;;  %7826 = vmatprep.subr.mxu1 %v770_v39  ;;  %v785_v53 = vld [vmem:[#allocation13 + $0x150] sm:$0xff]  ;;  %v768_v62 = vld [vmem:[#allocation13 + $0xc8] sm:$0xff]  ;;  %v783_v39 = vld [vmem:[#allocation13 + $0x140] sm:$0xff] }
 0xc83   : > { %v9118_v34 = vpop.eup %9117  ;;  %v4505_v5 = vadd.f32 %v4489_v10, %v4451_v36  ;;  %v4468_v2 = vmul.f32 %v4436_v17, %v12011_v42  ;;  %v4452_v27 = vmul.f32 %v4436_v17, %v11902_v1  ;;  %v801_v42 = vld [vmem:[#allocation13 + $0x1d0] sm:$0xff]  ;;  %7827 = vmatpush3.msra.mxu1 %v754_v30  ;;  %v800_v17 = vld [vmem:[#allocation13 + $0x1c8] sm:$0xff] }
 0xc84   : > { %v4403_v63 = vadd.f32 1e-05, %v4387_v44  ;;  %v4372_v25 = vsub.f32 %v4340_v58, %v4356_v45  ;;  %v4437_v56 = vmul.f32 %v9118_v34, %v11960_v46  ;;  %7828 = vmatprep.subr.mxu1 %v769_v31  ;;  %7908 = vmatprep.subr.mxu0 %v801_v42  ;;  %v767_v44 = vld [vmem:[#allocation13 + $0xc0] sm:$0xff]  ;;  %v782_v31 = vld [vmem:[#allocation13 + $0x138] sm:$0xff]  ;;  %v765_v42 = vld [vmem:[#allocation13 + $0xb0] sm:$0xff] }
 0xc85   : > { %4647 = vmatmul.mubr.f32.gmra.mxu1 %v4505_v5  ;;  %4808 = vmatmul.mubr.f32.gmra.mxu0 %v4505_v5  ;;  %v4490_v26 = vsub.f32 %v11966_v52, %v4468_v2  ;;  %v799_v45 = vld [vmem:[#allocation13 + $0x1c0] sm:$0xff] }
 0xc86   : > { %9125 = vrsqrt.f32 %v4403_v63  ;;  %v4388_v33 = vmax.f32 %v4372_v25, 0.0  ;;  %4652 = vmatprep.mubr.f32.mxu1 %v14375_v7  ;;  %4813 = vmatprep.mubr.f32.mxu0 %v14375_v7  ;;  %v4469_v15 = vmul.f32 %v4437_v56, %v12015_v32  ;;  %v4453_v43 = vmul.f32 %v4437_v56, %v11911_v11  ;;  %v751_v2 = vld [vmem:[#allocation13 + $0x40] sm:$0xff]  ;;  %v798_v63 = vld [vmem:[#allocation13 + $0x1b8] sm:$0xff] }
 0xc87   : > { %v9120_v0 = vpop.eup %9119  ;;  %v4506_v19 = vadd.f32 %v4490_v26, %v4452_v27  ;;  %7829 = vmatpush3.msra.mxu1 %v753_v14  ;;  %7909 = vmatpush3.msra.mxu0 %v785_v53  ;;  %v750_v26 = vld [vmem:[#allocation13 + $0x38] sm:$0xff]  ;;  %v764_v14 = vld [vmem:[#allocation13 + $0xa8] sm:$0xff] }
 0xc88   : > { %v4404_v40 = vadd.f32 1e-05, %v4388_v33  ;;  %v4491_v13 = vsub.f32 %v11966_v52, %v4469_v15  ;;  %v4438_v20 = vmul.f32 %v9120_v0, %v11960_v46  ;;  %7830 = vmatprep.subr.mxu1 %v768_v62  ;;  %7910 = vmatprep.subr.mxu0 %v800_v17  ;;  %v797_v33 = vld [vmem:[#allocation13 + $0x1b0] sm:$0xff]  ;;  %v796_v53 = vld [vmem:[#allocation13 + $0x1a8] sm:$0xff] }
 0xc89   : > { %4653 = vmatmul.mubr.f32.gmra.mxu1 %v4506_v19  ;;  %4814 = vmatmul.mubr.f32.gmra.mxu0 %v4506_v19 }
 0xc8a   : > { %9127 = vrsqrt.f32 %v4404_v40  ;;  %4658 = vmatprep.mubr.f32.mxu1 %v14375_v7  ;;  %4819 = vmatprep.mubr.f32.mxu0 %v14375_v7  ;;  %v4507_v32 = vadd.f32 %v4491_v13, %v4453_v43  ;;  %v4470_v18 = vmul.f32 %v4438_v20, %v12019_v22  ;;  %v4454_v51 = vmul.f32 %v4438_v20, %v11918_v57  ;;  %v749_v13 = vld [vmem:[#allocation13 + $0x30] sm:$0xff] }
 0xc8b   : > { %v9122_v61 = vpop.eup %9121  ;;  %7831 = vmatpush3.msra.mxu1 %v752_v60  ;;  %7911 = vmatpush3.msra.mxu0 %v784_v28  ;;  %v781_v20 = vld [vmem:[#allocation13 + $0x130] sm:$0xff]  ;;  %v794_v60 = vld [vmem:[#allocation13 + $0x198] sm:$0xff] }
 0xc8c   : > { %v4492_v36 = vsub.f32 %v11966_v52, %v4470_v18  ;;  %v4439_v10 = vmul.f32 %v9122_v61, %v11960_v46  ;;  %7832 = vmatprep.subr.mxu1 %v767_v44  ;;  %7912 = vmatprep.subr.mxu0 %v799_v45  ;;  %v780_v18 = vld [vmem:[#allocation13 + $0x128] sm:$0xff]  ;;  %v763_v61 = vld [vmem:[#allocation13 + $0xa0] sm:$0xff]  ;;  %v746_v28 = vld [vmem:[#allocation13 + $0x18] sm:$0xff] }
 0xc8d   : > { %4659 = vmatmul.mubr.f32.gmra.mxu1 %v4507_v32  ;;  %4820 = vmatmul.mubr.f32.gmra.mxu0 %v4507_v32  ;;  %v748_v32 = vld [vmem:[#allocation13 + $0x28] sm:$0xff]  ;;  %v778_v44 = vld [vmem:[#allocation13 + $0x118] sm:$0xff]  ;;  %v761_v45 = vld [vmem:[#allocation13 + $0x90] sm:$0xff] }
 0xc8e   : > { %4664 = vmatprep.mubr.f32.mxu1 %v14375_v7  ;;  %4825 = vmatprep.mubr.f32.mxu0 %v14375_v7  ;;  %v4508_v22 = vadd.f32 %v4492_v36, %v4454_v51  ;;  %v4471_v58 = vmul.f32 %v4439_v10, %v12023_v50  ;;  %v4455_v29 = vmul.f32 %v4439_v10, %v11927_v54  ;;  %v795_v51 = vld [vmem:[#allocation13 + $0x1a0] sm:$0xff] }
 0xc8f   : > { %v9124_v8 = vpop.eup %9123  ;;  %7833 = vmatpush3.msra.mxu1 %v751_v2  ;;  %7913 = vmatpush3.msra.mxu0 %v783_v39  ;;  %v779_v10 = vld [vmem:[#allocation13 + $0x120] sm:$0xff] }
 0xc90   : > { %v4493_v34 = vsub.f32 %v11966_v52, %v4471_v58  ;;  %v4440_v5 = vmul.f32 %v9124_v8, %v11960_v46  ;;  %7834 = vmatprep.subr.mxu1 %v766_v6  ;;  %7914 = vmatprep.subr.mxu0 %v798_v63  ;;  %v777_v58 = vld [vmem:[#allocation13 + $0x110] sm:$0xff]  ;;  %v760_v8 = vld [vmem:[#allocation13 + $0x88] sm:$0xff]  ;;  %v759_v2 = vld [vmem:[#allocation13 + $0x80] sm:$0xff] }
 0xc91   : > { %4665 = vmatmul.mubr.f32.gmra.mxu1 %v4508_v22  ;;  %4826 = vmatmul.mubr.f32.gmra.mxu0 %v4508_v22  ;;  %v793_v22 = vld [vmem:[#allocation13 + $0x190] sm:$0xff]  ;;  %v791_v39 = vld [vmem:[#allocation13 + $0x180] sm:$0xff] }
 0xc92   : > { %4670 = vmatprep.mubr.f32.mxu1 %v14375_v7  ;;  %4831 = vmatprep.mubr.f32.mxu0 %v14375_v7  ;;  %v4509_v50 = vadd.f32 %v4493_v34, %v4455_v29  ;;  %v4472_v25 = vmul.f32 %v4440_v5, %v12027_v41  ;;  %v4456_v30 = vmul.f32 %v4440_v5, %v11934_v59  ;;  %v792_v29 = vld [vmem:[#allocation13 + $0x188] sm:$0xff]  ;;  %v743_v6 = vld [vmem:[#allocation13] sm:$0xff] }
 0xc93   : > { %v9126_v56 = vpop.eup %9125  ;;  %7835 = vmatpush3.msra.mxu1 %v750_v26  ;;  %7915 = vmatpush3.msra.mxu0 %v782_v31  ;;  %v744_v34 = vld [vmem:[#allocation13 + $0x8] sm:$0xff]  ;;  %v775_v63 = vld [vmem:[#allocation13 + $0x100] sm:$0xff] }
 0xc94   : > { %v4494_v9 = vsub.f32 %v11966_v52, %v4472_v25  ;;  %v4441_v27 = vmul.f32 %v9126_v56, %v11960_v46  ;;  %7836 = vmatprep.subr.mxu1 %v765_v42  ;;  %7916 = vmatprep.subr.mxu0 %v797_v33  ;;  %v776_v5 = vld [vmem:[#allocation13 + $0x108] sm:$0xff]  ;;  %v14437_v25 = vld [vmem:[#allocation21_spill] sm:$0xff] }
 0xc95   : > { %4671 = vmatmul.mubr.f32.gmra.mxu1 %v4509_v50  ;;  %4832 = vmatmul.mubr.f32.gmra.mxu0 %v4509_v50  ;;  %v742_v50 = vld [vmem:[%s14106_s10] sm:$0xf]  ;;  %v4528_v56 = vsub.s32 3, %v14437_v25 }
 0xc96   : > { %4676 = vmatprep.mubr.f32.mxu1 %v14375_v7  ;;  %4837 = vmatprep.mubr.f32.mxu0 %v14375_v7  ;;  %v4510_v41 = vadd.f32 %v4494_v9, %v4456_v30  ;;  %v4473_v15 = vmul.f32 %v4441_v27, %v12033_v12  ;;  %v4457_v19 = vmul.f32 %v4441_v27, %v11943_v37  ;;  %v14438_v30 = vsub.s32 0, %v14437_v25 }
 0xc97   : > { %v9128_v0 = vpop.eup %9127  ;;  %7837 = vmatpush3.msra.mxu1 %v749_v13  ;;  %7917 = vmatpush3.msra.mxu0 %v781_v20  ;;  %v14439_v27 = vsub.s32 2, %v14437_v25 }
 0xc98   : > { %v4495_v40 = vsub.f32 %v11966_v52, %v4473_v15  ;;  %v4442_v43 = vmul.f32 %v9128_v0, %v11960_v46  ;;  %7838 = vmatprep.subr.mxu1 %v764_v14  ;;  %7918 = vmatprep.subr.mxu0 %v796_v53  ;;  %v12095_v9 = vrot.slane %v742_v50, %v14438_v30 }
 0xc99   : > { %4677 = vmatmul.mubr.f32.gmra.mxu1 %v4510_v41  ;;  %4838 = vmatmul.mubr.f32.gmra.mxu0 %v4510_v41  ;;  %v12099_v26 = vrot.slane %v742_v50, %v14439_v27  ;;  %v12105_v41 = vrot.slane %v742_v50, %v4528_v56 }
 0xc9a   : > { %4682 = vmatprep.mubr.f32.mxu1 %v14375_v7  ;;  %4843 = vmatprep.mubr.f32.mxu0 %v14375_v7  ;;  %v4511_v12 = vadd.f32 %v4495_v40, %v4457_v19  ;;  %v4474_v62 = vmul.f32 %v4442_v43, %v12040_v48  ;;  %v4458_v17 = vmul.f32 %v4442_v43, %v11949_v21  ;;  %v747_v48 = vld [vmem:[#allocation13 + $0x20] sm:$0xff] }
 0xc9b   : > { %7839 = vmatpush3.msra.mxu1 %v748_v32  ;;  %7919 = vmatpush3.msra.mxu0 %v780_v18  ;;  %14442 = vst [vmem:[#allocation37_spill] sm:$0xff] %v12105_v41 }
 0xc9c   : > { %v4496_v46 = vsub.f32 %v11966_v52, %v4474_v62  ;;  %7840 = vmatprep.subr.mxu1 %v763_v61  ;;  %7920 = vmatprep.subr.mxu0 %v795_v51  ;;  %v762_v52 = vld [vmem:[#allocation13 + $0x98] sm:$0xff] }
 0xc9d   : > { %4683 = vmatmul.mubr.f32.gmra.mxu1 %v4511_v12  ;;  %4844 = vmatmul.mubr.f32.gmra.mxu0 %v4511_v12 }
 0xc9e   : > { %4688 = vmatprep.mubr.f32.mxu1 %v14375_v7  ;;  %4849 = vmatprep.mubr.f32.mxu0 %v14375_v7  ;;  %v4512_v36 = vadd.f32 %v4496_v46, %v4458_v17  ;;  %v745_v7 = vld [vmem:[#allocation13 + $0x10] sm:$0xff] }
 0xc9f   : > { %7841 = vmatpush3.msra.mxu1 %v747_v48  ;;  %7921 = vmatpush3.msra.mxu0 %v779_v10 }
 0xca0   : > { %7842 = vmatprep.subr.mxu1 %v762_v52  ;;  %7922 = vmatprep.subr.mxu0 %v794_v60 }
 0xca1   : > { %4689 = vmatmul.mubr.f32.gmra.mxu1 %v4512_v36  ;;  %4850 = vmatmul.mubr.f32.gmra.mxu0 %v4512_v36 }
 0xca2   : > { %7843 = vmatpush3.msra.mxu1 %v746_v28  ;;  %7923 = vmatpush3.msra.mxu0 %v778_v44 }
 0xca3   : > { %7844 = vmatprep.subr.mxu1 %v761_v45  ;;  %7924 = vmatprep.subr.mxu0 %v793_v22 }
 0xca4   : > { %7845 = vmatpush3.msra.mxu1 %v745_v7  ;;  %7925 = vmatpush3.msra.mxu0 %v777_v58 }
 0xca5   : > { %7846 = vmatprep.subr.mxu1 %v760_v8  ;;  %7926 = vmatprep.subr.mxu0 %v792_v29 }
 0xca6   : > { %7847 = vmatpush3.msra.mxu1 %v744_v34  ;;  %7927 = vmatpush3.msra.mxu0 %v776_v5 }
 0xca7   : > { %7848 = vmatprep.subr.mxu1 %v759_v2  ;;  %7928 = vmatprep.subr.mxu0 %v791_v39 }
 0xca8   : > { %7849 = vmatpush3.msra.mxu1 %v743_v6  ;;  %7929 = vmatpush3.msra.mxu0 %v775_v63 }
 0xca9   : > { %8538 = vmatprep.subr.mxu1 %v12031_v38  ;;  %v14440_v38 = vsub.s32 1, %v14437_v25 }
 0xcab   : > { %v12103_v33 = vrot.slane %v742_v50, %v14440_v38 }
 0xcad   : > { %14441 = vst [vmem:[#allocation39_spill] sm:$0xff] %v12103_v33 }
 0xcd1   : > { %v4600_v31 = vpop.f32.mrf.mxu1  ;;  %v4761_v42 = vpop.f32.mrf.mxu0 }
 0xcd2   : > { %v12108_v15 = vadd.f32 %v4600_v31, %v12095_v9  ;;  %v12111_v0 = vadd.f32 %v4761_v42, %v12099_v26 }
 0xcd3   : > { %v4602_v19 = vpop.f32.mrf.mxu1  ;;  %v4763_v40 = vpop.f32.mrf.mxu0 }
 0xcd4   : > { %v4920_v43 = vmul.f32 0.70710677, %v12108_v15  ;;  %v4922_v13 = vmul.f32 0.70710677, %v12111_v0  ;;  %v12116_v20 = vadd.f32 %v4602_v19, %v12103_v33  ;;  %v12119_v14 = vadd.f32 %v4763_v40, %v12105_v41 }
 0xcd6   : > { %v12121_v53 = vclamps-f32 %v4920_v43, 4.0  ;;  %v12123_v12 = vclamps-f32 %v4922_v13, 4.0  ;;  %v4921_v62 = vmul.f32 0.70710677, %v12116_v20  ;;  %v4923_v17 = vmul.f32 0.70710677, %v12119_v14 }
 0xcd7   : > { %v4606_v46 = vpop.f32.mrf.mxu1  ;;  %v4767_v19 = vpop.f32.mrf.mxu0 }
 0xcd8   : > { %v12129_v32 = vmul.f32 %v12121_v53, %v12121_v53  ;;  %v12133_v18 = vmul.f32 %v12123_v12, %v12123_v12  ;;  %v12135_v61 = vclamps-f32 %v4921_v62, 4.0  ;;  %v12137_v51 = vclamps-f32 %v4923_v17, 4.0 }
 0xcd9   : > { %v12143_v52 = vadd.f32 %v4606_v46, %v12095_v9 }
 0xcda   : > { %v5176_v36 = vmul.f32 -2.7261424e-10, %v12129_v32  ;;  %v6008_v48 = vmul.f32 -1.45660715e-05, %v12129_v32  ;;  %v5178_v10 = vmul.f32 -2.7261424e-10, %v12133_v18  ;;  %v12148_v28 = vmul.f32 %v12135_v61, %v12135_v61 }
 0xcdb   : > { %v6010_v60 = vmul.f32 -1.45660715e-05, %v12133_v18  ;;  %v12152_v44 = vmul.f32 %v12137_v51, %v12137_v51  ;;  %v4924_v39 = vmul.f32 0.70710677, %v12143_v52 }
 0xcdc   : > { %v5240_v45 = vadd.f32 2.7706815e-08, %v5176_v36  ;;  %v6072_v22 = vadd.f32 -0.00021337405, %v6008_v48  ;;  %v5242_v7 = vadd.f32 2.7706815e-08, %v5178_v10 }
 0xcdd   : > { %v6074_v58 = vadd.f32 -0.00021337405, %v6010_v60  ;;  %v5177_v8 = vmul.f32 -2.7261424e-10, %v12148_v28  ;;  %v5179_v29 = vmul.f32 -2.7261424e-10, %v12152_v44  ;;  %v12174_v60 = vadd.f32 %v4767_v19, %v12099_v26 }
 0xcde   : > { %v5304_v34 = vmul.f32 %v5240_v45, %v12129_v32  ;;  %v6136_v5 = vmul.f32 %v6072_v22, %v12129_v32  ;;  %v5306_v2 = vmul.f32 %v5242_v7, %v12133_v18  ;;  %v12163_v38 = vclamps-f32 %v4924_v39, 4.0 }
 0xcdf   : > { %v6138_v6 = vmul.f32 %v6074_v58, %v12133_v18  ;;  %v5241_v63 = vadd.f32 2.7706815e-08, %v5177_v8  ;;  %v5243_v50 = vadd.f32 2.7706815e-08, %v5179_v29 }
 0xce0   : > { %v5368_v25 = vadd.f32 -2.101024e-06, %v5304_v34  ;;  %v6200_v56 = vadd.f32 -0.001682827, %v6136_v5  ;;  %v5370_v30 = vadd.f32 -2.101024e-06, %v5306_v2  ;;  %v12170_v46 = vmul.f32 %v12163_v38, %v12163_v38 }
 0xce1   : > { %v6202_v27 = vadd.f32 -0.001682827, %v6138_v6  ;;  %v5305_v31 = vmul.f32 %v5241_v63, %v12148_v28  ;;  %v5307_v42 = vmul.f32 %v5243_v50, %v12152_v44  ;;  %v4926_v63 = vmul.f32 0.70710677, %v12174_v60 }
 0xce2   : > { %v5432_v40 = vmul.f32 %v5368_v25, %v12129_v32  ;;  %v6264_v43 = vmul.f32 %v6200_v56, %v12129_v32  ;;  %v5434_v13 = vmul.f32 %v5370_v30, %v12133_v18  ;;  %v5180_v58 = vmul.f32 -2.7261424e-10, %v12170_v46 }
 0xce3   : > { %v5369_v62 = vadd.f32 -2.101024e-06, %v5305_v31  ;;  %v5371_v17 = vadd.f32 -2.101024e-06, %v5307_v42  ;;  %v6266_v10 = vmul.f32 %v6202_v27, %v12133_v18  ;;  %v6012_v34 = vmul.f32 -1.45660715e-05, %v12170_v46 }
 0xce4   : > { %v5496_v36 = vadd.f32 -5.6925062e-05, %v5432_v40  ;;  %v5498_v48 = vadd.f32 -5.6925062e-05, %v5434_v13  ;;  %v6328_v45 = vadd.f32 -0.0073733293, %v6264_v43 }
 0xce5   : > { %v5433_v22 = vmul.f32 %v5369_v62, %v12148_v28  ;;  %v5435_v7 = vmul.f32 %v5371_v17, %v12152_v44  ;;  %v5244_v2 = vadd.f32 2.7706815e-08, %v5180_v58  ;;  %v6330_v39 = vadd.f32 -0.0073733293, %v6266_v10 }
 0xce6   : > { %v5560_v8 = vmul.f32 %v5496_v36, %v12129_v32  ;;  %v5562_v29 = vmul.f32 %v5498_v48, %v12133_v18  ;;  %v6392_v25 = vmul.f32 %v6328_v45, %v12129_v32  ;;  %v6076_v27 = vadd.f32 -0.00021337405, %v6012_v34  ;;  %v4608_v48 = vpop.f32.mrf.mxu1 }
 0xce7   : > { %v5497_v5 = vadd.f32 -5.6925062e-05, %v5433_v22  ;;  %v5499_v6 = vadd.f32 -5.6925062e-05, %v5435_v7  ;;  %v5308_v30 = vmul.f32 %v5244_v2, %v12170_v46  ;;  %v6394_v19 = vmul.f32 %v6330_v39, %v12133_v18 }
 0xce8   : > { %v5624_v50 = vadd.f32 -0.00073499064, %v5560_v8  ;;  %v5626_v56 = vadd.f32 -0.00073499064, %v5562_v29  ;;  %v6140_v43 = vmul.f32 %v6076_v27, %v12170_v46  ;;  %v12189_v13 = vclamps-f32 %v4926_v63, 4.0 }
 0xce9   : > { %v5561_v31 = vmul.f32 %v5497_v5, %v12148_v28  ;;  %v5372_v42 = vadd.f32 -2.101024e-06, %v5308_v30  ;;  %v5563_v40 = vmul.f32 %v5499_v6, %v12152_v44  ;;  %v6456_v17 = vadd.f32 -0.014264739, %v6392_v25  ;;  %v4769_v5 = vpop.f32.mrf.mxu0 }
 0xcea   : > { %v5688_v62 = vmul.f32 %v5624_v50, %v12129_v32  ;;  %v5690_v36 = vmul.f32 %v5626_v56, %v12133_v18  ;;  %v12196_v45 = vmul.f32 %v12189_v13, %v12189_v13  ;;  %v6204_v7 = vadd.f32 -0.001682827, %v6140_v43 }
 0xceb   : > { %v5436_v10 = vmul.f32 %v5372_v42, %v12170_v46  ;;  %v5625_v22 = vadd.f32 -0.00073499064, %v5561_v31  ;;  %v6458_v58 = vadd.f32 -0.014264739, %v6394_v19  ;;  %v5627_v8 = vadd.f32 -0.00073499064, %v5563_v40 }
 0xcec   : > { %v5182_v29 = vmul.f32 -2.7261424e-10, %v12196_v45  ;;  %v4609_v34 = vadd.f32 %v4608_v48, %v12103_v33  ;;  %v5752_v2 = vadd.f32 -0.0029546, %v5688_v62  ;;  %9129 = vrcp.f32 %v6456_v17 }
 0xced   : > { %v5754_v39 = vadd.f32 -0.0029546, %v5690_v36  ;;  %v6014_v6 = vmul.f32 -1.45660715e-05, %v12196_v45  ;;  %v5500_v63 = vadd.f32 -5.6925062e-05, %v5436_v10  ;;  %v5689_v25 = vmul.f32 %v5625_v22, %v12148_v28 }
 0xcee   : > { %v5246_v50 = vadd.f32 2.7706815e-08, %v5182_v29  ;;  %v6268_v56 = vmul.f32 %v6204_v7, %v12170_v46  ;;  %v12204_v30 = vadd.f32 %v4769_v5, %v12105_v41  ;;  %v5691_v27 = vmul.f32 %v5627_v8, %v12152_v44 }
 0xcef   : > { %v6078_v42 = vadd.f32 -0.00021337405, %v6014_v6  ;;  %v4925_v19 = vmul.f32 0.70710677, %v4609_v34  ;;  %v12209_v40 = vmul.f32 0.5, %v12108_v15  ;;  %v5816_v43 = vmul.f32 %v5752_v2, %v12129_v32 }
 0xcf0   : > { %v5310_v31 = vmul.f32 %v5246_v50, %v12196_v45  ;;  %v5818_v62 = vmul.f32 %v5754_v39, %v12133_v18  ;;  %9131 = vrcp.f32 %v6458_v58  ;;  %v5564_v17 = vmul.f32 %v5500_v63, %v12170_v46 }
 0xcf1   : > { %v6142_v48 = vmul.f32 %v6078_v42, %v12196_v45  ;;  %v12215_v10 = vclamps-f32 %v4925_v19, 4.0  ;;  %v5753_v22 = vadd.f32 -0.0029546, %v5689_v25  ;;  %v6332_v7 = vadd.f32 -0.0073733293, %v6268_v56 }
 0xcf2   : > { %v5374_v36 = vadd.f32 -2.101024e-06, %v5310_v31  ;;  %v4927_v8 = vmul.f32 0.70710677, %v12204_v30  ;;  %v12219_v29 = vmul.f32 0.5, %v12111_v0  ;;  %v12223_v58 = vmul.f32 0.5, %v12116_v20 }
 0xcf3   : > { %v5755_v15 = vadd.f32 -0.0029546, %v5691_v27  ;;  %v6206_v5 = vadd.f32 -0.001682827, %v6142_v48  ;;  %v5880_v18 = vadd.f32 -0.016096033, %v5816_v43  ;;  %v12227_v2 = vmul.f32 %v12215_v10, %v12215_v10 }
 0xcf4   : > { %v5438_v32 = vmul.f32 %v5374_v36, %v12196_v45  ;;  %v12229_v39 = vclamps-f32 %v4927_v8, 4.0  ;;  %v5882_v6 = vadd.f32 -0.016096033, %v5818_v62  ;;  %v12232_v63 = vmul.f32 0.5, %v12119_v14 }
 0xcf5   : > { %v12235_v0 = vmul.f32 0.5, %v12143_v52  ;;  %v5628_v50 = vadd.f32 -0.00073499064, %v5564_v17  ;;  %v5817_v25 = vmul.f32 %v5753_v22, %v12148_v28  ;;  %v6396_v56 = vmul.f32 %v6332_v7, %v12170_v46 }
 0xcf6   : > { %v5181_v20 = vmul.f32 -2.7261424e-10, %v12227_v2  ;;  %v12242_v27 = vmul.f32 %v12229_v39, %v12229_v39  ;;  %v5819_v31 = vmul.f32 %v5755_v15, %v12152_v44  ;;  %v12246_v42 = vmul.f32 0.5, %v12174_v60 }
 0xcf7   : > { %v5502_v14 = vadd.f32 -5.6925062e-05, %v5438_v32  ;;  %v6270_v52 = vmul.f32 %v6206_v5, %v12196_v45  ;;  %v5944_v19 = vmul.f32 %v12121_v53, %v5880_v18  ;;  %v12250_v43 = vmul.f32 0.5, %v4609_v34 }
 0xcf8   : > { %v5245_v62 = vadd.f32 2.7706815e-08, %v5181_v20  ;;  %v5183_v17 = vmul.f32 -2.7261424e-10, %v12242_v27  ;;  %v5946_v7 = vmul.f32 %v12123_v12, %v5882_v6  ;;  %v5692_v8 = vmul.f32 %v5628_v50, %v12170_v46 }
 0xcf9   : > { %v9130_v22 = vpop.eup %9129  ;;  %v5881_v32 = vadd.f32 -0.016096033, %v5817_v25  ;;  %v6460_v53 = vadd.f32 -0.014264739, %v6396_v56  ;;  %v12262_v20 = vadd.f32 -0.016096033, %v5819_v31  ;;  %v5566_v21 = vmul.f32 %v5502_v14, %v12196_v45 }
 0xcfa   : > { %v5309_v34 = vmul.f32 %v5245_v62, %v12227_v2  ;;  %v5247_v5 = vadd.f32 2.7706815e-08, %v5183_v17  ;;  %v6334_v37 = vadd.f32 -0.0073733293, %v6270_v52  ;;  %v6521_v6 = vmul.f32 %v9130_v22, %v5944_v19 }
 0xcfb   : > { %v5756_v25 = vadd.f32 -0.0029546, %v5692_v8  ;;  %v6009_v31 = vmul.f32 -1.45660715e-05, %v12148_v28  ;;  %9133 = vrcp.f32 %v6460_v53  ;;  %v12278_v19 = vmul.f32 %v12135_v61, %v5881_v32 }
 0xcfc   : > { %v5373_v50 = vadd.f32 -2.101024e-06, %v5309_v34  ;;  %v5630_v22 = vadd.f32 -0.00073499064, %v5566_v21  ;;  %v6398_v34 = vmul.f32 %v6334_v37, %v12196_v45 }
 0xcfd   : > { %v4612_v36 = vpop.f32.mrf.mxu1  ;;  %v4773_v48 = vpop.f32.mrf.mxu0  ;;  %v5820_v32 = vmul.f32 %v5756_v25, %v12170_v46 }
 0xcfe   : > { %v12256_v60 = vadd.f32 %v4612_v36, %v12095_v9  ;;  %v12259_v15 = vadd.f32 %v4773_v48, %v12099_v26  ;;  %v5311_v36 = vmul.f32 %v5247_v5, %v12242_v27  ;;  %v9132_v59 = vpop.eup %9131  ;;  %v5437_v14 = vmul.f32 %v5373_v50, %v12227_v2 }
 0xcff   : > { %v4614_v18 = vpop.f32.mrf.mxu1  ;;  %v6648_v5 = vadd.f32 1.0, %v6521_v6  ;;  %v4775_v37 = vpop.f32.mrf.mxu0  ;;  %v5694_v6 = vmul.f32 %v5630_v22, %v12196_v45 }
 0xd00   : > { %v4928_v12 = vmul.f32 0.70710677, %v12256_v60  ;;  %v4930_v48 = vmul.f32 0.70710677, %v12259_v15  ;;  %v12271_v62 = vadd.f32 %v4614_v18, %v12103_v33  ;;  %v5375_v52 = vadd.f32 -2.101024e-06, %v5311_v36 }
 0xd01   : > { %v6525_v18 = vmul.f32 %v9132_v59, %v5946_v7  ;;  %v6073_v7 = vadd.f32 -0.00021337405, %v6009_v31  ;;  %v4776_v16 = vadd.f32 %v4775_v37, %v12105_v41  ;;  %v5884_v31 = vadd.f32 -0.016096033, %v5820_v32 }
 0xd02   : > { %v12268_v56 = vclamps-f32 %v4928_v12, 4.0  ;;  %v12275_v17 = vclamps-f32 %v4930_v48, 4.0  ;;  %v5501_v12 = vadd.f32 -5.6925062e-05, %v5437_v14  ;;  %v5439_v50 = vmul.f32 %v5375_v52, %v12242_v27 }
 0xd03   : > { %v4929_v21 = vmul.f32 0.70710677, %v12271_v62  ;;  %v6462_v14 = vadd.f32 -0.014264739, %v6398_v34  ;;  %v6650_v47 = vadd.f32 1.0, %v6525_v18  ;;  %v12320_v32 = vmul.f32 0.5, %v12204_v30 }
 0xd04   : > { %v12283_v8 = vmul.f32 %v12268_v56, %v12268_v56  ;;  %v12287_v53 = vmul.f32 %v12275_v17, %v12275_v17  ;;  %v5565_v52 = vmul.f32 %v5501_v12, %v12227_v2  ;;  %v5503_v55 = vadd.f32 -5.6925062e-05, %v5439_v50 }
 0xd05   : > { %v12301_v25 = vclamps-f32 %v4929_v21, 4.0  ;;  %9135 = vrcp.f32 %v6462_v14  ;;  %v4931_v37 = vmul.f32 0.70710677, %v4776_v16 }
 0xd06   : > { %v5184_v36 = vmul.f32 -2.7261424e-10, %v12283_v8  ;;  %v6016_v61 = vmul.f32 -1.45660715e-05, %v12283_v8  ;;  %v5186_v48 = vmul.f32 -2.7261424e-10, %v12287_v53 }
 0xd07   : > { %v6018_v59 = vmul.f32 -1.45660715e-05, %v12287_v53  ;;  %v5629_v50 = vadd.f32 -0.00073499064, %v5565_v52 }
 0xd08   : > { %v5248_v54 = vadd.f32 2.7706815e-08, %v5184_v36  ;;  %v6080_v57 = vadd.f32 -0.00021337405, %v6016_v61  ;;  %v5250_v11 = vadd.f32 2.7706815e-08, %v5186_v48  ;;  %v12307_v48 = vmul.f32 %v12301_v25, %v12301_v25 }
 0xd09   : > { %v6082_v1 = vadd.f32 -0.00021337405, %v6018_v59  ;;  %v5758_v36 = vadd.f32 -0.0029546, %v5694_v6  ;;  %v9134_v6 = vpop.eup %9133 }
 0xd0a   : > { %v5312_v4 = vmul.f32 %v5248_v54, %v12283_v8  ;;  %v6144_v46 = vmul.f32 %v6080_v57, %v12283_v8  ;;  %v5314_v22 = vmul.f32 %v5250_v11, %v12287_v53  ;;  %v5567_v57 = vmul.f32 %v5503_v55, %v12242_v27 }
 0xd0b   : > { %v6146_v34 = vmul.f32 %v6082_v1, %v12287_v53  ;;  %v5185_v18 = vmul.f32 -2.7261424e-10, %v12307_v48  ;;  %v6137_v11 = vmul.f32 %v6073_v7, %v12148_v28  ;;  %v12313_v1 = vmul.f32 %v6648_v5, %v12209_v40 }
 0xd0c   : > { %v5376_v61 = vadd.f32 -2.101024e-06, %v5312_v4  ;;  %v6208_v12 = vadd.f32 -0.001682827, %v6144_v46  ;;  %v5378_v54 = vadd.f32 -2.101024e-06, %v5314_v22  ;;  %v12317_v4 = vmul.f32 %v12137_v51, %v12262_v20 }
 0xd0d   : > { %v6210_v21 = vadd.f32 -0.001682827, %v6146_v34  ;;  %v12324_v55 = vmul.f32 %v6650_v47, %v12219_v29  ;;  %v5249_v52 = vadd.f32 2.7706815e-08, %v5185_v18  ;;  %v5948_v40 = vmul.f32 %v12163_v38, %v5884_v31 }
 0xd0e   : > { %v5440_v59 = vmul.f32 %v5376_v61, %v12283_v8  ;;  %v6272_v14 = vmul.f32 %v6208_v12, %v12283_v8  ;;  %v5442_v7 = vmul.f32 %v5378_v54, %v12287_v53  ;;  %v5822_v5 = vmul.f32 %v5758_v36, %v12196_v45 }
 0xd0f   : > { %v5693_v51 = vmul.f32 %v5629_v50, %v12227_v2  ;;  %v12331_v20 = vclamps-f32 %v4931_v37, 4.0  ;;  %v5631_v30 = vadd.f32 -0.00073499064, %v5567_v57  ;;  %v6274_v46 = vmul.f32 %v6210_v21, %v12287_v53 }
 0xd10   : > { %v5313_v22 = vmul.f32 %v5249_v52, %v12307_v48  ;;  %v6201_v47 = vadd.f32 -0.001682827, %v6137_v11  ;;  %v6529_v29 = vmul.f32 %v9134_v6, %v5948_v40  ;;  %v12336_v34 = vmul.f32 0.5, %v12256_v60  ;;  %v4618_v60 = vpop.f32.mrf.mxu1 }
 0xd11   : > { %v5504_v61 = vadd.f32 -5.6925062e-05, %v5440_v59  ;;  %v6011_v12 = vmul.f32 -1.45660715e-05, %v12152_v44  ;;  %v6336_v38 = vadd.f32 -0.0073733293, %v6272_v14  ;;  %v12349_v57 = vmul.f32 %v12331_v20, %v12331_v20 }
 0xd12   : > { %v12340_v45 = vmul.f32 0.5, %v12259_v15  ;;  %v5506_v31 = vadd.f32 -5.6925062e-05, %v5442_v7  ;;  %v12343_v36 = vmul.f32 0.5, %v12271_v62  ;;  %v5886_v50 = vadd.f32 -0.016096033, %v5822_v5 }
 0xd13   : > { %v5757_v54 = vadd.f32 -0.0029546, %v5693_v51  ;;  %v12345_v37 = vmul.f32 0.5, %v4776_v16  ;;  %v5695_v21 = vmul.f32 %v5631_v30, %v12242_v27  ;;  %v6338_v18 = vadd.f32 -0.0073733293, %v6274_v46 }
 0xd14   : > { %14443 = vst [vmem:[#allocation38_spill] sm:$0xff] %v12343_v36  ;;  %v5377_v11 = vadd.f32 -2.101024e-06, %v5313_v22  ;;  %v6265_v15 = vmul.f32 %v6201_v47, %v12148_v28  ;;  %v12353_v59 = vadd.f32 1.0, %v6529_v29  ;;  %v5568_v62 = vmul.f32 %v5504_v61, %v12283_v8  ;;  %v4779_v22 = vpop.f32.mrf.mxu0  ;;  %v9136_v47 = vpop.eup %9135 }
 0xd15   : > { %14444 = vst [vmem:[#allocation40_spill] sm:$0xff] %v12345_v37  ;;  %v5187_v6 = vmul.f32 -2.7261424e-10, %v12349_v57  ;;  %v6075_v14 = vadd.f32 -0.00021337405, %v6011_v12  ;;  %v6400_v16 = vmul.f32 %v6336_v38, %v12283_v8  ;;  %v5570_v7 = vmul.f32 %v5506_v31, %v12287_v53 }
 0xd16   : > { %v6329_v52 = vadd.f32 -0.0073733293, %v6265_v15  ;;  %v12360_v40 = vadd.f32 %v4618_v60, %v12095_v9  ;;  %v5950_v5 = vmul.f32 %v12189_v13, %v5886_v50  ;;  %v5821_v51 = vmul.f32 %v5757_v54, %v12227_v2  ;;  %v4620_v50 = vpop.f32.mrf.mxu1 }
 0xd17   : > { %v5251_v30 = vadd.f32 2.7706815e-08, %v5187_v6  ;;  %v6139_v46 = vmul.f32 %v6075_v14, %v12152_v44  ;;  %v5759_v29 = vadd.f32 -0.0029546, %v5695_v21  ;;  %v6402_v61 = vmul.f32 %v6338_v18, %v12287_v53 }
 0xd18   : > { %v5441_v12 = vmul.f32 %v5377_v11, %v12307_v48  ;;  %v6393_v38 = vmul.f32 %v6329_v52, %v12148_v28  ;;  %v5632_v31 = vadd.f32 -0.00073499064, %v5568_v62  ;;  %v4932_v13 = vmul.f32 0.70710677, %v12360_v40 }
 0xd19   : > { %v5315_v60 = vmul.f32 %v5251_v30, %v12349_v57  ;;  %v6203_v15 = vadd.f32 -0.001682827, %v6139_v46  ;;  %v6464_v54 = vadd.f32 -0.014264739, %v6400_v16  ;;  %v5634_v6 = vadd.f32 -0.00073499064, %v5570_v7 }
 0xd1a   : > { %v6457_v49 = vadd.f32 -0.014264739, %v6393_v38  ;;  %v12371_v14 = vadd.f32 %v4779_v22, %v12099_v26  ;;  %v6533_v21 = vmul.f32 %v9136_v47, %v5950_v5  ;;  %v12374_v11 = vclamps-f32 %v4932_v13, 4.0 }
 0xd1b   : > { %v5379_v35 = vadd.f32 -2.101024e-06, %v5315_v60  ;;  %v6267_v18 = vmul.f32 %v6203_v15, %v12152_v44  ;;  %v6466_v28 = vadd.f32 -0.014264739, %v6402_v61  ;;  %v5505_v62 = vadd.f32 -5.6925062e-05, %v5441_v12 }
 0xd1c   : > { %9137 = vrcp.f32 %v6457_v49  ;;  %v12377_v52 = vadd.f32 %v4620_v50, %v12103_v33  ;;  %v5696_v30 = vmul.f32 %v5632_v31, %v12283_v8  ;;  %v12383_v46 = vmul.f32 %v12374_v11, %v12374_v11 }
 0xd1d   : > { %v5443_v16 = vmul.f32 %v5379_v35, %v12349_v57  ;;  %v6331_v7 = vadd.f32 -0.0073733293, %v6267_v18  ;;  %v5823_v5 = vmul.f32 %v5759_v29, %v12242_v27  ;;  %9139 = vrcp.f32 %v6464_v54  ;;  %v4781_v54 = vpop.f32.mrf.mxu0 }
 0xd1e   : > { %v5698_v22 = vmul.f32 %v5634_v6, %v12287_v53  ;;  %v4934_v47 = vmul.f32 0.70710677, %v12371_v14  ;;  %v5188_v12 = vmul.f32 -2.7261424e-10, %v12383_v46  ;;  %v6020_v38 = vmul.f32 -1.45660715e-05, %v12383_v46 }
 0xd1f   : > { %v5507_v49 = vadd.f32 -5.6925062e-05, %v5443_v16  ;;  %v6395_v61 = vmul.f32 %v6331_v7, %v12152_v44  ;;  %9141 = vrcp.f32 %v6466_v28  ;;  %v5569_v35 = vmul.f32 %v5505_v62, %v12307_v48 }
 0xd20   : > { %v12392_v31 = vclamps-f32 %v4934_v47, 4.0  ;;  %v4933_v60 = vmul.f32 0.70710677, %v12377_v52  ;;  %v5760_v29 = vadd.f32 -0.0029546, %v5696_v30  ;;  %v6654_v28 = vadd.f32 1.0, %v6533_v21 }
 0xd21   : > { %v5571_v15 = vmul.f32 %v5507_v49, %v12349_v57  ;;  %v6459_v13 = vadd.f32 -0.014264739, %v6395_v61  ;;  %v5252_v50 = vadd.f32 2.7706815e-08, %v5188_v12  ;;  %v5885_v6 = vadd.f32 -0.016096033, %v5821_v51 }
 0xd22   : > { %v6084_v18 = vadd.f32 -0.00021337405, %v6020_v38  ;;  %v12398_v44 = vmul.f32 %v12392_v31, %v12392_v31  ;;  %v12400_v16 = vclamps-f32 %v4933_v60, 4.0  ;;  %v5762_v62 = vadd.f32 -0.0029546, %v5698_v22 }
 0xd23   : > { %9143 = vrcp.f32 %v6459_v13  ;;  %v5316_v7 = vmul.f32 %v5252_v50, %v12383_v46  ;;  %v5887_v47 = vadd.f32 -0.016096033, %v5823_v5  ;;  %v5633_v30 = vadd.f32 -0.00073499064, %v5569_v35 }
 0xd24   : > { %v5190_v49 = vmul.f32 -2.7261424e-10, %v12398_v44  ;;  %v12405_v61 = vadd.f32 %v4781_v54, %v12105_v41  ;;  %v5824_v51 = vmul.f32 %v5760_v29, %v12283_v8  ;;  %v5635_v12 = vadd.f32 -0.00073499064, %v5571_v15 }
 0xd25   : > { %v5380_v38 = vadd.f32 -2.101024e-06, %v5316_v7  ;;  %v6022_v3 = vmul.f32 -1.45660715e-05, %v12398_v44  ;;  %v12411_v21 = vmul.f32 %v12353_v59, %v12235_v0  ;;  %v6148_v22 = vmul.f32 %v6084_v18, %v12383_v46 }
 0xd26   : > { %v5254_v60 = vadd.f32 2.7706815e-08, %v5190_v49  ;;  %v12416_v5 = vmul.f32 %v12400_v16, %v12400_v16  ;;  %v12419_v35 = vmul.f32 %v12215_v10, %v5885_v6  ;;  %v5826_v8 = vmul.f32 %v5762_v62, %v12287_v53  ;;  %v4624_v62 = vpop.f32.mrf.mxu1 }
 0xd27   : > { %v5444_v29 = vmul.f32 %v5380_v38, %v12383_v46  ;;  %v6086_v15 = vadd.f32 -0.00021337405, %v6022_v3  ;;  %v5697_v13 = vmul.f32 %v5633_v30, %v12307_v48  ;;  %v4935_v50 = vmul.f32 0.70710677, %v12405_v61 }
 0xd28   : > { %v5318_v0 = vmul.f32 %v5254_v60, %v12398_v44  ;;  %v5189_v59 = vmul.f32 -2.7261424e-10, %v12416_v5  ;;  %v12428_v18 = vmul.f32 %v6654_v28, %v12246_v42  ;;  %v12431_v10 = vmul.f32 %v12229_v39, %v5887_v47 }
 0xd29   : > { %v9138_v54 = vpop.eup %9137  ;;  %v5888_v6 = vadd.f32 -0.016096033, %v5824_v51  ;;  %v5699_v53 = vmul.f32 %v5635_v12, %v12349_v57  ;;  %v5508_v7 = vadd.f32 -5.6925062e-05, %v5444_v29  ;;  %v6212_v30 = vadd.f32 -0.001682827, %v6148_v22 }
 0xd2a   : > { %v6523_v3 = vmul.f32 %v9138_v54, %v12278_v19  ;;  %v5253_v49 = vadd.f32 2.7706815e-08, %v5189_v59  ;;  %v9140_v38 = vpop.eup %9139  ;;  %v5890_v60 = vadd.f32 -0.016096033, %v5826_v8  ;;  %v5382_v24 = vadd.f32 -2.101024e-06, %v5318_v0 }
 0xd2b   : > { %v6150_v23 = vmul.f32 %v6086_v15, %v12398_v44  ;;  %v12436_v37 = vclamps-f32 %v4935_v50, 4.0  ;;  %v5761_v42 = vadd.f32 -0.0029546, %v5697_v13  ;;  %v12440_v47 = vadd.f32 %v4624_v62, %v12095_v9  ;;  %v4785_v62 = vpop.f32.mrf.mxu0 }
 0xd2c   : > { %v6649_v28 = vadd.f32 1.0, %v6523_v3  ;;  %v5317_v39 = vmul.f32 %v5253_v49, %v12416_v5  ;;  %v9142_v51 = vpop.eup %9141  ;;  %v5952_v19 = vmul.f32 %v12268_v56, %v5888_v6  ;;  %v12444_v12 = vmul.f32 0.5, %v12360_v40 }
 0xd2d   : > { %v12447_v22 = vmul.f32 0.5, %v12371_v14  ;;  %v12451_v8 = vmul.f32 %v12436_v37, %v12436_v37  ;;  %v5763_v29 = vadd.f32 -0.0029546, %v5699_v53  ;;  %v5572_v13 = vmul.f32 %v5508_v7, %v12383_v46 }
 0xd2e   : > { %v6713_v15 = vmul.f32 %v6649_v28, %v12223_v58  ;;  %v6276_v0 = vmul.f32 %v6212_v30, %v12383_v46  ;;  %v5954_v59 = vmul.f32 %v12275_v17, %v5890_v60  ;;  %v5446_v56 = vmul.f32 %v5382_v24, %v12398_v44 }
 0xd2f   : > { %v6214_v40 = vadd.f32 -0.001682827, %v6150_v23  ;;  %v5191_v50 = vmul.f32 -2.7261424e-10, %v12451_v8  ;;  %v5825_v54 = vmul.f32 %v5761_v42, %v12307_v48  ;;  %v12461_v6 = vmul.f32 0.5, %v12377_v52  ;;  %v9273_v42 = vld [vmem:[#allocation13 + $0x178] sm:$0xff] }
 0xd30   : > { %v9144_v14 = vpop.eup %9143  ;;  %6846 = vmatprep.mubr.f32.mxu1 %v6713_v15  ;;  %v5381_v53 = vadd.f32 -2.101024e-06, %v5317_v39  ;;  %v4936_v58 = vmul.f32 0.70710677, %v12440_v47  ;;  %v6537_v3 = vmul.f32 %v9140_v38, %v5952_v19  ;;  %v6541_v7 = vmul.f32 %v9142_v51, %v5954_v59  ;;  %v9274_v51 = vld [vmem:[#allocation13 + $0x1f0] sm:$0xff] }
 0xd31   : > { %14445 = vst [vmem:[#allocation41_spill] sm:$0xff] %v12461_v6  ;;  %v6527_v17 = vmul.f32 %v9144_v14, %v12317_v4  ;;  %6847 = vmatmul.mubr.f32.vlgmr.msra.gmra.mxu1 %v12313_v1  ;;  %v5255_v24 = vadd.f32 2.7706815e-08, %v5191_v50  ;;  %v5827_v23 = vmul.f32 %v5763_v29, %v12349_v57  ;;  %v5636_v30 = vadd.f32 -0.00073499064, %v5572_v13  ;;  %v9275_v15 = vld [vmem:[#allocation13 + $0x170] sm:$0xff] }
 0xd32   : > { %v6340_v49 = vadd.f32 -0.0073733293, %v6276_v0  ;;  %v12467_v60 = vclamps-f32 %v4936_v58, 4.0  ;;  %8554 = vmatpush3.msra.mxu1 %v9273_v42  ;;  %v5510_v28 = vadd.f32 -5.6925062e-05, %v5446_v56  ;;  %v6278_v39 = vmul.f32 %v6214_v40, %v12398_v44  ;;  %v9276_v40 = vld [vmem:[#allocation13 + $0x1e8] sm:$0xff] }
 0xd33   : > { %v6651_v52 = vadd.f32 1.0, %v6527_v17  ;;  %v12471_v38 = vadd.f32 %v4785_v62, %v12099_v26  ;;  %8539 = vmatprep.subr.mxu1 %v9274_v51  ;;  %v5889_v4 = vadd.f32 -0.016096033, %v5825_v54  ;;  %v5445_v1 = vmul.f32 %v5381_v53, %v12416_v5  ;;  %v9277_v53 = vld [vmem:[#allocation13 + $0x168] sm:$0xff]  ;;  %v9280_v51 = vld [vmem:[#allocation13 + $0x1d8] sm:$0xff] }
 0xd34   : > { %v12475_v19 = vmul.f32 0.5, %v12405_v61  ;;  %v12479_v29 = vmul.f32 %v12467_v60, %v12467_v60  ;;  %8555 = vmatpush3.msra.mxu1 %v9275_v15  ;;  %v6656_v13 = vadd.f32 1.0, %v6537_v3  ;;  %v6658_v0 = vadd.f32 1.0, %v6541_v7  ;;  %v9278_v7 = vld [vmem:[#allocation13 + $0x1e0] sm:$0xff]  ;;  %v9281_v15 = vld [vmem:[#allocation13 + $0x158] sm:$0xff] }
 0xd35   : > { %v6715_v59 = vmul.f32 %v6651_v52, %v12232_v63  ;;  %v5319_v56 = vmul.f32 %v5255_v24, %v12451_v8  ;;  %8540 = vmatprep.subr.mxu1 %v9276_v40  ;;  %v5891_v50 = vadd.f32 -0.016096033, %v5827_v23  ;;  %v5700_v14 = vmul.f32 %v5636_v30, %v12383_v46 }
 0xd36   : > { %14446 = vst [vmem:[#allocation48_spill] sm:$0xff] %v12475_v19  ;;  %v6404_v61 = vmul.f32 %v6340_v49, %v12383_v46  ;;  %v5192_v54 = vmul.f32 -2.7261424e-10, %v12479_v29  ;;  %8556 = vmatpush3.msra.mxu1 %v9277_v53  ;;  %v5574_v58 = vmul.f32 %v5510_v28, %v12398_v44  ;;  %v6342_v62 = vadd.f32 -0.0073733293, %v6278_v39  ;;  %v9279_v49 = vld [vmem:[#allocation13 + $0x160] sm:$0xff] }
 0xd37   : > { %6991 = vmatprep.mubr.f32.mxu0 %v6715_v59  ;;  %v6024_v3 = vmul.f32 -1.45660715e-05, %v12479_v29  ;;  %v4938_v63 = vmul.f32 0.70710677, %v12471_v38  ;;  %8541 = vmatprep.subr.mxu1 %v9278_v7  ;;  %v12490_v17 = vmul.f32 %v12301_v25, %v5889_v4  ;;  %v5509_v24 = vadd.f32 -5.6925062e-05, %v5445_v1 }
 0xd38   : > { %6992 = vmatmul.mubr.f32.vlgmr.msra.gmra.mxu0 %v12324_v55  ;;  %v5256_v23 = vadd.f32 2.7706815e-08, %v5192_v54  ;;  %v6013_v30 = vmul.f32 -1.45660715e-05, %v12227_v2  ;;  %8557 = vmatpush3.msra.mxu1 %v9279_v49  ;;  %v12495_v42 = vmul.f32 %v6656_v13, %v12336_v34  ;;  %v5383_v52 = vadd.f32 -2.101024e-06, %v5319_v56 }
 0xd39   : > { %14447 = vst [vmem:[#allocation76_spill] sm:$0xff] %v12490_v17  ;;  %v6088_v28 = vadd.f32 -0.00021337405, %v6024_v3  ;;  %v12497_v39 = vclamps-f32 %v4938_v63, 4.0  ;;  %8542 = vmatprep.subr.mxu1 %v9280_v51  ;;  %v12500_v25 = vmul.f32 %v6658_v0, %v12340_v45  ;;  %v6468_v4 = vadd.f32 -0.014264739, %v6404_v61 }
 0xd3a   : > { %14448 = vst [vmem:[#allocation45_spill] sm:$0xff] %v12495_v42  ;;  %v5320_v55 = vmul.f32 %v5256_v23, %v12479_v29  ;;  %v6077_v1 = vadd.f32 -0.00021337405, %v6013_v30  ;;  %8558 = vmatpush3.msra.mxu1 %v9281_v15  ;;  %v5764_v59 = vadd.f32 -0.0029546, %v5700_v14  ;;  %v9282_v56 = vld [vmem:[#allocation13 + $0x1d0] sm:$0xff]  ;;  %v6406_v54 = vmul.f32 %v6342_v62, %v12398_v44  ;;  %v4626_v15 = vpop.f32.mrf.mxu1 }
 0xd3b   : > { %14449 = vst [vmem:[#allocation49_spill] sm:$0xff] %v12500_v25  ;;  %v5638_v40 = vadd.f32 -0.00073499064, %v5574_v58  ;;  %v6152_v34 = vmul.f32 %v6088_v28, %v12479_v29  ;;  %v12506_v13 = vmul.f32 %v12497_v39, %v12497_v39  ;;  %8543 = vmatprep.subr.mxu1 %v9282_v56  ;;  %v5573_v45 = vmul.f32 %v5509_v24, %v12416_v5  ;;  %v9283_v53 = vld [vmem:[#allocation13 + $0x150] sm:$0xff]  ;;  %v9284_v7 = vld [vmem:[#allocation13 + $0x1c8] sm:$0xff]  ;;  %v9286_v51 = vld [vmem:[#allocation13 + $0x1c0] sm:$0xff] }
 0xd3c   : > { %v5384_v0 = vadd.f32 -2.101024e-06, %v5320_v55  ;;  %v6141_v61 = vmul.f32 %v6077_v1, %v12227_v2  ;;  %8559 = vmatpush3.msra.mxu1 %v9283_v53  ;;  %v12512_v14 = vmul.f32 %v12331_v20, %v5891_v50  ;;  %v5447_v58 = vmul.f32 %v5383_v52, %v12451_v8  ;;  %v9285_v49 = vld [vmem:[#allocation13 + $0x148] sm:$0xff] }
 0xd3d   : > { %v6216_v3 = vadd.f32 -0.001682827, %v6152_v34  ;;  %v5194_v63 = vmul.f32 -2.7261424e-10, %v12506_v13  ;;  %8544 = vmatprep.subr.mxu1 %v9284_v7  ;;  %v12517_v23 = vmul.f32 0.5, %v12440_v47  ;;  %v5828_v20 = vmul.f32 %v5764_v59, %v12383_v46  ;;  %v9287_v34 = vld [vmem:[#allocation13 + $0x140] sm:$0xff] }
 0xd3e   : > { %14450 = vst [vmem:[#allocation77_spill] sm:$0xff] %v12512_v14  ;;  %v5448_v62 = vmul.f32 %v5384_v0, %v12479_v29  ;;  %v6026_v24 = vmul.f32 -1.45660715e-05, %v12506_v13  ;;  %v6015_v30 = vmul.f32 -1.45660715e-05, %v12242_v27  ;;  %8560 = vmatpush3.msra.mxu1 %v9285_v49  ;;  %v5702_v50 = vmul.f32 %v5638_v40, %v12398_v44  ;;  %v9288_v59 = vld [vmem:[#allocation13 + $0x1b8] sm:$0xff] }
 0xd3f   : > { %v5258_v52 = vadd.f32 2.7706815e-08, %v5194_v63  ;;  %v6205_v28 = vadd.f32 -0.001682827, %v6141_v61  ;;  %8545 = vmatprep.subr.mxu1 %v9286_v51  ;;  %9145 = vrcp.f32 %v6468_v4  ;;  %v6470_v55 = vadd.f32 -0.014264739, %v6406_v54 }
 0xd40   : > { %v5637_v47 = vadd.f32 -0.00073499064, %v5573_v45  ;;  %v6090_v1 = vadd.f32 -0.00021337405, %v6026_v24  ;;  %8561 = vmatpush3.msra.mxu1 %v9287_v34  ;;  %v5511_v56 = vadd.f32 -5.6925062e-05, %v5447_v58  ;;  %v6280_v0 = vmul.f32 %v6216_v3, %v12479_v29  ;;  %v4787_v45 = vpop.f32.mrf.mxu0 }
 0xd41   : > { %v5322_v53 = vmul.f32 %v5258_v52, %v12506_v13  ;;  %v6269_v46 = vmul.f32 %v6205_v28, %v12227_v2  ;;  %8546 = vmatprep.subr.mxu1 %v9288_v59  ;;  %v5512_v40 = vadd.f32 -5.6925062e-05, %v5448_v62  ;;  %v12528_v61 = vmul.f32 0.5, %v12471_v38  ;;  %v9289_v63 = vld [vmem:[#allocation13 + $0x138] sm:$0xff]  ;;  %v9290_v49 = vld [vmem:[#allocation13 + $0x1b0] sm:$0xff]  ;;  %v9293_v59 = vld [vmem:[#allocation13 + $0x128] sm:$0xff] }
 0xd42   : > { %v6154_v4 = vmul.f32 %v6090_v1, %v12506_v13  ;;  %v6079_v54 = vadd.f32 -0.00021337405, %v6015_v30  ;;  %8562 = vmatpush3.msra.mxu1 %v9289_v63  ;;  %v5892_v7 = vadd.f32 -0.016096033, %v5828_v20  ;;  %v5766_v58 = vadd.f32 -0.0029546, %v5702_v50 }
 0xd43   : > { %v5386_v24 = vadd.f32 -2.101024e-06, %v5322_v53  ;;  %v12532_v3 = vadd.f32 %v4626_v15, %v12103_v33  ;;  %8547 = vmatprep.subr.mxu1 %v9290_v49  ;;  %v5701_v52 = vmul.f32 %v5637_v47, %v12416_v5  ;;  %v6333_v28 = vadd.f32 -0.0073733293, %v6269_v46  ;;  %v9291_v51 = vld [vmem:[#allocation13 + $0x130] sm:$0xff]  ;;  %v9292_v15 = vld [vmem:[#allocation13 + $0x1a8] sm:$0xff]  ;;  %v4630_v49 = vpop.f32.mrf.mxu1 }
 0xd44   : > { %v6218_v62 = vadd.f32 -0.001682827, %v6154_v4  ;;  %v6143_v38 = vmul.f32 %v6079_v54, %v12242_v27  ;;  %8563 = vmatpush3.msra.mxu1 %v9291_v51  ;;  %v5575_v30 = vmul.f32 %v5511_v56, %v12451_v8  ;;  %v6344_v1 = vadd.f32 -0.0073733293, %v6280_v0  ;;  %v9294_v54 = vld [vmem:[#allocation13 + $0x1a0] sm:$0xff]  ;;  %v9297_v51 = vld [vmem:[#allocation13 + $0x118] sm:$0xff] }
 0xd45   : > { %v5450_v20 = vmul.f32 %v5386_v24, %v12506_v13  ;;  %v12539_v50 = vadd.f32 %v4787_v45, %v12105_v41  ;;  %8548 = vmatprep.subr.mxu1 %v9292_v15  ;;  %v5576_v34 = vmul.f32 %v5512_v40, %v12479_v29  ;;  %v6397_v53 = vmul.f32 %v6333_v28, %v12227_v2 }
 0xd46   : > { %v6282_v47 = vmul.f32 %v6218_v62, %v12506_v13  ;;  %v6207_v46 = vadd.f32 -0.001682827, %v6143_v38  ;;  %8564 = vmatpush3.msra.mxu1 %v9293_v59  ;;  %v12545_v4 = vmul.f32 %v12374_v11, %v5892_v7  ;;  %v5830_v56 = vmul.f32 %v5766_v58, %v12398_v44  ;;  %v9295_v62 = vld [vmem:[#allocation13 + $0x120] sm:$0xff]  ;;  %v9296_v7 = vld [vmem:[#allocation13 + $0x198] sm:$0xff] }
 0xd47   : > { %9147 = vrcp.f32 %v6470_v55  ;;  %v5514_v0 = vadd.f32 -5.6925062e-05, %v5450_v20  ;;  %8549 = vmatprep.subr.mxu1 %v9294_v54  ;;  %v5765_v45 = vadd.f32 -0.0029546, %v5701_v52  ;;  %v6461_v24 = vadd.f32 -0.014264739, %v6397_v53  ;;  %v4791_v55 = vpop.f32.mrf.mxu0 }
 0xd48   : > { %v6346_v63 = vadd.f32 -0.0073733293, %v6282_v47  ;;  %v6271_v40 = vmul.f32 %v6207_v46, %v12242_v27  ;;  %8565 = vmatpush3.msra.mxu1 %v9295_v62  ;;  %v6408_v2 = vmul.f32 %v6344_v1, %v12479_v29  ;;  %v4937_v11 = vmul.f32 0.70710677, %v12532_v3  ;;  %v9298_v53 = vld [vmem:[#allocation13 + $0x190] sm:$0xff]  ;;  %v9300_v62 = vld [vmem:[#allocation13 + $0x188] sm:$0xff] }
 0xd49   : > { %v5578_v28 = vmul.f32 %v5514_v0, %v12506_v13  ;;  %v4939_v44 = vmul.f32 0.70710677, %v12539_v50  ;;  %8550 = vmatprep.subr.mxu1 %v9296_v7  ;;  %v5639_v58 = vadd.f32 -0.00073499064, %v5575_v30  ;;  %v5640_v52 = vadd.f32 -0.00073499064, %v5576_v34  ;;  %v4632_v0 = vpop.f32.mrf.mxu1 }
 0xd4a   : > { %9149 = vrcp.f32 %v6461_v24  ;;  %v6335_v38 = vadd.f32 -0.0073733293, %v6271_v40  ;;  %8566 = vmatpush3.msra.mxu1 %v9297_v51  ;;  %v6410_v20 = vmul.f32 %v6346_v63, %v12506_v13  ;;  %v12554_v15 = vclamps-f32 %v4937_v11, 4.0  ;;  %v9299_v54 = vld [vmem:[#allocation13 + $0x110] sm:$0xff]  ;;  %v9302_v51 = vld [vmem:[#allocation13 + $0x180] sm:$0xff] }
 0xd4b   : > { %v12556_v1 = vclamps-f32 %v4939_v44, 4.0  ;;  %v12559_v47 = vadd.f32 %v4630_v49, %v12095_v9  ;;  %8551 = vmatprep.subr.mxu1 %v9298_v53  ;;  %v5894_v46 = vadd.f32 -0.016096033, %v5830_v56  ;;  %v5642_v59 = vadd.f32 -0.00073499064, %v5578_v28 }
 0xd4c   : > { %v6399_v30 = vmul.f32 %v6335_v38, %v12242_v27  ;;  %v12563_v34 = vadd.f32 %v4791_v55, %v12099_v26  ;;  %8567 = vmatpush3.msra.mxu1 %v9299_v54  ;;  %v9146_v63 = vpop.eup %9145  ;;  %v5829_v24 = vmul.f32 %v5765_v45, %v12416_v5  ;;  %v6472_v40 = vadd.f32 -0.014264739, %v6408_v2  ;;  %v9301_v55 = vld [vmem:[#allocation13 + $0x108] sm:$0xff] }
 0xd4d   : > { %v12568_v49 = vmul.f32 %v12554_v15, %v12554_v15  ;;  %v12572_v56 = vmul.f32 %v12556_v1, %v12556_v1  ;;  %8552 = vmatprep.subr.mxu1 %v9300_v62  ;;  %v5703_v27 = vmul.f32 %v5639_v58, %v12451_v8  ;;  %v5704_v28 = vmul.f32 %v5640_v52, %v12479_v29 }
 0xd4e   : > { %v6463_v11 = vadd.f32 -0.014264739, %v6399_v30  ;;  %v4940_v44 = vmul.f32 0.70710677, %v12559_v47  ;;  %8568 = vmatpush3.msra.mxu1 %v9301_v55  ;;  %v6474_v45 = vadd.f32 -0.014264739, %v6410_v20  ;;  %v12580_v38 = vadd.f32 %v4632_v0, %v12103_v33 }
 0xd4f   : > { %v5193_v2 = vmul.f32 -2.7261424e-10, %v12568_v49  ;;  %v5195_v7 = vmul.f32 -2.7261424e-10, %v12572_v56  ;;  %8553 = vmatprep.subr.mxu1 %v9302_v51  ;;  %v5706_v53 = vmul.f32 %v5642_v59, %v12506_v13  ;;  %v4942_v52 = vmul.f32 0.70710677, %v12563_v34 }
 0xd50   : > { %9151 = vrcp.f32 %v6463_v11  ;;  %v12583_v58 = vclamps-f32 %v4940_v44, 4.0  ;;  %v9303_v30 = vld [vmem:[#allocation13 + $0x100] sm:$0xff]  ;;  %v5893_v54 = vadd.f32 -0.016096033, %v5829_v24  ;;  %v5767_v55 = vadd.f32 -0.0029546, %v5703_v27 }
 0xd51   : > { %8569 = vmatpush3.msra.mxu1 %v9303_v30  ;;  %9153 = vrcp.f32 %v6472_v40  ;;  %v5257_v20 = vadd.f32 2.7706815e-08, %v5193_v2  ;;  %v5259_v62 = vadd.f32 2.7706815e-08, %v5195_v7  ;;  %v12590_v19 = vclamps-f32 %v4942_v52, 4.0 }
 0xd52   : > { %v12588_v0 = vmul.f32 %v12583_v58, %v12583_v58  ;;  %v4941_v59 = vmul.f32 0.70710677, %v12580_v38  ;;  %v5768_v11 = vadd.f32 -0.0029546, %v5704_v28  ;;  %9155 = vrcp.f32 %v6474_v45 }
 0xd53   : > { %v5321_v44 = vmul.f32 %v5257_v20, %v12568_v49  ;;  %v5323_v51 = vmul.f32 %v5259_v62, %v12572_v56  ;;  %v5770_v24 = vadd.f32 -0.0029546, %v5706_v53  ;;  %v12599_v2 = vmul.f32 %v12590_v19, %v12590_v19 }
 0xd54   : > { %v9148_v30 = vpop.eup %9147  ;;  %v5196_v40 = vmul.f32 -2.7261424e-10, %v12588_v0  ;;  %v6028_v27 = vmul.f32 -1.45660715e-05, %v12588_v0  ;;  %v5958_v7 = vmul.f32 %v12392_v31, %v5894_v46  ;;  %v12602_v28 = vclamps-f32 %v4941_v59, 4.0 }
 0xd55   : > { %v5385_v52 = vadd.f32 -2.101024e-06, %v5321_v44  ;;  %v5387_v6 = vadd.f32 -2.101024e-06, %v5323_v51  ;;  %v6545_v45 = vmul.f32 %v9146_v63, %v12545_v4  ;;  %v5198_v53 = vmul.f32 -2.7261424e-10, %v12599_v2 }
 0xd56   : > { %v5260_v20 = vadd.f32 2.7706815e-08, %v5196_v40  ;;  %v6092_v62 = vadd.f32 -0.00021337405, %v6028_v27  ;;  %v5832_v42 = vmul.f32 %v5768_v11, %v12479_v29  ;;  %v6030_v17 = vmul.f32 -1.45660715e-05, %v12599_v2 }
 0xd57   : > { %v9150_v25 = vpop.eup %9149  ;;  %v5449_v36 = vmul.f32 %v5385_v52, %v12568_v49  ;;  %v5451_v14 = vmul.f32 %v5387_v6, %v12572_v56  ;;  %v5262_v4 = vadd.f32 2.7706815e-08, %v5198_v53  ;;  %v5834_v63 = vmul.f32 %v5770_v24, %v12506_v13 }
 0xd58   : > { %v6531_v31 = vmul.f32 %v9150_v25, %v12419_v35  ;;  %v5324_v46 = vmul.f32 %v5260_v20, %v12588_v0  ;;  %v6156_v59 = vmul.f32 %v6092_v62, %v12588_v0  ;;  %v6094_v51 = vadd.f32 -0.00021337405, %v6030_v17 }
 0xd59   : > { %v5513_v44 = vadd.f32 -5.6925062e-05, %v5449_v36  ;;  %v12616_v29 = vmul.f32 %v12602_v28, %v12602_v28  ;;  %v5326_v27 = vmul.f32 %v5262_v4, %v12599_v2  ;;  %v6660_v52 = vadd.f32 1.0, %v6545_v45 }
 0xd5a   : > { %v6653_v11 = vadd.f32 1.0, %v6531_v31  ;;  %v5388_v40 = vadd.f32 -2.101024e-06, %v5324_v46  ;;  %v6220_v6 = vadd.f32 -0.001682827, %v6156_v59  ;;  %v6549_v35 = vmul.f32 %v9148_v30, %v5958_v7 }
 0xd5b   : > { %v5831_v25 = vmul.f32 %v5767_v55, %v12451_v8  ;;  %v5896_v20 = vadd.f32 -0.016096033, %v5832_v42  ;;  %v5515_v53 = vadd.f32 -5.6925062e-05, %v5451_v14  ;;  %v6158_v17 = vmul.f32 %v6094_v51, %v12599_v2 }
 0xd5c   : > { %v6717_v62 = vmul.f32 %v6653_v11, %v12250_v43  ;;  %v5452_v36 = vmul.f32 %v5388_v40, %v12588_v0  ;;  %v5898_v24 = vadd.f32 -0.016096033, %v5834_v63  ;;  %v12624_v31 = vmul.f32 0.5, %v12532_v3  ;;  %v4793_v63 = vpop.f32.mrf.mxu0 }
 0xd5d   : > { %v9152_v13 = vpop.eup %9151  ;;  %v5577_v46 = vmul.f32 %v5513_v44, %v12568_v49  ;;  %v6284_v45 = vmul.f32 %v6220_v6, %v12588_v0  ;;  %v12629_v55 = vmul.f32 %v12400_v16, %v5893_v54  ;;  %v5390_v42 = vadd.f32 -2.101024e-06, %v5326_v27 }
 0xd5e   : > { %14451 = vst [vmem:[#allocation51_spill] sm:$0xff] %v12624_v31  ;;  %v9154_v30 = vpop.eup %9153  ;;  %6851 = vmatprep.mubr.f32.mxu1 %v6717_v62  ;;  %v6535_v43 = vmul.f32 %v9152_v13, %v12431_v10  ;;  %v5197_v14 = vmul.f32 -2.7261424e-10, %v12616_v29  ;;  %v6662_v7 = vadd.f32 1.0, %v6549_v35  ;;  %v5895_v59 = vadd.f32 -0.016096033, %v5831_v25  ;;  %v4636_v10 = vpop.f32.mrf.mxu1 }
 0xd5f   : > { %v5960_v4 = vmul.f32 %v12467_v60, %v5896_v20  ;;  %6852 = vmatmul.mubr.f32.gmra.mxu1 %v12411_v21  ;;  %v5516_v3 = vadd.f32 -5.6925062e-05, %v5452_v36  ;;  %v9156_v44 = vpop.eup %9155  ;;  %v12636_v51 = vmul.f32 %v6660_v52, %v12444_v12  ;;  %v5579_v54 = vmul.f32 %v5515_v53, %v12572_v56 }
 0xd60   : > { %v6655_v16 = vadd.f32 1.0, %v6535_v43  ;;  %v6222_v11 = vadd.f32 -0.001682827, %v6158_v17  ;;  %v5962_v6 = vmul.f32 %v12497_v39, %v5898_v24  ;;  %v5641_v27 = vadd.f32 -0.00073499064, %v5577_v46  ;;  %v4797_v39 = vpop.f32.mrf.mxu0  ;;  %v4638_v24 = vpop.f32.mrf.mxu1 }
 0xd61   : > { %v6553_v40 = vmul.f32 %v9154_v30, %v5960_v4  ;;  %v6348_v35 = vadd.f32 -0.0073733293, %v6284_v45  ;;  %v5454_v21 = vmul.f32 %v5390_v42, %v12599_v2  ;;  %v5261_v25 = vadd.f32 2.7706815e-08, %v5197_v14 }
 0xd62   : > { %v6719_v60 = vmul.f32 %v6655_v16, %v12320_v32  ;;  %v12643_v20 = vadd.f32 %v4793_v63, %v12105_v41  ;;  %v12646_v12 = vmul.f32 %v6662_v7, %v12447_v22  ;;  %v12649_v52 = vmul.f32 %v12436_v37, %v5895_v59 }
 0xd63   : > { %v6557_v62 = vmul.f32 %v9156_v44, %v5962_v6  ;;  %v5580_v53 = vmul.f32 %v5516_v3, %v12588_v0  ;;  %v12653_v36 = vmul.f32 0.5, %v12539_v50  ;;  %v5643_v32 = vadd.f32 -0.00073499064, %v5579_v54 }
 0xd64   : > { %6996 = vmatprep.mubr.f32.mxu0 %v6719_v60  ;;  %v12656_v17 = vmul.f32 0.5, %v12559_v47  ;;  %v6286_v13 = vmul.f32 %v6222_v11, %v12599_v2  ;;  %v6664_v22 = vadd.f32 1.0, %v6553_v40  ;;  %v5705_v46 = vmul.f32 %v5641_v27, %v12568_v49 }
 0xd65   : > { %14452 = vst [vmem:[#allocation47_spill] sm:$0xff] %v12653_v36  ;;  %6997 = vmatmul.mubr.f32.gmra.mxu0 %v12428_v18  ;;  %v6412_v37 = vmul.f32 %v6348_v35, %v12588_v0  ;;  %v12663_v45 = vadd.f32 %v4636_v10, %v12095_v9  ;;  %v5518_v30 = vadd.f32 -5.6925062e-05, %v5454_v21  ;;  %v5325_v50 = vmul.f32 %v5261_v25, %v12616_v29 }
 0xd66   : > { %v4943_v43 = vmul.f32 0.70710677, %v12643_v20  ;;  %v12668_v47 = vadd.f32 %v4797_v39, %v12099_v26  ;;  %v6666_v42 = vadd.f32 1.0, %v6557_v62  ;;  %v5644_v14 = vadd.f32 -0.00073499064, %v5580_v53 }
 0xd67   : > { %v12671_v7 = vmul.f32 0.5, %v12563_v34  ;;  %v12674_v18 = vadd.f32 %v4638_v24, %v12103_v33  ;;  %v5707_v59 = vmul.f32 %v5643_v32, %v12572_v56  ;;  %v6350_v4 = vadd.f32 -0.0073733293, %v6286_v13 }
 0xd68   : > { %v12678_v3 = vmul.f32 0.5, %v12580_v38  ;;  %v12680_v63 = vclamps-f32 %v4943_v43, 4.0  ;;  %v12683_v44 = vmul.f32 %v6664_v22, %v12517_v23  ;;  %v5769_v16 = vadd.f32 -0.0029546, %v5705_v46 }
 0xd69   : > { %v6476_v54 = vadd.f32 -0.014264739, %v6412_v37  ;;  %v4944_v11 = vmul.f32 0.70710677, %v12663_v45  ;;  %v5582_v34 = vmul.f32 %v5518_v30, %v12599_v2  ;;  %v5389_v10 = vadd.f32 -2.101024e-06, %v5325_v50 }
 0xd6a   : > { %14453 = vst [vmem:[#allocation53_spill] sm:$0xff] %v12678_v3  ;;  %14454 = vst [vmem:[#allocation50_spill] sm:$0xff] %v12683_v44  ;;  %v12689_v40 = vmul.f32 %v12680_v63, %v12680_v63  ;;  %v4946_v6 = vmul.f32 0.70710677, %v12668_v47  ;;  %v12693_v38 = vmul.f32 %v6666_v42, %v12528_v61  ;;  %v5708_v27 = vmul.f32 %v5644_v14, %v12588_v0 }
 0xd6b   : > { %v12696_v23 = vclamps-f32 %v4944_v11, 4.0  ;;  %v4945_v35 = vmul.f32 0.70710677, %v12674_v18  ;;  %v5771_v60 = vadd.f32 -0.0029546, %v5707_v59  ;;  %v6414_v21 = vmul.f32 %v6350_v4, %v12599_v2 }
 0xd6c   : > { %14455 = vst [vmem:[#allocation52_spill] sm:$0xff] %v12693_v38  ;;  %v5199_v25 = vmul.f32 -2.7261424e-10, %v12689_v40  ;;  %v12701_v62 = vclamps-f32 %v4946_v6, 4.0  ;;  %v5833_v53 = vmul.f32 %v5769_v16, %v12568_v49  ;;  %9157 = vrcp.f32 %v6476_v54 }
 0xd6d   : > { %v12706_v61 = vmul.f32 %v12696_v23, %v12696_v23  ;;  %v12708_v39 = vclamps-f32 %v4945_v35, 4.0  ;;  %v5646_v32 = vadd.f32 -0.00073499064, %v5582_v34  ;;  %v5453_v13 = vmul.f32 %v5389_v10, %v12616_v29 }
 0xd6e   : > { %v5263_v24 = vadd.f32 2.7706815e-08, %v5199_v25  ;;  %v12713_v22 = vmul.f32 %v12701_v62, %v12701_v62  ;;  %v5772_v46 = vadd.f32 -0.0029546, %v5708_v27  ;;  %v6478_v43 = vadd.f32 -0.014264739, %v6414_v21 }
 0xd6f   : > { %v5200_v37 = vmul.f32 -2.7261424e-10, %v12706_v61  ;;  %v6032_v30 = vmul.f32 -1.45660715e-05, %v12706_v61  ;;  %v12719_v50 = vmul.f32 %v12708_v39, %v12708_v39  ;;  %v5835_v4 = vmul.f32 %v5771_v60, %v12572_v56 }
 0xd70   : > { %v5327_v42 = vmul.f32 %v5263_v24, %v12689_v40  ;;  %v5202_v14 = vmul.f32 -2.7261424e-10, %v12713_v22  ;;  %v6034_v59 = vmul.f32 -1.45660715e-05, %v12713_v22  ;;  %v5710_v34 = vmul.f32 %v5646_v32, %v12599_v2 }
 0xd71   : > { %v5264_v16 = vadd.f32 2.7706815e-08, %v5200_v37  ;;  %v6096_v54 = vadd.f32 -0.00021337405, %v6032_v30  ;;  %v5201_v11 = vmul.f32 -2.7261424e-10, %v12719_v50  ;;  %v5836_v3 = vmul.f32 %v5772_v46, %v12588_v0 }
 0xd72   : > { %v5517_v10 = vadd.f32 -5.6925062e-05, %v5453_v13  ;;  %v5391_v6 = vadd.f32 -2.101024e-06, %v5327_v42  ;;  %v5266_v27 = vadd.f32 2.7706815e-08, %v5202_v14  ;;  %v4799_v42 = vpop.f32.mrf.mxu0  ;;  %9159 = vrcp.f32 %v6478_v43 }
 0xd73   : > { %v5328_v35 = vmul.f32 %v5264_v16, %v12706_v61  ;;  %v6160_v21 = vmul.f32 %v6096_v54, %v12706_v61  ;;  %v6098_v25 = vadd.f32 -0.00021337405, %v6034_v59  ;;  %v5265_v24 = vadd.f32 2.7706815e-08, %v5201_v11 }
 0xd74   : > { %v5897_v38 = vadd.f32 -0.016096033, %v5833_v53  ;;  %v5455_v60 = vmul.f32 %v5391_v6, %v12689_v40  ;;  %v5330_v37 = vmul.f32 %v5266_v27, %v12713_v22  ;;  %v5774_v14 = vadd.f32 -0.0029546, %v5710_v34 }
 0xd75   : > { %v5392_v30 = vadd.f32 -2.101024e-06, %v5328_v35  ;;  %v6224_v36 = vadd.f32 -0.001682827, %v6160_v21  ;;  %v6162_v32 = vmul.f32 %v6098_v25, %v12713_v22  ;;  %v5329_v13 = vmul.f32 %v5265_v24, %v12719_v50  ;;  %v4642_v21 = vpop.f32.mrf.mxu1 }
 0xd76   : > { %v5519_v16 = vadd.f32 -5.6925062e-05, %v5455_v60  ;;  %v5394_v54 = vadd.f32 -2.101024e-06, %v5330_v37  ;;  %v5581_v59 = vmul.f32 %v5517_v10, %v12616_v29  ;;  %v12740_v35 = vadd.f32 %v4799_v42, %v12105_v41 }
 0xd77   : > { %v5456_v53 = vmul.f32 %v5392_v30, %v12706_v61  ;;  %v6288_v0 = vmul.f32 %v6224_v36, %v12706_v61  ;;  %v6226_v46 = vadd.f32 -0.001682827, %v6162_v32  ;;  %v5393_v27 = vadd.f32 -2.101024e-06, %v5329_v13 }
 0xd78   : > { %v5583_v11 = vmul.f32 %v5519_v16, %v12689_v40  ;;  %v5458_v6 = vmul.f32 %v5394_v54, %v12713_v22  ;;  %v5900_v34 = vadd.f32 -0.016096033, %v5836_v3  ;;  %v5838_v60 = vmul.f32 %v5774_v14, %v12599_v2  ;;  %v4803_v2 = vpop.f32.mrf.mxu0 }
 0xd79   : > { %v5520_v43 = vadd.f32 -5.6925062e-05, %v5456_v53  ;;  %v6352_v25 = vadd.f32 -0.0073733293, %v6288_v0  ;;  %v6290_v24 = vmul.f32 %v6226_v46, %v12713_v22  ;;  %v9158_v10 = vpop.eup %9157  ;;  %v12745_v36 = vmul.f32 0.5, %v12643_v20 }
 0xd7a   : > { %v5522_v37 = vadd.f32 -5.6925062e-05, %v5458_v6  ;;  %v5457_v30 = vmul.f32 %v5393_v27, %v12719_v50  ;;  %v5645_v32 = vadd.f32 -0.00073499064, %v5581_v59  ;;  %v12750_v16 = vadd.f32 %v4642_v21, %v12095_v9 }
 0xd7b   : > { %14456 = vst [vmem:[#allocation54_spill] sm:$0xff] %v12745_v36  ;;  %v5584_v13 = vmul.f32 %v5520_v43, %v12706_v61  ;;  %v6354_v42 = vadd.f32 -0.0073733293, %v6290_v24  ;;  %v5647_v3 = vadd.f32 -0.00073499064, %v5583_v11  ;;  %v12755_v20 = vmul.f32 %v12554_v15, %v5897_v38 }
 0xd7c   : > { %v5586_v54 = vmul.f32 %v5522_v37, %v12713_v22  ;;  %v5521_v53 = vadd.f32 -5.6925062e-05, %v5457_v30  ;;  %v4947_v0 = vmul.f32 0.70710677, %v12740_v35  ;;  %v5899_v14 = vadd.f32 -0.016096033, %v5835_v4 }
 0xd7d   : > { %v5964_v46 = vmul.f32 %v12583_v58, %v5900_v34  ;;  %v6416_v59 = vmul.f32 %v6352_v25, %v12706_v61  ;;  %v5902_v6 = vadd.f32 -0.016096033, %v5838_v60  ;;  %v5648_v27 = vadd.f32 -0.00073499064, %v5584_v13 }
 0xd7e   : > { %v6418_v21 = vmul.f32 %v6354_v42, %v12713_v22  ;;  %v12760_v43 = vclamps-f32 %v4947_v0, 4.0  ;;  %v5709_v24 = vmul.f32 %v5645_v32, %v12616_v29  ;;  %v4948_v37 = vmul.f32 0.70710677, %v12750_v16 }
 0xd7f   : > { %v6561_v11 = vmul.f32 %v9158_v10, %v5964_v46  ;;  %v12765_v30 = vadd.f32 %v4803_v2, %v12099_v26  ;;  %v5711_v15 = vmul.f32 %v5647_v3, %v12689_v40  ;;  %v5650_v38 = vadd.f32 -0.00073499064, %v5586_v54  ;;  %v4644_v54 = vpop.f32.mrf.mxu1 }
 0xd80   : > { %v5585_v58 = vmul.f32 %v5521_v53, %v12719_v50  ;;  %v12771_v4 = vmul.f32 %v12760_v43, %v12760_v43  ;;  %v12774_v34 = vmul.f32 %v12556_v1, %v5899_v14  ;;  %v12777_v25 = vmul.f32 0.5, %v12663_v45  ;;  %v9160_v53 = vpop.eup %9159 }
 0xd81   : > { %v6480_v10 = vadd.f32 -0.014264739, %v6416_v59  ;;  %v12779_v60 = vclamps-f32 %v4948_v37, 4.0  ;;  %v5966_v32 = vmul.f32 %v12590_v19, %v5902_v6  ;;  %v5712_v13 = vmul.f32 %v5648_v27, %v12706_v61 }
 0xd82   : > { %14457 = vst [vmem:[#allocation78_spill] sm:$0xff] %v12774_v34  ;;  %v6482_v42 = vadd.f32 -0.014264739, %v6418_v21  ;;  %v5203_v3 = vmul.f32 -2.7261424e-10, %v12771_v4  ;;  %v6668_v0 = vadd.f32 1.0, %v6561_v11  ;;  %v5714_v46 = vmul.f32 %v5650_v38, %v12713_v22 }
 0xd83   : > { %14458 = vst [vmem:[#allocation79_spill] sm:$0xff] %v12779_v60  ;;  %v5773_v2 = vadd.f32 -0.0029546, %v5709_v24  ;;  %v12786_v1 = vmul.f32 %v12779_v60, %v12779_v60  ;;  %v4950_v45 = vmul.f32 0.70710677, %v12765_v30  ;;  %9161 = vrcp.f32 %v6480_v10 }
 0xd84   : > { %v5775_v14 = vadd.f32 -0.0029546, %v5711_v15  ;;  %v5649_v59 = vadd.f32 -0.00073499064, %v5585_v58  ;;  %v5267_v19 = vadd.f32 2.7706815e-08, %v5203_v3  ;;  %v12793_v21 = vadd.f32 %v4644_v54, %v12103_v33  ;;  %v4805_v54 = vpop.f32.mrf.mxu0 }
 0xd85   : > { %v5204_v6 = vmul.f32 -2.7261424e-10, %v12786_v1  ;;  %v6036_v27 = vmul.f32 -1.45660715e-05, %v12786_v1  ;;  %v5776_v11 = vadd.f32 -0.0029546, %v5712_v13  ;;  %9163 = vrcp.f32 %v6482_v42 }
 0xd86   : > { %v5331_v24 = vmul.f32 %v5267_v19, %v12771_v4  ;;  %v12796_v37 = vclamps-f32 %v4950_v45, 4.0  ;;  %v6565_v36 = vmul.f32 %v9160_v53, %v5966_v32  ;;  %v5837_v15 = vmul.f32 %v5773_v2, %v12616_v29 }
 0xd87   : > { %v5268_v38 = vadd.f32 2.7706815e-08, %v5204_v6  ;;  %v6100_v58 = vadd.f32 -0.00021337405, %v6036_v27  ;;  %v5778_v3 = vadd.f32 -0.0029546, %v5714_v46  ;;  %v5713_v10 = vmul.f32 %v5649_v59, %v12719_v50 }
 0xd88   : > { %14459 = vst [vmem:[#allocation56_spill] sm:$0xff] %v12796_v37  ;;  %v5395_v34 = vadd.f32 -2.101024e-06, %v5331_v24  ;;  %v12802_v44 = vmul.f32 %v12796_v37, %v12796_v37  ;;  %v5839_v13 = vmul.f32 %v5775_v14, %v12689_v40  ;;  %v4949_v32 = vmul.f32 0.70710677, %v12793_v21 }
 0xd89   : > { %v5332_v42 = vmul.f32 %v5268_v38, %v12786_v1  ;;  %v6164_v45 = vmul.f32 %v6100_v58, %v12786_v1  ;;  %v5840_v53 = vmul.f32 %v5776_v11, %v12706_v61  ;;  %v12815_v14 = vadd.f32 %v4805_v54, %v12105_v41 }
 0xd8a   : > { %v5459_v2 = vmul.f32 %v5395_v34, %v12771_v4  ;;  %v5206_v46 = vmul.f32 -2.7261424e-10, %v12802_v44  ;;  %v6038_v59 = vmul.f32 -1.45660715e-05, %v12802_v44  ;;  %v12812_v27 = vclamps-f32 %v4949_v32, 4.0 }
 0xd8b   : > { %v5396_v19 = vadd.f32 -2.101024e-06, %v5332_v42  ;;  %v6228_v6 = vadd.f32 -0.001682827, %v6164_v45  ;;  %v5842_v24 = vmul.f32 %v5778_v3, %v12713_v22  ;;  %v5777_v38 = vadd.f32 -0.0029546, %v5713_v10 }
 0xd8c   : > { %v5523_v58 = vadd.f32 -5.6925062e-05, %v5459_v2  ;;  %v5270_v37 = vadd.f32 2.7706815e-08, %v5206_v46  ;;  %v6670_v60 = vadd.f32 1.0, %v6565_v36  ;;  %v12819_v34 = vmul.f32 0.5, %v12668_v47 }
 0xd8d   : > { %v5901_v61 = vadd.f32 -0.016096033, %v5837_v15  ;;  %v6102_v11 = vadd.f32 -0.00021337405, %v6038_v59  ;;  %v12822_v31 = vmul.f32 %v6668_v0, %v12656_v17  ;;  %v12825_v42 = vmul.f32 0.5, %v12674_v18 }
 0xd8e   : > { %v5460_v54 = vmul.f32 %v5396_v19, %v12786_v1  ;;  %v12830_v22 = vmul.f32 %v12812_v27, %v12812_v27  ;;  %v5903_v3 = vadd.f32 -0.016096033, %v5839_v13  ;;  %v6292_v36 = vmul.f32 %v6228_v6, %v12786_v1 }
 0xd8f   : > { %v5334_v15 = vmul.f32 %v5270_v37, %v12802_v44  ;;  %v4951_v47 = vmul.f32 0.70710677, %v12815_v14  ;;  %v5904_v10 = vadd.f32 -0.016096033, %v5840_v53  ;;  %v5906_v45 = vadd.f32 -0.016096033, %v5842_v24 }
 0xd90   : > { %v5841_v17 = vmul.f32 %v5777_v38, %v12719_v50  ;;  %v5587_v18 = vmul.f32 %v5523_v58, %v12771_v4  ;;  %v12838_v0 = vmul.f32 %v6670_v60, %v12671_v7  ;;  %v12841_v32 = vmul.f32 %v12602_v28, %v5901_v61  ;;  %v9162_v37 = vpop.eup %9161 }
 0xd91   : > { %v12844_v13 = vmul.f32 0.5, %v12740_v35  ;;  %v6166_v2 = vmul.f32 %v6102_v11, %v12802_v44  ;;  %v12848_v46 = vmul.f32 0.5, %v12750_v16  ;;  %v5524_v53 = vadd.f32 -5.6925062e-05, %v5460_v54 }
 0xd92   : > { %v12851_v59 = vmul.f32 0.5, %v12765_v30  ;;  %v5205_v19 = vmul.f32 -2.7261424e-10, %v12830_v22  ;;  %v9164_v7 = vpop.eup %9163  ;;  %v12855_v60 = vmul.f32 %v12680_v63, %v5903_v3  ;;  %v6356_v28 = vadd.f32 -0.0073733293, %v6292_v36  ;;  %v4648_v63 = vpop.f32.mrf.mxu1 }
 0xd93   : > { %14460 = vst [vmem:[#allocation55_spill] sm:$0xff] %v12848_v46  ;;  %v5398_v6 = vadd.f32 -2.101024e-06, %v5334_v15  ;;  %v12857_v35 = vclamps-f32 %v4951_v47, 4.0  ;;  %v5968_v24 = vmul.f32 %v12696_v23, %v5904_v10  ;;  %v5970_v38 = vmul.f32 %v12701_v62, %v5906_v45  ;;  %v4809_v3 = vpop.f32.mrf.mxu0 }
 0xd94   : > { %14461 = vst [vmem:[#allocation80_spill] sm:$0xff] %v12851_v59  ;;  %v5905_v16 = vadd.f32 -0.016096033, %v5841_v17  ;;  %v5651_v58 = vadd.f32 -0.00073499064, %v5587_v18  ;;  %v12862_v30 = vmul.f32 0.5, %v12793_v21  ;;  %v5588_v47 = vmul.f32 %v5524_v53, %v12786_v1 }
 0xd95   : > { %v6230_v61 = vadd.f32 -0.001682827, %v6166_v2  ;;  %v5269_v11 = vadd.f32 2.7706815e-08, %v5205_v19  ;;  %v12866_v54 = vmul.f32 %v12857_v35, %v12857_v35  ;;  %v6569_v36 = vmul.f32 %v9162_v37, %v5968_v24 }
 0xd96   : > { %14462 = vst [vmem:[#allocation81_spill] sm:$0xff] %v12862_v30  ;;  %v6573_v15 = vmul.f32 %v9164_v7, %v5970_v38  ;;  %v6017_v23 = vmul.f32 -1.45660715e-05, %v12307_v48  ;;  %v6420_v62 = vmul.f32 %v6356_v28, %v12786_v1  ;;  %v5462_v10 = vmul.f32 %v5398_v6, %v12802_v44 }
 0xd97   : > { %v5207_v21 = vmul.f32 -2.7261424e-10, %v12866_v54  ;;  %v6019_v45 = vmul.f32 -1.45660715e-05, %v12349_v57  ;;  %v12875_v17 = vmul.f32 %v12708_v39, %v5905_v16  ;;  %v5715_v18 = vmul.f32 %v5651_v58, %v12771_v4  ;;  %v4650_v16 = vpop.f32.mrf.mxu1 }
 0xd98   : > { %v12879_v2 = vadd.f32 %v4648_v63, %v12095_v9  ;;  %v12882_v37 = vadd.f32 %v4809_v3, %v12099_v26  ;;  %v6294_v53 = vmul.f32 %v6230_v61, %v12802_v44  ;;  %v5333_v19 = vmul.f32 %v5269_v11, %v12830_v22 }
 0xd99   : > { %v5271_v7 = vadd.f32 2.7706815e-08, %v5207_v21  ;;  %v6081_v28 = vadd.f32 -0.00021337405, %v6017_v23  ;;  %v6672_v6 = vadd.f32 1.0, %v6569_v36  ;;  %v12886_v24 = vadd.f32 1.0, %v6573_v15 }
 0xd9a   : > { %v5652_v38 = vadd.f32 -0.00073499064, %v5588_v47  ;;  %v6083_v39 = vadd.f32 -0.00021337405, %v6019_v45  ;;  %v6484_v59 = vadd.f32 -0.014264739, %v6420_v62  ;;  %v12894_v47 = vadd.f32 %v4650_v16, %v12103_v33 }
 0xd9b   : > { %14463 = vst [vmem:[#allocation57_spill] sm:$0xff] %v12886_v24  ;;  %v5526_v58 = vadd.f32 -5.6925062e-05, %v5462_v10  ;;  %v5335_v63 = vmul.f32 %v5271_v7, %v12866_v54  ;;  %v6145_v46 = vmul.f32 %v6081_v28, %v12307_v48  ;;  %v5779_v3 = vadd.f32 -0.0029546, %v5715_v18  ;;  %v4811_v24 = vpop.f32.mrf.mxu0 }
 0xd9c   : > { %v6147_v30 = vmul.f32 %v6083_v39, %v12349_v57  ;;  %v6021_v61 = vmul.f32 -1.45660715e-05, %v12416_v5  ;;  %v6023_v11 = vmul.f32 -1.45660715e-05, %v12451_v8  ;;  %v6358_v23 = vadd.f32 -0.0073733293, %v6294_v53 }
 0xd9d   : > { %v5397_v36 = vadd.f32 -2.101024e-06, %v5333_v19  ;;  %v6209_v15 = vadd.f32 -0.001682827, %v6145_v46  ;;  %v12897_v62 = vmul.f32 %v6672_v6, %v12777_v25  ;;  %v5716_v18 = vmul.f32 %v5652_v38, %v12786_v1 }
 0xd9e   : > { %v6211_v10 = vadd.f32 -0.001682827, %v6147_v30  ;;  %v6085_v21 = vadd.f32 -0.00021337405, %v6021_v61  ;;  %v6087_v45 = vadd.f32 -0.00021337405, %v6023_v11  ;;  %v5590_v7 = vmul.f32 %v5526_v58, %v12802_v44 }
 0xd9f   : > { %v5399_v28 = vadd.f32 -2.101024e-06, %v5335_v63  ;;  %v6273_v39 = vmul.f32 %v6209_v15, %v12307_v48  ;;  %v6025_v25 = vmul.f32 -1.45660715e-05, %v12568_v49  ;;  %v5843_v30 = vmul.f32 %v5779_v3, %v12771_v4 }
 0xda0   : > { %v6275_v53 = vmul.f32 %v6211_v10, %v12349_v57  ;;  %v6149_v46 = vmul.f32 %v6085_v21, %v12416_v5  ;;  %v6151_v19 = vmul.f32 %v6087_v45, %v12451_v8  ;;  %v6422_v6 = vmul.f32 %v6358_v23, %v12802_v44 }
 0xda1   : > { %v5461_v38 = vmul.f32 %v5397_v36, %v12830_v22  ;;  %v6337_v16 = vadd.f32 -0.0073733293, %v6273_v39  ;;  %v12910_v11 = vadd.f32 %v4811_v24, %v12105_v41  ;;  %v5780_v15 = vadd.f32 -0.0029546, %v5716_v18  ;;  %v4654_v39 = vpop.f32.mrf.mxu1 }
 0xda2   : > { %v6339_v58 = vadd.f32 -0.0073733293, %v6275_v53  ;;  %v6213_v63 = vadd.f32 -0.001682827, %v6149_v46  ;;  %v6215_v61 = vadd.f32 -0.001682827, %v6151_v19  ;;  %v5463_v21 = vmul.f32 %v5399_v28, %v12866_v54 }
 0xda3   : > { %v5654_v10 = vadd.f32 -0.00073499064, %v5590_v7  ;;  %v6401_v45 = vmul.f32 %v6337_v16, %v12307_v48  ;;  %v6089_v36 = vadd.f32 -0.00021337405, %v6025_v25  ;;  %v5907_v53 = vadd.f32 -0.016096033, %v5843_v30 }
 0xda4   : > { %v6403_v33 = vmul.f32 %v6339_v58, %v12349_v57  ;;  %v6277_v3 = vmul.f32 %v6213_v63, %v12416_v5  ;;  %v6279_v23 = vmul.f32 %v6215_v61, %v12451_v8  ;;  %9165 = vrcp.f32 %v6484_v59 }
 0xda5   : > { %v6486_v46 = vadd.f32 -0.014264739, %v6422_v6  ;;  %v5525_v19 = vadd.f32 -5.6925062e-05, %v5461_v38  ;;  %v6465_v24 = vadd.f32 -0.014264739, %v6401_v45  ;;  %v6153_v7 = vmul.f32 %v6089_v36, %v12568_v49 }
 0xda6   : > { %v6467_v41 = vadd.f32 -0.014264739, %v6403_v33  ;;  %v6341_v18 = vadd.f32 -0.0073733293, %v6277_v3  ;;  %v5844_v28 = vmul.f32 %v5780_v15, %v12786_v1  ;;  %v5527_v48 = vadd.f32 -5.6925062e-05, %v5463_v21 }
 0xda7   : > { %v6343_v16 = vadd.f32 -0.0073733293, %v6279_v23  ;;  %v12920_v57 = vadd.f32 %v4654_v39, %v12095_v9  ;;  %v5718_v58 = vmul.f32 %v5654_v10, %v12802_v44  ;;  %9167 = vrcp.f32 %v6465_v24 }
 0xda8   : > { %v6405_v25 = vmul.f32 %v6341_v18, %v12416_v5  ;;  %v6217_v59 = vadd.f32 -0.001682827, %v6153_v7  ;;  %v12925_v30 = vmul.f32 %v12760_v43, %v5907_v53  ;;  %v5589_v33 = vmul.f32 %v5525_v19, %v12830_v22 }
 0xda9   : > { %9169 = vrcp.f32 %v6467_v41  ;;  %v6407_v6 = vmul.f32 %v6343_v16, %v12451_v8  ;;  %v6027_v63 = vmul.f32 -1.45660715e-05, %v12572_v56  ;;  %v12931_v61 = vadd.f32 -0.016096033, %v5844_v28 }
 0xdaa   : > { %9171 = vrcp.f32 %v6486_v46  ;;  %v6469_v1 = vadd.f32 -0.014264739, %v6405_v25  ;;  %v6281_v38 = vmul.f32 %v6217_v59, %v12568_v49  ;;  %v5591_v15 = vmul.f32 %v5527_v48, %v12866_v54 }
 0xdab   : > { %v6471_v5 = vadd.f32 -0.014264739, %v6407_v6  ;;  %v6029_v10 = vmul.f32 -1.45660715e-05, %v12616_v29  ;;  %v5782_v43 = vadd.f32 -0.0029546, %v5718_v58 }
 0xdac   : > { %9173 = vrcp.f32 %v6469_v1  ;;  %v6345_v21 = vadd.f32 -0.0073733293, %v6281_v38  ;;  %v6091_v45 = vadd.f32 -0.00021337405, %v6027_v63  ;;  %v5653_v41 = vadd.f32 -0.00073499064, %v5589_v33 }
 0xdad   : > { %9175 = vrcp.f32 %v6471_v5  ;;  %v6093_v8 = vadd.f32 -0.00021337405, %v6029_v10  ;;  %v6031_v3 = vmul.f32 -1.45660715e-05, %v12689_v40  ;;  %v6033_v39 = vmul.f32 -1.45660715e-05, %v12719_v50 }
 0xdae   : > { %v6409_v23 = vmul.f32 %v6345_v21, %v12568_v49  ;;  %v6155_v36 = vmul.f32 %v6091_v45, %v12572_v56  ;;  %v6035_v53 = vmul.f32 -1.45660715e-05, %v12771_v4  ;;  %v12940_v46 = vadd.f32 -0.00073499064, %v5591_v15 }
 0xdaf   : > { %v6157_v19 = vmul.f32 %v6093_v8, %v12616_v29  ;;  %v6095_v24 = vadd.f32 -0.00021337405, %v6031_v3  ;;  %v6037_v18 = vmul.f32 -1.45660715e-05, %v12830_v22  ;;  %v12945_v7 = vmul.f32 %v5782_v43, %v12802_v44 }
 0xdb0   : > { %v6473_v28 = vadd.f32 -0.014264739, %v6409_v23  ;;  %v6219_v48 = vadd.f32 -0.001682827, %v6155_v36  ;;  %v6097_v16 = vadd.f32 -0.00021337405, %v6033_v39  ;;  %v12957_v10 = vmul.f32 %v5653_v41, %v12830_v22 }
 0xdb1   : > { %v6221_v49 = vadd.f32 -0.001682827, %v6157_v19  ;;  %v6159_v58 = vmul.f32 %v6095_v24, %v12689_v40  ;;  %v6099_v25 = vadd.f32 -0.00021337405, %v6035_v53  ;;  %v6101_v59 = vadd.f32 -0.00021337405, %v6037_v18  ;;  %v12948_v33 = vpop.eup %9165 }
 0xdb2   : > { %9177 = vrcp.f32 %v6473_v28  ;;  %v6283_v6 = vmul.f32 %v6219_v48, %v12572_v56  ;;  %v6161_v1 = vmul.f32 %v6097_v16, %v12719_v50  ;;  %v6039_v38 = vmul.f32 -1.45660715e-05, %v12866_v54  ;;  %v14464_v19 = vld [vmem:[#allocation76_spill] sm:$0xff]  ;;  %v14465_v16 = vld [vmem:[#allocation77_spill] sm:$0xff] }
 0xdb3   : > { %v6285_v44 = vmul.f32 %v6221_v49, %v12616_v29  ;;  %v6223_v63 = vadd.f32 -0.001682827, %v6159_v58  ;;  %v6163_v15 = vmul.f32 %v6099_v25, %v12771_v4  ;;  %v6165_v5 = vmul.f32 %v6101_v59, %v12830_v22 }
 0xdb4   : > { %v6347_v43 = vadd.f32 -0.0073733293, %v6283_v6  ;;  %v6225_v21 = vadd.f32 -0.001682827, %v6161_v1  ;;  %v6103_v45 = vadd.f32 -0.00021337405, %v6039_v38  ;;  %v9168_v8 = vpop.eup %9167 }
 0xdb5   : > { %v6349_v3 = vadd.f32 -0.0073733293, %v6285_v44  ;;  %v6287_v23 = vmul.f32 %v6223_v63, %v12689_v40  ;;  %v6227_v36 = vadd.f32 -0.001682827, %v6163_v15  ;;  %v6229_v39 = vadd.f32 -0.001682827, %v6165_v5 }
 0xdb6   : > { %v9170_v53 = vpop.eup %9169  ;;  %v6539_v24 = vmul.f32 %v9168_v8, %v14464_v19  ;;  %v6411_v18 = vmul.f32 %v6347_v43, %v12572_v56  ;;  %v6289_v28 = vmul.f32 %v6225_v21, %v12719_v50  ;;  %v6167_v48 = vmul.f32 %v6103_v45, %v12866_v54  ;;  %v14466_v45 = vld [vmem:[#allocation38_spill] sm:$0xff] }
 0xdb7   : > { %v12964_v41 = vpop.eup %9171  ;;  %v6543_v49 = vmul.f32 %v9170_v53, %v14465_v16  ;;  %v6413_v58 = vmul.f32 %v6349_v3, %v12616_v29  ;;  %v6351_v25 = vadd.f32 -0.0073733293, %v6287_v23  ;;  %v6291_v59 = vmul.f32 %v6227_v36, %v12771_v4  ;;  %v14467_v3 = vld [vmem:[#allocation40_spill] sm:$0xff] }
 0xdb8   : > { %v6657_v6 = vadd.f32 1.0, %v6539_v24  ;;  %v6475_v1 = vadd.f32 -0.014264739, %v6411_v18  ;;  %v6353_v38 = vadd.f32 -0.0073733293, %v6289_v28  ;;  %v6293_v44 = vmul.f32 %v6229_v39, %v12830_v22  ;;  %v14468_v28 = vld [vmem:[#allocation45_spill] sm:$0xff] }
 0xdb9   : > { %v9174_v63 = vpop.eup %9173  ;;  %v6659_v56 = vadd.f32 1.0, %v6543_v49  ;;  %v6477_v15 = vadd.f32 -0.014264739, %v6413_v58  ;;  %v6415_v5 = vmul.f32 %v6351_v25, %v12689_v40  ;;  %v6355_v43 = vadd.f32 -0.0073733293, %v6291_v59  ;;  %v14469_v49 = vld [vmem:[#allocation49_spill] sm:$0xff] }
 0xdba   : > { %v9176_v21 = vpop.eup %9175  ;;  %v6721_v8 = vmul.f32 %v6657_v6, %v14466_v45  ;;  %v6547_v53 = vmul.f32 %v9174_v63, %v12629_v55  ;;  %9179 = vrcp.f32 %v6475_v1  ;;  %v6417_v29 = vmul.f32 %v6353_v38, %v12719_v50  ;;  %v14470_v58 = vld [vmem:[#allocation41_spill] sm:$0xff]  ;;  %v14471_v1 = vld [vmem:[#allocation48_spill] sm:$0xff] }
 0xdbb   : > { %v6723_v23 = vmul.f32 %v6659_v56, %v14467_v3  ;;  %v6551_v36 = vmul.f32 %v9176_v21, %v12649_v52  ;;  %9181 = vrcp.f32 %v6477_v15  ;;  %v6479_v39 = vadd.f32 -0.014264739, %v6415_v5 }
 0xdbc   : > { %6856 = vmatprep.mubr.f32.mxu1 %v6721_v8  ;;  %v6661_v19 = vadd.f32 1.0, %v6547_v53  ;;  %v6481_v24 = vadd.f32 -0.014264739, %v6417_v29  ;;  %v6419_v40 = vmul.f32 %v6355_v43, %v12771_v4  ;;  %v6357_v18 = vadd.f32 -0.0073733293, %v6293_v44 }
 0xdbd   : > { %7001 = vmatprep.mubr.f32.mxu0 %v6723_v23  ;;  %6857 = vmatmul.mubr.f32.gmra.mxu1 %v14468_v28  ;;  %v6663_v16 = vadd.f32 1.0, %v6551_v36  ;;  %9183 = vrcp.f32 %v6479_v39  ;;  %v6231_v55 = vadd.f32 -0.001682827, %v6167_v48  ;;  %v4952_v50 = vmul.f32 0.70710677, %v12879_v2  ;;  %v14472_v23 = vld [vmem:[#allocation51_spill] sm:$0xff] }
 0xdbe   : > { %7002 = vmatmul.mubr.f32.gmra.mxu0 %v14469_v49  ;;  %v6725_v52 = vmul.f32 %v6661_v19, %v14470_v58  ;;  %9185 = vrcp.f32 %v6481_v24  ;;  %v6483_v25 = vadd.f32 -0.014264739, %v6419_v40  ;;  %v6421_v59 = vmul.f32 %v6357_v18, %v12830_v22  ;;  %v14473_v49 = vld [vmem:[#allocation79_spill] sm:$0xff] }
 0xdbf   : > { %v9178_v6 = vpop.eup %9177  ;;  %v5719_v4 = vmul.f32 %v12940_v46, %v12866_v54  ;;  %v6727_v38 = vmul.f32 %v6663_v16, %v14471_v1  ;;  %v6295_v44 = vmul.f32 %v6231_v55, %v12866_v54  ;;  %v12986_v63 = vclamps-f32 %v4952_v50, 4.0  ;;  %v14476_v1 = vld [vmem:[#allocation78_spill] sm:$0xff] }
 0xdc0   : > { %6861 = vmatprep.mubr.f32.mxu1 %v6725_v52  ;;  %v6555_v48 = vmul.f32 %v9178_v6, %v12755_v20  ;;  %9187 = vrcp.f32 %v6483_v25  ;;  %v6485_v56 = vadd.f32 -0.014264739, %v6421_v59  ;;  %v4954_v15 = vmul.f32 0.70710677, %v12882_v37  ;;  %v14474_v52 = vld [vmem:[#allocation50_spill] sm:$0xff] }
 0xdc1   : > { %v5910_v5 = vadd.f32 -0.016096033, %v12945_v7  ;;  %7006 = vmatprep.mubr.f32.mxu0 %v6727_v38  ;;  %6862 = vmatmul.mubr.f32.gmra.mxu1 %v12636_v51  ;;  %v6359_v43 = vadd.f32 -0.0073733293, %v6295_v44  ;;  %v12994_v46 = vmul.f32 %v12986_v63, %v12986_v63  ;;  %v4953_v21 = vmul.f32 0.70710677, %v12894_v47 }
 0xdc2   : > { %v5781_v45 = vadd.f32 -0.0029546, %v12957_v10  ;;  %7007 = vmatmul.mubr.f32.gmra.mxu0 %v12646_v12  ;;  %v6665_v20 = vadd.f32 1.0, %v6555_v48  ;;  %9189 = vrcp.f32 %v6485_v56  ;;  %v12999_v8 = vclamps-f32 %v4954_v15, 4.0 }
 0xdc3   : > { %v6423_v7 = vmul.f32 %v6359_v43, %v12866_v54  ;;  %v5208_v53 = vmul.f32 -2.7261424e-10, %v12994_v46  ;;  %v6040_v51 = vmul.f32 -1.45660715e-05, %v12994_v46  ;;  %v13004_v29 = vclamps-f32 %v4953_v21, 4.0 }
 0xdc4   : > { %v5783_v3 = vadd.f32 -0.0029546, %v5719_v4  ;;  %v6729_v36 = vmul.f32 %v6665_v20, %v14472_v23  ;;  %v13009_v10 = vmul.f32 %v12999_v8, %v12999_v8  ;;  %v4955_v12 = vmul.f32 0.70710677, %v12910_v11 }
 0xdc5   : > { %v6487_v39 = vadd.f32 -0.014264739, %v6423_v7  ;;  %v5272_v19 = vadd.f32 2.7706815e-08, %v5208_v53  ;;  %v6104_v24 = vadd.f32 -0.00021337405, %v6040_v51  ;;  %v13014_v40 = vmul.f32 %v13004_v29, %v13004_v29 }
 0xdc6   : > { %v5845_v18 = vmul.f32 %v5781_v45, %v12830_v22  ;;  %6866 = vmatprep.mubr.f32.mxu1 %v6729_v36  ;;  %v5210_v28 = vmul.f32 -2.7261424e-10, %v13009_v10  ;;  %v6042_v16 = vmul.f32 -1.45660715e-05, %v13009_v10  ;;  %v13019_v55 = vclamps-f32 %v4955_v12, 4.0  ;;  %v14475_v22 = vld [vmem:[#allocation56_spill] sm:$0xff] }
 0xdc7   : > { %v9180_v50 = vpop.eup %9179  ;;  %v5972_v58 = vmul.f32 %v14473_v49, %v12931_v61  ;;  %6867 = vmatmul.mubr.f32.gmra.mxu1 %v14474_v52  ;;  %9191 = vrcp.f32 %v6487_v39  ;;  %v5336_v25 = vmul.f32 %v5272_v19, %v12994_v46  ;;  %v6168_v59 = vmul.f32 %v6104_v24, %v12994_v46  ;;  %v14477_v39 = vld [vmem:[#allocation47_spill] sm:$0xff] }
 0xdc8   : > { %v9182_v6 = vpop.eup %9181  ;;  %v5974_v4 = vmul.f32 %v14475_v22, %v5910_v5  ;;  %v6559_v38 = vmul.f32 %v9180_v50, %v14476_v1  ;;  %v5274_v44 = vadd.f32 2.7706815e-08, %v5210_v28  ;;  %v13030_v48 = vmul.f32 %v13019_v55, %v13019_v55 }
 0xdc9   : > { %v6563_v56 = vmul.f32 %v9182_v6, %v12841_v32  ;;  %v5400_v61 = vadd.f32 -2.101024e-06, %v5336_v25  ;;  %v6106_v15 = vadd.f32 -0.00021337405, %v6042_v16  ;;  %v5209_v43 = vmul.f32 -2.7261424e-10, %v13014_v40 }
 0xdca   : > { %v9184_v21 = vpop.eup %9183  ;;  %v5909_v45 = vadd.f32 -0.016096033, %v5845_v18  ;;  %v5847_v20 = vmul.f32 %v5783_v3, %v12866_v54  ;;  %v6667_v7 = vadd.f32 1.0, %v6559_v38  ;;  %v6232_v53 = vadd.f32 -0.001682827, %v6168_v59  ;;  %v14478_v54 = vld [vmem:[#allocation53_spill] sm:$0xff] }
 0xdcb   : > { %v9186_v5 = vpop.eup %9185  ;;  %v6669_v51 = vadd.f32 1.0, %v6563_v56  ;;  %v6567_v23 = vmul.f32 %v9184_v21, %v12855_v60  ;;  %v5338_v36 = vmul.f32 %v5274_v44, %v13009_v10  ;;  %v5211_v12 = vmul.f32 -2.7261424e-10, %v13030_v48  ;;  %v14479_v6 = vld [vmem:[#allocation52_spill] sm:$0xff] }
 0xdcc   : > { %v6577_v32 = vmul.f32 %v12948_v33, %v5972_v58  ;;  %v6731_v19 = vmul.f32 %v6667_v7, %v14477_v39  ;;  %v6571_v24 = vmul.f32 %v9186_v5, %v12875_v17  ;;  %v5464_v18 = vmul.f32 %v5400_v61, %v12994_v46  ;;  %v4815_v58 = vpop.f32.mrf.mxu0  ;;  %v14480_v17 = vld [vmem:[#allocation54_spill] sm:$0xff]  ;;  %v4656_v39 = vpop.f32.mrf.mxu1 }
 0xdcd   : > { %v9188_v28 = vpop.eup %9187  ;;  %v6733_v3 = vmul.f32 %v6669_v51, %v14478_v54  ;;  %v6671_v16 = vadd.f32 1.0, %v6567_v23  ;;  %v6170_v50 = vmul.f32 %v6106_v15, %v13009_v10  ;;  %v5273_v49 = vadd.f32 2.7706815e-08, %v5209_v43  ;;  %v14481_v23 = vld [vmem:[#allocation57_spill] sm:$0xff] }
 0xdce   : > { %v5973_v60 = vmul.f32 %v12812_v27, %v5909_v45  ;;  %v5911_v52 = vadd.f32 -0.016096033, %v5847_v20  ;;  %7011 = vmatprep.mubr.f32.mxu0 %v6731_v19  ;;  %v6673_v25 = vadd.f32 1.0, %v6571_v24  ;;  %v6575_v33 = vmul.f32 %v9188_v28, %v12925_v30 }
 0xdcf   : > { %v9190_v59 = vpop.eup %9189  ;;  %7012 = vmatmul.mubr.f32.gmra.mxu0 %v14479_v6  ;;  %6871 = vmatprep.mubr.f32.mxu1 %v6733_v3  ;;  %v6735_v22 = vmul.f32 %v6671_v16, %v14480_v17  ;;  %v6296_v1 = vmul.f32 %v6232_v53, %v12994_v46  ;;  %v5402_v38 = vadd.f32 -2.101024e-06, %v5338_v36  ;;  %v5275_v44 = vadd.f32 2.7706815e-08, %v5211_v12 }
 0xdd0   : > { %6872 = vmatmul.mubr.f32.gmra.mxu1 %v12822_v31  ;;  %v6737_v27 = vmul.f32 %v6673_v25, %v12825_v42  ;;  %v6675_v56 = vadd.f32 1.0, %v6575_v33  ;;  %v6579_v61 = vmul.f32 %v9190_v59, %v5973_v60  ;;  %v5528_v15 = vadd.f32 -5.6925062e-05, %v5464_v18  ;;  %v14483_v18 = vld [vmem:[#allocation55_spill] sm:$0xff] }
 0xdd1   : > { %v6581_v30 = vmul.f32 %v12964_v41, %v5974_v4  ;;  %7016 = vmatprep.mubr.f32.mxu0 %v6735_v22  ;;  %v6234_v43 = vadd.f32 -0.001682827, %v6170_v50  ;;  %v5337_v21 = vmul.f32 %v5273_v49, %v13014_v40  ;;  %v13054_v45 = vadd.f32 %v4815_v58, %v12099_v26  ;;  %v14484_v49 = vld [vmem:[#allocation39_spill] sm:$0xff]  ;;  %v14485_v58 = vld [vmem:[#allocation80_spill] sm:$0xff] }
 0xdd2   : > { %v6676_v20 = vadd.f32 1.0, %v6577_v32  ;;  %6876 = vmatprep.mubr.f32.mxu1 %v6737_v27  ;;  %v6739_v7 = vmul.f32 %v6675_v56, %v12844_v13  ;;  %v6677_v53 = vadd.f32 1.0, %v6579_v61  ;;  %v5339_v31 = vmul.f32 %v5275_v44, %v13030_v48  ;;  %v14482_v13 = vld [vmem:[#allocation81_spill] sm:$0xff] }
 0xdd3   : > { %v4887_v42 = vmul.f32 0.5, %v12815_v14  ;;  %v5975_v5 = vmul.f32 %v12857_v35, %v5911_v52  ;;  %7017 = vmatmul.mubr.f32.gmra.mxu0 %v12838_v0  ;;  %v6360_v41 = vadd.f32 -0.0073733293, %v6296_v1  ;;  %v5466_v4 = vmul.f32 %v5402_v38, %v13009_v10 }
 0xdd4   : > { %v9192_v51 = vpop.eup %9191  ;;  %v6738_v36 = vmul.f32 %v14481_v23, %v12819_v34  ;;  %7021 = vmatprep.mubr.f32.mxu0 %v6739_v7  ;;  %6877 = vmatmul.mubr.f32.gmra.mxu1 %v12897_v62  ;;  %v6741_v12 = vmul.f32 %v6677_v53, %v14482_v13  ;;  %v5592_v32 = vmul.f32 %v5528_v15, %v12994_v46  ;;  %v4956_v14 = vmul.f32 0.70710677, %v12920_v57 }
 0xdd5   : > { %v6678_v35 = vadd.f32 1.0, %v6581_v30  ;;  %v6583_v19 = vmul.f32 %v9192_v51, %v5975_v5  ;;  %v6298_v0 = vmul.f32 %v6234_v43, %v13009_v10  ;;  %v5401_v24 = vadd.f32 -2.101024e-06, %v5337_v21 }
 0xdd6   : > { %v6740_v28 = vmul.f32 %v6676_v20, %v14483_v18  ;;  %6881 = vmatprep.mubr.f32.mxu1 %v6741_v12  ;;  %v5403_v54 = vadd.f32 -2.101024e-06, %v5339_v31  ;;  %v13070_v34 = vclamps-f32 %v4956_v14, 4.0  ;;  %v4958_v62 = vmul.f32 0.70710677, %v13054_v45  ;;  %v4817_v14 = vpop.f32.mrf.mxu0 }
 0xdd7   : > { %7022 = vmatmul.mubr.f32.gmra.mxu0 %v6738_v36  ;;  %v6679_v3 = vadd.f32 1.0, %v6583_v19  ;;  %v6424_v16 = vmul.f32 %v6360_v41, %v12994_v46  ;;  %v5530_v50 = vadd.f32 -5.6925062e-05, %v5466_v4  ;;  %v13075_v60 = vadd.f32 %v4656_v39, %v14484_v49 }
 0xdd8   : > { %6882 = vmatmul.mubr.f32.gmra.mxu1 %v6740_v28  ;;  %v5656_v52 = vadd.f32 -0.00073499064, %v5592_v32  ;;  %v13079_v25 = vmul.f32 %v13070_v34, %v13070_v34  ;;  %v13081_v33 = vclamps-f32 %v4958_v62, 4.0  ;;  %v6742_v59 = vmul.f32 %v6678_v35, %v14485_v58 }
 0xdd9   : > { %v6743_v6 = vmul.f32 %v6679_v3, %v4887_v42  ;;  %v6362_v17 = vadd.f32 -0.0073733293, %v6298_v0  ;;  %v5465_v22 = vmul.f32 %v5401_v24, %v13014_v40  ;;  %v5467_v1 = vmul.f32 %v5403_v54, %v13030_v48  ;;  %v14486_v3 = vld [vmem:[#allocation37_spill] sm:$0xff] }
 0xdda   : > { %v5212_v38 = vmul.f32 -2.7261424e-10, %v13079_v25  ;;  %v6044_v44 = vmul.f32 -1.45660715e-05, %v13079_v25  ;;  %v6488_v27 = vadd.f32 -0.014264739, %v6424_v16  ;;  %v5594_v56 = vmul.f32 %v5530_v50, %v13009_v10 }
 0xddb   : > { %7026 = vmatprep.mubr.f32.mxu0 %v6743_v6  ;;  %v13091_v61 = vmul.f32 %v13081_v33, %v13081_v33  ;;  %v4957_v15 = vmul.f32 0.70710677, %v13075_v60  ;;  %v5720_v30 = vmul.f32 %v5656_v52, %v12994_v46  ;;  %v6426_v21 = vmul.f32 %v6362_v17, %v13009_v10  ;;  %v4660_v6 = vpop.f32.mrf.mxu1 }
 0xddc   : > { %7027 = vmatmul.mubr.f32.gmra.mxu0 %v6742_v59  ;;  %v5276_v43 = vadd.f32 2.7706815e-08, %v5212_v38  ;;  %v6108_v20 = vadd.f32 -0.00021337405, %v6044_v44  ;;  %v5529_v31 = vadd.f32 -5.6925062e-05, %v5465_v22  ;;  %9193 = vrcp.f32 %v6488_v27 }
 0xddd   : > { %v5214_v7 = vmul.f32 -2.7261424e-10, %v13091_v61  ;;  %v6046_v53 = vmul.f32 -1.45660715e-05, %v13091_v61  ;;  %v5531_v42 = vadd.f32 -5.6925062e-05, %v5467_v1  ;;  %v13113_v16 = vadd.f32 %v4817_v14, %v14486_v3 }
 0xdde   : > { %v5340_v5 = vmul.f32 %v5276_v43, %v13079_v25  ;;  %v13099_v41 = vclamps-f32 %v4957_v15, 4.0  ;;  %v5658_v4 = vadd.f32 -0.00073499064, %v5594_v56  ;;  %v6172_v51 = vmul.f32 %v6108_v20, %v13079_v25 }
 0xddf   : > { %v5278_v23 = vadd.f32 2.7706815e-08, %v5214_v7  ;;  %v5784_v36 = vadd.f32 -0.0029546, %v5720_v30  ;;  %v6110_v12 = vadd.f32 -0.00021337405, %v6046_v53  ;;  %v5593_v0 = vmul.f32 %v5529_v31, %v13014_v40 }
 0xde0   : > { %v5404_v13 = vadd.f32 -2.101024e-06, %v5340_v5  ;;  %v13104_v32 = vmul.f32 %v13099_v41, %v13099_v41  ;;  %v6236_v39 = vadd.f32 -0.001682827, %v6172_v51  ;;  %v6490_v19 = vadd.f32 -0.014264739, %v6426_v21 }
 0xde1   : > { %v5342_v35 = vmul.f32 %v5278_v23, %v13091_v61  ;;  %v5595_v24 = vmul.f32 %v5531_v42, %v13030_v48  ;;  %v13116_v50 = vmul.f32 0.5, %v12879_v2  ;;  %v5848_v52 = vmul.f32 %v5784_v36, %v12994_v46 }
 0xde2   : > { %v5468_v18 = vmul.f32 %v5404_v13, %v13079_v25  ;;  %v6300_v28 = vmul.f32 %v6236_v39, %v13079_v25  ;;  %v5213_v62 = vmul.f32 -2.7261424e-10, %v13104_v32  ;;  %v5722_v58 = vmul.f32 %v5658_v4, %v13009_v10 }
 0xde3   : > { %v5406_v54 = vadd.f32 -2.101024e-06, %v5342_v35  ;;  %v6174_v59 = vmul.f32 %v6110_v12, %v13091_v61  ;;  %v13122_v17 = vmul.f32 0.5, %v12882_v37  ;;  %v13125_v22 = vmul.f32 0.5, %v12894_v47  ;;  %v4821_v37 = vpop.f32.mrf.mxu0  ;;  %v4662_v12 = vpop.f32.mrf.mxu1 }
 0xde4   : > { %v13128_v1 = vmul.f32 0.5, %v12910_v11  ;;  %v5532_v38 = vadd.f32 -5.6925062e-05, %v5468_v18  ;;  %9195 = vrcp.f32 %v6490_v19  ;;  %v5657_v2 = vadd.f32 -0.00073499064, %v5593_v0 }
 0xde5   : > { %14487 = vst [vmem:[#allocation58_spill] sm:$0xff] %v13125_v22  ;;  %v5659_v44 = vadd.f32 -0.00073499064, %v5595_v24  ;;  %v5470_v46 = vmul.f32 %v5406_v54, %v13091_v61  ;;  %v6364_v27 = vadd.f32 -0.0073733293, %v6300_v28  ;;  %v13133_v30 = vadd.f32 %v4660_v6, %v12095_v9 }
 0xde6   : > { %14488 = vst [vmem:[#allocation82_spill] sm:$0xff] %v13128_v1  ;;  %v5277_v56 = vadd.f32 2.7706815e-08, %v5213_v62  ;;  %v4959_v15 = vmul.f32 0.70710677, %v13113_v16  ;;  %v5596_v11 = vmul.f32 %v5532_v38, %v13079_v25  ;;  %v5721_v31 = vmul.f32 %v5657_v2, %v13014_v40 }
 0xde7   : > { %v5912_v43 = vadd.f32 -0.016096033, %v5848_v52  ;;  %v5786_v47 = vadd.f32 -0.0029546, %v5722_v58  ;;  %v6238_v21 = vadd.f32 -0.001682827, %v6174_v59  ;;  %v5723_v42 = vmul.f32 %v5659_v44, %v13030_v48 }
 0xde8   : > { %v5534_v20 = vadd.f32 -5.6925062e-05, %v5470_v46  ;;  %v5341_v7 = vmul.f32 %v5277_v56, %v13104_v32  ;;  %v13137_v53 = vclamps-f32 %v4959_v15, 4.0  ;;  %v13142_v5 = vmul.f32 0.5, %v12920_v57 }
 0xde9   : > { %v13145_v4 = vadd.f32 %v4821_v37, %v12099_v26  ;;  %v6428_v51 = vmul.f32 %v6364_v27, %v13079_v25  ;;  %v4960_v13 = vmul.f32 0.70710677, %v13133_v30  ;;  %v9194_v14 = vpop.eup %9193  ;;  %v5976_v39 = vmul.f32 %v12986_v63, %v5912_v43 }
 0xdea   : > { %v5405_v23 = vadd.f32 -2.101024e-06, %v5341_v7  ;;  %v13150_v36 = vmul.f32 %v13137_v53, %v13137_v53  ;;  %v5850_v35 = vmul.f32 %v5786_v47, %v13009_v10  ;;  %v13156_v57 = vmul.f32 0.5, %v13054_v45 }
 0xdeb   : > { %v6302_v19 = vmul.f32 %v6238_v21, %v13091_v61  ;;  %v5660_v0 = vadd.f32 -0.00073499064, %v5596_v11  ;;  %v5598_v24 = vmul.f32 %v5534_v20, %v13091_v61  ;;  %v13161_v28 = vclamps-f32 %v4960_v13, 4.0 }
 0xdec   : > { %v5215_v18 = vmul.f32 -2.7261424e-10, %v13150_v36  ;;  %v5785_v54 = vadd.f32 -0.0029546, %v5721_v31  ;;  %v5787_v62 = vadd.f32 -0.0029546, %v5723_v42  ;;  %v13165_v63 = vadd.f32 %v4662_v12, %v14484_v49 }
 0xded   : > { %v4962_v52 = vmul.f32 0.70710677, %v13145_v4  ;;  %v6492_v10 = vadd.f32 -0.014264739, %v6428_v51  ;;  %v5469_v45 = vmul.f32 %v5405_v23, %v13104_v32  ;;  %v13170_v59 = vmul.f32 %v13161_v28, %v13161_v28 }
 0xdee   : > { %v5279_v58 = vadd.f32 2.7706815e-08, %v5215_v18  ;;  %v6585_v6 = vmul.f32 %v9194_v14, %v5976_v39  ;;  %v5914_v38 = vadd.f32 -0.016096033, %v5850_v35  ;;  %v6366_v2 = vadd.f32 -0.0073733293, %v6302_v19 }
 0xdef   : > { %v13172_v44 = vclamps-f32 %v4962_v52, 4.0  ;;  %v5724_v46 = vmul.f32 %v5660_v0, %v13079_v25  ;;  %v5662_v27 = vadd.f32 -0.00073499064, %v5598_v24  ;;  %v5216_v56 = vmul.f32 -2.7261424e-10, %v13170_v59 }
 0xdf0   : > { %v6048_v15 = vmul.f32 -1.45660715e-05, %v13170_v59  ;;  %v5849_v37 = vmul.f32 %v5785_v54, %v13014_v40  ;;  %v5851_v43 = vmul.f32 %v5787_v62, %v13030_v48  ;;  %v4961_v21 = vmul.f32 0.70710677, %v13165_v63 }
 0xdf1   : > { %v13181_v47 = vmul.f32 %v13172_v44, %v13172_v44  ;;  %v9196_v11 = vpop.eup %9195  ;;  %9197 = vrcp.f32 %v6492_v10  ;;  %v5533_v20 = vadd.f32 -5.6925062e-05, %v5469_v45  ;;  %v5343_v7 = vmul.f32 %v5279_v58, %v13150_v36 }
 0xdf2   : > { %v5280_v31 = vadd.f32 2.7706815e-08, %v5216_v56  ;;  %v5978_v42 = vmul.f32 %v12999_v8, %v5914_v38  ;;  %v6430_v51 = vmul.f32 %v6366_v2, %v13091_v61  ;;  %v13188_v23 = vmul.f32 0.5, %v13075_v60  ;;  %v4823_v38 = vpop.f32.mrf.mxu0 }
 0xdf3   : > { %v5218_v13 = vmul.f32 -2.7261424e-10, %v13181_v47  ;;  %v5788_v12 = vadd.f32 -0.0029546, %v5724_v46  ;;  %v5726_v14 = vmul.f32 %v5662_v27, %v13091_v61  ;;  %v6112_v35 = vadd.f32 -0.00021337405, %v6048_v15 }
 0xdf4   : > { %14489 = vst [vmem:[#allocation83_spill] sm:$0xff] %v13188_v23  ;;  %v5344_v39 = vmul.f32 %v5280_v31, %v13170_v59  ;;  %v6680_v19 = vadd.f32 1.0, %v6585_v6  ;;  %v6589_v0 = vmul.f32 %v9196_v11, %v5978_v42  ;;  %v13193_v18 = vclamps-f32 %v4961_v21, 4.0 }
 0xdf5   : > { %v5282_v24 = vadd.f32 2.7706815e-08, %v5218_v13  ;;  %v5913_v54 = vadd.f32 -0.016096033, %v5849_v37  ;;  %v5915_v8 = vadd.f32 -0.016096033, %v5851_v43  ;;  %v5597_v62 = vmul.f32 %v5533_v20, %v13104_v32 }
 0xdf6   : > { %v5407_v52 = vadd.f32 -2.101024e-06, %v5343_v7  ;;  %v5408_v60 = vadd.f32 -2.101024e-06, %v5344_v39  ;;  %v6050_v45 = vmul.f32 -1.45660715e-05, %v13181_v47  ;;  %v13200_v58 = vmul.f32 %v13193_v18, %v13193_v18 }
 0xdf7   : > { %v5346_v10 = vmul.f32 %v5282_v24, %v13181_v47  ;;  %v5852_v6 = vmul.f32 %v5788_v12, %v13079_v25  ;;  %v5790_v2 = vadd.f32 -0.0029546, %v5726_v14  ;;  %v6494_v46 = vadd.f32 -0.014264739, %v6430_v51  ;;  %v4666_v25 = vpop.f32.mrf.mxu1 }
 0xdf8   : > { %v6176_v27 = vmul.f32 %v6112_v35, %v13170_v59  ;;  %v13205_v56 = vmul.f32 %v6680_v19, %v13116_v50  ;;  %v6682_v15 = vadd.f32 1.0, %v6589_v0  ;;  %v13208_v37 = vmul.f32 0.5, %v13113_v16 }
 0xdf9   : > { %v5410_v43 = vadd.f32 -2.101024e-06, %v5346_v10  ;;  %v5661_v21 = vadd.f32 -0.00073499064, %v5597_v62  ;;  %v5471_v11 = vmul.f32 %v5407_v52, %v13150_v36  ;;  %v5217_v20 = vmul.f32 -2.7261424e-10, %v13200_v58 }
 0xdfa   : > { %14490 = vst [vmem:[#allocation60_spill] sm:$0xff] %v13205_v56  ;;  %14491 = vst [vmem:[#allocation61_spill] sm:$0xff] %v13208_v37  ;;  %v4824_v7 = vadd.f32 %v4823_v38, %v14486_v3  ;;  %v13214_v31 = vmul.f32 %v13004_v29, %v5913_v54  ;;  %v13217_v42 = vmul.f32 %v13019_v55, %v5915_v8  ;;  %v6114_v51 = vadd.f32 -0.00021337405, %v6050_v45  ;;  %v4827_v54 = vpop.f32.mrf.mxu0 }
 0xdfb   : > { %v5472_v50 = vmul.f32 %v5408_v60, %v13170_v59  ;;  %v5916_v16 = vadd.f32 -0.016096033, %v5852_v6  ;;  %v5854_v13 = vmul.f32 %v5790_v2, %v13091_v61  ;;  %9199 = vrcp.f32 %v6494_v46  ;;  %v4668_v46 = vpop.f32.mrf.mxu1 }
 0xdfc   : > { %v6240_v12 = vadd.f32 -0.001682827, %v6176_v27  ;;  %v13222_v14 = vmul.f32 %v6682_v15, %v13122_v17  ;;  %v13225_v39 = vmul.f32 0.5, %v13133_v30  ;;  %v5474_v29 = vmul.f32 %v5410_v43, %v13181_v47 }
 0xdfd   : > { %v13229_v35 = vadd.f32 %v4666_v25, %v12095_v9  ;;  %v5725_v55 = vmul.f32 %v5661_v21, %v13104_v32  ;;  %v5535_v19 = vadd.f32 -5.6925062e-05, %v5471_v11  ;;  %v5281_v0 = vadd.f32 2.7706815e-08, %v5217_v20 }
 0xdfe   : > { %14492 = vst [vmem:[#allocation59_spill] sm:$0xff] %v13222_v14  ;;  %v4963_v24 = vmul.f32 0.70710677, %v4824_v7  ;;  %v9198_v61 = vpop.eup %9197  ;;  %v5536_v8 = vadd.f32 -5.6925062e-05, %v5472_v50  ;;  %v13233_v62 = vmul.f32 0.5, %v13145_v4  ;;  %v6178_v17 = vmul.f32 %v6114_v51, %v13181_v47 }
 0xdff   : > { %v13237_v30 = vmul.f32 0.5, %v13165_v63  ;;  %v5980_v52 = vmul.f32 %v13070_v34, %v5916_v16  ;;  %v5918_v60 = vadd.f32 -0.016096033, %v5854_v13  ;;  %v6304_v10 = vmul.f32 %v6240_v12, %v13170_v59 }
 0xe00   : > { %v13241_v45 = vclamps-f32 %v4963_v24, 4.0  ;;  %v5538_v38 = vadd.f32 -5.6925062e-05, %v5474_v29  ;;  %v5345_v6 = vmul.f32 %v5281_v0, %v13200_v58  ;;  %v4964_v2 = vmul.f32 0.70710677, %v13229_v35 }
 0xe01   : > { %14493 = vst [vmem:[#allocation33_spill] sm:$0xff] %v13237_v30  ;;  %v13246_v4 = vadd.f32 %v4827_v54, %v12099_v26  ;;  %v6593_v27 = vmul.f32 %v9198_v61, %v5980_v52  ;;  %v5789_v15 = vadd.f32 -0.0029546, %v5725_v55  ;;  %v5599_v63 = vmul.f32 %v5535_v19, %v13150_v36 }
 0xe02   : > { %v13251_v34 = vmul.f32 %v13241_v45, %v13241_v45  ;;  %v5600_v43 = vmul.f32 %v5536_v8, %v13170_v59  ;;  %v6242_v21 = vadd.f32 -0.001682827, %v6178_v17  ;;  %v13254_v11 = vmul.f32 0.5, %v4824_v7 }
 0xe03   : > { %v13256_v20 = vclamps-f32 %v4964_v2, 4.0  ;;  %v5982_v25 = vmul.f32 %v13081_v33, %v5918_v60  ;;  %v6368_v50 = vadd.f32 -0.0073733293, %v6304_v10  ;;  %v13261_v16 = vadd.f32 %v4668_v46, %v14484_v49 }
 0xe04   : > { %14494 = vst [vmem:[#allocation84_spill] sm:$0xff] %v13254_v11  ;;  %v5219_v51 = vmul.f32 -2.7261424e-10, %v13251_v34  ;;  %v5602_v13 = vmul.f32 %v5538_v38, %v13181_v47  ;;  %v5409_v12 = vadd.f32 -2.101024e-06, %v5345_v6  ;;  %v6684_v55 = vadd.f32 1.0, %v6593_v27 }
 0xe05   : > { %v13266_v29 = vmul.f32 %v13256_v20, %v13256_v20  ;;  %v4966_v7 = vmul.f32 0.70710677, %v13246_v4  ;;  %v5853_v19 = vmul.f32 %v5789_v15, %v13104_v32  ;;  %v5663_v0 = vadd.f32 -0.00073499064, %v5599_v63 }
 0xe06   : > { %v5283_v33 = vadd.f32 2.7706815e-08, %v5219_v51  ;;  %v5664_v24 = vadd.f32 -0.00073499064, %v5600_v43  ;;  %v6306_v54 = vmul.f32 %v6242_v21, %v13181_v47  ;;  %v6432_v17 = vmul.f32 %v6368_v50, %v13170_v59 }
 0xe07   : > { %v5220_v61 = vmul.f32 -2.7261424e-10, %v13266_v29  ;;  %v6052_v8 = vmul.f32 -1.45660715e-05, %v13266_v29  ;;  %v13275_v60 = vclamps-f32 %v4966_v7, 4.0  ;;  %v5473_v2 = vmul.f32 %v5409_v12, %v13200_v58 }
 0xe08   : > { %v5347_v52 = vmul.f32 %v5283_v33, %v13251_v34  ;;  %v4965_v10 = vmul.f32 0.70710677, %v13261_v16  ;;  %v9200_v38 = vpop.eup %9199  ;;  %v5666_v6 = vadd.f32 -0.00073499064, %v5602_v13  ;;  %v5727_v15 = vmul.f32 %v5663_v0, %v13150_v36 }
 0xe09   : > { %v5284_v46 = vadd.f32 2.7706815e-08, %v5220_v61  ;;  %v6116_v27 = vadd.f32 -0.00021337405, %v6052_v8  ;;  %v13282_v43 = vmul.f32 %v13275_v60, %v13275_v60  ;;  %v5728_v50 = vmul.f32 %v5664_v24, %v13170_v59 }
 0xe0a   : > { %v5411_v63 = vadd.f32 -2.101024e-06, %v5347_v52  ;;  %v13284_v21 = vclamps-f32 %v4965_v10, 4.0  ;;  %v6370_v51 = vadd.f32 -0.0073733293, %v6306_v54  ;;  %v6597_v33 = vmul.f32 %v9200_v38, %v5982_v25 }
 0xe0b   : > { %v5348_v7 = vmul.f32 %v5284_v46, %v13266_v29  ;;  %v6180_v13 = vmul.f32 %v6116_v27, %v13266_v29  ;;  %v6496_v12 = vadd.f32 -0.014264739, %v6432_v17  ;;  %v5222_v61 = vmul.f32 -2.7261424e-10, %v13282_v43 }
 0xe0c   : > { %v6054_v0 = vmul.f32 -1.45660715e-05, %v13282_v43  ;;  %v5730_v8 = vmul.f32 %v5666_v6, %v13181_v47  ;;  %v5537_v52 = vadd.f32 -5.6925062e-05, %v5473_v2  ;;  %v13294_v10 = vmul.f32 %v13284_v21, %v13284_v21 }
 0xe0d   : > { %v5412_v11 = vadd.f32 -2.101024e-06, %v5348_v7  ;;  %v5791_v24 = vadd.f32 -0.0029546, %v5727_v15  ;;  %v5475_v54 = vmul.f32 %v5411_v63, %v13251_v34  ;;  %v6244_v46 = vadd.f32 -0.001682827, %v6180_v13  ;;  %v4829_v13 = vpop.f32.mrf.mxu0 }
 0xe0e   : > { %v5286_v30 = vadd.f32 2.7706815e-08, %v5222_v61  ;;  %v5917_v27 = vadd.f32 -0.016096033, %v5853_v19  ;;  %v5792_v25 = vadd.f32 -0.0029546, %v5728_v50  ;;  %v6434_v17 = vmul.f32 %v6370_v51, %v13181_v47  ;;  %v4672_v61 = vpop.f32.mrf.mxu1 }
 0xe0f   : > { %v13299_v38 = vmul.f32 0.5, %v13229_v35  ;;  %v6686_v37 = vadd.f32 1.0, %v6597_v33  ;;  %v5476_v6 = vmul.f32 %v5412_v11, %v13266_v29  ;;  %v6118_v7 = vadd.f32 -0.00021337405, %v6054_v0 }
 0xe10   : > { %v5350_v2 = vmul.f32 %v5286_v30, %v13282_v43  ;;  %9201 = vrcp.f32 %v6496_v12  ;;  %v5794_v23 = vadd.f32 -0.0029546, %v5730_v8  ;;  %v5601_v15 = vmul.f32 %v5537_v52, %v13200_v58 }
 0xe11   : > { %v5221_v63 = vmul.f32 -2.7261424e-10, %v13294_v10  ;;  %v5855_v19 = vmul.f32 %v5791_v24, %v13150_v36  ;;  %v5539_v50 = vadd.f32 -5.6925062e-05, %v5475_v54  ;;  %v6308_v51 = vmul.f32 %v6244_v46, %v13266_v29 }
 0xe12   : > { %v5414_v35 = vadd.f32 -2.101024e-06, %v5350_v2  ;;  %v13308_v33 = vmul.f32 %v6684_v55, %v13142_v5  ;;  %v13311_v30 = vmul.f32 %v13099_v41, %v5917_v27  ;;  %v5856_v11 = vmul.f32 %v5792_v25, %v13170_v59  ;;  %v4833_v41 = vpop.f32.mrf.mxu0 }
 0xe13   : > { %v6498_v12 = vadd.f32 -0.014264739, %v6434_v17  ;;  %v5540_v0 = vadd.f32 -5.6925062e-05, %v5476_v6  ;;  %v6182_v52 = vmul.f32 %v6118_v7, %v13282_v43  ;;  %v13317_v24 = vadd.f32 %v4829_v13, %v14486_v3 }
 0xe14   : > { %14495 = vst [vmem:[#allocation85_spill] sm:$0xff] %v13308_v33  ;;  %14496 = vst [vmem:[#allocation63_spill] sm:$0xff] %v13311_v30  ;;  %v5478_v8 = vmul.f32 %v5414_v35, %v13282_v43  ;;  %v5858_v54 = vmul.f32 %v5794_v23, %v13181_v47  ;;  %v5665_v46 = vadd.f32 -0.00073499064, %v5601_v15  ;;  %v5285_v2 = vadd.f32 2.7706815e-08, %v5221_v63 }
 0xe15   : > { %v13321_v5 = vadd.f32 %v4672_v61, %v12095_v9  ;;  %v13324_v55 = vmul.f32 %v6686_v37, %v13156_v57  ;;  %v13326_v59 = vadd.f32 -0.016096033, %v5855_v19  ;;  %v5603_v27 = vmul.f32 %v5539_v50, %v13251_v34 }
 0xe16   : > { %v6372_v25 = vadd.f32 -0.0073733293, %v6308_v51  ;;  %v5920_v17 = vadd.f32 -0.016096033, %v5856_v11  ;;  %9203 = vrcp.f32 %v6498_v12  ;;  %v5542_v6 = vadd.f32 -5.6925062e-05, %v5478_v8 }
 0xe17   : > { %14497 = vst [vmem:[#allocation62_spill] sm:$0xff] %v13324_v55  ;;  %v5349_v7 = vmul.f32 %v5285_v2, %v13294_v10  ;;  %v5604_v47 = vmul.f32 %v5540_v0, %v13266_v29  ;;  %v6246_v23 = vadd.f32 -0.001682827, %v6182_v52  ;;  %v4967_v15 = vmul.f32 0.70710677, %v13317_v24  ;;  %v4674_v2 = vpop.f32.mrf.mxu1 }
 0xe18   : > { %v13333_v63 = vadd.f32 %v4833_v41, %v12099_v26  ;;  %v5922_v57 = vadd.f32 -0.016096033, %v5858_v54  ;;  %v5729_v37 = vmul.f32 %v5665_v46, %v13200_v58  ;;  %v4968_v19 = vmul.f32 0.70710677, %v13321_v5 }
 0xe19   : > { %v5413_v13 = vadd.f32 -2.101024e-06, %v5349_v7  ;;  %v5667_v50 = vadd.f32 -0.00073499064, %v5603_v27  ;;  %v6436_v51 = vmul.f32 %v6372_v25, %v13266_v29  ;;  %v13339_v35 = vmul.f32 0.5, %v13246_v4 }
 0xe1a   : > { %14498 = vst [vmem:[#allocation65_spill] sm:$0xff] %v13333_v63  ;;  %v13341_v61 = vclamps-f32 %v4967_v15, 4.0  ;;  %v5984_v11 = vmul.f32 %v13161_v28, %v5920_v17  ;;  %v5606_v12 = vmul.f32 %v5542_v6, %v13282_v43  ;;  %v13346_v0 = vmul.f32 0.5, %v13261_v16 }
 0xe1b   : > { %v13348_v8 = vclamps-f32 %v4968_v19, 4.0  ;;  %v5668_v52 = vadd.f32 -0.00073499064, %v5604_v47  ;;  %v6310_v54 = vmul.f32 %v6246_v23, %v13282_v43  ;;  %v4970_v4 = vmul.f32 0.70710677, %v13333_v63 }
 0xe1c   : > { %14499 = vst [vmem:[#allocation64_spill] sm:$0xff] %v13346_v0  ;;  %v13353_v46 = vmul.f32 %v13341_v61, %v13341_v61  ;;  %v5986_v41 = vmul.f32 %v13172_v44, %v5922_v57  ;;  %v5793_v28 = vadd.f32 -0.0029546, %v5729_v37  ;;  %v5477_v27 = vmul.f32 %v5413_v13, %v13294_v10 }
 0xe1d   : > { %v13360_v16 = vmul.f32 %v13348_v8, %v13348_v8  ;;  %v9202_v25 = vpop.eup %9201  ;;  %v5731_v17 = vmul.f32 %v5667_v50, %v13251_v34  ;;  %v6500_v6 = vadd.f32 -0.014264739, %v6436_v51  ;;  %v13364_v47 = vclamps-f32 %v4970_v4, 4.0 }
 0xe1e   : > { %v5223_v7 = vmul.f32 -2.7261424e-10, %v13353_v46  ;;  %v5670_v23 = vadd.f32 -0.00073499064, %v5606_v12  ;;  %v13369_v57 = vadd.f32 %v4674_v2, %v14484_v49  ;;  %v5732_v37 = vmul.f32 %v5668_v52, %v13266_v29 }
 0xe1f   : > { %v5224_v15 = vmul.f32 -2.7261424e-10, %v13360_v16  ;;  %v6056_v44 = vmul.f32 -1.45660715e-05, %v13360_v16  ;;  %v6374_v13 = vadd.f32 -0.0073733293, %v6310_v54  ;;  %v13374_v50 = vmul.f32 %v13364_v47, %v13364_v47 }
 0xe20   : > { %v5287_v19 = vadd.f32 2.7706815e-08, %v5223_v7  ;;  %v6601_v51 = vmul.f32 %v9202_v25, %v5984_v11  ;;  %v5541_v63 = vadd.f32 -5.6925062e-05, %v5477_v27  ;;  %v5857_v12 = vmul.f32 %v5793_v28, %v13200_v58 }
 0xe21   : > { %v5288_v4 = vadd.f32 2.7706815e-08, %v5224_v15  ;;  %v6120_v0 = vadd.f32 -0.00021337405, %v6056_v44  ;;  %v5795_v55 = vadd.f32 -0.0029546, %v5731_v17  ;;  %9205 = vrcp.f32 %v6500_v6 }
 0xe22   : > { %v5226_v33 = vmul.f32 -2.7261424e-10, %v13374_v50  ;;  %v5734_v2 = vmul.f32 %v5670_v23, %v13282_v43  ;;  %v4969_v7 = vmul.f32 0.70710677, %v13369_v57  ;;  %v5796_v30 = vadd.f32 -0.0029546, %v5732_v37 }
 0xe23   : > { %v5352_v52 = vmul.f32 %v5288_v4, %v13360_v16  ;;  %v6184_v54 = vmul.f32 %v6120_v0, %v13360_v16  ;;  %v9204_v14 = vpop.eup %9203  ;;  %v5351_v11 = vmul.f32 %v5287_v19, %v13353_v46  ;;  %v6058_v25 = vmul.f32 -1.45660715e-05, %v13374_v50 }
 0xe24   : > { %v5290_v27 = vadd.f32 2.7706815e-08, %v5226_v33  ;;  %v6438_v28 = vmul.f32 %v6374_v13, %v13282_v43  ;;  %v5605_v17 = vmul.f32 %v5541_v63, %v13294_v10  ;;  %v6688_v23 = vadd.f32 1.0, %v6601_v51  ;;  %v4835_v51 = vpop.f32.mrf.mxu0 }
 0xe25   : > { %v5416_v6 = vadd.f32 -2.101024e-06, %v5352_v52  ;;  %v6248_v15 = vadd.f32 -0.001682827, %v6184_v54  ;;  %v13387_v44 = vmul.f32 0.5, %v13317_v24  ;;  %v13390_v4 = vclamps-f32 %v4969_v7, 4.0 }
 0xe26   : > { %v5354_v0 = vmul.f32 %v5290_v27, %v13374_v50  ;;  %v6605_v37 = vmul.f32 %v9204_v14, %v5986_v41  ;;  %v5921_v56 = vadd.f32 -0.016096033, %v5857_v12  ;;  %v5798_v19 = vadd.f32 -0.0029546, %v5734_v2 }
 0xe27   : > { %14500 = vst [vmem:[#allocation67_spill] sm:$0xff] %v13387_v44  ;;  %v5480_v33 = vmul.f32 %v5416_v6, %v13360_v16  ;;  %v5415_v1 = vadd.f32 -2.101024e-06, %v5351_v11  ;;  %v6312_v13 = vmul.f32 %v6248_v15, %v13360_v16  ;;  %v6122_v22 = vadd.f32 -0.00021337405, %v6058_v25  ;;  %v4678_v11 = vpop.f32.mrf.mxu1 }
 0xe28   : > { %v13396_v63 = vmul.f32 %v13390_v4, %v13390_v4  ;;  %v5859_v24 = vmul.f32 %v5795_v55, %v13251_v34  ;;  %v5860_v52 = vmul.f32 %v5796_v30, %v13266_v29  ;;  %v6502_v54 = vadd.f32 -0.014264739, %v6438_v28 }
 0xe29   : > { %v5669_v7 = vadd.f32 -0.00073499064, %v5605_v17  ;;  %v13402_v14 = vmul.f32 %v13137_v53, %v13326_v59  ;;  %v5544_v41 = vadd.f32 -5.6925062e-05, %v5480_v33  ;;  %v5418_v12 = vadd.f32 -2.101024e-06, %v5354_v0 }
 0xe2a   : > { %v5225_v2 = vmul.f32 -2.7261424e-10, %v13396_v63  ;;  %v13406_v27 = vmul.f32 %v6688_v23, %v13225_v39  ;;  %v6690_v25 = vadd.f32 1.0, %v6605_v37  ;;  %v5862_v6 = vmul.f32 %v5798_v19, %v13282_v43 }
 0xe2b   : > { %v13410_v55 = vadd.f32 %v4835_v51, %v14486_v3  ;;  %v13413_v29 = vmul.f32 %v13193_v18, %v5921_v56  ;;  %v5479_v53 = vmul.f32 %v5415_v1, %v13353_v46  ;;  %v6376_v30 = vadd.f32 -0.0073733293, %v6312_v13 }
 0xe2c   : > { %14501 = vst [vmem:[#allocation66_spill] sm:$0xff] %v13406_v27  ;;  %v6186_v59 = vmul.f32 %v6122_v22, %v13374_v50  ;;  %v5923_v28 = vadd.f32 -0.016096033, %v5859_v24  ;;  %v5924_v17 = vadd.f32 -0.016096033, %v5860_v52  ;;  %9207 = vrcp.f32 %v6502_v54  ;;  %v4839_v24 = vpop.f32.mrf.mxu0 }
 0xe2d   : > { %14502 = vst [vmem:[#allocation43_spill] sm:$0xff] %v13413_v29  ;;  %v13418_v39 = vadd.f32 %v4678_v11, %v12095_v9  ;;  %v5733_v15 = vmul.f32 %v5669_v7, %v13294_v10  ;;  %v5608_v43 = vmul.f32 %v5544_v41, %v13360_v16  ;;  %v5482_v23 = vmul.f32 %v5418_v12, %v13374_v50  ;;  %v4680_v11 = vpop.f32.mrf.mxu1 }
 0xe2e   : > { %v5289_v0 = vadd.f32 2.7706815e-08, %v5225_v2  ;;  %v9206_v18 = vpop.eup %9205  ;;  %v13424_v56 = vmul.f32 %v6690_v25, %v13233_v62  ;;  %v5926_v1 = vadd.f32 -0.016096033, %v5862_v6  ;;  %v13427_v22 = vmul.f32 0.5, %v13321_v5 }
 0xe2f   : > { %v4971_v37 = vmul.f32 0.70710677, %v13410_v55  ;;  %v5543_v19 = vadd.f32 -5.6925062e-05, %v5479_v53  ;;  %v6440_v33 = vmul.f32 %v6376_v30, %v13360_v16  ;;  %v6250_v13 = vadd.f32 -0.001682827, %v6186_v59 }
 0xe30   : > { %14503 = vst [vmem:[#allocation42_spill] sm:$0xff] %v13424_v56  ;;  %v5353_v51 = vmul.f32 %v5289_v0, %v13396_v63  ;;  %v13433_v52 = vmul.f32 %v13241_v45, %v5923_v28  ;;  %v13436_v54 = vmul.f32 0.5, %v13369_v57  ;;  %v4972_v5 = vmul.f32 0.70710677, %v13418_v39 }
 0xe31   : > { %v13438_v62 = vclamps-f32 %v4971_v37, 4.0  ;;  %v5988_v7 = vmul.f32 %v13256_v20, %v5924_v17  ;;  %v5797_v41 = vadd.f32 -0.0029546, %v5733_v15  ;;  %v5672_v12 = vadd.f32 -0.00073499064, %v5608_v43 }
 0xe32   : > { %14504 = vst [vmem:[#allocation86_spill] sm:$0xff] %v13433_v52  ;;  %14505 = vst [vmem:[#allocation87_spill] sm:$0xff] %v13436_v54  ;;  %v5546_v2 = vadd.f32 -5.6925062e-05, %v5482_v23  ;;  %v5417_v25 = vadd.f32 -2.101024e-06, %v5353_v51  ;;  %v13449_v57 = vadd.f32 %v4839_v24, %v12099_v26  ;;  %v5990_v53 = vmul.f32 %v13275_v60, %v5926_v1  ;;  %v4841_v52 = vpop.f32.mrf.mxu0 }
 0xe33   : > { %v13444_v6 = vmul.f32 %v13438_v62, %v13438_v62  ;;  %v13446_v45 = vclamps-f32 %v4972_v5, 4.0  ;;  %v5607_v30 = vmul.f32 %v5543_v19, %v13353_v46  ;;  %v6504_v59 = vadd.f32 -0.014264739, %v6440_v33 }
 0xe34   : > { %14506 = vst [vmem:[#allocation88_spill] sm:$0xff] %v13449_v57  ;;  %v6314_v20 = vmul.f32 %v6250_v13, %v13374_v50  ;;  %v6609_v28 = vmul.f32 %v9206_v18, %v5988_v7  ;;  %v13460_v43 = vadd.f32 %v4680_v11, %v14484_v49  ;;  %v5861_v23 = vmul.f32 %v5797_v41, %v13294_v10 }
 0xe35   : > { %v5227_v17 = vmul.f32 -2.7261424e-10, %v13444_v6  ;;  %v13457_v15 = vmul.f32 %v13446_v45, %v13446_v45  ;;  %v5736_v0 = vmul.f32 %v5672_v12, %v13360_v16  ;;  %v5610_v60 = vmul.f32 %v5546_v2, %v13374_v50 }
 0xe36   : > { %v4974_v1 = vmul.f32 0.70710677, %v13449_v57  ;;  %v5481_v37 = vmul.f32 %v5417_v25, %v13396_v63  ;;  %v5671_v13 = vadd.f32 -0.00073499064, %v5607_v30  ;;  %9209 = vrcp.f32 %v6504_v59 }
 0xe37   : > { %v5291_v18 = vadd.f32 2.7706815e-08, %v5227_v17  ;;  %v5228_v19 = vmul.f32 -2.7261424e-10, %v13457_v15  ;;  %v6060_v33 = vmul.f32 -1.45660715e-05, %v13457_v15 }
 0xe38   : > { %v6378_v51 = vadd.f32 -0.0073733293, %v6314_v20  ;;  %v13469_v24 = vclamps-f32 %v4974_v1, 4.0  ;;  %v4973_v12 = vmul.f32 0.70710677, %v13460_v43  ;;  %v6692_v11 = vadd.f32 1.0, %v6609_v28 }
 0xe39   : > { %v5355_v5 = vmul.f32 %v5291_v18, %v13444_v6  ;;  %v5292_v7 = vadd.f32 2.7706815e-08, %v5228_v19  ;;  %v6124_v41 = vadd.f32 -0.00021337405, %v6060_v33  ;;  %v9208_v2 = vpop.eup %9207  ;;  %v5800_v57 = vadd.f32 -0.0029546, %v5736_v0 }
 0xe3a   : > { %v5674_v25 = vadd.f32 -0.00073499064, %v5610_v60  ;;  %v13475_v17 = vmul.f32 %v13469_v24, %v13469_v24  ;;  %v5545_v54 = vadd.f32 -5.6925062e-05, %v5481_v37  ;;  %v5925_v1 = vadd.f32 -0.016096033, %v5861_v23 }
 0xe3b   : > { %v5419_v30 = vadd.f32 -2.101024e-06, %v5355_v5  ;;  %v5356_v59 = vmul.f32 %v5292_v7, %v13457_v15  ;;  %v6188_v20 = vmul.f32 %v6124_v41, %v13457_v15  ;;  %v5735_v18 = vmul.f32 %v5671_v13, %v13353_v46 }
 0xe3c   : > { %v5230_v19 = vmul.f32 -2.7261424e-10, %v13475_v17  ;;  %v13481_v33 = vclamps-f32 %v4973_v12, 4.0  ;;  %v6442_v28 = vmul.f32 %v6378_v51, %v13374_v50  ;;  %v6613_v44 = vmul.f32 %v9208_v2, %v5990_v53 }
 0xe3d   : > { %v5483_v0 = vmul.f32 %v5419_v30, %v13444_v6  ;;  %v5420_v60 = vadd.f32 -2.101024e-06, %v5356_v59  ;;  %v6252_v56 = vadd.f32 -0.001682827, %v6188_v20  ;;  %v5864_v37 = vmul.f32 %v5800_v57, %v13360_v16 }
 0xe3e   : > { %v5738_v5 = vmul.f32 %v5674_v25, %v13374_v50  ;;  %v5294_v7 = vadd.f32 2.7706815e-08, %v5230_v19  ;;  %v5609_v23 = vmul.f32 %v5545_v54, %v13396_v63  ;;  %v6062_v12 = vmul.f32 -1.45660715e-05, %v13475_v17 }
 0xe3f   : > { %v5547_v41 = vadd.f32 -5.6925062e-05, %v5483_v0  ;;  %v5484_v13 = vmul.f32 %v5420_v60, %v13457_v15  ;;  %v13491_v51 = vmul.f32 %v6692_v11, %v13299_v38  ;;  %v6316_v30 = vmul.f32 %v6252_v56, %v13457_v15  ;;  %v4684_v56 = vpop.f32.mrf.mxu1 }
 0xe40   : > { %v5358_v53 = vmul.f32 %v5294_v7, %v13475_v17  ;;  %v13497_v16 = vmul.f32 %v13481_v33, %v13481_v33  ;;  %v13500_v57 = vmul.f32 %v13284_v21, %v5925_v1  ;;  %v5799_v54 = vadd.f32 -0.0029546, %v5735_v18 }
 0xe41   : > { %14507 = vst [vmem:[#allocation89_spill] sm:$0xff] %v13491_v51  ;;  %v6506_v2 = vadd.f32 -0.014264739, %v6442_v28  ;;  %v5548_v25 = vadd.f32 -5.6925062e-05, %v5484_v13  ;;  %v13502_v59 = vadd.f32 1.0, %v6613_v44  ;;  %v13505_v38 = vadd.f32 %v4841_v52, %v14486_v3 }
 0xe42   : > { %14508 = vst [vmem:[#allocation90_spill] sm:$0xff] %v13500_v57  ;;  %v5802_v20 = vadd.f32 -0.0029546, %v5738_v5  ;;  %v5422_v19 = vadd.f32 -2.101024e-06, %v5358_v53  ;;  %v5611_v60 = vmul.f32 %v5547_v41, %v13444_v6  ;;  %v13509_v51 = vmul.f32 0.5, %v13410_v55  ;;  %v4845_v5 = vpop.f32.mrf.mxu0 }
 0xe43   : > { %14509 = vst [vmem:[#allocation91_spill] sm:$0xff] %v13505_v38  ;;  %v5928_v11 = vadd.f32 -0.016096033, %v5864_v37  ;;  %v5673_v0 = vadd.f32 -0.00073499064, %v5609_v23  ;;  %v13512_v21 = vmul.f32 0.5, %v13418_v39  ;;  %v9210_v18 = vpop.eup %9209  ;;  %v5863_v28 = vmul.f32 %v5799_v54, %v13353_v46 }
 0xe44   : > { %v6126_v7 = vadd.f32 -0.00021337405, %v6062_v12  ;;  %14510 = vst [vmem:[#allocation92_spill] sm:$0xff] %v13509_v51  ;;  %v6380_v1 = vadd.f32 -0.0073733293, %v6316_v30  ;;  %9211 = vrcp.f32 %v6506_v2  ;;  %v5612_v52 = vmul.f32 %v5548_v25, %v13457_v15 }
 0xe45   : > { %v5229_v44 = vmul.f32 -2.7261424e-10, %v13497_v16  ;;  %v13518_v37 = vadd.f32 %v4684_v56, %v12095_v9  ;;  %v5866_v23 = vmul.f32 %v5802_v20, %v13374_v50  ;;  %v5486_v55 = vmul.f32 %v5422_v19, %v13475_v17 }
 0xe46   : > { %v4975_v39 = vmul.f32 0.70710677, %v13505_v38  ;;  %v5992_v13 = vmul.f32 %v13348_v8, %v5928_v11  ;;  %v5737_v12 = vmul.f32 %v5673_v0, %v13396_v63  ;;  %v5675_v30 = vadd.f32 -0.00073499064, %v5611_v60 }
 0xe47   : > { %v5293_v41 = vadd.f32 2.7706815e-08, %v5229_v44  ;;  %v6190_v53 = vmul.f32 %v6126_v7, %v13475_v17  ;;  %v6444_v54 = vmul.f32 %v6380_v1, %v13457_v15  ;;  %v13531_v50 = vadd.f32 %v4845_v5, %v12099_v26  ;;  %v4686_v5 = vpop.f32.mrf.mxu1 }
 0xe48   : > { %v13528_v25 = vclamps-f32 %v4975_v39, 4.0  ;;  %v5927_v20 = vadd.f32 -0.016096033, %v5863_v28  ;;  %v6617_v19 = vmul.f32 %v9210_v18, %v5992_v13  ;;  %v5676_v56 = vadd.f32 -0.00073499064, %v5612_v52 }
 0xe49   : > { %v5357_v2 = vmul.f32 %v5293_v41, %v13497_v16  ;;  %14511 = vst [vmem:[#allocation93_spill] sm:$0xff] %v13531_v50  ;;  %v4976_v44 = vmul.f32 0.70710677, %v13518_v37  ;;  %v5930_v8 = vadd.f32 -0.016096033, %v5866_v23  ;;  %v5739_v1 = vmul.f32 %v5675_v30, %v13444_v6 }
 0xe4a   : > { %v5550_v11 = vadd.f32 -5.6925062e-05, %v5486_v55  ;;  %v13536_v60 = vmul.f32 %v13528_v25, %v13528_v25  ;;  %v5801_v7 = vadd.f32 -0.0029546, %v5737_v12  ;;  %v6254_v41 = vadd.f32 -0.001682827, %v6190_v53 }
 0xe4b   : > { %v5421_v0 = vadd.f32 -2.101024e-06, %v5357_v2  ;;  %v13539_v39 = vclamps-f32 %v4976_v44, 4.0  ;;  %v6508_v38 = vadd.f32 -0.014264739, %v6444_v54  ;;  %v6696_v23 = vadd.f32 1.0, %v6617_v19 }
 0xe4c   : > { %v5231_v28 = vmul.f32 -2.7261424e-10, %v13536_v60  ;;  %v4978_v52 = vmul.f32 0.70710677, %v13531_v50  ;;  %v5740_v55 = vmul.f32 %v5676_v56, %v13457_v15  ;;  %v13546_v13 = vmul.f32 0.5, %v13460_v43 }
 0xe4d   : > { %v5485_v18 = vmul.f32 %v5421_v0, %v13497_v16  ;;  %v13550_v12 = vmul.f32 %v13539_v39, %v13539_v39  ;;  %v5614_v30 = vmul.f32 %v5550_v11, %v13475_v17  ;;  %v13554_v2 = vadd.f32 %v4686_v5, %v14484_v49 }
 0xe4e   : > { %14512 = vst [vmem:[#allocation69_spill] sm:$0xff] %v13546_v13  ;;  %v5295_v54 = vadd.f32 2.7706815e-08, %v5231_v28  ;;  %v5865_v44 = vmul.f32 %v5801_v7, %v13396_v63  ;;  %v13559_v0 = vclamps-f32 %v4978_v52, 4.0  ;;  %v5803_v43 = vadd.f32 -0.0029546, %v5739_v1 }
 0xe4f   : > { %v5549_v53 = vadd.f32 -5.6925062e-05, %v5485_v18  ;;  %v5232_v19 = vmul.f32 -2.7261424e-10, %v13550_v12  ;;  %v6064_v56 = vmul.f32 -1.45660715e-05, %v13550_v12  ;;  %9213 = vrcp.f32 %v6508_v38 }
 0xe50   : > { %14513 = vst [vmem:[#allocation68_spill] sm:$0xff] %v13559_v0  ;;  %v6318_v50 = vmul.f32 %v6254_v41, %v13475_v17  ;;  %v5359_v51 = vmul.f32 %v5295_v54, %v13536_v60  ;;  %v13565_v5 = vmul.f32 %v13559_v0, %v13559_v0  ;;  %v4977_v7 = vmul.f32 0.70710677, %v13554_v2 }
 0xe51   : > { %v5296_v11 = vadd.f32 2.7706815e-08, %v5232_v19  ;;  %v6128_v18 = vadd.f32 -0.00021337405, %v6064_v56  ;;  %v9212_v28 = vpop.eup %9211  ;;  %v13570_v13 = vmul.f32 %v13502_v59, %v13339_v35  ;;  %v5804_v52 = vadd.f32 -0.0029546, %v5740_v55 }
 0xe52   : > { %v5678_v1 = vadd.f32 -0.00073499064, %v5614_v30  ;;  %v5423_v38 = vadd.f32 -2.101024e-06, %v5359_v51  ;;  %v5613_v41 = vmul.f32 %v5549_v53, %v13497_v16  ;;  %v5234_v56 = vmul.f32 -2.7261424e-10, %v13565_v5 }
 0xe53   : > { %14514 = vst [vmem:[#allocation71_spill] sm:$0xff] %v13570_v13  ;;  %v5360_v54 = vmul.f32 %v5296_v11, %v13550_v12  ;;  %v6192_v19 = vmul.f32 %v6128_v18, %v13550_v12  ;;  %v5929_v0 = vadd.f32 -0.016096033, %v5865_v44  ;;  %v6066_v27 = vmul.f32 -1.45660715e-05, %v13565_v5 }
 0xe54   : > { %v5487_v57 = vmul.f32 %v5423_v38, %v13536_v60  ;;  %v13578_v29 = vclamps-f32 %v4977_v7, 4.0  ;;  %v5994_v35 = vmul.f32 %v13364_v47, %v5930_v8  ;;  %v6382_v59 = vadd.f32 -0.0073733293, %v6318_v50 }
 0xe55   : > { %v5424_v55 = vadd.f32 -2.101024e-06, %v5360_v54  ;;  %v6256_v51 = vadd.f32 -0.001682827, %v6192_v19  ;;  %v5867_v30 = vmul.f32 %v5803_v43, %v13444_v6  ;;  %v5868_v53 = vmul.f32 %v5804_v52, %v13457_v15  ;;  %v4847_v15 = vpop.f32.mrf.mxu0 }
 0xe56   : > { %v5298_v11 = vadd.f32 2.7706815e-08, %v5234_v56  ;;  %v13585_v18 = vmul.f32 %v13578_v29, %v13578_v29  ;;  %v5742_v44 = vmul.f32 %v5678_v1, %v13475_v17  ;;  %v5677_v38 = vadd.f32 -0.00073499064, %v5613_v41 }
 0xe57   : > { %v5488_v7 = vmul.f32 %v5424_v55, %v13550_v12  ;;  %v6320_v13 = vmul.f32 %v6256_v51, %v13550_v12  ;;  %v13591_v47 = vmul.f32 %v13341_v61, %v5927_v20  ;;  %v5551_v50 = vadd.f32 -5.6925062e-05, %v5487_v57  ;;  %v4690_v61 = vpop.f32.mrf.mxu1 }
 0xe58   : > { %v6130_v8 = vadd.f32 -0.00021337405, %v6066_v27  ;;  %v5233_v43 = vmul.f32 -2.7261424e-10, %v13585_v18  ;;  %v13594_v52 = vmul.f32 %v9212_v28, %v5994_v35  ;;  %v6446_v54 = vmul.f32 %v6382_v59, %v13475_v17 }
 0xe59   : > { %v5552_v19 = vadd.f32 -5.6925062e-05, %v5488_v7  ;;  %v6384_v56 = vadd.f32 -0.0073733293, %v6320_v13  ;;  %v13598_v1 = vmul.f32 %v6696_v23, %v13427_v22  ;;  %v5931_v41 = vadd.f32 -0.016096033, %v5867_v30 }
 0xe5a   : > { %14515 = vst [vmem:[#allocation70_spill] sm:$0xff] %v13594_v52  ;;  %v5932_v55 = vadd.f32 -0.016096033, %v5868_v53  ;;  %v5362_v51 = vmul.f32 %v5298_v11, %v13565_v5  ;;  %v5806_v20 = vadd.f32 -0.0029546, %v5742_v44  ;;  %v5741_v27 = vmul.f32 %v5677_v38, %v13497_v16 }
 0xe5b   : > { %v5616_v57 = vmul.f32 %v5552_v19, %v13550_v12  ;;  %v13604_v28 = vadd.f32 %v4847_v15, %v14486_v3  ;;  %v13607_v35 = vmul.f32 %v13390_v4, %v5929_v0  ;;  %v5615_v13 = vmul.f32 %v5551_v50, %v13536_v60 }
 0xe5c   : > { %v6194_v22 = vmul.f32 %v6130_v8, %v13565_v5  ;;  %v5297_v23 = vadd.f32 2.7706815e-08, %v5233_v43  ;;  %v9214_v59 = vpop.eup %9213  ;;  %v6510_v30 = vadd.f32 -0.014264739, %v6446_v54  ;;  %v13612_v53 = vmul.f32 0.5, %v13518_v37 }
 0xe5d   : > { %14516 = vst [vmem:[#allocation73_spill] sm:$0xff] %v13604_v28  ;;  %v6448_v11 = vmul.f32 %v6384_v56, %v13550_v12  ;;  %v13616_v44 = vadd.f32 %v4690_v61, %v12095_v9  ;;  %v5996_v38 = vmul.f32 %v13446_v45, %v5932_v55  ;;  %v5680_v7 = vadd.f32 -0.00073499064, %v5616_v57  ;;  %v4851_v9 = vpop.f32.mrf.mxu0 }
 0xe5e   : > { %v5426_v4 = vadd.f32 -2.101024e-06, %v5362_v51  ;;  %v5361_v0 = vmul.f32 %v5297_v23, %v13585_v18  ;;  %v13621_v50 = vmul.f32 %v13438_v62, %v5931_v41  ;;  %v5870_v8 = vmul.f32 %v5806_v20, %v13475_v17 }
 0xe5f   : > { %v5805_v43 = vadd.f32 -0.0029546, %v5741_v27  ;;  %v4979_v37 = vmul.f32 0.70710677, %v13604_v28  ;;  %v6625_v15 = vmul.f32 %v9214_v59, %v5996_v38  ;;  %v5679_v54 = vadd.f32 -0.00073499064, %v5615_v13 }
 0xe60   : > { %14517 = vst [vmem:[#allocation72_spill] sm:$0xff] %v13621_v50  ;;  %v6258_v19 = vadd.f32 -0.001682827, %v6194_v22  ;;  %v5425_v56 = vadd.f32 -2.101024e-06, %v5361_v0  ;;  %9215 = vrcp.f32 %v6510_v30  ;;  %v5744_v51 = vmul.f32 %v5680_v7, %v13550_v12  ;;  %v4692_v22 = vpop.f32.mrf.mxu1 }
 0xe61   : > { %v6512_v61 = vadd.f32 -0.014264739, %v6448_v11  ;;  %v13625_v45 = vclamps-f32 %v4979_v37, 4.0  ;;  %v4980_v55 = vmul.f32 0.70710677, %v13616_v44  ;;  %v5490_v62 = vmul.f32 %v5426_v4, %v13565_v5 }
 0xe62   : > { %v13631_v17 = vmul.f32 0.5, %v13554_v2  ;;  %v5489_v41 = vmul.f32 %v5425_v56, %v13585_v18  ;;  %v5934_v20 = vadd.f32 -0.016096033, %v5870_v8  ;;  %v13641_v13 = vadd.f32 %v4851_v9, %v12099_v26 }
 0xe63   : > { %14518 = vst [vmem:[#allocation75_spill] sm:$0xff] %v13625_v45  ;;  %v13636_v27 = vmul.f32 %v13625_v45, %v13625_v45  ;;  %v13638_v57 = vclamps-f32 %v4980_v55, 4.0  ;;  %v6700_v23 = vadd.f32 1.0, %v6625_v15  ;;  %v5743_v59 = vmul.f32 %v5679_v54, %v13536_v60 }
 0xe64   : > { %14519 = vst [vmem:[#allocation74_spill] sm:$0xff] %v13641_v13  ;;  %v6322_v30 = vmul.f32 %v6258_v19, %v13565_v5  ;;  %v5553_v2 = vadd.f32 -5.6925062e-05, %v5489_v41  ;;  %v5869_v11 = vmul.f32 %v5805_v43, %v13497_v16  ;;  %9217 = vrcp.f32 %v6512_v61 }
 0xe65   : > { %v5235_v38 = vmul.f32 -2.7261424e-10, %v13636_v27  ;;  %v13649_v7 = vmul.f32 %v13638_v57, %v13638_v57  ;;  %v5808_v4 = vadd.f32 -0.0029546, %v5744_v51  ;;  %v5554_v0 = vadd.f32 -5.6925062e-05, %v5490_v62 }
 0xe66   : > { %v4982_v26 = vmul.f32 0.70710677, %v13641_v13  ;;  %v13653_v8 = vadd.f32 %v4692_v22, %v14484_v49  ;;  %v13656_v37 = vmul.f32 %v13469_v24, %v5934_v20  ;;  %v5807_v19 = vadd.f32 -0.0029546, %v5743_v59 }
 0xe67   : > { %v5299_v15 = vadd.f32 2.7706815e-08, %v5235_v38  ;;  %v5236_v43 = vmul.f32 -2.7261424e-10, %v13649_v7  ;;  %v6068_v54 = vmul.f32 -1.45660715e-05, %v13649_v7  ;;  %v5617_v9 = vmul.f32 %v5553_v2, %v13585_v18 }
 0xe68   : > { %14520 = vst [vmem:[#allocation21_spill] sm:$0xff] %v13656_v37  ;;  %v6386_v56 = vadd.f32 -0.0073733293, %v6322_v30  ;;  %v13661_v61 = vclamps-f32 %v4982_v26, 4.0  ;;  %v4981_v49 = vmul.f32 0.70710677, %v13653_v8  ;;  %v5872_v24 = vmul.f32 %v5808_v4, %v13550_v12 }
 0xe69   : > { %v5363_v55 = vmul.f32 %v5299_v15, %v13636_v27  ;;  %v5300_v51 = vadd.f32 2.7706815e-08, %v5236_v43  ;;  %v6132_v62 = vadd.f32 -0.00021337405, %v6068_v54  ;;  %v5933_v41 = vadd.f32 -0.016096033, %v5869_v11 }
 0xe6a   : > { %14521 = vst [vmem:[#allocation76_spill] sm:$0xff] %v13661_v61  ;;  %v5618_v20 = vmul.f32 %v5554_v0, %v13565_v5  ;;  %v13669_v22 = vmul.f32 %v13661_v61, %v13661_v61  ;;  %v13673_v38 = vclamps-f32 %v4981_v49, 4.0  ;;  %v5871_v26 = vmul.f32 %v5807_v19, %v13536_v60 }
 0xe6b   : > { %v5427_v59 = vadd.f32 -2.101024e-06, %v5363_v55  ;;  %v5364_v30 = vmul.f32 %v5300_v51, %v13649_v7  ;;  %v6196_v2 = vmul.f32 %v6132_v62, %v13649_v7  ;;  %v5681_v15 = vadd.f32 -0.00073499064, %v5617_v9 }
 0xe6c   : > { %14522 = vst [vmem:[#allocation77_spill] sm:$0xff] %v13669_v22  ;;  %v5238_v11 = vmul.f32 -2.7261424e-10, %v13669_v22  ;;  %v6070_v12 = vmul.f32 -1.45660715e-05, %v13669_v22  ;;  %v6450_v4 = vmul.f32 %v6386_v56, %v13565_v5  ;;  %v13684_v49 = vmul.f32 %v13673_v38, %v13673_v38  ;;  %v4853_v56 = vpop.f32.mrf.mxu0 }
 0xe6d   : > { %v5491_v0 = vmul.f32 %v5427_v59, %v13636_v27  ;;  %v5428_v43 = vadd.f32 -2.101024e-06, %v5364_v30  ;;  %v6260_v54 = vadd.f32 -0.001682827, %v6196_v2  ;;  %v13680_v55 = vpop.eup %9215  ;;  %v5682_v51 = vadd.f32 -0.00073499064, %v5618_v20 }
 0xe6e   : > { %14523 = vst [vmem:[#allocation38_spill] sm:$0xff] %v13680_v55  ;;  %v5302_v13 = vadd.f32 2.7706815e-08, %v5238_v11  ;;  %v6134_v62 = vadd.f32 -0.00021337405, %v6070_v12  ;;  %v5745_v59 = vmul.f32 %v5681_v15, %v13585_v18  ;;  %v13693_v11 = vmul.f32 %v6700_v23, %v13512_v21 }
 0xe6f   : > { %v5936_v19 = vadd.f32 -0.016096033, %v5872_v24  ;;  %v5555_v9 = vadd.f32 -5.6925062e-05, %v5491_v0  ;;  %v5492_v28 = vmul.f32 %v5428_v43, %v13649_v7  ;;  %v6324_v61 = vmul.f32 %v6260_v54, %v13649_v7 }
 0xe70   : > { %v5366_v30 = vmul.f32 %v5302_v13, %v13669_v22  ;;  %v6198_v2 = vmul.f32 %v6134_v62, %v13669_v22  ;;  %v5237_v20 = vmul.f32 -2.7261424e-10, %v13684_v49  ;;  %v5935_v12 = vadd.f32 -0.016096033, %v5871_v26 }
 0xe71   : > { %v5619_v24 = vmul.f32 %v5555_v9, %v13636_v27  ;;  %v5556_v0 = vadd.f32 -5.6925062e-05, %v5492_v28  ;;  %v9218_v55 = vpop.eup %9217  ;;  %v5746_v43 = vmul.f32 %v5682_v51, %v13565_v5  ;;  %v6514_v54 = vadd.f32 -0.014264739, %v6450_v4 }
 0xe72   : > { %v6388_v37 = vadd.f32 -0.0073733293, %v6324_v61  ;;  %v13698_v15 = vadd.f32 %v4853_v56, %v14486_v3  ;;  %v6000_v13 = vmul.f32 %v13539_v39, %v5936_v19  ;;  %v5430_v52 = vadd.f32 -2.101024e-06, %v5366_v30 }
 0xe73   : > { %v5620_v62 = vmul.f32 %v5556_v0, %v13649_v7  ;;  %v5301_v45 = vadd.f32 2.7706815e-08, %v5237_v20  ;;  %v13703_v21 = vmul.f32 %v13481_v33, %v5933_v41  ;;  %v5809_v23 = vadd.f32 -0.0029546, %v5745_v59 }
 0xe74   : > { %14524 = vst [vmem:[#allocation40_spill] sm:$0xff] %v13698_v15  ;;  %v13706_v28 = vmul.f32 0.5, %v13616_v44  ;;  %v6262_v26 = vadd.f32 -0.001682827, %v6198_v2  ;;  %v13709_v4 = vmul.f32 %v13528_v25, %v5935_v12  ;;  %v6633_v61 = vmul.f32 %v9218_v55, %v6000_v13 }
 0xe75   : > { %v5683_v3 = vadd.f32 -0.00073499064, %v5619_v24  ;;  %v5365_v51 = vmul.f32 %v5301_v45, %v13684_v49  ;;  %9219 = vrcp.f32 %v6514_v54  ;;  %v5684_v39 = vadd.f32 -0.00073499064, %v5620_v62 }
 0xe76   : > { %14525 = vst [vmem:[#allocation45_spill] sm:$0xff] %v13706_v28  ;;  %14526 = vst [vmem:[#allocation49_spill] sm:$0xff] %v13709_v4  ;;  %v6452_v19 = vmul.f32 %v6388_v37, %v13649_v7  ;;  %v4983_v9 = vmul.f32 0.70710677, %v13698_v15  ;;  %v5810_v33 = vadd.f32 -0.0029546, %v5746_v43  ;;  %v5494_v41 = vmul.f32 %v5430_v52, %v13669_v22 }
 0xe77   : > { %v13716_v44 = vmul.f32 0.5, %v13653_v8  ;;  %v5429_v56 = vadd.f32 -2.101024e-06, %v5365_v51  ;;  %v5873_v25 = vmul.f32 %v5809_v23, %v13585_v18  ;;  %v6326_v55 = vmul.f32 %v6262_v26, %v13669_v22 }
 0xe78   : > { %v13720_v59 = vclamps-f32 %v4983_v9, 4.0  ;;  %v6041_v45 = vmul.f32 -1.45660715e-05, %v13014_v40  ;;  %v6704_v30 = vadd.f32 1.0, %v6633_v61  ;;  %v5747_v37 = vmul.f32 %v5683_v3, %v13636_v27  ;;  %v7850_v9 = vpop.f32.mrf.mxu1 }
 0xe79   : > { %v5493_v2 = vmul.f32 %v5429_v56, %v13684_v49  ;;  %v6043_v20 = vmul.f32 -1.45660715e-05, %v13030_v48  ;;  %v5748_v52 = vmul.f32 %v5684_v39, %v13649_v7  ;;  %v6516_v8 = vadd.f32 -0.014264739, %v6452_v19  ;;  %v13741_v56 = vpop.f32.mrf.mxu0 }
 0xe7a   : > { %14527 = vst [vmem:[#allocation41_spill] sm:$0xff] %v13720_v59  ;;  %v13729_v12 = vmul.f32 %v13720_v59, %v13720_v59  ;;  %v6105_v24 = vadd.f32 -0.00021337405, %v6041_v45  ;;  %v13732_v0 = vmul.f32 %v5810_v33, %v13565_v5  ;;  %v5558_v43 = vadd.f32 -5.6925062e-05, %v5494_v41 }
 0xe7b   : > { %v5557_v54 = vadd.f32 -5.6925062e-05, %v5493_v2  ;;  %v6107_v13 = vadd.f32 -0.00021337405, %v6043_v20  ;;  %v5937_v62 = vadd.f32 -0.016096033, %v5873_v25  ;;  %v13737_v3 = vmul.f32 %v6704_v30, %v13612_v53 }
 0xe7c   : > { %14528 = vst [vmem:[#allocation48_spill] sm:$0xff] %v13732_v0  ;;  %v6390_v23 = vadd.f32 -0.0073733293, %v6326_v55  ;;  %v5239_v26 = vmul.f32 -2.7261424e-10, %v13729_v12  ;;  %v6169_v61 = vmul.f32 %v6105_v24, %v13014_v40  ;;  %9221 = vrcp.f32 %v6516_v8 }
 0xe7d   : > { %14529 = vst [vmem:[#allocation51_spill] sm:$0xff] %v13737_v3  ;;  %v5811_v51 = vadd.f32 -0.0029546, %v5747_v37  ;;  %v5621_v39 = vmul.f32 %v5557_v54, %v13684_v49  ;;  %v6171_v19 = vmul.f32 %v6107_v13, %v13030_v48  ;;  %v5812_v5 = vadd.f32 -0.0029546, %v5748_v52 }
 0xe7e   : > { %v5303_v33 = vadd.f32 2.7706815e-08, %v5239_v26  ;;  %v6233_v41 = vadd.f32 -0.001682827, %v6169_v61  ;;  %v5622_v25 = vmul.f32 %v5558_v43, %v13669_v22  ;;  %v6045_v2 = vmul.f32 -1.45660715e-05, %v13104_v32  ;;  %v7851_v43 = vpop.f32.mrf.mxu1 }
 0xe7f   : > { %v5685_v55 = vadd.f32 -0.00073499064, %v5621_v39  ;;  %v6235_v45 = vadd.f32 -0.001682827, %v6171_v19  ;;  %v6454_v53 = vmul.f32 %v6390_v23, %v13669_v22  ;;  %v6047_v20 = vmul.f32 -1.45660715e-05, %v13150_v36  ;;  %v13756_v39 = vpop.f32.mrf.mxu0 }
 0xe80   : > { %v5367_v30 = vmul.f32 %v5303_v33, %v13729_v12  ;;  %v6297_v37 = vmul.f32 %v6233_v41, %v13014_v40  ;;  %v6109_v24 = vadd.f32 -0.00021337405, %v6045_v2  ;;  %v6049_v54 = vmul.f32 -1.45660715e-05, %v13200_v58  ;;  %v13762_v2 = vpop.f32.mrf.mxu1 }
 0xe81   : > { %v5749_v52 = vmul.f32 %v5685_v55, %v13684_v49  ;;  %v6299_v8 = vmul.f32 %v6235_v45, %v13030_v48  ;;  %v13753_v13 = vmul.f32 %v13578_v29, %v5937_v62  ;;  %v5875_v26 = vmul.f32 %v5811_v51, %v13636_v27 }
 0xe82   : > { %v5431_v23 = vadd.f32 -2.101024e-06, %v5367_v30  ;;  %v6361_v61 = vadd.f32 -0.0073733293, %v6297_v37  ;;  %v13758_v19 = vpop.eup %9219  ;;  %v5876_v33 = vmul.f32 %v5812_v5, %v13649_v7  ;;  %v6173_v55 = vmul.f32 %v6109_v24, %v13104_v32  ;;  %v13766_v30 = vpop.f32.mrf.mxu0 }
 0xe83   : > { %14530 = vst [vmem:[#allocation79_spill] sm:$0xff] %v13758_v19  ;;  %v6363_v41 = vadd.f32 -0.0073733293, %v6299_v8  ;;  %v6111_v45 = vadd.f32 -0.00021337405, %v6047_v20 }
 0xe84   : > { %v5813_v15 = vadd.f32 -0.0029546, %v5749_v52  ;;  %v5495_v29 = vmul.f32 %v5431_v23, %v13729_v12  ;;  %v6425_v62 = vmul.f32 %v6361_v61, %v13014_v40  ;;  %v6113_v51 = vadd.f32 -0.00021337405, %v6049_v54  ;;  %v13774_v54 = vpop.f32.mrf.mxu1  ;;  %v13777_v61 = vpop.f32.mrf.mxu0 }
 0xe85   : > { %v5686_v37 = vadd.f32 -0.00073499064, %v5622_v25  ;;  %v6518_v59 = vadd.f32 -0.014264739, %v6454_v53  ;;  %v6427_v19 = vmul.f32 %v6363_v41, %v13030_v48  ;;  %v6237_v28 = vadd.f32 -0.001682827, %v6173_v55 }
 0xe86   : > { %v5559_v7 = vadd.f32 -5.6925062e-05, %v5495_v29  ;;  %v6489_v5 = vadd.f32 -0.014264739, %v6425_v62  ;;  %v6175_v8 = vmul.f32 %v6111_v45, %v13150_v36  ;;  %v6177_v20 = vmul.f32 %v6113_v51, %v13200_v58  ;;  %v13782_v45 = vpop.f32.mrf.mxu1  ;;  %v13792_v29 = vpop.f32.mrf.mxu0 }
 0xe87   : > { %v13771_v24 = vadd.f32 -0.016096033, %v5875_v26  ;;  %v5940_v52 = vadd.f32 -0.016096033, %v5876_v33  ;;  %v6491_v23 = vadd.f32 -0.014264739, %v6427_v19  ;;  %v6301_v40 = vmul.f32 %v6237_v28, %v13104_v32 }
 0xe88   : > { %v5877_v25 = vmul.f32 %v5813_v15, %v13684_v49  ;;  %9223 = vrcp.f32 %v6489_v5  ;;  %v6239_v53 = vadd.f32 -0.001682827, %v6175_v8  ;;  %v6241_v48 = vadd.f32 -0.001682827, %v6177_v20  ;;  %v13790_v33 = vld [vmem:[%s14108_s12] ss:$0 sm:$0xff] }
 0xe89   : > { %14531 = vst [vmem:[#allocation50_spill] sm:$0xff] %v13771_v24  ;;  %v13780_v41 = vmul.f32 %v5686_v37, %v13669_v22  ;;  %9225 = vrcp.f32 %v6491_v23  ;;  %v6365_v55 = vadd.f32 -0.0073733293, %v6301_v40  ;;  %v7852_v26 = vadd.f32 %v7851_v43, %v7850_v9  ;;  %v9222_v62 = vpop.eup %9221  ;;  %v13808_v22 = vpop.f32.mrf.mxu0 }
 0xe8a   : > { %9227 = vrcp.f32 %v6518_v59  ;;  %v5623_v28 = vmul.f32 %v5559_v7, %v13729_v12  ;;  %v6303_v19 = vmul.f32 %v6239_v53, %v13150_v36  ;;  %v6305_v15 = vmul.f32 %v6241_v48, %v13200_v58  ;;  %v13802_v48 = vpop.f32.mrf.mxu1 }
 0xe8b   : > { %v6429_v51 = vmul.f32 %v6365_v55, %v13104_v32  ;;  %v6051_v9 = vmul.f32 -1.45660715e-05, %v13251_v34  ;;  %v6053_v59 = vmul.f32 -1.45660715e-05, %v13294_v10  ;;  %v6055_v43 = vmul.f32 -1.45660715e-05, %v13353_v46 }
 0xe8c   : > { %v6004_v37 = vmul.f32 %v13638_v57, %v5940_v52  ;;  %v5941_v7 = vadd.f32 -0.016096033, %v5877_v25  ;;  %v6367_v5 = vadd.f32 -0.0073733293, %v6303_v19  ;;  %v6369_v8 = vadd.f32 -0.0073733293, %v6305_v15 }
 0xe8d   : > { %v6493_v20 = vadd.f32 -0.014264739, %v6429_v51  ;;  %v6115_v23 = vadd.f32 -0.00021337405, %v6051_v9  ;;  %v6117_v40 = vadd.f32 -0.00021337405, %v6053_v59  ;;  %v13800_v53 = vadd.f32 %v7852_v26, %v13790_v33  ;;  %v13818_v9 = vpop.f32.mrf.mxu1 }
 0xe8e   : > { %v13804_v32 = vmul.f32 %v9222_v62, %v6004_v37  ;;  %v5687_v55 = vadd.f32 -0.00073499064, %v5623_v28  ;;  %v6431_v4 = vmul.f32 %v6367_v5, %v13150_v36  ;;  %v6433_v3 = vmul.f32 %v6369_v8, %v13200_v58  ;;  %v13824_v37 = vpop.f32.mrf.mxu0 }
 0xe8f   : > { %9229 = vrcp.f32 %v6493_v20  ;;  %v6179_v57 = vmul.f32 %v6115_v23, %v13251_v34  ;;  %v6181_v52 = vmul.f32 %v6117_v40, %v13294_v10  ;;  %v6119_v25 = vadd.f32 -0.00021337405, %v6055_v43 }
 0xe90   : > { %v13813_v26 = vmul.f32 %v13673_v38, %v5941_v7  ;;  %v6495_v19 = vadd.f32 -0.014264739, %v6431_v4  ;;  %v6497_v15 = vadd.f32 -0.014264739, %v6433_v3  ;;  %v6057_v62 = vmul.f32 -1.45660715e-05, %v13396_v63 }
 0xe91   : > { %v6243_v28 = vadd.f32 -0.001682827, %v6179_v57  ;;  %v6245_v51 = vadd.f32 -0.001682827, %v6181_v52  ;;  %v6183_v36 = vmul.f32 %v6119_v25, %v13353_v46  ;;  %v6061_v58 = vmul.f32 -1.45660715e-05, %v13497_v16 }
 0xe92   : > { %v13821_v59 = vmul.f32 %v5687_v55, %v13729_v12  ;;  %9231 = vrcp.f32 %v6495_v19  ;;  %v6121_v43 = vadd.f32 -0.00021337405, %v6057_v62  ;;  %v6065_v38 = vmul.f32 -1.45660715e-05, %v13585_v18  ;;  %v13833_v19 = vpop.f32.mrf.mxu1 }
 0xe93   : > { %9233 = vrcp.f32 %v6497_v15  ;;  %v6307_v4 = vmul.f32 %v6243_v28, %v13251_v34  ;;  %v6309_v3 = vmul.f32 %v6245_v51, %v13294_v10  ;;  %v6247_v7 = vadd.f32 -0.001682827, %v6183_v36 }
 0xe94   : > { %v6185_v5 = vmul.f32 %v6121_v43, %v13396_v63  ;;  %v6125_v8 = vadd.f32 -0.00021337405, %v6061_v58  ;;  %v6129_v20 = vadd.f32 -0.00021337405, %v6065_v38  ;;  %v7932_v23 = vadd.f32 %v13756_v39, %v13741_v56  ;;  %v13838_v58 = vpop.f32.mrf.mxu0  ;;  %v13847_v0 = vpop.f32.mrf.mxu1 }
 0xe95   : > { %v9224_v40 = vpop.eup %9223  ;;  %v6371_v55 = vadd.f32 -0.0073733293, %v6307_v4  ;;  %v6373_v57 = vadd.f32 -0.0073733293, %v6309_v3  ;;  %v6311_v52 = vmul.f32 %v6247_v7, %v13353_v46  ;;  %v6069_v25 = vmul.f32 -1.45660715e-05, %v13684_v49 }
 0xe96   : > { %v9226_v15 = vpop.eup %9225  ;;  %v6587_v62 = vmul.f32 %v9224_v40, %v13214_v31  ;;  %v6249_v28 = vadd.f32 -0.001682827, %v6185_v5  ;;  %v6189_v51 = vmul.f32 %v6125_v8, %v13497_v16  ;;  %v6193_v36 = vmul.f32 %v6129_v20, %v13585_v18 }
 0xe97   : > { %v13840_v56 = vpop.eup %9227  ;;  %v6591_v39 = vmul.f32 %v9226_v15, %v13217_v42  ;;  %v6435_v43 = vmul.f32 %v6371_v55, %v13251_v34  ;;  %v6437_v38 = vmul.f32 %v6373_v57, %v13294_v10  ;;  %v6375_v4 = vadd.f32 -0.0073733293, %v6311_v52  ;;  %v13852_v55 = vpop.f32.mrf.mxu0  ;;  %v14534_v57 = vld [vmem:[#allocation82_spill] sm:$0xff] }
 0xe98   : > { %14532 = vst [vmem:[#allocation56_spill] sm:$0xff] %v13840_v56  ;;  %v6681_v3 = vadd.f32 1.0, %v6587_v62  ;;  %v6313_v7 = vmul.f32 %v6249_v28, %v13396_v63  ;;  %v6253_v31 = vadd.f32 -0.001682827, %v6189_v51  ;;  %v6257_v5 = vadd.f32 -0.001682827, %v6193_v36 }
 0xe99   : > { %v6683_v40 = vadd.f32 1.0, %v6591_v39  ;;  %v6499_v8 = vadd.f32 -0.014264739, %v6435_v43  ;;  %v6501_v24 = vadd.f32 -0.014264739, %v6437_v38  ;;  %v6439_v20 = vmul.f32 %v6375_v4, %v13353_v46  ;;  %v14533_v56 = vld [vmem:[#allocation58_spill] sm:$0xff] }
 0xe9a   : > { %v6745_v50 = vmul.f32 %v6681_v3, %v14533_v56  ;;  %v6377_v42 = vadd.f32 -0.0073733293, %v6313_v7  ;;  %v6317_v34 = vmul.f32 %v6253_v31, %v13497_v16  ;;  %v6321_v10 = vmul.f32 %v6257_v5, %v13585_v18  ;;  %v14535_v56 = vld [vmem:[#allocation60_spill] sm:$0xff]  ;;  %v14536_v39 = vld [vmem:[#allocation63_spill] sm:$0xff]  ;;  %v13860_v3 = vpop.f32.mrf.mxu1  ;;  %v13866_v31 = vpop.f32.mrf.mxu0 }
 0xe9b   : > { %v6747_v52 = vmul.f32 %v6683_v40, %v14534_v57  ;;  %9235 = vrcp.f32 %v6499_v8  ;;  %v6503_v15 = vadd.f32 -0.014264739, %v6439_v20  ;;  %v6133_v62 = vadd.f32 -0.00021337405, %v6069_v25  ;;  %v14537_v25 = vld [vmem:[#allocation59_spill] sm:$0xff] }
 0xe9c   : > { %v9230_v28 = vpop.eup %9229  ;;  %6886 = vmatprep.mubr.f32.mxu1 %v6745_v50  ;;  %9237 = vrcp.f32 %v6501_v24  ;;  %v6441_v46 = vmul.f32 %v6377_v42, %v13396_v63  ;;  %v6381_v51 = vadd.f32 -0.0073733293, %v6317_v34  ;;  %v6385_v36 = vadd.f32 -0.0073733293, %v6321_v10 }
 0xe9d   : > { %7031 = vmatprep.mubr.f32.mxu0 %v6747_v52  ;;  %6887 = vmatmul.mubr.f32.gmra.mxu1 %v14535_v56  ;;  %v6595_v43 = vmul.f32 %v9230_v28, %v14536_v39  ;;  %9239 = vrcp.f32 %v6503_v15  ;;  %v6197_v38 = vmul.f32 %v6133_v62, %v13684_v49  ;;  %v6059_v4 = vmul.f32 -1.45660715e-05, %v13444_v6  ;;  %v14538_v15 = vld [vmem:[#allocation83_spill] sm:$0xff]  ;;  %v13882_v56 = vpop.f32.mrf.mxu0 }
 0xe9e   : > { %7032 = vmatmul.mubr.f32.gmra.mxu0 %v14537_v25  ;;  %v6505_v50 = vadd.f32 -0.014264739, %v6441_v46  ;;  %v6445_v24 = vmul.f32 %v6381_v51, %v13497_v16  ;;  %v6449_v63 = vmul.f32 %v6385_v36, %v13585_v18  ;;  %v6063_v7 = vmul.f32 -1.45660715e-05, %v13536_v60  ;;  %v14539_v62 = vld [vmem:[#allocation43_spill] sm:$0xff] }
 0xe9f   : > { %v9232_v5 = vpop.eup %9231  ;;  %v6685_v40 = vadd.f32 1.0, %v6595_v43  ;;  %v6261_v8 = vadd.f32 -0.001682827, %v6197_v38  ;;  %v6123_v20 = vadd.f32 -0.00021337405, %v6059_v4  ;;  %v6994_v42 = vadd.f32 %v7932_v23, %v13800_v53  ;;  %v13879_v53 = vpop.f32.mrf.mxu1  ;;  %v14541_v4 = vld [vmem:[#allocation61_spill] sm:$0xff] }
 0xea0   : > { %v9234_v34 = vpop.eup %9233  ;;  %v6599_v10 = vmul.f32 %v9232_v5, %v13402_v14  ;;  %9241 = vrcp.f32 %v6505_v50  ;;  %v6509_v57 = vadd.f32 -0.014264739, %v6445_v24  ;;  %v6513_v52 = vadd.f32 -0.014264739, %v6449_v63  ;;  %v13877_v51 = vld [vmem:[%s14540_s27] ss:$0 sm:$0xff] }
 0xea1   : > { %v6749_v16 = vmul.f32 %v6685_v40, %v14538_v15  ;;  %v6603_v18 = vmul.f32 %v9234_v34, %v14539_v62  ;;  %v6325_v28 = vmul.f32 %v6261_v8, %v13684_v49  ;;  %v6187_v46 = vmul.f32 %v6123_v20, %v13444_v6  ;;  %v14542_v50 = vld [vmem:[#allocation85_spill] sm:$0xff]  ;;  %v13897_v62 = vpop.f32.mrf.mxu0 }
 0xea2   : > { %v6687_v23 = vadd.f32 1.0, %v6599_v10  ;;  %9243 = vrcp.f32 %v6509_v57  ;;  %v6127_v14 = vadd.f32 -0.00021337405, %v6063_v7  ;;  %v6067_v36 = vmul.f32 -1.45660715e-05, %v13636_v27  ;;  %v14543_v40 = vld [vmem:[#allocation33_spill] sm:$0xff]  ;;  %v13892_v10 = vpop.f32.mrf.mxu1 }
 0xea3   : > { %6891 = vmatprep.mubr.f32.mxu1 %v6749_v16  ;;  %v6689_v39 = vadd.f32 1.0, %v6603_v18  ;;  %9245 = vrcp.f32 %v6513_v52  ;;  %v6389_v43 = vadd.f32 -0.0073733293, %v6325_v28  ;;  %v6251_v38 = vadd.f32 -0.001682827, %v6187_v46  ;;  %v14544_v18 = vld [vmem:[#allocation62_spill] sm:$0xff] }
 0xea4   : > { %v6751_v25 = vmul.f32 %v6687_v23, %v14541_v4  ;;  %6892 = vmatmul.mubr.f32.gmra.mxu1 %v14542_v50  ;;  %v6191_v24 = vmul.f32 %v6127_v14, %v13536_v60  ;;  %v6131_v63 = vadd.f32 -0.00021337405, %v6067_v36  ;;  %v6071_v5 = vmul.f32 -1.45660715e-05, %v13729_v12  ;;  %v14545_v46 = vld [vmem:[#allocation46_spill] sm:$0xff] }
 0xea5   : > { %v6753_v7 = vmul.f32 %v6689_v39, %v14543_v40  ;;  %v6453_v8 = vmul.f32 %v6389_v43, %v13684_v49  ;;  %v6315_v20 = vmul.f32 %v6251_v38, %v13444_v6  ;;  %v7078_v34 = vmul.f32 %v13877_v51, %v6994_v42  ;;  %v14546_v36 = vld [vmem:[#allocation66_spill] sm:$0xff] }
 0xea6   : > { %7036 = vmatprep.mubr.f32.mxu0 %v6751_v25  ;;  %v6255_v57 = vadd.f32 -0.001682827, %v6191_v24  ;;  %v6195_v52 = vmul.f32 %v6131_v63, %v13636_v27  ;;  %v6135_v15 = vadd.f32 -0.00021337405, %v6071_v5  ;;  %v7855_v16 = vadd.f32 %v13774_v54, %v13762_v2  ;;  %v14547_v4 = vld [vmem:[#allocation86_spill] sm:$0xff] }
 0xea7   : > { %7037 = vmatmul.mubr.f32.gmra.mxu0 %v14544_v18  ;;  %6896 = vmatprep.mubr.f32.mxu1 %v6753_v7  ;;  %v6517_v49 = vadd.f32 -0.014264739, %v6453_v8  ;;  %v6379_v28 = vadd.f32 -0.0073733293, %v6315_v20  ;;  %v7094_v42 = vadd.f32 %v7078_v34, %v14545_v46  ;;  %v7935_v23 = vadd.f32 %v13777_v61, %v13766_v30  ;;  %v13916_v61 = vpop.f32.mrf.mxu1  ;;  %v14548_v63 = vld [vmem:[#allocation90_spill] sm:$0xff]  ;;  %v13920_v20 = vpop.f32.mrf.mxu0 }
 0xea8   : > { %v9236_v14 = vpop.eup %9235  ;;  %6897 = vmatmul.mubr.f32.gmra.mxu1 %v14546_v36  ;;  %v6319_v39 = vmul.f32 %v6255_v57, %v13536_v60  ;;  %v6259_v43 = vadd.f32 -0.001682827, %v6195_v52  ;;  %v6199_v2 = vmul.f32 %v6135_v15, %v13729_v12  ;;  %v6854_v54 = vadd.f32 %v7855_v16, %v13790_v33  ;;  %v14550_v36 = vld [vmem:[#allocation64_spill] sm:$0xff] }
 0xea9   : > { %v9238_v38 = vpop.eup %9237  ;;  %v6607_v25 = vmul.f32 %v9236_v14, %v14547_v4  ;;  %9247 = vrcp.f32 %v6517_v49  ;;  %v6443_v50 = vmul.f32 %v6379_v28, %v13444_v6  ;;  %7110 = vst [vmem:[%s13911_s22] sm:$0xff] %v7094_v42  ;;  %v7858_v30 = vadd.f32 %v13802_v48, %v13782_v45  ;;  %v14549_v49 = vld [vmem:[#allocation84_spill] sm:$0xff]  ;;  %v7869_v14 = vpop.f32.mrf.mxu1 }
 0xeaa   : > { %v9240_v24 = vpop.eup %9239  ;;  %v6611_v5 = vmul.f32 %v9238_v38, %v14548_v63  ;;  %v6383_v40 = vadd.f32 -0.0073733293, %v6319_v39  ;;  %v6323_v7 = vmul.f32 %v6259_v43, %v13636_v27  ;;  %v6263_v8 = vadd.f32 -0.001682827, %v6199_v2  ;;  %v7949_v2 = vpop.f32.mrf.mxu0 }
 0xeab   : > { %v6691_v6 = vadd.f32 1.0, %v6607_v25  ;;  %v6615_v34 = vmul.f32 %v9240_v24, %v13591_v47  ;;  %v6507_v57 = vadd.f32 -0.014264739, %v6443_v50  ;;  %v6999_v52 = vadd.f32 %v7935_v23, %v6854_v54  ;;  %v14551_v54 = vld [vmem:[#allocation67_spill] sm:$0xff]  ;;  %v14552_v25 = vld [vmem:[#allocation44_spill] sm:$0xff] }
 0xeac   : > { %v6693_v15 = vadd.f32 1.0, %v6611_v5  ;;  %v6447_v16 = vmul.f32 %v6383_v40, %v13536_v60  ;;  %v6387_v45 = vadd.f32 -0.0073733293, %v6323_v7  ;;  %v6327_v48 = vmul.f32 %v6263_v8, %v13729_v12  ;;  %v14553_v5 = vld [vmem:[#allocation42_spill] sm:$0xff]  ;;  %v14554_v8 = vld [vmem:[#allocation89_spill] sm:$0xff] }
 0xead   : > { %v9242_v18 = vpop.eup %9241  ;;  %v6755_v28 = vmul.f32 %v6691_v6, %v14549_v49  ;;  %v6695_v46 = vadd.f32 1.0, %v6615_v34  ;;  %9249 = vrcp.f32 %v6507_v57  ;;  %v7079_v42 = vmul.f32 %v13877_v51, %v6999_v52  ;;  %v7871_v57 = vpop.f32.mrf.mxu1  ;;  %v14555_v52 = vld [vmem:[#allocation87_spill] sm:$0xff] }
 0xeae   : > { %v6757_v39 = vmul.f32 %v6693_v15, %v14550_v36  ;;  %v6619_v47 = vmul.f32 %v9242_v18, %v13607_v35  ;;  %v6511_v43 = vadd.f32 -0.014264739, %v6447_v16  ;;  %v6451_v23 = vmul.f32 %v6387_v45, %v13636_v27 }
 0xeaf   : > { %v9244_v60 = vpop.eup %9243  ;;  %7041 = vmatprep.mubr.f32.mxu0 %v6755_v28  ;;  %v6759_v38 = vmul.f32 %v6695_v46, %v14551_v54  ;;  %v6391_v4 = vadd.f32 -0.0073733293, %v6327_v48  ;;  %v7095_v50 = vadd.f32 %v7079_v42, %v14552_v25  ;;  %v6859_v24 = vadd.f32 %v7858_v30, %v13790_v33  ;;  %v14556_v28 = vld [vmem:[#allocation71_spill] sm:$0xff] }
 0xeb0   : > { %v9246_v63 = vpop.eup %9245  ;;  %7042 = vmatmul.mubr.f32.gmra.mxu0 %v14553_v5  ;;  %6901 = vmatprep.mubr.f32.mxu1 %v6757_v39  ;;  %v6697_v40 = vadd.f32 1.0, %v6619_v47  ;;  %v6627_v35 = vmul.f32 %v9244_v60, %v13703_v21  ;;  %9251 = vrcp.f32 %v6511_v43  ;;  %v6515_v27 = vadd.f32 -0.014264739, %v6451_v23 }
 0xeb1   : > { %v5815_v7 = vadd.f32 -0.0029546, %v13821_v59  ;;  %7046 = vmatprep.mubr.f32.mxu0 %v6759_v38  ;;  %6902 = vmatmul.mubr.f32.gmra.mxu1 %v14554_v8  ;;  %v6635_v6 = vmul.f32 %v9246_v63, %v13753_v13  ;;  %v6455_v34 = vmul.f32 %v6391_v4, %v13729_v12  ;;  %7111 = vst [vmem:[%s13911_s22 + $0x8] sm:$0xff] %v7095_v50  ;;  %v7951_v59 = vpop.f32.mrf.mxu0  ;;  %v5814_v49 = vadd.f32 -0.0029546, %v13780_v41  ;;  %v7872_v41 = vpop.f32.mrf.mxu1 }
 0xeb2   : > { %v7938_v30 = vadd.f32 %v13808_v22, %v13792_v29  ;;  %v6761_v15 = vmul.f32 %v6697_v40, %v14555_v52  ;;  %v6701_v16 = vadd.f32 1.0, %v6627_v35  ;;  %9253 = vrcp.f32 %v6515_v27  ;;  %v14557_v22 = vld [vmem:[#allocation69_spill] sm:$0xff]  ;;  %v14561_v40 = vld [vmem:[#allocation48_spill] sm:$0xff]  ;;  %v14566_v52 = vld [vmem:[#allocation51_spill] sm:$0xff] }
 0xeb3   : > { %v7861_v21 = vadd.f32 %v13833_v19, %v13818_v9  ;;  %v6705_v45 = vadd.f32 1.0, %v6635_v6  ;;  %v6519_v48 = vadd.f32 -0.014264739, %v6455_v34  ;;  %v7941_v13 = vadd.f32 %v13838_v58, %v13824_v37  ;;  %v14563_v6 = vld [vmem:[#allocation50_spill] sm:$0xff]  ;;  %v14564_v34 = vld [vmem:[#allocation75_spill] sm:$0xff] }
 0xeb4   : > { %v7004_v18 = vadd.f32 %v7938_v30, %v6859_v24  ;;  %7047 = vmatmul.mubr.f32.gmra.mxu0 %v14556_v28  ;;  %6906 = vmatprep.mubr.f32.mxu1 %v6761_v15  ;;  %v6765_v29 = vmul.f32 %v6701_v16, %v14557_v22  ;;  %v7864_v42 = vadd.f32 %v13860_v3, %v13847_v0  ;;  %v7952_v0 = vpop.f32.mrf.mxu0  ;;  %v6708_v50 = vadd.f32 1.0, %v13804_v32  ;;  %v14560_v24 = vld [vmem:[#allocation72_spill] sm:$0xff]  ;;  %v14569_v28 = vld [vmem:[#allocation70_spill] sm:$0xff] }
 0xeb5   : > { %v6864_v46 = vadd.f32 %v7861_v21, %v13790_v33  ;;  %v5879_v9 = vmul.f32 %v5815_v7, %v13729_v12  ;;  %6907 = vmatmul.mubr.f32.gmra.mxu1 %v13598_v1  ;;  %v6769_v19 = vmul.f32 %v6705_v45, %v13631_v17  ;;  %9255 = vrcp.f32 %v6519_v48  ;;  %v14558_v17 = vld [vmem:[#allocation23_spill] sm:$0xff]  ;;  %v14567_v21 = vld [vmem:[#allocation49_spill] sm:$0xff]  ;;  %v14568_v45 = vld [vmem:[#allocation24_spill] sm:$0xff] }
 0xeb6   : > { %v7080_v37 = vmul.f32 %v13877_v51, %v7004_v18  ;;  %v9248_v58 = vpop.eup %9247  ;;  %6911 = vmatprep.mubr.f32.mxu1 %v6765_v29  ;;  %v6869_v39 = vadd.f32 %v7864_v42, %v13790_v33  ;;  %v7944_v47 = vadd.f32 %v13866_v31, %v13852_v55  ;;  %v7867_v12 = vadd.f32 %v13892_v10, %v13879_v53  ;;  %v14571_v29 = vld [vmem:[#allocation38_spill] sm:$0xff]  ;;  %v14572_v42 = vld [vmem:[#allocation45_spill] sm:$0xff] }
 0xeb7   : > { %v7009_v36 = vadd.f32 %v7941_v13, %v6864_v46  ;;  %v6643_v1 = vmul.f32 %v9248_v58, %v13813_v26  ;;  %v7947_v43 = vadd.f32 %v13897_v62, %v13882_v56  ;;  %v7870_v23 = vadd.f32 %v7869_v14, %v13916_v61  ;;  %v14559_v56 = vld [vmem:[#allocation22_spill] sm:$0xff] }
 0xeb8   : > { %v7096_v3 = vadd.f32 %v7080_v37, %v14558_v17  ;;  %v7014_v54 = vadd.f32 %v7944_v47, %v6869_v39  ;;  %v6874_v38 = vadd.f32 %v7867_v12, %v13790_v33  ;;  %v7873_v4 = vadd.f32 %v7872_v41, %v7871_v57  ;;  %v14565_v57 = vld [vmem:[#allocation77_spill] sm:$0xff]  ;;  %v14573_v37 = vld [vmem:[#allocation27_spill] sm:$0xff]  ;;  %v14574_v41 = vld [vmem:[#allocation92_spill] sm:$0xff] }
 0xeb9   : > { %v7081_v60 = vmul.f32 %v13877_v51, %v7009_v36  ;;  %6912 = vmatmul.mubr.f32.gmra.mxu1 %v13693_v11  ;;  %v6709_v55 = vadd.f32 1.0, %v6643_v1  ;;  %v6879_v26 = vadd.f32 %v7870_v23, %v13790_v33  ;;  %v7950_v31 = vadd.f32 %v7949_v2, %v13920_v20  ;;  %v14562_v2 = vld [vmem:[#allocation25_spill] sm:$0xff]  ;;  %v14575_v47 = vld [vmem:[#allocation26_spill] sm:$0xff]  ;;  %v14577_v17 = vld [vmem:[#allocation68_spill] sm:$0xff] }
 0xeba   : > { %7112 = vst [vmem:[%s13911_s22 + $0x10] sm:$0xff] %v7096_v3  ;;  %v7953_v53 = vadd.f32 %v7952_v0, %v7951_v59  ;;  %v9250_v10 = vpop.eup %9249  ;;  %6916 = vmatprep.mubr.f32.mxu1 %v6769_v19  ;;  %v7082_v61 = vmul.f32 %v13877_v51, %v7014_v54  ;;  %v7019_v14 = vadd.f32 %v7947_v43, %v6874_v38  ;;  %v5938_v20 = vadd.f32 -0.016096033, %v14561_v40  ;;  %v14576_v0 = vld [vmem:[#allocation65_spill] sm:$0xff]  ;;  %v14584_v40 = vld [vmem:[#allocation56_spill] sm:$0xff] }
 0xebb   : > { %v7097_v62 = vadd.f32 %v7081_v60, %v14559_v56  ;;  %v6884_v25 = vadd.f32 %v7873_v4, %v13790_v33  ;;  %v6773_v11 = vmul.f32 %v6709_v55, %v13716_v44  ;;  %v6623_v63 = vmul.f32 %v9250_v10, %v14560_v24  ;;  %v14578_v60 = vld [vmem:[#allocation91_spill] sm:$0xff]  ;;  %v14579_v38 = vld [vmem:[#allocation41_spill] sm:$0xff] }
 0xebc   : > { %v7024_v5 = vadd.f32 %v7950_v31, %v6879_v26  ;;  %v7098_v35 = vadd.f32 %v7082_v61, %v14562_v2  ;;  %v7083_v27 = vmul.f32 %v13877_v51, %v7019_v14  ;;  %v6003_v30 = vmul.f32 %v14564_v34, %v14563_v6  ;;  %v14580_v31 = vld [vmem:[#allocation79_spill] sm:$0xff]  ;;  %v14581_v61 = vld [vmem:[#allocation88_spill] sm:$0xff] }
 0xebd   : > { %7113 = vst [vmem:[%s13911_s22 + $0x18] sm:$0xff] %v7097_v62  ;;  %v7029_v7 = vadd.f32 %v7953_v53, %v6884_v25  ;;  %v9252_v8 = vpop.eup %9251  ;;  %v5878_v32 = vmul.f32 %v5814_v49, %v14565_v57  ;;  %6917 = vmatmul.mubr.f32.gmra.mxu1 %v14566_v52  ;;  %v6699_v44 = vadd.f32 1.0, %v6623_v63  ;;  %v5943_v16 = vadd.f32 -0.016096033, %v5879_v9  ;;  %v14570_v49 = vld [vmem:[#allocation21_spill] sm:$0xff]  ;;  %v14582_v25 = vld [vmem:[#allocation76_spill] sm:$0xff] }
 0xebe   : > { %v7084_v15 = vmul.f32 %v13877_v51, %v7024_v5  ;;  %6921 = vmatprep.mubr.f32.mxu1 %v6773_v11  ;;  %v6631_v59 = vmul.f32 %v9252_v8, %v14567_v21  ;;  %7114 = vst [vmem:[%s13911_s22 + $0x20] sm:$0xff] %v7098_v35  ;;  %v7099_v48 = vadd.f32 %v7083_v27, %v14568_v45  ;;  %v6698_v22 = vadd.f32 1.0, %v14569_v28  ;;  %v14583_v11 = vld [vmem:[#allocation73_spill] sm:$0xff]  ;;  %v14586_v8 = vld [vmem:[#allocation40_spill] sm:$0xff] }
 0xebf   : > { %v7085_v18 = vmul.f32 %v13877_v51, %v7029_v7  ;;  %v9254_v13 = vpop.eup %9253  ;;  %v6629_v46 = vmul.f32 %v14571_v29, %v14570_v49  ;;  %v6772_v19 = vmul.f32 %v6708_v50, %v14572_v42  ;;  %v6763_v58 = vmul.f32 %v6699_v44, %v14574_v41  ;;  %v14585_v27 = vld [vmem:[#allocation93_spill] sm:$0xff] }
 0xec0   : > { %v7100_v9 = vadd.f32 %v7084_v15, %v14573_v37  ;;  %v6703_v36 = vadd.f32 1.0, %v6631_v59  ;;  %v6639_v39 = vmul.f32 %v9254_v13, %v6003_v30  ;;  %7115 = vst [vmem:[%s13911_s22 + $0x28] sm:$0xff] %v7099_v48  ;;  %v4906_v1 = vmul.f32 0.5, %v14576_v0  ;;  %v14588_v42 = vld [vmem:[#allocation29_spill] sm:$0xff]  ;;  %v14589_v0 = vld [vmem:[#allocation28_spill] sm:$0xff] }
 0xec1   : > { %v7101_v12 = vadd.f32 %v7085_v18, %v14575_v47  ;;  %v6002_v3 = vmul.f32 %v14577_v17, %v5938_v20  ;;  %v5942_v43 = vadd.f32 -0.016096033, %v5878_v32  ;;  %6922 = vmatmul.mubr.f32.gmra.mxu1 %v6772_v19  ;;  %v4911_v54 = vmul.f32 0.5, %v14578_v60  ;;  %v14587_v32 = vld [vmem:[#allocation74_spill] sm:$0xff] }
 0xec2   : > { %7116 = vst [vmem:[%s13911_s22 + $0x30] sm:$0xff] %v7100_v9  ;;  %v9256_v23 = vpop.eup %9255  ;;  %v6007_v4 = vmul.f32 %v14579_v38, %v5943_v16  ;;  %7051 = vmatprep.mubr.f32.mxu1 %v6763_v58  ;;  %v6762_v55 = vmul.f32 %v6698_v22, %v4906_v1  ;;  %v6702_v26 = vadd.f32 1.0, %v6629_v46  ;;  %v6707_v56 = vadd.f32 1.0, %v6639_v39 }
 0xec3   : > { %7117 = vst [vmem:[%s13911_s22 + $0x38] sm:$0xff] %v7101_v12  ;;  %v6637_v53 = vmul.f32 %v14580_v31, %v6002_v3  ;;  %v6767_v10 = vmul.f32 %v6703_v36, %v4911_v54  ;;  %v4910_v14 = vmul.f32 0.5, %v14581_v61  ;;  %v6006_v50 = vmul.f32 %v14582_v25, %v5942_v43  ;;  %v14590_v61 = vld [vmem:[#allocation31_spill] sm:$0xff] }
 0xec4   : > { %v6647_v62 = vmul.f32 %v9256_v23, %v6007_v4  ;;  %v4915_v24 = vmul.f32 0.5, %v14583_v11  ;;  %v4914_v7 = vmul.f32 0.5, %v14585_v27  ;;  %v4919_v6 = vmul.f32 0.5, %v14586_v8 }
 0xec5   : > { %7052 = vmatmul.mubr.f32.vlgmr.msra.gmra.mxu1 %v6762_v55  ;;  %v6766_v63 = vmul.f32 %v6702_v26, %v4910_v14  ;;  %v6706_v5 = vadd.f32 1.0, %v6637_v53  ;;  %v6645_v20 = vmul.f32 %v14584_v40, %v6006_v50  ;;  %v4918_v52 = vmul.f32 0.5, %v14587_v32 }
 0xec6   : > { %7056 = vmatprep.mubr.f32.mxu1 %v6767_v10  ;;  %v6771_v2 = vmul.f32 %v6707_v56, %v4915_v24  ;;  %v6711_v35 = vadd.f32 1.0, %v6647_v62 }
 0xec7   : > { %v6770_v34 = vmul.f32 %v6706_v5, %v4914_v7  ;;  %v6710_v30 = vadd.f32 1.0, %v6645_v20 }
 0xec8   : > { %v6775_v57 = vmul.f32 %v6711_v35, %v4919_v6 }
 0xec9   : > { %7057 = vmatmul.mubr.f32.gmra.mxu1 %v6766_v63  ;;  %v6774_v44 = vmul.f32 %v6710_v30, %v4918_v52  ;;  %v14591_v63 = vld [vmem:[#allocation30_spill] sm:$0xff] }
 0xeca   : > { %7061 = vmatprep.mubr.f32.mxu1 %v6771_v2 }
 0xecd   : > { %7062 = vmatmul.mubr.f32.gmra.mxu1 %v6770_v34 }
 0xece   : > { %7066 = vmatprep.mubr.f32.mxu1 %v6775_v57 }
 0xed1   : > { %7067 = vmatmul.mubr.f32.gmra.mxu1 %v6774_v44 }
 0xf5d   : > { %v7874_v15 = vpop.f32.mrf.mxu1 }
 0xf5e   : > { %v7954_v16 = vpop.f32.mrf.mxu0 }
 0xf5f   : > { %v7875_v21 = vpop.f32.mrf.mxu1 }
 0xf60   : > { %v7876_v59 = vadd.f32 %v7875_v21, %v7874_v15  ;;  %v7955_v45 = vpop.f32.mrf.mxu0 }
 0xf61   : > { %v7956_v18 = vadd.f32 %v7955_v45, %v7954_v16  ;;  %v14592_v45 = vld [vmem:[#allocation34_spill] sm:$0xff] }
 0xf62   : > { %v6889_v48 = vadd.f32 %v7876_v59, %v13790_v33 }
 0xf64   : > { %v7034_v13 = vadd.f32 %v7956_v18, %v6889_v48  ;;  %v7877_v28 = vpop.f32.mrf.mxu1 }
 0xf66   : > { %v7086_v22 = vmul.f32 %v13877_v51, %v7034_v13  ;;  %v7878_v49 = vpop.f32.mrf.mxu1 }
 0xf67   : > { %v7957_v29 = vpop.f32.mrf.mxu0  ;;  %v7879_v46 = vadd.f32 %v7878_v49, %v7877_v28 }
 0xf68   : > { %v7102_v19 = vadd.f32 %v7086_v22, %v14588_v42  ;;  %v7880_v37 = vpop.f32.mrf.mxu1  ;;  %v14593_v42 = vld [vmem:[#allocation32_spill] sm:$0xff] }
 0xf69   : > { %v6894_v9 = vadd.f32 %v7879_v46, %v13790_v33  ;;  %v7958_v41 = vpop.f32.mrf.mxu0 }
 0xf6a   : > { %7118 = vst [vmem:[%s13911_s22 + $0x40] sm:$0xff] %v7102_v19  ;;  %v7959_v58 = vadd.f32 %v7958_v41, %v7957_v29  ;;  %v7881_v36 = vpop.f32.mrf.mxu1 }
 0xf6b   : > { %v7882_v47 = vadd.f32 %v7881_v36, %v7880_v37 }
 0xf6c   : > { %v7039_v39 = vadd.f32 %v7959_v58, %v6894_v9 }
 0xf6d   : > { %v6899_v3 = vadd.f32 %v7882_v47, %v13790_v33 }
 0xf6e   : > { %v7087_v12 = vmul.f32 %v13877_v51, %v7039_v39  ;;  %v14594_v39 = vld [vmem:[#allocation36_spill] sm:$0xff] }
 0xf70   : > { %v7103_v1 = vadd.f32 %v7087_v12, %v14589_v0  ;;  %v7960_v17 = vpop.f32.mrf.mxu0 }
 0xf71   : > { %v7883_v43 = vpop.f32.mrf.mxu1 }
 0xf72   : > { %7119 = vst [vmem:[%s13911_s22 + $0x48] sm:$0xff] %v7103_v1  ;;  %v7961_v23 = vpop.f32.mrf.mxu0 }
 0xf73   : > { %v7962_v60 = vadd.f32 %v7961_v23, %v7960_v17  ;;  %v7884_v54 = vpop.f32.mrf.mxu1 }
 0xf74   : > { %v7963_v38 = vpop.f32.mrf.mxu0  ;;  %v7885_v4 = vadd.f32 %v7884_v54, %v7883_v43 }
 0xf75   : > { %v7044_v55 = vadd.f32 %v7962_v60, %v6899_v3  ;;  %v7886_v26 = vpop.f32.mrf.mxu1 }
 0xf76   : > { %v6904_v31 = vadd.f32 %v7885_v4, %v13790_v33  ;;  %v7964_v53 = vpop.f32.mrf.mxu0 }
 0xf77   : > { %v7088_v10 = vmul.f32 %v13877_v51, %v7044_v55  ;;  %v7965_v56 = vadd.f32 %v7964_v53, %v7963_v38  ;;  %v7887_v62 = vpop.f32.mrf.mxu1 }
 0xf78   : > { %v7888_v27 = vadd.f32 %v7887_v62, %v7886_v26 }
 0xf79   : > { %v7104_v14 = vadd.f32 %v7088_v10, %v14590_v61  ;;  %v7049_v25 = vadd.f32 %v7965_v56, %v6904_v31  ;;  %v7889_v50 = vpop.f32.mrf.mxu1 }
 0xf7a   : > { %v6909_v6 = vadd.f32 %v7888_v27, %v13790_v33 }
 0xf7b   : > { %7120 = vst [vmem:[%s13911_s22 + $0x50] sm:$0xff] %v7104_v14  ;;  %v7089_v11 = vmul.f32 %v13877_v51, %v7049_v25  ;;  %v7890_v24 = vpop.f32.mrf.mxu1 }
 0xf7c   : > { %v7891_v34 = vadd.f32 %v7890_v24, %v7889_v50 }
 0xf7d   : > { %v7105_v5 = vadd.f32 %v7089_v11, %v14591_v63  ;;  %v7892_v40 = vpop.f32.mrf.mxu1 }
 0xf7e   : > { %v6914_v44 = vadd.f32 %v7891_v34, %v13790_v33 }
 0xf7f   : > { %7121 = vst [vmem:[%s13911_s22 + $0x58] sm:$0xff] %v7105_v5  ;;  %v7893_v20 = vpop.f32.mrf.mxu1 }
 0xf80   : > { %v7894_v15 = vadd.f32 %v7893_v20, %v7892_v40 }
 0xf81   : > { %v7895_v2 = vpop.f32.mrf.mxu1 }
 0xf82   : > { %v6919_v28 = vadd.f32 %v7894_v15, %v13790_v33 }
 0xf83   : > { %v7896_v35 = vpop.f32.mrf.mxu1 }
 0xf84   : > { %v7897_v22 = vadd.f32 %v7896_v35, %v7895_v2 }
 0xf85   : > { %v7966_v7 = vpop.f32.mrf.mxu1 }
 0xf86   : > { %v6924_v41 = vadd.f32 %v7897_v22, %v13790_v33  ;;  %v14596_v33 = vld [vmem:[#allocation35_spill] sm:$0xff] }
 0xf87   : > { %v7967_v8 = vpop.f32.mrf.mxu1 }
 0xf88   : > { %v7968_v30 = vadd.f32 %v7967_v8, %v7966_v7 }
 0xf89   : > { %v7969_v57 = vpop.f32.mrf.mxu1 }
 0xf8a   : > { %v7054_v32 = vadd.f32 %v7968_v30, %v6909_v6 }
 0xf8b   : > { %v7970_v52 = vpop.f32.mrf.mxu1 }
 0xf8c   : > { %v7090_v16 = vmul.f32 %v13877_v51, %v7054_v32  ;;  %v7971_v21 = vadd.f32 %v7970_v52, %v7969_v57 }
 0xf8d   : > { %v7972_v59 = vpop.f32.mrf.mxu1 }
 0xf8e   : > { %v7106_v48 = vadd.f32 %v7090_v16, %v14592_v45  ;;  %v7059_v18 = vadd.f32 %v7971_v21, %v6914_v44 }
 0xf8f   : > { %v7973_v13 = vpop.f32.mrf.mxu1 }
 0xf90   : > { %7122 = vst [vmem:[%s13911_s22 + $0x60] sm:$0xff] %v7106_v48  ;;  %v7091_v49 = vmul.f32 %v13877_v51, %v7059_v18  ;;  %v7974_v29 = vadd.f32 %v7973_v13, %v7972_v59 }
 0xf91   : > { %v7975_v46 = vpop.f32.mrf.mxu1 }
 0xf92   : > { %v7107_v19 = vadd.f32 %v7091_v49, %v14593_v42  ;;  %v7064_v37 = vadd.f32 %v7974_v29, %v6919_v28 }
 0xf93   : > { %v7976_v9 = vpop.f32.mrf.mxu1 }
 0xf94   : > { %7123 = vst [vmem:[%s13911_s22 + $0x68] sm:$0xff] %v7107_v19  ;;  %v7092_v58 = vmul.f32 %v13877_v51, %v7064_v37  ;;  %v7977_v36 = vadd.f32 %v7976_v9, %v7975_v46 }
 0xf96   : > { %v7108_v47 = vadd.f32 %v7092_v58, %v14594_v39  ;;  %v7069_v12 = vadd.f32 %v7977_v36, %v6924_v41 }
 0xf98   : > { %7124 = vst [vmem:[%s13911_s22 + $0x70] sm:$0xff] %v7108_v47  ;;  %v7093_v0 = vmul.f32 %v13877_v51, %v7069_v12 }
 0xf9a   : > { %v7109_v1 = vadd.f32 %v7093_v0, %v14596_v33 }
 0xf9c   : > { %7125 = vst [vmem:[%s13911_s22 + $0x78] sm:$0xff] %v7109_v1 }
 0xf9d   : > { %9501 = shalt.err (!%p9498_p6)
}
 0xf9e   : > { %s9502_s17 = scalar_lea.hbm %s14049_s5, 2048  ;;  %s9506_s22 = scalar_lea.hbm %s14595_s30, 4096 }
 0xf9f   : > { %p9503_p4 = scmp.ne.s32.totalorder %s14049_s5, %s9502_s17  ;;  %p9507_p9 = scmp.lt.s32.totalorder %s14049_s5, %s14595_s30 }
 0xfa0   : > { %p9508_p11 = scmp.lt.s32.totalorder %s9506_s22, %s9502_s17 }
 0xfa1   : > { %p9504_p0 = pnand %p9503_p4, %p14597_p13 }
 0xfa2   : > { %p9509_p10 = por %p9508_p11, %p9507_p9 }
 0xfa3   : > { %p9505_p2 = pneg %p9504_p0 }
 0xfa5   : > { %p9510_p12 = pnand %p9509_p10, %p9505_p2 }
 0xfa7   : > { %9513 = shalt.err (!%p9510_p12)
}
 0xfa8   : > { %s9584_s1 = smov 128   ;;  %s9585_s9 = smov 8  }
 0xfa9   : > { %8596 = dma.vmem_to_hbm [thread:$0]  (%p14597_p13), %s14051_s3, 2048, %s14049_s5, %s7127_s2, %s9584_s1, %s9584_s1, %s9585_s9  }
 0xfaa PF: > { %s7155_s24 = sand.u32 1, %s9552_s18   ;;  %p14598_p1 = scmp.ne.s32.totalorder %s14239_s14, 0 }
 0xfab   : > { %p14599_p3 = scmp.ge.s32.totalorder %s9564_s21, 2  ;;  %s7156_s25 = scalar_lea.sflag [#allocation4], %s7155_s24 }
 0xfad   : > { %p8622_p5 = pnand %p14599_p3, %p14598_p1 }
 0xfaf   : > { %p8623_p8 = pneg %p8622_p5 }
 0xfb1   : > { %9547 = dma.done.wait (%p8623_p8), %s7156_s25, 2048  }
 0xfb2   : > { %9549 = vsyncadd (%p8623_p8), %s7156_s25, 4294965248  ;;  %s14600_s15 = sld [smem:[#allocation20_spill]]  ;;  %p31_p7 = scmp.ge.s32.totalorder %s9775_s16, 4  }
 0xfb3   : > { %s14601_s18 = smov %s9556_s19  ;;  %s14602_s19 = smov %s9560_s20 }
 0xfb4   : > { %s14604_s21 = smov %s9775_s16  ;;  %33 = sbr.rel (!%p31_p7) target bundleno = 17 (0x11), region = 149 }
 0xfb8   : > { %s14603_s20 = smov %s14600_s15 }
 0xfb9   :  { %7161 = vsyncpa [#allocation3], 1 }
 0xfba   :  { %7163 = vsyncpa [#allocation3 + $0x1], 1 }
 0xfbb   :  { %7164 = vsyncpa [#allocation6], 1 }
 0xfbc   :  { %7165 = vsyncpa [#allocation9], 1 }
 0xfbd   :  { %7166 = vsyncpa [#allocation12], 1 }
 0xfbe   :  { %7167 = vsyncpa [#allocation4], 1 }
 0xfbf   :  { %7169 = vsyncpa [#allocation4 + $0x1], 1 }

</bundles_post_ra>
